<compile_context>
chip_gen: v7x
topology: tpu7x:2x2x1
jax: 0.10.0
libtpu: 0.0.40
codegen_flags: <defaults>
</compile_context>

<pallas_src>
import jax
import jax.numpy as jnp
from jax.experimental import pallas as pl
from jax.experimental.pallas import tpu as pltpu


# -----------------------------------------------------------------------------
# Static network configuration: (Cin, Cout, padding, pool) per conv block.
# -----------------------------------------------------------------------------
LAYER_CFG = [
    (306, 128, 0, 1),
    (128, 128, 1, 2),
    (128, 128, 1, 1),
    (128, 256, 1, 1),
    (256, 256, 1, 1),
    (256, 256, 1, 1),
    (256, 256, 1, 1),
    (256, 256, 1, 1),
    (256, 256, 1, 1),
    (256, 512, 1, 1),
    (512, 512, 1, 22),
]
PAD_POOL = tuple((pad, pool) for (_, _, pad, pool) in LAYER_CFG)
N_CONV = len(LAYER_CFG)
BN_EPS = 1e-5

C_IN = 306
C_PAD = 384          # 306 padded up to a multiple of 128 (lane-aligned K)
SEQ_LEN = 46         # 46 -> conv1(valid) 44 -> pool2 22 -> ... -> pool22 1
MAXL = 48            # scratch rows  (>= 46, multiple of 8)
MAXC = 512           # scratch lanes (max channel count)


def _round_up(v, m):
    return ((v + m - 1) // m) * m


# -----------------------------------------------------------------------------
# Fused kernel: conv1..conv11 + FC for ONE sample, entirely in VMEM.
# -----------------------------------------------------------------------------
def fused_net_kernel(*refs):
    """refs = (x, [w, scale, shift] * 11, fc_w, fc_b, out, xbuf).

    x:      (L, C_PAD)       f32   channels-last input for one sample
    w:      (3, Cin, Cout)   bf16  conv taps (tap-major)
    scale:  (1, Cout)        f32   folded BN scale  = gamma / sqrt(var + eps)
    shift:  (1, Cout)        f32   folded BN shift  = (bias - mean)*scale + beta
    fc_w:   (512, 50) bf16,  fc_b: (1, 50) f32
    out:    (1, 50)          f32   logits for this sample
    xbuf:   (MAXL, MAXC)     bf16  persistent activation scratch (VMEM)
    """
    x_ref = refs[0]
    conv_refs = refs[1:1 + 3 * N_CONV]
    fc_w_ref = refs[1 + 3 * N_CONV]
    fc_b_ref = refs[2 + 3 * N_CONV]
    o_ref = refs[3 + 3 * N_CONV]
    xbuf = refs[4 + 3 * N_CONV]

    L0, C0 = x_ref.shape
    # Stage the (channel-padded) input into the bf16 activation scratch.
    # Layer 1 has padding=0, so its data starts at row 0.
    xbuf[0:L0, 0:C0] = x_ref[...].astype(jnp.bfloat16)

    L = L0
    feat = None
    for li, (pad, pool) in enumerate(PAD_POOL):
        w_ref = conv_refs[3 * li]                     # (3, Cin, Cout) bf16
        scale = conv_refs[3 * li + 1][...]            # (1, Cout) f32
        shift = conv_refs[3 * li + 2][...]            # (1, Cout) f32
        _, cin, cout = w_ref.shape
        lout = L + 2 * pad - 2

        # Tap-wise conv: three matmuls on static slices of the scratch
        # (edge rows for pad=1 were zeroed when the activation was written),
        # accumulated in f32 on the MXU. No im2col concat, no L-pad concat.
        acc = jnp.dot(xbuf[0:lout, 0:cin], w_ref[0],
                      preferred_element_type=jnp.float32)
        acc = acc + jnp.dot(xbuf[1:1 + lout, 0:cin], w_ref[1],
                            preferred_element_type=jnp.float32)
        acc = acc + jnp.dot(xbuf[2:2 + lout, 0:cin], w_ref[2],
                            preferred_element_type=jnp.float32)
        y = jnp.maximum(acc * scale + shift, 0.0)     # folded BN + ReLU (f32)

        if pool > 1:
            assert lout % pool == 0
            lq = lout // pool
            y = jnp.max(y.reshape(lq, pool, cout), axis=1)   # MaxPool1d
            lout = lq

        if li + 1 < N_CONV:
            # Write activation positioned for the next layer's padding: data
            # at rows [npad, npad+lout), zero edge rows in place.
            npad = PAD_POOL[li + 1][0]                # 1 for layers 2..11
            if npad:
                zrow = jnp.zeros((npad, cout), jnp.bfloat16)
                xbuf[0:npad, 0:cout] = zrow
                xbuf[npad + lout:npad + lout + npad, 0:cout] = zrow
            xbuf[npad:npad + lout, 0:cout] = y.astype(jnp.bfloat16)
            L = lout
        else:
            feat = y                                  # (1, 512) after pool 22

    # Flatten is trivial: after conv11 + MaxPool1d(22) the length is 1, so the
    # (1, 512) channels-last row equals PyTorch's out.view(B, C*L) per sample.
    flat = feat.astype(jnp.bfloat16)                  # (1, 512)
    logits = (jnp.dot(flat, fc_w_ref[...],
                      preferred_element_type=jnp.float32) + fc_b_ref[...])
    # TODO(synk): self.activation (Sigmoid) is defined in __init__ but never
    # applied in forward(); raw logits are returned, matching the reference.
    o_ref[...] = logits


# -----------------------------------------------------------------------------
# Wrapper
# -----------------------------------------------------------------------------
def _const_spec(shape):
    """Full-array block with a constant index_map -> resident in VMEM, no
    re-DMA across grid steps."""
    n = len(shape)
    return pl.BlockSpec(shape, lambda b: (0,) * n)


@jax.jit
def forward(x_ncl, params):
    """x_ncl: (B, 306, L) f32, PyTorch NCL layout. Returns (B, 50) logits."""
    x = jnp.transpose(x_ncl, (0, 2, 1))               # -> (B, L, 306)
    B, L, C = x.shape
    x = jnp.pad(x, ((0, 0), (0, 0), (0, C_PAD - C)))  # lane-align channels

    args = [x]
    in_specs = [pl.BlockSpec((None, L, C_PAD), lambda b: (b, 0, 0))]
    for li in range(N_CONV):
        for name in ("conv_w", "conv_scale", "conv_shift"):
            a = params[name][li]
            args.append(a)
            in_specs.append(_const_spec(a.shape))
    for name in ("fc_w", "fc_b"):
        a = params[name]
        args.append(a)
        in_specs.append(_const_spec(a.shape))

    out = pl.pallas_call(
        fused_net_kernel,
        out_shape=jax.ShapeDtypeStruct((B, 1, 50), jnp.float32),
        grid=(B,),
        in_specs=in_specs,
        out_specs=pl.BlockSpec((None, 1, 50), lambda b: (b, 0, 0)),
        scratch_shapes=[pltpu.VMEM((MAXL, MAXC), jnp.bfloat16)],
        compiler_params=pltpu.CompilerParams(
            dimension_semantics=("parallel",),
            vmem_limit_bytes=32 * 1024 * 1024),
    )(*args)
    return out[:, 0, :]


# -----------------------------------------------------------------------------
# Parameters (deterministic PyTorch-default-like init; eval-mode BN folded)
# -----------------------------------------------------------------------------
def init_params(key):
    params = {"conv_w": [], "conv_scale": [], "conv_shift": []}
    keys = jax.random.split(key, 4 * N_CONV + 2)
    ki = 0
    for (cin, cout, _, _) in LAYER_CFG:
        bound = 1.0 / (cin * 3.0) ** 0.5
        w = jax.random.uniform(keys[ki], (cout, cin, 3), jnp.float32,
                               -bound, bound); ki += 1
        bias = jax.random.uniform(keys[ki], (cout,), jnp.float32,
                                  -bound, bound); ki += 1
        gamma = 1.0 + 0.1 * jax.random.normal(keys[ki], (cout,), jnp.float32); ki += 1
        beta = 0.1 * jax.random.normal(keys[ki], (cout,), jnp.float32); ki += 1
        run_mean = jnp.zeros((cout,), jnp.float32)
        run_var = jnp.ones((cout,), jnp.float32)
        # Fold eval-mode BN (+ conv bias) into per-channel scale / shift.
        scale = gamma / jnp.sqrt(run_var + BN_EPS)
        shift = (bias - run_mean) * scale + beta
        # (Cout, Cin, 3) -> (3, Cin, Cout): tap-major weights; zero-pad Cin of
        # layer 1 to the lane-aligned C_PAD (matches the zero-padded input).
        w_taps = jnp.transpose(w, (2, 1, 0))
        cin_pad = _round_up(cin, 128)
        if cin_pad != cin:
            w_taps = jnp.pad(w_taps, ((0, 0), (0, cin_pad - cin), (0, 0)))
        params["conv_w"].append(w_taps.astype(jnp.bfloat16))
        params["conv_scale"].append(scale.reshape(1, cout))
        params["conv_shift"].append(shift.reshape(1, cout))

    fbound = 1.0 / (512.0 ** 0.5)
    w_fc = jax.random.uniform(keys[ki], (50, 512), jnp.float32,
                              -fbound, fbound); ki += 1
    b_fc = jax.random.uniform(keys[ki], (50,), jnp.float32, -fbound, fbound)
    params["fc_w"] = jnp.transpose(w_fc).astype(jnp.bfloat16)   # (512, 50)
    params["fc_b"] = b_fc.reshape(1, 50)
    return params


# -----------------------------------------------------------------------------
if __name__ == "__main__":
    key = jax.random.PRNGKey(0)
    k_x, k_p = jax.random.split(key)

    # L = 46 so that: conv1 (valid) -> 44, pool2 -> 22, conv3..10 -> 22,
    # conv11 + MaxPool1d(22) -> 1, giving exactly 512 flat features for fc.
    B = 2
    x = jax.random.normal(k_x, (B, C_IN, SEQ_LEN), jnp.float32)
    params = init_params(k_p)

    logits = forward(x, params)
    logits = jax.block_until_ready(logits)

    assert logits.shape == (B, 50), logits.shape
    assert logits.dtype == jnp.float32
    assert bool(jnp.all(jnp.isfinite(logits)))
    print("KERNEL_OK")
</pallas_src>

<mosaic_0001>
module attributes {stable_mosaic.version = 11 : i64} {
  func.func @fused_net_kernel(%arg0: i32, %arg1: memref<1x46x384xf32, #tpu.memory_space<vmem>>, %arg2: memref<3x384x128xbf16, #tpu.memory_space<vmem>>, %arg3: memref<1x128xf32, #tpu.memory_space<vmem>>, %arg4: memref<1x128xf32, #tpu.memory_space<vmem>>, %arg5: memref<3x128x128xbf16, #tpu.memory_space<vmem>>, %arg6: memref<1x128xf32, #tpu.memory_space<vmem>>, %arg7: memref<1x128xf32, #tpu.memory_space<vmem>>, %arg8: memref<3x128x128xbf16, #tpu.memory_space<vmem>>, %arg9: memref<1x128xf32, #tpu.memory_space<vmem>>, %arg10: memref<1x128xf32, #tpu.memory_space<vmem>>, %arg11: memref<3x128x256xbf16, #tpu.memory_space<vmem>>, %arg12: memref<1x256xf32, #tpu.memory_space<vmem>>, %arg13: memref<1x256xf32, #tpu.memory_space<vmem>>, %arg14: memref<3x256x256xbf16, #tpu.memory_space<vmem>>, %arg15: memref<1x256xf32, #tpu.memory_space<vmem>>, %arg16: memref<1x256xf32, #tpu.memory_space<vmem>>, %arg17: memref<3x256x256xbf16, #tpu.memory_space<vmem>>, %arg18: memref<1x256xf32, #tpu.memory_space<vmem>>, %arg19: memref<1x256xf32, #tpu.memory_space<vmem>>, %arg20: memref<3x256x256xbf16, #tpu.memory_space<vmem>>, %arg21: memref<1x256xf32, #tpu.memory_space<vmem>>, %arg22: memref<1x256xf32, #tpu.memory_space<vmem>>, %arg23: memref<3x256x256xbf16, #tpu.memory_space<vmem>>, %arg24: memref<1x256xf32, #tpu.memory_space<vmem>>, %arg25: memref<1x256xf32, #tpu.memory_space<vmem>>, %arg26: memref<3x256x256xbf16, #tpu.memory_space<vmem>>, %arg27: memref<1x256xf32, #tpu.memory_space<vmem>>, %arg28: memref<1x256xf32, #tpu.memory_space<vmem>>, %arg29: memref<3x256x512xbf16, #tpu.memory_space<vmem>>, %arg30: memref<1x512xf32, #tpu.memory_space<vmem>>, %arg31: memref<1x512xf32, #tpu.memory_space<vmem>>, %arg32: memref<3x512x512xbf16, #tpu.memory_space<vmem>>, %arg33: memref<1x512xf32, #tpu.memory_space<vmem>>, %arg34: memref<1x512xf32, #tpu.memory_space<vmem>>, %arg35: memref<512x50xbf16, #tpu.memory_space<vmem>>, %arg36: memref<1x50xf32, #tpu.memory_space<vmem>>, %arg37: memref<1x1x50xf32, #tpu.memory_space<vmem>>, %arg38: memref<48x512xbf16, #tpu.memory_space<vmem>>) attributes {dimension_semantics = [#tpu.dimension_semantics<parallel>], iteration_bounds = array<i64: 2>, scalar_prefetch = 0 : i64, scratch_operands = 1 : i64, tpu.core_type = #tpu.core_type<tc>, window_params = [{transform_indices = @transform_0, window_bounds = array<i64: 1, 46, 384>}, {pipeline_mode = #tpu.pipeline_mode<synchronous>, transform_indices = @transform_1, window_bounds = array<i64: 3, 384, 128>}, {pipeline_mode = #tpu.pipeline_mode<synchronous>, transform_indices = @transform_2, window_bounds = array<i64: 1, 128>}, {pipeline_mode = #tpu.pipeline_mode<synchronous>, transform_indices = @transform_3, window_bounds = array<i64: 1, 128>}, {pipeline_mode = #tpu.pipeline_mode<synchronous>, transform_indices = @transform_4, window_bounds = array<i64: 3, 128, 128>}, {pipeline_mode = #tpu.pipeline_mode<synchronous>, transform_indices = @transform_5, window_bounds = array<i64: 1, 128>}, {pipeline_mode = #tpu.pipeline_mode<synchronous>, transform_indices = @transform_6, window_bounds = array<i64: 1, 128>}, {pipeline_mode = #tpu.pipeline_mode<synchronous>, transform_indices = @transform_7, window_bounds = array<i64: 3, 128, 128>}, {pipeline_mode = #tpu.pipeline_mode<synchronous>, transform_indices = @transform_8, window_bounds = array<i64: 1, 128>}, {pipeline_mode = #tpu.pipeline_mode<synchronous>, transform_indices = @transform_9, window_bounds = array<i64: 1, 128>}, {pipeline_mode = #tpu.pipeline_mode<synchronous>, transform_indices = @transform_10, window_bounds = array<i64: 3, 128, 256>}, {pipeline_mode = #tpu.pipeline_mode<synchronous>, transform_indices = @transform_11, window_bounds = array<i64: 1, 256>}, {pipeline_mode = #tpu.pipeline_mode<synchronous>, transform_indices = @transform_12, window_bounds = array<i64: 1, 256>}, {pipeline_mode = #tpu.pipeline_mode<synchronous>, transform_indices = @transform_13, window_bounds = array<i64: 3, 256, 256>}, {pipeline_mode = #tpu.pipeline_mode<synchronous>, transform_indices = @transform_14, window_bounds = array<i64: 1, 256>}, {pipeline_mode = #tpu.pipeline_mode<synchronous>, transform_indices = @transform_15, window_bounds = array<i64: 1, 256>}, {pipeline_mode = #tpu.pipeline_mode<synchronous>, transform_indices = @transform_16, window_bounds = array<i64: 3, 256, 256>}, {pipeline_mode = #tpu.pipeline_mode<synchronous>, transform_indices = @transform_17, window_bounds = array<i64: 1, 256>}, {pipeline_mode = #tpu.pipeline_mode<synchronous>, transform_indices = @transform_18, window_bounds = array<i64: 1, 256>}, {pipeline_mode = #tpu.pipeline_mode<synchronous>, transform_indices = @transform_19, window_bounds = array<i64: 3, 256, 256>}, {pipeline_mode = #tpu.pipeline_mode<synchronous>, transform_indices = @transform_20, window_bounds = array<i64: 1, 256>}, {pipeline_mode = #tpu.pipeline_mode<synchronous>, transform_indices = @transform_21, window_bounds = array<i64: 1, 256>}, {pipeline_mode = #tpu.pipeline_mode<synchronous>, transform_indices = @transform_22, window_bounds = array<i64: 3, 256, 256>}, {pipeline_mode = #tpu.pipeline_mode<synchronous>, transform_indices = @transform_23, window_bounds = array<i64: 1, 256>}, {pipeline_mode = #tpu.pipeline_mode<synchronous>, transform_indices = @transform_24, window_bounds = array<i64: 1, 256>}, {pipeline_mode = #tpu.pipeline_mode<synchronous>, transform_indices = @transform_25, window_bounds = array<i64: 3, 256, 256>}, {pipeline_mode = #tpu.pipeline_mode<synchronous>, transform_indices = @transform_26, window_bounds = array<i64: 1, 256>}, {pipeline_mode = #tpu.pipeline_mode<synchronous>, transform_indices = @transform_27, window_bounds = array<i64: 1, 256>}, {pipeline_mode = #tpu.pipeline_mode<synchronous>, transform_indices = @transform_28, window_bounds = array<i64: 3, 256, 512>}, {pipeline_mode = #tpu.pipeline_mode<synchronous>, transform_indices = @transform_29, window_bounds = array<i64: 1, 512>}, {pipeline_mode = #tpu.pipeline_mode<synchronous>, transform_indices = @transform_30, window_bounds = array<i64: 1, 512>}, {pipeline_mode = #tpu.pipeline_mode<synchronous>, transform_indices = @transform_31, window_bounds = array<i64: 3, 512, 512>}, {pipeline_mode = #tpu.pipeline_mode<synchronous>, transform_indices = @transform_32, window_bounds = array<i64: 1, 512>}, {pipeline_mode = #tpu.pipeline_mode<synchronous>, transform_indices = @transform_33, window_bounds = array<i64: 1, 512>}, {pipeline_mode = #tpu.pipeline_mode<synchronous>, transform_indices = @transform_34, window_bounds = array<i64: 512, 50>}, {pipeline_mode = #tpu.pipeline_mode<synchronous>, transform_indices = @transform_35, window_bounds = array<i64: 1, 50>}, {transform_indices = @transform_36, window_bounds = array<i64: 1, 1, 50>}]} {
    %c0 = arith.constant 0 : index
    %c0_0 = arith.constant 0 : index
    %c0_1 = arith.constant 0 : index
    %0 = vector.load %arg1[%c0, %c0_0, %c0_1] : memref<1x46x384xf32, #tpu.memory_space<vmem>>, vector<1x46x384xf32>
    %1 = vector.shape_cast %0 : vector<1x46x384xf32> to vector<46x384xf32>
    %2 = arith.truncf %1 : vector<46x384xf32> to vector<46x384xbf16>
    %c0_2 = arith.constant 0 : index
    %c0_3 = arith.constant 0 : index
    %3 = vector.load %arg38[%c0_2, %c0_3] : memref<48x512xbf16, #tpu.memory_space<vmem>>, vector<46x384xbf16>
    tpu.vector_store %arg38[%c0_2, %c0_3], %2 {strides = array<i32>} : memref<48x512xbf16, #tpu.memory_space<vmem>>, vector<46x384xbf16>,
    %c0_4 = arith.constant 0 : index
    %c0_5 = arith.constant 0 : index
    %4 = vector.load %arg3[%c0_4, %c0_5] : memref<1x128xf32, #tpu.memory_space<vmem>>, vector<1x128xf32>
    %c0_6 = arith.constant 0 : index
    %c0_7 = arith.constant 0 : index
    %5 = vector.load %arg4[%c0_6, %c0_7] : memref<1x128xf32, #tpu.memory_space<vmem>>, vector<1x128xf32>
    %c0_8 = arith.constant 0 : index
    %c0_9 = arith.constant 0 : index
    %6 = vector.load %arg38[%c0_8, %c0_9] : memref<48x512xbf16, #tpu.memory_space<vmem>>, vector<44x384xbf16>
    %c0_10 = arith.constant 0 : index
    %c0_11 = arith.constant 0 : index
    %c0_12 = arith.constant 0 : index
    %7 = vector.load %arg2[%c0_10, %c0_11, %c0_12] : memref<3x384x128xbf16, #tpu.memory_space<vmem>>, vector<1x384x128xbf16>
    %8 = vector.shape_cast %7 : vector<1x384x128xbf16> to vector<384x128xbf16>
    %cst = arith.constant dense<0.000000e+00> : vector<44x128xf32>
    %9 = tpu.matmul %6, %8, %cst {dimension_numbers = #tpu.dot_dimension_numbers<[1], [0], [0], [1], [0, 0, 1, 1], [], []>} : vector<44x384xbf16>, vector<384x128xbf16>, vector<44x128xf32> -> vector<44x128xf32>
    %c1 = arith.constant 1 : index
    %c0_13 = arith.constant 0 : index
    %10 = vector.load %arg38[%c1, %c0_13] : memref<48x512xbf16, #tpu.memory_space<vmem>>, vector<44x384xbf16>
    %c1_14 = arith.constant 1 : index
    %c0_15 = arith.constant 0 : index
    %c0_16 = arith.constant 0 : index
    %11 = vector.load %arg2[%c1_14, %c0_15, %c0_16] : memref<3x384x128xbf16, #tpu.memory_space<vmem>>, vector<1x384x128xbf16>
    %12 = vector.shape_cast %11 : vector<1x384x128xbf16> to vector<384x128xbf16>
    %cst_17 = arith.constant dense<0.000000e+00> : vector<44x128xf32>
    %13 = tpu.matmul %10, %12, %cst_17 {dimension_numbers = #tpu.dot_dimension_numbers<[1], [0], [0], [1], [0, 0, 1, 1], [], []>} : vector<44x384xbf16>, vector<384x128xbf16>, vector<44x128xf32> -> vector<44x128xf32>
    %14 = arith.addf %9, %13 : vector<44x128xf32>
    %c2 = arith.constant 2 : index
    %c0_18 = arith.constant 0 : index
    %15 = vector.load %arg38[%c2, %c0_18] : memref<48x512xbf16, #tpu.memory_space<vmem>>, vector<44x384xbf16>
    %c2_19 = arith.constant 2 : index
    %c0_20 = arith.constant 0 : index
    %c0_21 = arith.constant 0 : index
    %16 = vector.load %arg2[%c2_19, %c0_20, %c0_21] : memref<3x384x128xbf16, #tpu.memory_space<vmem>>, vector<1x384x128xbf16>
    %17 = vector.shape_cast %16 : vector<1x384x128xbf16> to vector<384x128xbf16>
    %cst_22 = arith.constant dense<0.000000e+00> : vector<44x128xf32>
    %18 = tpu.matmul %15, %17, %cst_22 {dimension_numbers = #tpu.dot_dimension_numbers<[1], [0], [0], [1], [0, 0, 1, 1], [], []>} : vector<44x384xbf16>, vector<384x128xbf16>, vector<44x128xf32> -> vector<44x128xf32>
    %19 = arith.addf %14, %18 : vector<44x128xf32>
    %20 = vector.broadcast %4 : vector<1x128xf32> to vector<44x128xf32>
    %21 = arith.mulf %19, %20 : vector<44x128xf32>
    %22 = vector.broadcast %5 : vector<1x128xf32> to vector<44x128xf32>
    %23 = arith.addf %21, %22 : vector<44x128xf32>
    %cst_23 = arith.constant 0.000000e+00 : f32
    %24 = vector.broadcast %cst_23 : f32 to vector<44x128xf32>
    %25 = arith.maximumf %23, %24 : vector<44x128xf32>
    %cst_24 = arith.constant 0.000000e+00 : bf16
    %26 = vector.broadcast %cst_24 : bf16 to vector<1x128xbf16>
    %c0_25 = arith.constant 0 : index
    %c0_26 = arith.constant 0 : index
    %27 = vector.load %arg38[%c0_25, %c0_26] : memref<48x512xbf16, #tpu.memory_space<vmem>>, vector<1x128xbf16>
    tpu.vector_store %arg38[%c0_25, %c0_26], %26 {strides = array<i32>} : memref<48x512xbf16, #tpu.memory_space<vmem>>, vector<1x128xbf16>,
    %c45 = arith.constant 45 : index
    %c0_27 = arith.constant 0 : index
    %28 = vector.load %arg38[%c45, %c0_27] : memref<48x512xbf16, #tpu.memory_space<vmem>>, vector<1x128xbf16>
    tpu.vector_store %arg38[%c45, %c0_27], %26 {strides = array<i32>} : memref<48x512xbf16, #tpu.memory_space<vmem>>, vector<1x128xbf16>,
    %29 = arith.truncf %25 : vector<44x128xf32> to vector<44x128xbf16>
    %c1_28 = arith.constant 1 : index
    %c0_29 = arith.constant 0 : index
    %30 = vector.load %arg38[%c1_28, %c0_29] : memref<48x512xbf16, #tpu.memory_space<vmem>>, vector<44x128xbf16>
    tpu.vector_store %arg38[%c1_28, %c0_29], %29 {strides = array<i32>} : memref<48x512xbf16, #tpu.memory_space<vmem>>, vector<44x128xbf16>,
    %c0_30 = arith.constant 0 : index
    %c0_31 = arith.constant 0 : index
    %31 = vector.load %arg6[%c0_30, %c0_31] : memref<1x128xf32, #tpu.memory_space<vmem>>, vector<1x128xf32>
    %c0_32 = arith.constant 0 : index
    %c0_33 = arith.constant 0 : index
    %32 = vector.load %arg7[%c0_32, %c0_33] : memref<1x128xf32, #tpu.memory_space<vmem>>, vector<1x128xf32>
    %c0_34 = arith.constant 0 : index
    %c0_35 = arith.constant 0 : index
    %33 = vector.load %arg38[%c0_34, %c0_35] : memref<48x512xbf16, #tpu.memory_space<vmem>>, vector<44x128xbf16>
    %c0_36 = arith.constant 0 : index
    %c0_37 = arith.constant 0 : index
    %c0_38 = arith.constant 0 : index
    %34 = vector.load %arg5[%c0_36, %c0_37, %c0_38] : memref<3x128x128xbf16, #tpu.memory_space<vmem>>, vector<1x128x128xbf16>
    %35 = vector.shape_cast %34 : vector<1x128x128xbf16> to vector<128x128xbf16>
    %cst_39 = arith.constant dense<0.000000e+00> : vector<44x128xf32>
    %36 = tpu.matmul %33, %35, %cst_39 {dimension_numbers = #tpu.dot_dimension_numbers<[1], [0], [0], [1], [0, 0, 1, 1], [], []>} : vector<44x128xbf16>, vector<128x128xbf16>, vector<44x128xf32> -> vector<44x128xf32>
    %c1_40 = arith.constant 1 : index
    %c0_41 = arith.constant 0 : index
    %37 = vector.load %arg38[%c1_40, %c0_41] : memref<48x512xbf16, #tpu.memory_space<vmem>>, vector<44x128xbf16>
    %c1_42 = arith.constant 1 : index
    %c0_43 = arith.constant 0 : index
    %c0_44 = arith.constant 0 : index
    %38 = vector.load %arg5[%c1_42, %c0_43, %c0_44] : memref<3x128x128xbf16, #tpu.memory_space<vmem>>, vector<1x128x128xbf16>
    %39 = vector.shape_cast %38 : vector<1x128x128xbf16> to vector<128x128xbf16>
    %cst_45 = arith.constant dense<0.000000e+00> : vector<44x128xf32>
    %40 = tpu.matmul %37, %39, %cst_45 {dimension_numbers = #tpu.dot_dimension_numbers<[1], [0], [0], [1], [0, 0, 1, 1], [], []>} : vector<44x128xbf16>, vector<128x128xbf16>, vector<44x128xf32> -> vector<44x128xf32>
    %41 = arith.addf %36, %40 : vector<44x128xf32>
    %c2_46 = arith.constant 2 : index
    %c0_47 = arith.constant 0 : index
    %42 = vector.load %arg38[%c2_46, %c0_47] : memref<48x512xbf16, #tpu.memory_space<vmem>>, vector<44x128xbf16>
    %c2_48 = arith.constant 2 : index
    %c0_49 = arith.constant 0 : index
    %c0_50 = arith.constant 0 : index
    %43 = vector.load %arg5[%c2_48, %c0_49, %c0_50] : memref<3x128x128xbf16, #tpu.memory_space<vmem>>, vector<1x128x128xbf16>
    %44 = vector.shape_cast %43 : vector<1x128x128xbf16> to vector<128x128xbf16>
    %cst_51 = arith.constant dense<0.000000e+00> : vector<44x128xf32>
    %45 = tpu.matmul %42, %44, %cst_51 {dimension_numbers = #tpu.dot_dimension_numbers<[1], [0], [0], [1], [0, 0, 1, 1], [], []>} : vector<44x128xbf16>, vector<128x128xbf16>, vector<44x128xf32> -> vector<44x128xf32>
    %46 = arith.addf %41, %45 : vector<44x128xf32>
    %47 = vector.broadcast %31 : vector<1x128xf32> to vector<44x128xf32>
    %48 = arith.mulf %46, %47 : vector<44x128xf32>
    %49 = vector.broadcast %32 : vector<1x128xf32> to vector<44x128xf32>
    %50 = arith.addf %48, %49 : vector<44x128xf32>
    %cst_52 = arith.constant 0.000000e+00 : f32
    %51 = vector.broadcast %cst_52 : f32 to vector<44x128xf32>
    %52 = arith.maximumf %50, %51 : vector<44x128xf32>
    %53 = vector.shape_cast %52 : vector<44x128xf32> to vector<22x2x128xf32>
    %cst_53 = arith.constant dense<0xFF800000> : vector<22x128xf32>
    %54 = vector.multi_reduction <maximumf>, %53, %cst_53 [1] : vector<22x2x128xf32> to vector<22x128xf32>
    %cst_54 = arith.constant 0.000000e+00 : bf16
    %55 = vector.broadcast %cst_54 : bf16 to vector<1x128xbf16>
    %c0_55 = arith.constant 0 : index
    %c0_56 = arith.constant 0 : index
    %56 = vector.load %arg38[%c0_55, %c0_56] : memref<48x512xbf16, #tpu.memory_space<vmem>>, vector<1x128xbf16>
    tpu.vector_store %arg38[%c0_55, %c0_56], %55 {strides = array<i32>} : memref<48x512xbf16, #tpu.memory_space<vmem>>, vector<1x128xbf16>,
    %c23 = arith.constant 23 : index
    %c0_57 = arith.constant 0 : index
    %57 = vector.load %arg38[%c23, %c0_57] : memref<48x512xbf16, #tpu.memory_space<vmem>>, vector<1x128xbf16>
    tpu.vector_store %arg38[%c23, %c0_57], %55 {strides = array<i32>} : memref<48x512xbf16, #tpu.memory_space<vmem>>, vector<1x128xbf16>,
    %58 = arith.truncf %54 : vector<22x128xf32> to vector<22x128xbf16>
    %c1_58 = arith.constant 1 : index
    %c0_59 = arith.constant 0 : index
    %59 = vector.load %arg38[%c1_58, %c0_59] : memref<48x512xbf16, #tpu.memory_space<vmem>>, vector<22x128xbf16>
    tpu.vector_store %arg38[%c1_58, %c0_59], %58 {strides = array<i32>} : memref<48x512xbf16, #tpu.memory_space<vmem>>, vector<22x128xbf16>,
    %c0_60 = arith.constant 0 : index
    %c0_61 = arith.constant 0 : index
    %60 = vector.load %arg9[%c0_60, %c0_61] : memref<1x128xf32, #tpu.memory_space<vmem>>, vector<1x128xf32>
    %c0_62 = arith.constant 0 : index
    %c0_63 = arith.constant 0 : index
    %61 = vector.load %arg10[%c0_62, %c0_63] : memref<1x128xf32, #tpu.memory_space<vmem>>, vector<1x128xf32>
    %c0_64 = arith.constant 0 : index
    %c0_65 = arith.constant 0 : index
    %62 = vector.load %arg38[%c0_64, %c0_65] : memref<48x512xbf16, #tpu.memory_space<vmem>>, vector<22x128xbf16>
    %c0_66 = arith.constant 0 : index
    %c0_67 = arith.constant 0 : index
    %c0_68 = arith.constant 0 : index
    %63 = vector.load %arg8[%c0_66, %c0_67, %c0_68] : memref<3x128x128xbf16, #tpu.memory_space<vmem>>, vector<1x128x128xbf16>
    %64 = vector.shape_cast %63 : vector<1x128x128xbf16> to vector<128x128xbf16>
    %cst_69 = arith.constant dense<0.000000e+00> : vector<22x128xf32>
    %65 = tpu.matmul %62, %64, %cst_69 {dimension_numbers = #tpu.dot_dimension_numbers<[1], [0], [0], [1], [0, 0, 1, 1], [], []>} : vector<22x128xbf16>, vector<128x128xbf16>, vector<22x128xf32> -> vector<22x128xf32>
    %c1_70 = arith.constant 1 : index
    %c0_71 = arith.constant 0 : index
    %66 = vector.load %arg38[%c1_70, %c0_71] : memref<48x512xbf16, #tpu.memory_space<vmem>>, vector<22x128xbf16>
    %c1_72 = arith.constant 1 : index
    %c0_73 = arith.constant 0 : index
    %c0_74 = arith.constant 0 : index
    %67 = vector.load %arg8[%c1_72, %c0_73, %c0_74] : memref<3x128x128xbf16, #tpu.memory_space<vmem>>, vector<1x128x128xbf16>
    %68 = vector.shape_cast %67 : vector<1x128x128xbf16> to vector<128x128xbf16>
    %cst_75 = arith.constant dense<0.000000e+00> : vector<22x128xf32>
    %69 = tpu.matmul %66, %68, %cst_75 {dimension_numbers = #tpu.dot_dimension_numbers<[1], [0], [0], [1], [0, 0, 1, 1], [], []>} : vector<22x128xbf16>, vector<128x128xbf16>, vector<22x128xf32> -> vector<22x128xf32>
    %70 = arith.addf %65, %69 : vector<22x128xf32>
    %c2_76 = arith.constant 2 : index
    %c0_77 = arith.constant 0 : index
    %71 = vector.load %arg38[%c2_76, %c0_77] : memref<48x512xbf16, #tpu.memory_space<vmem>>, vector<22x128xbf16>
    %c2_78 = arith.constant 2 : index
    %c0_79 = arith.constant 0 : index
    %c0_80 = arith.constant 0 : index
    %72 = vector.load %arg8[%c2_78, %c0_79, %c0_80] : memref<3x128x128xbf16, #tpu.memory_space<vmem>>, vector<1x128x128xbf16>
    %73 = vector.shape_cast %72 : vector<1x128x128xbf16> to vector<128x128xbf16>
    %cst_81 = arith.constant dense<0.000000e+00> : vector<22x128xf32>
    %74 = tpu.matmul %71, %73, %cst_81 {dimension_numbers = #tpu.dot_dimension_numbers<[1], [0], [0], [1], [0, 0, 1, 1], [], []>} : vector<22x128xbf16>, vector<128x128xbf16>, vector<22x128xf32> -> vector<22x128xf32>
    %75 = arith.addf %70, %74 : vector<22x128xf32>
    %76 = vector.broadcast %60 : vector<1x128xf32> to vector<22x128xf32>
    %77 = arith.mulf %75, %76 : vector<22x128xf32>
    %78 = vector.broadcast %61 : vector<1x128xf32> to vector<22x128xf32>
    %79 = arith.addf %77, %78 : vector<22x128xf32>
    %cst_82 = arith.constant 0.000000e+00 : f32
    %80 = vector.broadcast %cst_82 : f32 to vector<22x128xf32>
    %81 = arith.maximumf %79, %80 : vector<22x128xf32>
    %cst_83 = arith.constant 0.000000e+00 : bf16
    %82 = vector.broadcast %cst_83 : bf16 to vector<1x128xbf16>
    %c0_84 = arith.constant 0 : index
    %c0_85 = arith.constant 0 : index
    %83 = vector.load %arg38[%c0_84, %c0_85] : memref<48x512xbf16, #tpu.memory_space<vmem>>, vector<1x128xbf16>
    tpu.vector_store %arg38[%c0_84, %c0_85], %82 {strides = array<i32>} : memref<48x512xbf16, #tpu.memory_space<vmem>>, vector<1x128xbf16>,
    %c23_86 = arith.constant 23 : index
    %c0_87 = arith.constant 0 : index
    %84 = vector.load %arg38[%c23_86, %c0_87] : memref<48x512xbf16, #tpu.memory_space<vmem>>, vector<1x128xbf16>
    tpu.vector_store %arg38[%c23_86, %c0_87], %82 {strides = array<i32>} : memref<48x512xbf16, #tpu.memory_space<vmem>>, vector<1x128xbf16>,
    %85 = arith.truncf %81 : vector<22x128xf32> to vector<22x128xbf16>
    %c1_88 = arith.constant 1 : index
    %c0_89 = arith.constant 0 : index
    %86 = vector.load %arg38[%c1_88, %c0_89] : memref<48x512xbf16, #tpu.memory_space<vmem>>, vector<22x128xbf16>
    tpu.vector_store %arg38[%c1_88, %c0_89], %85 {strides = array<i32>} : memref<48x512xbf16, #tpu.memory_space<vmem>>, vector<22x128xbf16>,
    %c0_90 = arith.constant 0 : index
    %c0_91 = arith.constant 0 : index
    %87 = vector.load %arg12[%c0_90, %c0_91] : memref<1x256xf32, #tpu.memory_space<vmem>>, vector<1x256xf32>
    %c0_92 = arith.constant 0 : index
    %c0_93 = arith.constant 0 : index
    %88 = vector.load %arg13[%c0_92, %c0_93] : memref<1x256xf32, #tpu.memory_space<vmem>>, vector<1x256xf32>
    %c0_94 = arith.constant 0 : index
    %c0_95 = arith.constant 0 : index
    %89 = vector.load %arg38[%c0_94, %c0_95] : memref<48x512xbf16, #tpu.memory_space<vmem>>, vector<22x128xbf16>
    %c0_96 = arith.constant 0 : index
    %c0_97 = arith.constant 0 : index
    %c0_98 = arith.constant 0 : index
    %90 = vector.load %arg11[%c0_96, %c0_97, %c0_98] : memref<3x128x256xbf16, #tpu.memory_space<vmem>>, vector<1x128x256xbf16>
    %91 = vector.shape_cast %90 : vector<1x128x256xbf16> to vector<128x256xbf16>
    %cst_99 = arith.constant dense<0.000000e+00> : vector<22x256xf32>
    %92 = tpu.matmul %89, %91, %cst_99 {dimension_numbers = #tpu.dot_dimension_numbers<[1], [0], [0], [1], [0, 0, 1, 1], [], []>} : vector<22x128xbf16>, vector<128x256xbf16>, vector<22x256xf32> -> vector<22x256xf32>
    %c1_100 = arith.constant 1 : index
    %c0_101 = arith.constant 0 : index
    %93 = vector.load %arg38[%c1_100, %c0_101] : memref<48x512xbf16, #tpu.memory_space<vmem>>, vector<22x128xbf16>
    %c1_102 = arith.constant 1 : index
    %c0_103 = arith.constant 0 : index
    %c0_104 = arith.constant 0 : index
    %94 = vector.load %arg11[%c1_102, %c0_103, %c0_104] : memref<3x128x256xbf16, #tpu.memory_space<vmem>>, vector<1x128x256xbf16>
    %95 = vector.shape_cast %94 : vector<1x128x256xbf16> to vector<128x256xbf16>
    %cst_105 = arith.constant dense<0.000000e+00> : vector<22x256xf32>
    %96 = tpu.matmul %93, %95, %cst_105 {dimension_numbers = #tpu.dot_dimension_numbers<[1], [0], [0], [1], [0, 0, 1, 1], [], []>} : vector<22x128xbf16>, vector<128x256xbf16>, vector<22x256xf32> -> vector<22x256xf32>
    %97 = arith.addf %92, %96 : vector<22x256xf32>
    %c2_106 = arith.constant 2 : index
    %c0_107 = arith.constant 0 : index
    %98 = vector.load %arg38[%c2_106, %c0_107] : memref<48x512xbf16, #tpu.memory_space<vmem>>, vector<22x128xbf16>
    %c2_108 = arith.constant 2 : index
    %c0_109 = arith.constant 0 : index
    %c0_110 = arith.constant 0 : index
    %99 = vector.load %arg11[%c2_108, %c0_109, %c0_110] : memref<3x128x256xbf16, #tpu.memory_space<vmem>>, vector<1x128x256xbf16>
    %100 = vector.shape_cast %99 : vector<1x128x256xbf16> to vector<128x256xbf16>
    %cst_111 = arith.constant dense<0.000000e+00> : vector<22x256xf32>
    %101 = tpu.matmul %98, %100, %cst_111 {dimension_numbers = #tpu.dot_dimension_numbers<[1], [0], [0], [1], [0, 0, 1, 1], [], []>} : vector<22x128xbf16>, vector<128x256xbf16>, vector<22x256xf32> -> vector<22x256xf32>
    %102 = arith.addf %97, %101 : vector<22x256xf32>
    %103 = vector.broadcast %87 : vector<1x256xf32> to vector<22x256xf32>
    %104 = arith.mulf %102, %103 : vector<22x256xf32>
    %105 = vector.broadcast %88 : vector<1x256xf32> to vector<22x256xf32>
    %106 = arith.addf %104, %105 : vector<22x256xf32>
    %cst_112 = arith.constant 0.000000e+00 : f32
    %107 = vector.broadcast %cst_112 : f32 to vector<22x256xf32>
    %108 = arith.maximumf %106, %107 : vector<22x256xf32>
    %cst_113 = arith.constant 0.000000e+00 : bf16
    %109 = vector.broadcast %cst_113 : bf16 to vector<1x256xbf16>
    %c0_114 = arith.constant 0 : index
    %c0_115 = arith.constant 0 : index
    %110 = vector.load %arg38[%c0_114, %c0_115] : memref<48x512xbf16, #tpu.memory_space<vmem>>, vector<1x256xbf16>
    tpu.vector_store %arg38[%c0_114, %c0_115], %109 {strides = array<i32>} : memref<48x512xbf16, #tpu.memory_space<vmem>>, vector<1x256xbf16>,
    %c23_116 = arith.constant 23 : index
    %c0_117 = arith.constant 0 : index
    %111 = vector.load %arg38[%c23_116, %c0_117] : memref<48x512xbf16, #tpu.memory_space<vmem>>, vector<1x256xbf16>
    tpu.vector_store %arg38[%c23_116, %c0_117], %109 {strides = array<i32>} : memref<48x512xbf16, #tpu.memory_space<vmem>>, vector<1x256xbf16>,
    %112 = arith.truncf %108 : vector<22x256xf32> to vector<22x256xbf16>
    %c1_118 = arith.constant 1 : index
    %c0_119 = arith.constant 0 : index
    %113 = vector.load %arg38[%c1_118, %c0_119] : memref<48x512xbf16, #tpu.memory_space<vmem>>, vector<22x256xbf16>
    tpu.vector_store %arg38[%c1_118, %c0_119], %112 {strides = array<i32>} : memref<48x512xbf16, #tpu.memory_space<vmem>>, vector<22x256xbf16>,
    %c0_120 = arith.constant 0 : index
    %c0_121 = arith.constant 0 : index
    %114 = vector.load %arg15[%c0_120, %c0_121] : memref<1x256xf32, #tpu.memory_space<vmem>>, vector<1x256xf32>
    %c0_122 = arith.constant 0 : index
    %c0_123 = arith.constant 0 : index
    %115 = vector.load %arg16[%c0_122, %c0_123] : memref<1x256xf32, #tpu.memory_space<vmem>>, vector<1x256xf32>
    %c0_124 = arith.constant 0 : index
    %c0_125 = arith.constant 0 : index
    %116 = vector.load %arg38[%c0_124, %c0_125] : memref<48x512xbf16, #tpu.memory_space<vmem>>, vector<22x256xbf16>
    %c0_126 = arith.constant 0 : index
    %c0_127 = arith.constant 0 : index
    %c0_128 = arith.constant 0 : index
    %117 = vector.load %arg14[%c0_126, %c0_127, %c0_128] : memref<3x256x256xbf16, #tpu.memory_space<vmem>>, vector<1x256x256xbf16>
    %118 = vector.shape_cast %117 : vector<1x256x256xbf16> to vector<256x256xbf16>
    %cst_129 = arith.constant dense<0.000000e+00> : vector<22x256xf32>
    %119 = tpu.matmul %116, %118, %cst_129 {dimension_numbers = #tpu.dot_dimension_numbers<[1], [0], [0], [1], [0, 0, 1, 1], [], []>} : vector<22x256xbf16>, vector<256x256xbf16>, vector<22x256xf32> -> vector<22x256xf32>
    %c1_130 = arith.constant 1 : index
    %c0_131 = arith.constant 0 : index
    %120 = vector.load %arg38[%c1_130, %c0_131] : memref<48x512xbf16, #tpu.memory_space<vmem>>, vector<22x256xbf16>
    %c1_132 = arith.constant 1 : index
    %c0_133 = arith.constant 0 : index
    %c0_134 = arith.constant 0 : index
    %121 = vector.load %arg14[%c1_132, %c0_133, %c0_134] : memref<3x256x256xbf16, #tpu.memory_space<vmem>>, vector<1x256x256xbf16>
    %122 = vector.shape_cast %121 : vector<1x256x256xbf16> to vector<256x256xbf16>
    %cst_135 = arith.constant dense<0.000000e+00> : vector<22x256xf32>
    %123 = tpu.matmul %120, %122, %cst_135 {dimension_numbers = #tpu.dot_dimension_numbers<[1], [0], [0], [1], [0, 0, 1, 1], [], []>} : vector<22x256xbf16>, vector<256x256xbf16>, vector<22x256xf32> -> vector<22x256xf32>
    %124 = arith.addf %119, %123 : vector<22x256xf32>
    %c2_136 = arith.constant 2 : index
    %c0_137 = arith.constant 0 : index
    %125 = vector.load %arg38[%c2_136, %c0_137] : memref<48x512xbf16, #tpu.memory_space<vmem>>, vector<22x256xbf16>
    %c2_138 = arith.constant 2 : index
    %c0_139 = arith.constant 0 : index
    %c0_140 = arith.constant 0 : index
    %126 = vector.load %arg14[%c2_138, %c0_139, %c0_140] : memref<3x256x256xbf16, #tpu.memory_space<vmem>>, vector<1x256x256xbf16>
    %127 = vector.shape_cast %126 : vector<1x256x256xbf16> to vector<256x256xbf16>
    %cst_141 = arith.constant dense<0.000000e+00> : vector<22x256xf32>
    %128 = tpu.matmul %125, %127, %cst_141 {dimension_numbers = #tpu.dot_dimension_numbers<[1], [0], [0], [1], [0, 0, 1, 1], [], []>} : vector<22x256xbf16>, vector<256x256xbf16>, vector<22x256xf32> -> vector<22x256xf32>
    %129 = arith.addf %124, %128 : vector<22x256xf32>
    %130 = vector.broadcast %114 : vector<1x256xf32> to vector<22x256xf32>
    %131 = arith.mulf %129, %130 : vector<22x256xf32>
    %132 = vector.broadcast %115 : vector<1x256xf32> to vector<22x256xf32>
    %133 = arith.addf %131, %132 : vector<22x256xf32>
    %cst_142 = arith.constant 0.000000e+00 : f32
    %134 = vector.broadcast %cst_142 : f32 to vector<22x256xf32>
    %135 = arith.maximumf %133, %134 : vector<22x256xf32>
    %cst_143 = arith.constant 0.000000e+00 : bf16
    %136 = vector.broadcast %cst_143 : bf16 to vector<1x256xbf16>
    %c0_144 = arith.constant 0 : index
    %c0_145 = arith.constant 0 : index
    %137 = vector.load %arg38[%c0_144, %c0_145] : memref<48x512xbf16, #tpu.memory_space<vmem>>, vector<1x256xbf16>
    tpu.vector_store %arg38[%c0_144, %c0_145], %136 {strides = array<i32>} : memref<48x512xbf16, #tpu.memory_space<vmem>>, vector<1x256xbf16>,
    %c23_146 = arith.constant 23 : index
    %c0_147 = arith.constant 0 : index
    %138 = vector.load %arg38[%c23_146, %c0_147] : memref<48x512xbf16, #tpu.memory_space<vmem>>, vector<1x256xbf16>
    tpu.vector_store %arg38[%c23_146, %c0_147], %136 {strides = array<i32>} : memref<48x512xbf16, #tpu.memory_space<vmem>>, vector<1x256xbf16>,
    %139 = arith.truncf %135 : vector<22x256xf32> to vector<22x256xbf16>
    %c1_148 = arith.constant 1 : index
    %c0_149 = arith.constant 0 : index
    %140 = vector.load %arg38[%c1_148, %c0_149] : memref<48x512xbf16, #tpu.memory_space<vmem>>, vector<22x256xbf16>
    tpu.vector_store %arg38[%c1_148, %c0_149], %139 {strides = array<i32>} : memref<48x512xbf16, #tpu.memory_space<vmem>>, vector<22x256xbf16>,
    %c0_150 = arith.constant 0 : index
    %c0_151 = arith.constant 0 : index
    %141 = vector.load %arg18[%c0_150, %c0_151] : memref<1x256xf32, #tpu.memory_space<vmem>>, vector<1x256xf32>
    %c0_152 = arith.constant 0 : index
    %c0_153 = arith.constant 0 : index
    %142 = vector.load %arg19[%c0_152, %c0_153] : memref<1x256xf32, #tpu.memory_space<vmem>>, vector<1x256xf32>
    %c0_154 = arith.constant 0 : index
    %c0_155 = arith.constant 0 : index
    %143 = vector.load %arg38[%c0_154, %c0_155] : memref<48x512xbf16, #tpu.memory_space<vmem>>, vector<22x256xbf16>
    %c0_156 = arith.constant 0 : index
    %c0_157 = arith.constant 0 : index
    %c0_158 = arith.constant 0 : index
    %144 = vector.load %arg17[%c0_156, %c0_157, %c0_158] : memref<3x256x256xbf16, #tpu.memory_space<vmem>>, vector<1x256x256xbf16>
    %145 = vector.shape_cast %144 : vector<1x256x256xbf16> to vector<256x256xbf16>
    %cst_159 = arith.constant dense<0.000000e+00> : vector<22x256xf32>
    %146 = tpu.matmul %143, %145, %cst_159 {dimension_numbers = #tpu.dot_dimension_numbers<[1], [0], [0], [1], [0, 0, 1, 1], [], []>} : vector<22x256xbf16>, vector<256x256xbf16>, vector<22x256xf32> -> vector<22x256xf32>
    %c1_160 = arith.constant 1 : index
    %c0_161 = arith.constant 0 : index
    %147 = vector.load %arg38[%c1_160, %c0_161] : memref<48x512xbf16, #tpu.memory_space<vmem>>, vector<22x256xbf16>
    %c1_162 = arith.constant 1 : index
    %c0_163 = arith.constant 0 : index
    %c0_164 = arith.constant 0 : index
    %148 = vector.load %arg17[%c1_162, %c0_163, %c0_164] : memref<3x256x256xbf16, #tpu.memory_space<vmem>>, vector<1x256x256xbf16>
    %149 = vector.shape_cast %148 : vector<1x256x256xbf16> to vector<256x256xbf16>
    %cst_165 = arith.constant dense<0.000000e+00> : vector<22x256xf32>
    %150 = tpu.matmul %147, %149, %cst_165 {dimension_numbers = #tpu.dot_dimension_numbers<[1], [0], [0], [1], [0, 0, 1, 1], [], []>} : vector<22x256xbf16>, vector<256x256xbf16>, vector<22x256xf32> -> vector<22x256xf32>
    %151 = arith.addf %146, %150 : vector<22x256xf32>
    %c2_166 = arith.constant 2 : index
    %c0_167 = arith.constant 0 : index
    %152 = vector.load %arg38[%c2_166, %c0_167] : memref<48x512xbf16, #tpu.memory_space<vmem>>, vector<22x256xbf16>
    %c2_168 = arith.constant 2 : index
    %c0_169 = arith.constant 0 : index
    %c0_170 = arith.constant 0 : index
    %153 = vector.load %arg17[%c2_168, %c0_169, %c0_170] : memref<3x256x256xbf16, #tpu.memory_space<vmem>>, vector<1x256x256xbf16>
    %154 = vector.shape_cast %153 : vector<1x256x256xbf16> to vector<256x256xbf16>
    %cst_171 = arith.constant dense<0.000000e+00> : vector<22x256xf32>
    %155 = tpu.matmul %152, %154, %cst_171 {dimension_numbers = #tpu.dot_dimension_numbers<[1], [0], [0], [1], [0, 0, 1, 1], [], []>} : vector<22x256xbf16>, vector<256x256xbf16>, vector<22x256xf32> -> vector<22x256xf32>
    %156 = arith.addf %151, %155 : vector<22x256xf32>
    %157 = vector.broadcast %141 : vector<1x256xf32> to vector<22x256xf32>
    %158 = arith.mulf %156, %157 : vector<22x256xf32>
    %159 = vector.broadcast %142 : vector<1x256xf32> to vector<22x256xf32>
    %160 = arith.addf %158, %159 : vector<22x256xf32>
    %cst_172 = arith.constant 0.000000e+00 : f32
    %161 = vector.broadcast %cst_172 : f32 to vector<22x256xf32>
    %162 = arith.maximumf %160, %161 : vector<22x256xf32>
    %cst_173 = arith.constant 0.000000e+00 : bf16
    %163 = vector.broadcast %cst_173 : bf16 to vector<1x256xbf16>
    %c0_174 = arith.constant 0 : index
    %c0_175 = arith.constant 0 : index
    %164 = vector.load %arg38[%c0_174, %c0_175] : memref<48x512xbf16, #tpu.memory_space<vmem>>, vector<1x256xbf16>
    tpu.vector_store %arg38[%c0_174, %c0_175], %163 {strides = array<i32>} : memref<48x512xbf16, #tpu.memory_space<vmem>>, vector<1x256xbf16>,
    %c23_176 = arith.constant 23 : index
    %c0_177 = arith.constant 0 : index
    %165 = vector.load %arg38[%c23_176, %c0_177] : memref<48x512xbf16, #tpu.memory_space<vmem>>, vector<1x256xbf16>
    tpu.vector_store %arg38[%c23_176, %c0_177], %163 {strides = array<i32>} : memref<48x512xbf16, #tpu.memory_space<vmem>>, vector<1x256xbf16>,
    %166 = arith.truncf %162 : vector<22x256xf32> to vector<22x256xbf16>
    %c1_178 = arith.constant 1 : index
    %c0_179 = arith.constant 0 : index
    %167 = vector.load %arg38[%c1_178, %c0_179] : memref<48x512xbf16, #tpu.memory_space<vmem>>, vector<22x256xbf16>
    tpu.vector_store %arg38[%c1_178, %c0_179], %166 {strides = array<i32>} : memref<48x512xbf16, #tpu.memory_space<vmem>>, vector<22x256xbf16>,
    %c0_180 = arith.constant 0 : index
    %c0_181 = arith.constant 0 : index
    %168 = vector.load %arg21[%c0_180, %c0_181] : memref<1x256xf32, #tpu.memory_space<vmem>>, vector<1x256xf32>
    %c0_182 = arith.constant 0 : index
    %c0_183 = arith.constant 0 : index
    %169 = vector.load %arg22[%c0_182, %c0_183] : memref<1x256xf32, #tpu.memory_space<vmem>>, vector<1x256xf32>
    %c0_184 = arith.constant 0 : index
    %c0_185 = arith.constant 0 : index
    %170 = vector.load %arg38[%c0_184, %c0_185] : memref<48x512xbf16, #tpu.memory_space<vmem>>, vector<22x256xbf16>
    %c0_186 = arith.constant 0 : index
    %c0_187 = arith.constant 0 : index
    %c0_188 = arith.constant 0 : index
    %171 = vector.load %arg20[%c0_186, %c0_187, %c0_188] : memref<3x256x256xbf16, #tpu.memory_space<vmem>>, vector<1x256x256xbf16>
    %172 = vector.shape_cast %171 : vector<1x256x256xbf16> to vector<256x256xbf16>
    %cst_189 = arith.constant dense<0.000000e+00> : vector<22x256xf32>
    %173 = tpu.matmul %170, %172, %cst_189 {dimension_numbers = #tpu.dot_dimension_numbers<[1], [0], [0], [1], [0, 0, 1, 1], [], []>} : vector<22x256xbf16>, vector<256x256xbf16>, vector<22x256xf32> -> vector<22x256xf32>
    %c1_190 = arith.constant 1 : index
    %c0_191 = arith.constant 0 : index
    %174 = vector.load %arg38[%c1_190, %c0_191] : memref<48x512xbf16, #tpu.memory_space<vmem>>, vector<22x256xbf16>
    %c1_192 = arith.constant 1 : index
    %c0_193 = arith.constant 0 : index
    %c0_194 = arith.constant 0 : index
    %175 = vector.load %arg20[%c1_192, %c0_193, %c0_194] : memref<3x256x256xbf16, #tpu.memory_space<vmem>>, vector<1x256x256xbf16>
    %176 = vector.shape_cast %175 : vector<1x256x256xbf16> to vector<256x256xbf16>
    %cst_195 = arith.constant dense<0.000000e+00> : vector<22x256xf32>
    %177 = tpu.matmul %174, %176, %cst_195 {dimension_numbers = #tpu.dot_dimension_numbers<[1], [0], [0], [1], [0, 0, 1, 1], [], []>} : vector<22x256xbf16>, vector<256x256xbf16>, vector<22x256xf32> -> vector<22x256xf32>
    %178 = arith.addf %173, %177 : vector<22x256xf32>
    %c2_196 = arith.constant 2 : index
    %c0_197 = arith.constant 0 : index
    %179 = vector.load %arg38[%c2_196, %c0_197] : memref<48x512xbf16, #tpu.memory_space<vmem>>, vector<22x256xbf16>
    %c2_198 = arith.constant 2 : index
    %c0_199 = arith.constant 0 : index
    %c0_200 = arith.constant 0 : index
    %180 = vector.load %arg20[%c2_198, %c0_199, %c0_200] : memref<3x256x256xbf16, #tpu.memory_space<vmem>>, vector<1x256x256xbf16>
    %181 = vector.shape_cast %180 : vector<1x256x256xbf16> to vector<256x256xbf16>
    %cst_201 = arith.constant dense<0.000000e+00> : vector<22x256xf32>
    %182 = tpu.matmul %179, %181, %cst_201 {dimension_numbers = #tpu.dot_dimension_numbers<[1], [0], [0], [1], [0, 0, 1, 1], [], []>} : vector<22x256xbf16>, vector<256x256xbf16>, vector<22x256xf32> -> vector<22x256xf32>
    %183 = arith.addf %178, %182 : vector<22x256xf32>
    %184 = vector.broadcast %168 : vector<1x256xf32> to vector<22x256xf32>
    %185 = arith.mulf %183, %184 : vector<22x256xf32>
    %186 = vector.broadcast %169 : vector<1x256xf32> to vector<22x256xf32>
    %187 = arith.addf %185, %186 : vector<22x256xf32>
    %cst_202 = arith.constant 0.000000e+00 : f32
    %188 = vector.broadcast %cst_202 : f32 to vector<22x256xf32>
    %189 = arith.maximumf %187, %188 : vector<22x256xf32>
    %cst_203 = arith.constant 0.000000e+00 : bf16
    %190 = vector.broadcast %cst_203 : bf16 to vector<1x256xbf16>
    %c0_204 = arith.constant 0 : index
    %c0_205 = arith.constant 0 : index
    %191 = vector.load %arg38[%c0_204, %c0_205] : memref<48x512xbf16, #tpu.memory_space<vmem>>, vector<1x256xbf16>
    tpu.vector_store %arg38[%c0_204, %c0_205], %190 {strides = array<i32>} : memref<48x512xbf16, #tpu.memory_space<vmem>>, vector<1x256xbf16>,
    %c23_206 = arith.constant 23 : index
    %c0_207 = arith.constant 0 : index
    %192 = vector.load %arg38[%c23_206, %c0_207] : memref<48x512xbf16, #tpu.memory_space<vmem>>, vector<1x256xbf16>
    tpu.vector_store %arg38[%c23_206, %c0_207], %190 {strides = array<i32>} : memref<48x512xbf16, #tpu.memory_space<vmem>>, vector<1x256xbf16>,
    %193 = arith.truncf %189 : vector<22x256xf32> to vector<22x256xbf16>
    %c1_208 = arith.constant 1 : index
    %c0_209 = arith.constant 0 : index
    %194 = vector.load %arg38[%c1_208, %c0_209] : memref<48x512xbf16, #tpu.memory_space<vmem>>, vector<22x256xbf16>
    tpu.vector_store %arg38[%c1_208, %c0_209], %193 {strides = array<i32>} : memref<48x512xbf16, #tpu.memory_space<vmem>>, vector<22x256xbf16>,
    %c0_210 = arith.constant 0 : index
    %c0_211 = arith.constant 0 : index
    %195 = vector.load %arg24[%c0_210, %c0_211] : memref<1x256xf32, #tpu.memory_space<vmem>>, vector<1x256xf32>
    %c0_212 = arith.constant 0 : index
    %c0_213 = arith.constant 0 : index
    %196 = vector.load %arg25[%c0_212, %c0_213] : memref<1x256xf32, #tpu.memory_space<vmem>>, vector<1x256xf32>
    %c0_214 = arith.constant 0 : index
    %c0_215 = arith.constant 0 : index
    %197 = vector.load %arg38[%c0_214, %c0_215] : memref<48x512xbf16, #tpu.memory_space<vmem>>, vector<22x256xbf16>
    %c0_216 = arith.constant 0 : index
    %c0_217 = arith.constant 0 : index
    %c0_218 = arith.constant 0 : index
    %198 = vector.load %arg23[%c0_216, %c0_217, %c0_218] : memref<3x256x256xbf16, #tpu.memory_space<vmem>>, vector<1x256x256xbf16>
    %199 = vector.shape_cast %198 : vector<1x256x256xbf16> to vector<256x256xbf16>
    %cst_219 = arith.constant dense<0.000000e+00> : vector<22x256xf32>
    %200 = tpu.matmul %197, %199, %cst_219 {dimension_numbers = #tpu.dot_dimension_numbers<[1], [0], [0], [1], [0, 0, 1, 1], [], []>} : vector<22x256xbf16>, vector<256x256xbf16>, vector<22x256xf32> -> vector<22x256xf32>
    %c1_220 = arith.constant 1 : index
    %c0_221 = arith.constant 0 : index
    %201 = vector.load %arg38[%c1_220, %c0_221] : memref<48x512xbf16, #tpu.memory_space<vmem>>, vector<22x256xbf16>
    %c1_222 = arith.constant 1 : index
    %c0_223 = arith.constant 0 : index
    %c0_224 = arith.constant 0 : index
    %202 = vector.load %arg23[%c1_222, %c0_223, %c0_224] : memref<3x256x256xbf16, #tpu.memory_space<vmem>>, vector<1x256x256xbf16>
    %203 = vector.shape_cast %202 : vector<1x256x256xbf16> to vector<256x256xbf16>
    %cst_225 = arith.constant dense<0.000000e+00> : vector<22x256xf32>
    %204 = tpu.matmul %201, %203, %cst_225 {dimension_numbers = #tpu.dot_dimension_numbers<[1], [0], [0], [1], [0, 0, 1, 1], [], []>} : vector<22x256xbf16>, vector<256x256xbf16>, vector<22x256xf32> -> vector<22x256xf32>
    %205 = arith.addf %200, %204 : vector<22x256xf32>
    %c2_226 = arith.constant 2 : index
    %c0_227 = arith.constant 0 : index
    %206 = vector.load %arg38[%c2_226, %c0_227] : memref<48x512xbf16, #tpu.memory_space<vmem>>, vector<22x256xbf16>
    %c2_228 = arith.constant 2 : index
    %c0_229 = arith.constant 0 : index
    %c0_230 = arith.constant 0 : index
    %207 = vector.load %arg23[%c2_228, %c0_229, %c0_230] : memref<3x256x256xbf16, #tpu.memory_space<vmem>>, vector<1x256x256xbf16>
    %208 = vector.shape_cast %207 : vector<1x256x256xbf16> to vector<256x256xbf16>
    %cst_231 = arith.constant dense<0.000000e+00> : vector<22x256xf32>
    %209 = tpu.matmul %206, %208, %cst_231 {dimension_numbers = #tpu.dot_dimension_numbers<[1], [0], [0], [1], [0, 0, 1, 1], [], []>} : vector<22x256xbf16>, vector<256x256xbf16>, vector<22x256xf32> -> vector<22x256xf32>
    %210 = arith.addf %205, %209 : vector<22x256xf32>
    %211 = vector.broadcast %195 : vector<1x256xf32> to vector<22x256xf32>
    %212 = arith.mulf %210, %211 : vector<22x256xf32>
    %213 = vector.broadcast %196 : vector<1x256xf32> to vector<22x256xf32>
    %214 = arith.addf %212, %213 : vector<22x256xf32>
    %cst_232 = arith.constant 0.000000e+00 : f32
    %215 = vector.broadcast %cst_232 : f32 to vector<22x256xf32>
    %216 = arith.maximumf %214, %215 : vector<22x256xf32>
    %cst_233 = arith.constant 0.000000e+00 : bf16
    %217 = vector.broadcast %cst_233 : bf16 to vector<1x256xbf16>
    %c0_234 = arith.constant 0 : index
    %c0_235 = arith.constant 0 : index
    %218 = vector.load %arg38[%c0_234, %c0_235] : memref<48x512xbf16, #tpu.memory_space<vmem>>, vector<1x256xbf16>
    tpu.vector_store %arg38[%c0_234, %c0_235], %217 {strides = array<i32>} : memref<48x512xbf16, #tpu.memory_space<vmem>>, vector<1x256xbf16>,
    %c23_236 = arith.constant 23 : index
    %c0_237 = arith.constant 0 : index
    %219 = vector.load %arg38[%c23_236, %c0_237] : memref<48x512xbf16, #tpu.memory_space<vmem>>, vector<1x256xbf16>
    tpu.vector_store %arg38[%c23_236, %c0_237], %217 {strides = array<i32>} : memref<48x512xbf16, #tpu.memory_space<vmem>>, vector<1x256xbf16>,
    %220 = arith.truncf %216 : vector<22x256xf32> to vector<22x256xbf16>
    %c1_238 = arith.constant 1 : index
    %c0_239 = arith.constant 0 : index
    %221 = vector.load %arg38[%c1_238, %c0_239] : memref<48x512xbf16, #tpu.memory_space<vmem>>, vector<22x256xbf16>
    tpu.vector_store %arg38[%c1_238, %c0_239], %220 {strides = array<i32>} : memref<48x512xbf16, #tpu.memory_space<vmem>>, vector<22x256xbf16>,
    %c0_240 = arith.constant 0 : index
    %c0_241 = arith.constant 0 : index
    %222 = vector.load %arg27[%c0_240, %c0_241] : memref<1x256xf32, #tpu.memory_space<vmem>>, vector<1x256xf32>
    %c0_242 = arith.constant 0 : index
    %c0_243 = arith.constant 0 : index
    %223 = vector.load %arg28[%c0_242, %c0_243] : memref<1x256xf32, #tpu.memory_space<vmem>>, vector<1x256xf32>
    %c0_244 = arith.constant 0 : index
    %c0_245 = arith.constant 0 : index
    %224 = vector.load %arg38[%c0_244, %c0_245] : memref<48x512xbf16, #tpu.memory_space<vmem>>, vector<22x256xbf16>
    %c0_246 = arith.constant 0 : index
    %c0_247 = arith.constant 0 : index
    %c0_248 = arith.constant 0 : index
    %225 = vector.load %arg26[%c0_246, %c0_247, %c0_248] : memref<3x256x256xbf16, #tpu.memory_space<vmem>>, vector<1x256x256xbf16>
    %226 = vector.shape_cast %225 : vector<1x256x256xbf16> to vector<256x256xbf16>
    %cst_249 = arith.constant dense<0.000000e+00> : vector<22x256xf32>
    %227 = tpu.matmul %224, %226, %cst_249 {dimension_numbers = #tpu.dot_dimension_numbers<[1], [0], [0], [1], [0, 0, 1, 1], [], []>} : vector<22x256xbf16>, vector<256x256xbf16>, vector<22x256xf32> -> vector<22x256xf32>
    %c1_250 = arith.constant 1 : index
    %c0_251 = arith.constant 0 : index
    %228 = vector.load %arg38[%c1_250, %c0_251] : memref<48x512xbf16, #tpu.memory_space<vmem>>, vector<22x256xbf16>
    %c1_252 = arith.constant 1 : index
    %c0_253 = arith.constant 0 : index
    %c0_254 = arith.constant 0 : index
    %229 = vector.load %arg26[%c1_252, %c0_253, %c0_254] : memref<3x256x256xbf16, #tpu.memory_space<vmem>>, vector<1x256x256xbf16>
    %230 = vector.shape_cast %229 : vector<1x256x256xbf16> to vector<256x256xbf16>
    %cst_255 = arith.constant dense<0.000000e+00> : vector<22x256xf32>
    %231 = tpu.matmul %228, %230, %cst_255 {dimension_numbers = #tpu.dot_dimension_numbers<[1], [0], [0], [1], [0, 0, 1, 1], [], []>} : vector<22x256xbf16>, vector<256x256xbf16>, vector<22x256xf32> -> vector<22x256xf32>
    %232 = arith.addf %227, %231 : vector<22x256xf32>
    %c2_256 = arith.constant 2 : index
    %c0_257 = arith.constant 0 : index
    %233 = vector.load %arg38[%c2_256, %c0_257] : memref<48x512xbf16, #tpu.memory_space<vmem>>, vector<22x256xbf16>
    %c2_258 = arith.constant 2 : index
    %c0_259 = arith.constant 0 : index
    %c0_260 = arith.constant 0 : index
    %234 = vector.load %arg26[%c2_258, %c0_259, %c0_260] : memref<3x256x256xbf16, #tpu.memory_space<vmem>>, vector<1x256x256xbf16>
    %235 = vector.shape_cast %234 : vector<1x256x256xbf16> to vector<256x256xbf16>
    %cst_261 = arith.constant dense<0.000000e+00> : vector<22x256xf32>
    %236 = tpu.matmul %233, %235, %cst_261 {dimension_numbers = #tpu.dot_dimension_numbers<[1], [0], [0], [1], [0, 0, 1, 1], [], []>} : vector<22x256xbf16>, vector<256x256xbf16>, vector<22x256xf32> -> vector<22x256xf32>
    %237 = arith.addf %232, %236 : vector<22x256xf32>
    %238 = vector.broadcast %222 : vector<1x256xf32> to vector<22x256xf32>
    %239 = arith.mulf %237, %238 : vector<22x256xf32>
    %240 = vector.broadcast %223 : vector<1x256xf32> to vector<22x256xf32>
    %241 = arith.addf %239, %240 : vector<22x256xf32>
    %cst_262 = arith.constant 0.000000e+00 : f32
    %242 = vector.broadcast %cst_262 : f32 to vector<22x256xf32>
    %243 = arith.maximumf %241, %242 : vector<22x256xf32>
    %cst_263 = arith.constant 0.000000e+00 : bf16
    %244 = vector.broadcast %cst_263 : bf16 to vector<1x256xbf16>
    %c0_264 = arith.constant 0 : index
    %c0_265 = arith.constant 0 : index
    %245 = vector.load %arg38[%c0_264, %c0_265] : memref<48x512xbf16, #tpu.memory_space<vmem>>, vector<1x256xbf16>
    tpu.vector_store %arg38[%c0_264, %c0_265], %244 {strides = array<i32>} : memref<48x512xbf16, #tpu.memory_space<vmem>>, vector<1x256xbf16>,
    %c23_266 = arith.constant 23 : index
    %c0_267 = arith.constant 0 : index
    %246 = vector.load %arg38[%c23_266, %c0_267] : memref<48x512xbf16, #tpu.memory_space<vmem>>, vector<1x256xbf16>
    tpu.vector_store %arg38[%c23_266, %c0_267], %244 {strides = array<i32>} : memref<48x512xbf16, #tpu.memory_space<vmem>>, vector<1x256xbf16>,
    %247 = arith.truncf %243 : vector<22x256xf32> to vector<22x256xbf16>
    %c1_268 = arith.constant 1 : index
    %c0_269 = arith.constant 0 : index
    %248 = vector.load %arg38[%c1_268, %c0_269] : memref<48x512xbf16, #tpu.memory_space<vmem>>, vector<22x256xbf16>
    tpu.vector_store %arg38[%c1_268, %c0_269], %247 {strides = array<i32>} : memref<48x512xbf16, #tpu.memory_space<vmem>>, vector<22x256xbf16>,
    %c0_270 = arith.constant 0 : index
    %c0_271 = arith.constant 0 : index
    %249 = vector.load %arg30[%c0_270, %c0_271] : memref<1x512xf32, #tpu.memory_space<vmem>>, vector<1x512xf32>
    %c0_272 = arith.constant 0 : index
    %c0_273 = arith.constant 0 : index
    %250 = vector.load %arg31[%c0_272, %c0_273] : memref<1x512xf32, #tpu.memory_space<vmem>>, vector<1x512xf32>
    %c0_274 = arith.constant 0 : index
    %c0_275 = arith.constant 0 : index
    %251 = vector.load %arg38[%c0_274, %c0_275] : memref<48x512xbf16, #tpu.memory_space<vmem>>, vector<22x256xbf16>
    %c0_276 = arith.constant 0 : index
    %c0_277 = arith.constant 0 : index
    %c0_278 = arith.constant 0 : index
    %252 = vector.load %arg29[%c0_276, %c0_277, %c0_278] : memref<3x256x512xbf16, #tpu.memory_space<vmem>>, vector<1x256x512xbf16>
    %253 = vector.shape_cast %252 : vector<1x256x512xbf16> to vector<256x512xbf16>
    %cst_279 = arith.constant dense<0.000000e+00> : vector<22x512xf32>
    %254 = tpu.matmul %251, %253, %cst_279 {dimension_numbers = #tpu.dot_dimension_numbers<[1], [0], [0], [1], [0, 0, 1, 1], [], []>} : vector<22x256xbf16>, vector<256x512xbf16>, vector<22x512xf32> -> vector<22x512xf32>
    %c1_280 = arith.constant 1 : index
    %c0_281 = arith.constant 0 : index
    %255 = vector.load %arg38[%c1_280, %c0_281] : memref<48x512xbf16, #tpu.memory_space<vmem>>, vector<22x256xbf16>
    %c1_282 = arith.constant 1 : index
    %c0_283 = arith.constant 0 : index
    %c0_284 = arith.constant 0 : index
    %256 = vector.load %arg29[%c1_282, %c0_283, %c0_284] : memref<3x256x512xbf16, #tpu.memory_space<vmem>>, vector<1x256x512xbf16>
    %257 = vector.shape_cast %256 : vector<1x256x512xbf16> to vector<256x512xbf16>
    %cst_285 = arith.constant dense<0.000000e+00> : vector<22x512xf32>
    %258 = tpu.matmul %255, %257, %cst_285 {dimension_numbers = #tpu.dot_dimension_numbers<[1], [0], [0], [1], [0, 0, 1, 1], [], []>} : vector<22x256xbf16>, vector<256x512xbf16>, vector<22x512xf32> -> vector<22x512xf32>
    %259 = arith.addf %254, %258 : vector<22x512xf32>
    %c2_286 = arith.constant 2 : index
    %c0_287 = arith.constant 0 : index
    %260 = vector.load %arg38[%c2_286, %c0_287] : memref<48x512xbf16, #tpu.memory_space<vmem>>, vector<22x256xbf16>
    %c2_288 = arith.constant 2 : index
    %c0_289 = arith.constant 0 : index
    %c0_290 = arith.constant 0 : index
    %261 = vector.load %arg29[%c2_288, %c0_289, %c0_290] : memref<3x256x512xbf16, #tpu.memory_space<vmem>>, vector<1x256x512xbf16>
    %262 = vector.shape_cast %261 : vector<1x256x512xbf16> to vector<256x512xbf16>
    %cst_291 = arith.constant dense<0.000000e+00> : vector<22x512xf32>
    %263 = tpu.matmul %260, %262, %cst_291 {dimension_numbers = #tpu.dot_dimension_numbers<[1], [0], [0], [1], [0, 0, 1, 1], [], []>} : vector<22x256xbf16>, vector<256x512xbf16>, vector<22x512xf32> -> vector<22x512xf32>
    %264 = arith.addf %259, %263 : vector<22x512xf32>
    %265 = vector.broadcast %249 : vector<1x512xf32> to vector<22x512xf32>
    %266 = arith.mulf %264, %265 : vector<22x512xf32>
    %267 = vector.broadcast %250 : vector<1x512xf32> to vector<22x512xf32>
    %268 = arith.addf %266, %267 : vector<22x512xf32>
    %cst_292 = arith.constant 0.000000e+00 : f32
    %269 = vector.broadcast %cst_292 : f32 to vector<22x512xf32>
    %270 = arith.maximumf %268, %269 : vector<22x512xf32>
    %cst_293 = arith.constant 0.000000e+00 : bf16
    %271 = vector.broadcast %cst_293 : bf16 to vector<1x512xbf16>
    %c0_294 = arith.constant 0 : index
    %c0_295 = arith.constant 0 : index
    %272 = vector.load %arg38[%c0_294, %c0_295] : memref<48x512xbf16, #tpu.memory_space<vmem>>, vector<1x512xbf16>
    tpu.vector_store %arg38[%c0_294, %c0_295], %271 {strides = array<i32>} : memref<48x512xbf16, #tpu.memory_space<vmem>>, vector<1x512xbf16>,
    %c23_296 = arith.constant 23 : index
    %c0_297 = arith.constant 0 : index
    %273 = vector.load %arg38[%c23_296, %c0_297] : memref<48x512xbf16, #tpu.memory_space<vmem>>, vector<1x512xbf16>
    tpu.vector_store %arg38[%c23_296, %c0_297], %271 {strides = array<i32>} : memref<48x512xbf16, #tpu.memory_space<vmem>>, vector<1x512xbf16>,
    %274 = arith.truncf %270 : vector<22x512xf32> to vector<22x512xbf16>
    %c1_298 = arith.constant 1 : index
    %c0_299 = arith.constant 0 : index
    %275 = vector.load %arg38[%c1_298, %c0_299] : memref<48x512xbf16, #tpu.memory_space<vmem>>, vector<22x512xbf16>
    tpu.vector_store %arg38[%c1_298, %c0_299], %274 {strides = array<i32>} : memref<48x512xbf16, #tpu.memory_space<vmem>>, vector<22x512xbf16>,
    %c0_300 = arith.constant 0 : index
    %c0_301 = arith.constant 0 : index
    %276 = vector.load %arg33[%c0_300, %c0_301] : memref<1x512xf32, #tpu.memory_space<vmem>>, vector<1x512xf32>
    %c0_302 = arith.constant 0 : index
    %c0_303 = arith.constant 0 : index
    %277 = vector.load %arg34[%c0_302, %c0_303] : memref<1x512xf32, #tpu.memory_space<vmem>>, vector<1x512xf32>
    %c0_304 = arith.constant 0 : index
    %c0_305 = arith.constant 0 : index
    %278 = vector.load %arg38[%c0_304, %c0_305] : memref<48x512xbf16, #tpu.memory_space<vmem>>, vector<22x512xbf16>
    %c0_306 = arith.constant 0 : index
    %c0_307 = arith.constant 0 : index
    %c0_308 = arith.constant 0 : index
    %279 = vector.load %arg32[%c0_306, %c0_307, %c0_308] : memref<3x512x512xbf16, #tpu.memory_space<vmem>>, vector<1x512x512xbf16>
    %280 = vector.shape_cast %279 : vector<1x512x512xbf16> to vector<512x512xbf16>
    %cst_309 = arith.constant dense<0.000000e+00> : vector<22x512xf32>
    %281 = tpu.matmul %278, %280, %cst_309 {dimension_numbers = #tpu.dot_dimension_numbers<[1], [0], [0], [1], [0, 0, 1, 1], [], []>} : vector<22x512xbf16>, vector<512x512xbf16>, vector<22x512xf32> -> vector<22x512xf32>
    %c1_310 = arith.constant 1 : index
    %c0_311 = arith.constant 0 : index
    %282 = vector.load %arg38[%c1_310, %c0_311] : memref<48x512xbf16, #tpu.memory_space<vmem>>, vector<22x512xbf16>
    %c1_312 = arith.constant 1 : index
    %c0_313 = arith.constant 0 : index
    %c0_314 = arith.constant 0 : index
    %283 = vector.load %arg32[%c1_312, %c0_313, %c0_314] : memref<3x512x512xbf16, #tpu.memory_space<vmem>>, vector<1x512x512xbf16>
    %284 = vector.shape_cast %283 : vector<1x512x512xbf16> to vector<512x512xbf16>
    %cst_315 = arith.constant dense<0.000000e+00> : vector<22x512xf32>
    %285 = tpu.matmul %282, %284, %cst_315 {dimension_numbers = #tpu.dot_dimension_numbers<[1], [0], [0], [1], [0, 0, 1, 1], [], []>} : vector<22x512xbf16>, vector<512x512xbf16>, vector<22x512xf32> -> vector<22x512xf32>
    %286 = arith.addf %281, %285 : vector<22x512xf32>
    %c2_316 = arith.constant 2 : index
    %c0_317 = arith.constant 0 : index
    %287 = vector.load %arg38[%c2_316, %c0_317] : memref<48x512xbf16, #tpu.memory_space<vmem>>, vector<22x512xbf16>
    %c2_318 = arith.constant 2 : index
    %c0_319 = arith.constant 0 : index
    %c0_320 = arith.constant 0 : index
    %288 = vector.load %arg32[%c2_318, %c0_319, %c0_320] : memref<3x512x512xbf16, #tpu.memory_space<vmem>>, vector<1x512x512xbf16>
    %289 = vector.shape_cast %288 : vector<1x512x512xbf16> to vector<512x512xbf16>
    %cst_321 = arith.constant dense<0.000000e+00> : vector<22x512xf32>
    %290 = tpu.matmul %287, %289, %cst_321 {dimension_numbers = #tpu.dot_dimension_numbers<[1], [0], [0], [1], [0, 0, 1, 1], [], []>} : vector<22x512xbf16>, vector<512x512xbf16>, vector<22x512xf32> -> vector<22x512xf32>
    %291 = arith.addf %286, %290 : vector<22x512xf32>
    %292 = vector.broadcast %276 : vector<1x512xf32> to vector<22x512xf32>
    %293 = arith.mulf %291, %292 : vector<22x512xf32>
    %294 = vector.broadcast %277 : vector<1x512xf32> to vector<22x512xf32>
    %295 = arith.addf %293, %294 : vector<22x512xf32>
    %cst_322 = arith.constant 0.000000e+00 : f32
    %296 = vector.broadcast %cst_322 : f32 to vector<22x512xf32>
    %297 = arith.maximumf %295, %296 : vector<22x512xf32>
    %298 = vector.shape_cast %297 : vector<22x512xf32> to vector<1x22x512xf32>
    %cst_323 = arith.constant dense<0xFF800000> : vector<1x512xf32>
    %299 = vector.multi_reduction <maximumf>, %298, %cst_323 [1] : vector<1x22x512xf32> to vector<1x512xf32>
    %300 = arith.truncf %299 : vector<1x512xf32> to vector<1x512xbf16>
    %c0_324 = arith.constant 0 : index
    %c0_325 = arith.constant 0 : index
    %301 = vector.load %arg35[%c0_324, %c0_325] : memref<512x50xbf16, #tpu.memory_space<vmem>>, vector<512x50xbf16>
    %cst_326 = arith.constant dense<0.000000e+00> : vector<1x50xf32>
    %302 = tpu.matmul %300, %301, %cst_326 {dimension_numbers = #tpu.dot_dimension_numbers<[1], [0], [0], [1], [0, 0, 1, 1], [], []>} : vector<1x512xbf16>, vector<512x50xbf16>, vector<1x50xf32> -> vector<1x50xf32>
    %c0_327 = arith.constant 0 : index
    %c0_328 = arith.constant 0 : index
    %303 = vector.load %arg36[%c0_327, %c0_328] : memref<1x50xf32, #tpu.memory_space<vmem>>, vector<1x50xf32>
    %304 = arith.addf %302, %303 : vector<1x50xf32>
    %c0_329 = arith.constant 0 : index
    %c0_330 = arith.constant 0 : index
    %c0_331 = arith.constant 0 : index
    %305 = vector.load %arg37[%c0_329, %c0_330, %c0_331] : memref<1x1x50xf32, #tpu.memory_space<vmem>>, vector<1x1x50xf32>
    %306 = vector.shape_cast %305 : vector<1x1x50xf32> to vector<1x50xf32>
    %307 = vector.shape_cast %304 : vector<1x50xf32> to vector<1x1x50xf32>
    tpu.vector_store %arg37[%c0_329, %c0_330, %c0_331], %307 {strides = array<i32>} : memref<1x1x50xf32, #tpu.memory_space<vmem>>, vector<1x1x50xf32>,
    return
  }
  func.func @transform_0(%arg0: i32) -> (i32, i32, i32) {
    %c0_i32 = arith.constant 0 : i32
    %c0_i32_0 = arith.constant 0 : i32
    %c0_i32_1 = arith.constant 0 : i32
    return %arg0, %c0_i32, %c0_i32_0 : i32, i32, i32
  }
  func.func @transform_1(%arg0: i32) -> (i32, i32, i32) {
    %c0_i32 = arith.constant 0 : i32
    %c0_i32_0 = arith.constant 0 : i32
    %c0_i32_1 = arith.constant 0 : i32
    %c0_i32_2 = arith.constant 0 : i32
    return %c0_i32, %c0_i32_0, %c0_i32_1 : i32, i32, i32
  }
  func.func @transform_2(%arg0: i32) -> (i32, i32) {
    %c0_i32 = arith.constant 0 : i32
    %c0_i32_0 = arith.constant 0 : i32
    %c0_i32_1 = arith.constant 0 : i32
    return %c0_i32, %c0_i32_0 : i32, i32
  }
  func.func @transform_3(%arg0: i32) -> (i32, i32) {
    %c0_i32 = arith.constant 0 : i32
    %c0_i32_0 = arith.constant 0 : i32
    %c0_i32_1 = arith.constant 0 : i32
    return %c0_i32, %c0_i32_0 : i32, i32
  }
  func.func @transform_4(%arg0: i32) -> (i32, i32, i32) {
    %c0_i32 = arith.constant 0 : i32
    %c0_i32_0 = arith.constant 0 : i32
    %c0_i32_1 = arith.constant 0 : i32
    %c0_i32_2 = arith.constant 0 : i32
    return %c0_i32, %c0_i32_0, %c0_i32_1 : i32, i32, i32
  }
  func.func @transform_5(%arg0: i32) -> (i32, i32) {
    %c0_i32 = arith.constant 0 : i32
    %c0_i32_0 = arith.constant 0 : i32
    %c0_i32_1 = arith.constant 0 : i32
    return %c0_i32, %c0_i32_0 : i32, i32
  }
  func.func @transform_6(%arg0: i32) -> (i32, i32) {
    %c0_i32 = arith.constant 0 : i32
    %c0_i32_0 = arith.constant 0 : i32
    %c0_i32_1 = arith.constant 0 : i32
    return %c0_i32, %c0_i32_0 : i32, i32
  }
  func.func @transform_7(%arg0: i32) -> (i32, i32, i32) {
    %c0_i32 = arith.constant 0 : i32
    %c0_i32_0 = arith.constant 0 : i32
    %c0_i32_1 = arith.constant 0 : i32
    %c0_i32_2 = arith.constant 0 : i32
    return %c0_i32, %c0_i32_0, %c0_i32_1 : i32, i32, i32
  }
  func.func @transform_8(%arg0: i32) -> (i32, i32) {
    %c0_i32 = arith.constant 0 : i32
    %c0_i32_0 = arith.constant 0 : i32
    %c0_i32_1 = arith.constant 0 : i32
    return %c0_i32, %c0_i32_0 : i32, i32
  }
  func.func @transform_9(%arg0: i32) -> (i32, i32) {
    %c0_i32 = arith.constant 0 : i32
    %c0_i32_0 = arith.constant 0 : i32
    %c0_i32_1 = arith.constant 0 : i32
    return %c0_i32, %c0_i32_0 : i32, i32
  }
  func.func @transform_10(%arg0: i32) -> (i32, i32, i32) {
    %c0_i32 = arith.constant 0 : i32
    %c0_i32_0 = arith.constant 0 : i32
    %c0_i32_1 = arith.constant 0 : i32
    %c0_i32_2 = arith.constant 0 : i32
    return %c0_i32, %c0_i32_0, %c0_i32_1 : i32, i32, i32
  }
  func.func @transform_11(%arg0: i32) -> (i32, i32) {
    %c0_i32 = arith.constant 0 : i32
    %c0_i32_0 = arith.constant 0 : i32
    %c0_i32_1 = arith.constant 0 : i32
    return %c0_i32, %c0_i32_0 : i32, i32
  }
  func.func @transform_12(%arg0: i32) -> (i32, i32) {
    %c0_i32 = arith.constant 0 : i32
    %c0_i32_0 = arith.constant 0 : i32
    %c0_i32_1 = arith.constant 0 : i32
    return %c0_i32, %c0_i32_0 : i32, i32
  }
  func.func @transform_13(%arg0: i32) -> (i32, i32, i32) {
    %c0_i32 = arith.constant 0 : i32
    %c0_i32_0 = arith.constant 0 : i32
    %c0_i32_1 = arith.constant 0 : i32
    %c0_i32_2 = arith.constant 0 : i32
    return %c0_i32, %c0_i32_0, %c0_i32_1 : i32, i32, i32
  }
  func.func @transform_14(%arg0: i32) -> (i32, i32) {
    %c0_i32 = arith.constant 0 : i32
    %c0_i32_0 = arith.constant 0 : i32
    %c0_i32_1 = arith.constant 0 : i32
    return %c0_i32, %c0_i32_0 : i32, i32
  }
  func.func @transform_15(%arg0: i32) -> (i32, i32) {
    %c0_i32 = arith.constant 0 : i32
    %c0_i32_0 = arith.constant 0 : i32
    %c0_i32_1 = arith.constant 0 : i32
    return %c0_i32, %c0_i32_0 : i32, i32
  }
  func.func @transform_16(%arg0: i32) -> (i32, i32, i32) {
    %c0_i32 = arith.constant 0 : i32
    %c0_i32_0 = arith.constant 0 : i32
    %c0_i32_1 = arith.constant 0 : i32
    %c0_i32_2 = arith.constant 0 : i32
    return %c0_i32, %c0_i32_0, %c0_i32_1 : i32, i32, i32
  }
  func.func @transform_17(%arg0: i32) -> (i32, i32) {
    %c0_i32 = arith.constant 0 : i32
    %c0_i32_0 = arith.constant 0 : i32
    %c0_i32_1 = arith.constant 0 : i32
    return %c0_i32, %c0_i32_0 : i32, i32
  }
  func.func @transform_18(%arg0: i32) -> (i32, i32) {
    %c0_i32 = arith.constant 0 : i32
    %c0_i32_0 = arith.constant 0 : i32
    %c0_i32_1 = arith.constant 0 : i32
    return %c0_i32, %c0_i32_0 : i32, i32
  }
  func.func @transform_19(%arg0: i32) -> (i32, i32, i32) {
    %c0_i32 = arith.constant 0 : i32
    %c0_i32_0 = arith.constant 0 : i32
    %c0_i32_1 = arith.constant 0 : i32
    %c0_i32_2 = arith.constant 0 : i32
    return %c0_i32, %c0_i32_0, %c0_i32_1 : i32, i32, i32
  }
  func.func @transform_20(%arg0: i32) -> (i32, i32) {
    %c0_i32 = arith.constant 0 : i32
    %c0_i32_0 = arith.constant 0 : i32
    %c0_i32_1 = arith.constant 0 : i32
    return %c0_i32, %c0_i32_0 : i32, i32
  }
  func.func @transform_21(%arg0: i32) -> (i32, i32) {
    %c0_i32 = arith.constant 0 : i32
    %c0_i32_0 = arith.constant 0 : i32
    %c0_i32_1 = arith.constant 0 : i32
    return %c0_i32, %c0_i32_0 : i32, i32
  }
  func.func @transform_22(%arg0: i32) -> (i32, i32, i32) {
    %c0_i32 = arith.constant 0 : i32
    %c0_i32_0 = arith.constant 0 : i32
    %c0_i32_1 = arith.constant 0 : i32
    %c0_i32_2 = arith.constant 0 : i32
    return %c0_i32, %c0_i32_0, %c0_i32_1 : i32, i32, i32
  }
  func.func @transform_23(%arg0: i32) -> (i32, i32) {
    %c0_i32 = arith.constant 0 : i32
    %c0_i32_0 = arith.constant 0 : i32
    %c0_i32_1 = arith.constant 0 : i32
    return %c0_i32, %c0_i32_0 : i32, i32
  }
  func.func @transform_24(%arg0: i32) -> (i32, i32) {
    %c0_i32 = arith.constant 0 : i32
    %c0_i32_0 = arith.constant 0 : i32
    %c0_i32_1 = arith.constant 0 : i32
    return %c0_i32, %c0_i32_0 : i32, i32
  }
  func.func @transform_25(%arg0: i32) -> (i32, i32, i32) {
    %c0_i32 = arith.constant 0 : i32
    %c0_i32_0 = arith.constant 0 : i32
    %c0_i32_1 = arith.constant 0 : i32
    %c0_i32_2 = arith.constant 0 : i32
    return %c0_i32, %c0_i32_0, %c0_i32_1 : i32, i32, i32
  }
  func.func @transform_26(%arg0: i32) -> (i32, i32) {
    %c0_i32 = arith.constant 0 : i32
    %c0_i32_0 = arith.constant 0 : i32
    %c0_i32_1 = arith.constant 0 : i32
    return %c0_i32, %c0_i32_0 : i32, i32
  }
  func.func @transform_27(%arg0: i32) -> (i32, i32) {
    %c0_i32 = arith.constant 0 : i32
    %c0_i32_0 = arith.constant 0 : i32
    %c0_i32_1 = arith.constant 0 : i32
    return %c0_i32, %c0_i32_0 : i32, i32
  }
  func.func @transform_28(%arg0: i32) -> (i32, i32, i32) {
    %c0_i32 = arith.constant 0 : i32
    %c0_i32_0 = arith.constant 0 : i32
    %c0_i32_1 = arith.constant 0 : i32
    %c0_i32_2 = arith.constant 0 : i32
    return %c0_i32, %c0_i32_0, %c0_i32_1 : i32, i32, i32
  }
  func.func @transform_29(%arg0: i32) -> (i32, i32) {
    %c0_i32 = arith.constant 0 : i32
    %c0_i32_0 = arith.constant 0 : i32
    %c0_i32_1 = arith.constant 0 : i32
    return %c0_i32, %c0_i32_0 : i32, i32
  }
  func.func @transform_30(%arg0: i32) -> (i32, i32) {
    %c0_i32 = arith.constant 0 : i32
    %c0_i32_0 = arith.constant 0 : i32
    %c0_i32_1 = arith.constant 0 : i32
    return %c0_i32, %c0_i32_0 : i32, i32
  }
  func.func @transform_31(%arg0: i32) -> (i32, i32, i32) {
    %c0_i32 = arith.constant 0 : i32
    %c0_i32_0 = arith.constant 0 : i32
    %c0_i32_1 = arith.constant 0 : i32
    %c0_i32_2 = arith.constant 0 : i32
    return %c0_i32, %c0_i32_0, %c0_i32_1 : i32, i32, i32
  }
  func.func @transform_32(%arg0: i32) -> (i32, i32) {
    %c0_i32 = arith.constant 0 : i32
    %c0_i32_0 = arith.constant 0 : i32
    %c0_i32_1 = arith.constant 0 : i32
    return %c0_i32, %c0_i32_0 : i32, i32
  }
  func.func @transform_33(%arg0: i32) -> (i32, i32) {
    %c0_i32 = arith.constant 0 : i32
    %c0_i32_0 = arith.constant 0 : i32
    %c0_i32_1 = arith.constant 0 : i32
    return %c0_i32, %c0_i32_0 : i32, i32
  }
  func.func @transform_34(%arg0: i32) -> (i32, i32) {
    %c0_i32 = arith.constant 0 : i32
    %c0_i32_0 = arith.constant 0 : i32
    %c0_i32_1 = arith.constant 0 : i32
    return %c0_i32, %c0_i32_0 : i32, i32
  }
  func.func @transform_35(%arg0: i32) -> (i32, i32) {
    %c0_i32 = arith.constant 0 : i32
    %c0_i32_0 = arith.constant 0 : i32
    %c0_i32_1 = arith.constant 0 : i32
    return %c0_i32, %c0_i32_0 : i32, i32
  }
  func.func @transform_36(%arg0: i32) -> (i32, i32, i32) {
    %c0_i32 = arith.constant 0 : i32
    %c0_i32_0 = arith.constant 0 : i32
    %c0_i32_1 = arith.constant 0 : i32
    return %arg0, %c0_i32, %c0_i32_0 : i32, i32, i32
  }
}

</mosaic_0001>

<bundles_post_ra>
// kernel: forward.1
= control target key start
LH: loop header
LB: loop body
LE: loop exit
PB: predicated region body
PF: predicated region fallthrough
CT: control target
= control target key end

     0   :  { %s19949_s6 = smov 1   ;;  %s19950_s10 = smov 2   ;;  %s21842_s0 = inlined_call_operand.smem [shape: u32[37], index: -1, kind: input, shape index: {}] }
   0x1   :  { %s20038_s5 = sld [smem:[%s21842_s0]]   ;;  %s19951_s14 = smov 3  }
   0x2   :  { %s20043_s9 = sld [smem:[%s21842_s0 + %s19949_s6]]   ;;  %s19952_s18 = smov 4  }
   0x3   :  { %s20048_s13 = sld [smem:[%s21842_s0 + %s19950_s10]]   ;;  %s19953_s22 = smov 5  }
   0x4   :  { %s20053_s17 = sld [smem:[%s21842_s0 + %s19951_s14]]   ;;  %s19954_s26 = smov 6  }
   0x5   :  { %s20058_s21 = sld [smem:[%s21842_s0 + %s19952_s18]]   ;;  %s19955_s30 = smov 7  }
   0x6   :  { %s20063_s25 = sld [smem:[%s21842_s0 + %s19953_s22]]   ;;  %s19956_s4 = smov 8  }
   0x7   :  { %21896 = sst [smem:[#allocation76_spill]] %s20038_s5  ;;  %s19957_s10 = smov 9  }
   0x8   :  { %21897 = sst [smem:[#allocation77_spill]] %s20043_s9  ;;  %s19958_s15 = smov 10  }
   0x9   :  { %21898 = sst [smem:[#allocation78_spill]] %s20048_s13  ;;  %s19959_s20 = smov 11  }
   0xa   :  { %21899 = sst [smem:[#allocation79_spill]] %s20053_s17  ;;  %s19961_s1 = smov 13  }
   0xb   :  { %s20068_s29 = sld [smem:[%s21842_s0 + %s19954_s26]]   ;;  %s19960_s26 = smov 12  }
   0xc   :  { %21900 = sst [smem:[#allocation80_spill]] %s20063_s25  ;;  %s19962_s7 = smov 14  }
   0xd   :  { %s20073_s3 = sld [smem:[%s21842_s0 + %s19955_s30]]   ;;  %s19964_s22 = smov 16  }
   0xe   :  { %s20078_s8 = sld [smem:[%s21842_s0 + %s19956_s4]]   ;;  %s19965_s28 = smov 17  }
   0xf   :  { %s20083_s14 = sld [smem:[%s21842_s0 + %s19957_s10]]  }
  0x10   :  { %s20088_s19 = sld [smem:[%s21842_s0 + %s19958_s15]]   ;;  %s19963_s15 = smov 15  }
  0x11   :  { %s20093_s24 = sld [smem:[%s21842_s0 + %s19959_s20]]  }
  0x12   :  { %s20098_s30 = sld [smem:[%s21842_s0 + %s19960_s26]]  }
  0x13   :  { %21901 = sst [smem:[#allocation81_spill]] %s20073_s3 }
  0x14   :  { %21902 = sst [smem:[#allocation82_spill]] %s20078_s8 }
  0x15   :  { %21903 = sst [smem:[#allocation83_spill]] %s20083_s14 }
  0x16   :  { %s20103_s6 = sld [smem:[%s21842_s0 + %s19961_s1]]  }
  0x17   :  { %21904 = sst [smem:[#allocation84_spill]] %s20093_s24 }
  0x18   :  { %s20108_s12 = sld [smem:[%s21842_s0 + %s19962_s7]]   ;;  %s19966_s7 = smov 18  }
  0x19   :  { %s20113_s20 = sld [smem:[%s21842_s0 + %s19963_s15]]   ;;  %s19967_s15 = smov 19  }
  0x1a   :  { %s20118_s27 = sld [smem:[%s21842_s0 + %s19964_s22]]   ;;  %s19968_s22 = smov 20  }
  0x1b   :  { %s20123_s4 = sld [smem:[%s21842_s0 + %s19965_s28]]   ;;  %s19969_s28 = smov 21  }
  0x1c   :  { %21905 = sst [smem:[#allocation85_spill]] %s20103_s6 }
  0x1d   :  { %s20128_s5 = sld [smem:[%s21842_s0 + %s19966_s7]]   ;;  %s19970_s7 = smov 22  }
  0x1e   :  { %21906 = sst [smem:[#allocation86_spill]] %s20108_s12 }
  0x1f   :  { %21907 = sst [smem:[#allocation87_spill]] %s20113_s20 }
  0x20   :  { %s20133_s20 = sld [smem:[%s21842_s0 + %s19967_s15]]   ;;  %s19971_s15 = smov 23  }
  0x21   :  { %21908 = sst [smem:[#allocation88_spill]] %s20123_s4 }
  0x22   :  { %s20138_s6 = sld [smem:[%s21842_s0 + %s19968_s22]]   ;;  %s19972_s22 = smov 24  }
  0x23   :  { %21909 = sst [smem:[#allocation89_spill]] %s20128_s5 }
  0x24   :  { %s20143_s4 = sld [smem:[%s21842_s0 + %s19969_s28]]   ;;  %s19973_s28 = smov 25  }
  0x25   :  { %s20148_s24 = sld [smem:[%s21842_s0 + %s19970_s7]]   ;;  %s19974_s7 = smov 26  }
  0x26   :  { %21910 = sst [smem:[#allocation90_spill]] %s20133_s20 }
  0x27   :  { %s20153_s20 = sld [smem:[%s21842_s0 + %s19971_s15]]   ;;  %s19975_s15 = smov 27  }
  0x28   :  { %21911 = sst [smem:[#allocation91_spill]] %s20138_s6 }
  0x29   :  { %s20158_s14 = sld [smem:[%s21842_s0 + %s19972_s22]]   ;;  %s19976_s22 = smov 28  }
  0x2a   :  { %21912 = sst [smem:[#allocation92_spill]] %s20143_s4 }
  0x2b   :  { %s20163_s4 = sld [smem:[%s21842_s0 + %s19973_s28]]   ;;  %s19977_s28 = smov 29  }
  0x2c   :  { %s20168_s3 = sld [smem:[%s21842_s0 + %s19974_s7]]   ;;  %s19978_s7 = smov 30  }
  0x2d   :  { %21913 = sst [smem:[#allocation93_spill]] %s20153_s20 }
  0x2e   :  { %s20173_s20 = sld [smem:[%s21842_s0 + %s19975_s15]]   ;;  %s19979_s15 = smov 31  }
  0x2f   :  { %21914 = sst [smem:[#allocation94_spill]] %s20158_s14 }
  0x30   :  { %s20178_s25 = sld [smem:[%s21842_s0 + %s19976_s22]]   ;;  %s19980_s22 = smov 32  }
  0x31   :  { %21915 = sst [smem:[#allocation95_spill]] %s20163_s4 }
  0x32   :  { %21916 = sst [smem:[#allocation96_spill]] %s20168_s3 }
  0x33   :  { %s20183_s4 = sld [smem:[%s21842_s0 + %s19977_s28]]   ;;  %s19981_s28 = smov 33  }
  0x34   :  { %21917 = sst [smem:[#allocation97_spill]] %s20173_s20 }
  0x35   :  { %s20188_s17 = sld [smem:[%s21842_s0 + %s19978_s7]]   ;;  %s19982_s7 = smov 34  }
  0x36   :  { %s20193_s20 = sld [smem:[%s21842_s0 + %s19979_s15]]   ;;  %s19983_s15 = smov 35  }
  0x37   :  { %s20198_s9 = sld [smem:[%s21842_s0 + %s19980_s22]]   ;;  %s19984_s22 = smov 36  }
  0x39   :  { %21918 = sst [smem:[#allocation98_spill]] %s20183_s4 }
  0x3a   :  { %s20203_s4 = sld [smem:[%s21842_s0 + %s19981_s28]]  }
  0x3b   :  { %21919 = sst [smem:[#allocation99_spill]] %s20188_s17 }
  0x3c   :  { %21920 = sst [smem:[#allocation100_spill]] %s20193_s20 }
  0x3d   :  { %21921 = sst [smem:[#allocation101_spill]] %s20198_s9 }
  0x3e   :  { %s20208_s17 = sld [smem:[%s21842_s0 + %s19982_s7]]  }
  0x3f   :  { %s20213_s20 = sld [smem:[%s21842_s0 + %s19983_s15]]  }
  0x40   :  { %s20218_s9 = sld [smem:[%s21842_s0 + %s19984_s22]]  }
  0x41   :  { %78 = vsyncpa [#allocation4], 0 }
  0x42   :  { %79 = vsyncpa [#allocation7], 0 }
  0x43   :  { %80 = vsyncpa [#allocation10], 0 }
  0x44   :  { %81 = vsyncpa [#allocation13], 0 }
  0x45   :  { %82 = vsyncpa [#allocation16], 0 }
  0x46   :  { %83 = vsyncpa [#allocation19], 0 }
  0x47   :  { %84 = vsyncpa [#allocation22], 0 }
  0x48   :  { %85 = vsyncpa [#allocation25], 0 }
  0x49   :  { %86 = vsyncpa [#allocation28], 0 }
  0x4a   :  { %87 = vsyncpa [#allocation31], 0 }
  0x4b   :  { %88 = vsyncpa [#allocation34], 0 }
  0x4c   :  { %89 = vsyncpa [#allocation37], 0 }
  0x4d   :  { %90 = vsyncpa [#allocation40], 0 }
  0x4e   :  { %91 = vsyncpa [#allocation43], 0 }
  0x4f   :  { %92 = vsyncpa [#allocation46], 0 }
  0x50   :  { %93 = vsyncpa [#allocation49], 0 }
  0x51   :  { %94 = vsyncpa [#allocation52], 0 }
  0x52   :  { %95 = vsyncpa [#allocation55], 0 }
  0x53   :  { %96 = vsyncpa [#allocation5], 0 }
  0x54   :  { %98 = vsyncpa [#allocation5 + $0x1], 0  ;;  %s20220_s0 = smov 0   ;;  %s20222_s28 = smov 0  }
  0x55   :  { %s20224_s1 = smov 0   ;;  %s20226_s2 = smov 0  }
  0x56 LB: > { %s21922_s14 = sld [smem:[#allocation94_spill]]  ;;  %s21925_s6 = sld [smem:[#allocation91_spill]]  ;;  %s19943_s1 = sphi %s20224_s1, %s21982_s1   ;;  %s19939_s28 = sphi %s20222_s28, %s21984_s28   ;;  %s19935_s0 = sphi %s20220_s0, %s21983_s0   ;;  %s19947_s2 = sphi %s20226_s2, %s21980_s2  }
  0x57   : > { %s21923_s13 = sld [smem:[#allocation78_spill]]  ;;  %s21926_s5 = sld [smem:[#allocation89_spill]] }
  0x58   : > { %s21924_s12 = sld [smem:[#allocation86_spill]]  ;;  %s21927_s3 = sld [smem:[#allocation96_spill]] }
  0x59   : > { %s21928_s8 = sld [smem:[#allocation82_spill]]  ;;  %21929 = sst [smem:[#allocation102_spill]] %s19935_s0 }
  0x5a   : > { %21930 = sst [smem:[#allocation103_spill]] %s19943_s1  ;;  %s20241_s7 = sadd.s32 4294967295, %s19947_s2  }
  0x5b   : > { %s14708_s10 = sadd.s32 4294967294, %s19947_s2   ;;  %s20245_s11 = sadd.s32 1, %s19947_s2  }
  0x5c   : > { %21931 = sst [smem:[#allocation104_spill]] %s20245_s11  ;;  %s872_s15 = sadd.s32 1, %s19943_s1 }
  0x5d   : > { %s869_s16 = ssub.s32 %s19947_s2, %s20245_s11  ;;  %p882_p0 = scmp.ne.s32.totalorder %s19943_s1, %s19939_s28 }
  0x5e   : > { %p870_p1 = scmp.eq.s32.totalorder %s869_s16, 0  ;;  %p883_p2 = scmp.eq.s32.totalorder %s20241_s7, 1 }
  0x5f   : > { %p888_p3 = scmp.ne.s32.totalorder %s19939_s28, %s19935_s0  ;;  %p889_p4 = scmp.eq.s32.totalorder %s14708_s10, 1 }
  0x60   : > { %s20256_s18 = scalar_select %p870_p1, %s19943_s1, %s872_s15  }
  0x61   : > { %p20258_p5 = por %p883_p2, %p882_p0  ;;  %p20262_p6 = por %p889_p4, %p888_p3 }
  0x62   : > { %21932 = sst [smem:[#allocation105_spill]] %s20256_s18  ;;  %p14709_p7 = scmp.ge.s32.totalorder %s19947_s2, 1 }
  0x63   : > { %s21933_s22 = scalar_select %p20258_p5, 1, 0 }
  0x64   : > { %s21934_s23 = scalar_select %p20262_p6, 1, 0 }
  0x65   : > { %p896_p8 = scmp.lt.s32.totalorder %s19947_s2, 3 }
  0x66   : > { %21935 = sst [smem:[#allocation106_spill]] %s21934_s23 }
  0x67   : > { %p20268_p9 = pnand %p14709_p7, %p896_p8 }
  0x68   : > { %p16935_p10 = scmp.eq.s32.totalorder (!%p20268_p9), %s20241_s7, 0  ;;  %s19985_s10 = smov (!%p20268_p9), [#allocation6]  }
  0x69   : > { %900 = sbr.rel (%p20268_p9) target bundleno = 929 (0x3a1), region = 12  ;;  %s922_s15 = sshll.u32 (!%p20268_p9), %s19985_s10, 4  ;;  %s923_s15 = int_to_ptr.vmem [resolvable:$true] %s922_s15 }
  0x6a   : > { %s18929_s16 = scalar_lea.hbm (!%p20268_p9), %s21923_s13, 16 }
  0x6b   : > { %p18930_p11 = scmp.ne.s32.totalorder (!%p20268_p9), %s21923_s13, %s18929_s16  ;;  %p18935_p0 = scmp.lt.u32.totalorder (!%p20268_p9), %s18929_s16, %s21923_s13 }
  0x6d   : > { %p18931_p12 = pnand (!%p20268_p9), %p18930_p11, %p16935_p10 }
  0x6f   : > { %p18932_p13 = pneg (!%p20268_p9), %p18931_p12 }
  0x71   : > { %p18937_p1 = pnand %p18935_p0, %p18932_p13 }
  0x73   : > { %18940 = shalt.err (!%p18937_p1)
}
  0x74   : > { %s18941_s18 = scalar_lea.vmem %s923_s15, 16  ;;  %s18947_s1 = scalar_lea.vmem %s923_s15, 32 }
  0x75   : > { %p18942_p2 = scmp.ne.s32.totalorder %s923_s15, %s18941_s18  ;;  %p18948_p7 = scmp.lt.s32.totalorder %s923_s15, %s923_s15 }
  0x76   : > { %p18949_p8 = scmp.lt.s32.totalorder %s18947_s1, %s18941_s18 }
  0x77   : > { %p18943_p3 = pnand %p18942_p2, %p16935_p10 }
  0x78   : > { %p18950_p6 = por %p18949_p8, %p18948_p7 }
  0x79   : > { %p18944_p4 = pneg %p18943_p3 }
  0x7b   : > { %p18951_p5 = pnand %p18950_p6, %p18944_p4 }
  0x7d   : > { %18954 = shalt.err (!%p18951_p5)
}
  0x7e   : > { %16796 = dma.hbm_to_vmem [thread:$0]  (%p16935_p10), %s21923_s13, 16, %s923_s15, [#allocation7]  }
  0x7f   : > { %s19986_s10 = smov [#allocation9]   ;;  %s19987_s11 = smov [#allocation12]  }
  0x80   : > { %s943_s16 = sshll.u32 %s19986_s10, 4  ;;  %s968_s23 = sshll.u32 %s19987_s11, 4  ;;  %s944_s16 = int_to_ptr.vmem [resolvable:$true] %s943_s16  ;;  %s20285_s23 = int_to_ptr.vmem [resolvable:$true] %s968_s23 }
  0x81   : > { %s18955_s0 = scalar_lea.hbm %s20058_s21, 3072 }
  0x82   : > { %p18956_p11 = scmp.ne.s32.totalorder %s20058_s21, %s18955_s0  ;;  %p18961_p12 = scmp.lt.u32.totalorder %s18955_s0, %s20058_s21 }
  0x84   : > { %p18957_p6 = pnand %p18956_p11, %p16935_p10 }
  0x86   : > { %p18958_p5 = pneg %p18957_p6 }
  0x88   : > { %p18963_p13 = pnand %p18961_p12, %p18958_p5 }
  0x8a   : > { %18966 = shalt.err (!%p18963_p13)
}
  0x8b   : > { %s18967_s1 = scalar_lea.vmem %s944_s16, 3072  ;;  %p18974_p3 = scmp.lt.s32.totalorder %s944_s16, %s944_s16 }
  0x8c   : > { %p18968_p0 = scmp.ne.s32.totalorder %s944_s16, %s18967_s1  ;;  %p18975_p4 = scmp.lt.s32.totalorder %s18967_s1, %s18967_s1 }
  0x8e   : > { %p18969_p1 = pnand %p18968_p0, %p16935_p10  ;;  %p18976_p7 = por %p18975_p4, %p18974_p3 }
  0x90   : > { %p18970_p2 = pneg %p18969_p1 }
  0x92   : > { %p18977_p8 = pnand %p18976_p7, %p18970_p2 }
  0x94   : > { %18980 = shalt.err (!%p18977_p8)
}
  0x95   : > { %s21867_s11 = smov 64   ;;  %s21869_s0 = smov 4  }
  0x96   : > { %16800 = dma.hbm_to_vmem [thread:$0]  (%p16935_p10), %s20058_s21, 3072, %s944_s16, [#allocation10], %s21867_s11, %s21867_s11, %s21869_s0  }
  0x97   : > { %s18981_s18 = scalar_lea.hbm %s20068_s29, 16 }
  0x98   : > { %p18982_p11 = scmp.ne.s32.totalorder %s20068_s29, %s18981_s18  ;;  %p18987_p12 = scmp.lt.u32.totalorder %s18981_s18, %s20068_s29 }
  0x9a   : > { %p18983_p6 = pnand %p18982_p11, %p16935_p10 }
  0x9c   : > { %p18984_p5 = pneg %p18983_p6 }
  0x9e   : > { %p18989_p13 = pnand %p18987_p12, %p18984_p5 }
  0xa0   : > { %18992 = shalt.err (!%p18989_p13)
}
  0xa1   : > { %s18993_s15 = scalar_lea.vmem %s20285_s23, 16  ;;  %s18999_s10 = scalar_lea.vmem %s20285_s23, 32 }
  0xa2   : > { %p18994_p0 = scmp.ne.s32.totalorder %s20285_s23, %s18993_s15  ;;  %p19000_p3 = scmp.lt.s32.totalorder %s20285_s23, %s20285_s23 }
  0xa3   : > { %p19001_p4 = scmp.lt.s32.totalorder %s18999_s10, %s18993_s15 }
  0xa4   : > { %p18995_p1 = pnand %p18994_p0, %p16935_p10 }
  0xa5   : > { %p19002_p7 = por %p19001_p4, %p19000_p3 }
  0xa6   : > { %p18996_p2 = pneg %p18995_p1 }
  0xa8   : > { %p19003_p8 = pnand %p19002_p7, %p18996_p2 }
  0xaa   : > { %19006 = shalt.err (!%p19003_p8)
}
  0xab   : > { %16804 = dma.hbm_to_vmem [thread:$0]  (%p16935_p10), %s20068_s29, 16, %s20285_s23, [#allocation13]  }
  0xac   : > { %s19990_s16 = smov [#allocation15]   ;;  %s19991_s18 = smov [#allocation18]  }
  0xad   : > { %s992_s1 = sshll.u32 %s19990_s16, 4  ;;  %s1013_s11 = sshll.u32 %s19991_s18, 4  ;;  %s993_s1 = int_to_ptr.vmem [resolvable:$true] %s992_s1  ;;  %s20316_s11 = int_to_ptr.vmem [resolvable:$true] %s1013_s11 }
  0xae   : > { %s19007_s15 = scalar_lea.hbm %s21928_s8, 16 }
  0xaf   : > { %p19008_p11 = scmp.ne.s32.totalorder %s21928_s8, %s19007_s15  ;;  %p19013_p12 = scmp.lt.u32.totalorder %s19007_s15, %s21928_s8 }
  0xb1   : > { %p19009_p6 = pnand %p19008_p11, %p16935_p10 }
  0xb3   : > { %p19010_p5 = pneg %p19009_p6 }
  0xb5   : > { %p19015_p13 = pnand %p19013_p12, %p19010_p5 }
  0xb7   : > { %19018 = shalt.err (!%p19015_p13)
}
  0xb8   : > { %s19019_s10 = scalar_lea.vmem %s993_s1, 16  ;;  %s19025_s23 = scalar_lea.vmem %s993_s1, 32 }
  0xb9   : > { %p19020_p0 = scmp.ne.s32.totalorder %s993_s1, %s19019_s10  ;;  %p19026_p3 = scmp.lt.s32.totalorder %s993_s1, %s993_s1 }
  0xba   : > { %p19027_p4 = scmp.lt.s32.totalorder %s19025_s23, %s19019_s10 }
  0xbb   : > { %p19021_p1 = pnand %p19020_p0, %p16935_p10 }
  0xbc   : > { %p19028_p7 = por %p19027_p4, %p19026_p3 }
  0xbd   : > { %p19022_p2 = pneg %p19021_p1 }
  0xbf   : > { %p19029_p8 = pnand %p19028_p7, %p19022_p2 }
  0xc1   : > { %19032 = shalt.err (!%p19029_p8)
}
  0xc2   : > { %16808 = dma.hbm_to_vmem [thread:$0]  (%p16935_p10), %s21928_s8, 16, %s993_s1, [#allocation16]  }
  0xc3   : > { %s19033_s16 = scalar_lea.hbm %s20088_s19, 6144 }
  0xc4   : > { %p19034_p11 = scmp.ne.s32.totalorder %s20088_s19, %s19033_s16  ;;  %p19039_p12 = scmp.lt.u32.totalorder %s19033_s16, %s20088_s19 }
  0xc6   : > { %p19035_p6 = pnand %p19034_p11, %p16935_p10 }
  0xc8   : > { %p19036_p5 = pneg %p19035_p6 }
  0xca   : > { %p19041_p13 = pnand %p19039_p12, %p19036_p5 }
  0xcc   : > { %19044 = shalt.err (!%p19041_p13)
}
  0xcd   : > { %s19045_s18 = scalar_lea.vmem %s20316_s11, 6144  ;;  %p19052_p3 = scmp.lt.s32.totalorder %s20316_s11, %s20316_s11 }
  0xce   : > { %p19046_p0 = scmp.ne.s32.totalorder %s20316_s11, %s19045_s18  ;;  %p19053_p4 = scmp.lt.s32.totalorder %s19045_s18, %s19045_s18 }
  0xd0   : > { %p19047_p1 = pnand %p19046_p0, %p16935_p10  ;;  %p19054_p7 = por %p19053_p4, %p19052_p3 }
  0xd2   : > { %p19048_p2 = pneg %p19047_p1 }
  0xd4   : > { %p19055_p8 = pnand %p19054_p7, %p19048_p2 }
  0xd6   : > { %19058 = shalt.err (!%p19055_p8)
}
  0xd7   : > { %s21872_s1 = smov 128   ;;  %s21874_s15 = smov 8  }
  0xd8   : > { %16812 = dma.hbm_to_vmem [thread:$0]  (%p16935_p10), %s20088_s19, 6144, %s20316_s11, [#allocation19], %s21872_s1, %s21872_s1, %s21874_s15  }
  0xd9   : > { %s19994_s10 = smov [#allocation21]   ;;  %s19995_s16 = smov [#allocation24]  }
  0xda   : > { %s1038_s23 = sshll.u32 %s19994_s10, 4  ;;  %s1062_s18 = sshll.u32 %s19995_s16, 4  ;;  %s1039_s23 = int_to_ptr.vmem [resolvable:$true] %s1038_s23  ;;  %s20346_s18 = int_to_ptr.vmem [resolvable:$true] %s1062_s18 }
  0xdb   : > { %s19059_s0 = scalar_lea.hbm %s20098_s30, 32 }
  0xdc   : > { %p19060_p11 = scmp.ne.s32.totalorder %s20098_s30, %s19059_s0  ;;  %p19065_p12 = scmp.lt.u32.totalorder %s19059_s0, %s20098_s30 }
  0xde   : > { %p19061_p6 = pnand %p19060_p11, %p16935_p10 }
  0xe0   : > { %p19062_p5 = pneg %p19061_p6 }
  0xe2   : > { %p19067_p13 = pnand %p19065_p12, %p19062_p5 }
  0xe4   : > { %19070 = shalt.err (!%p19067_p13)
}
  0xe5   : > { %s19071_s8 = scalar_lea.vmem %s1039_s23, 32  ;;  %p19078_p3 = scmp.lt.s32.totalorder %s1039_s23, %s1039_s23 }
  0xe6   : > { %p19072_p0 = scmp.ne.s32.totalorder %s1039_s23, %s19071_s8  ;;  %p19079_p4 = scmp.lt.s32.totalorder %s19071_s8, %s19071_s8 }
  0xe8   : > { %p19073_p1 = pnand %p19072_p0, %p16935_p10  ;;  %p19080_p7 = por %p19079_p4, %p19078_p3 }
  0xea   : > { %p19074_p2 = pneg %p19073_p1 }
  0xec   : > { %p19081_p8 = pnand %p19080_p7, %p19074_p2 }
  0xee   : > { %19084 = shalt.err (!%p19081_p8)
}
  0xef   : > { %16816 = dma.hbm_to_vmem [thread:$0]  (%p16935_p10), %s20098_s30, 32, %s1039_s23, [#allocation22]  }
  0xf0   : > { %s19085_s11 = scalar_lea.hbm %s21924_s12, 32 }
  0xf1   : > { %p19086_p11 = scmp.ne.s32.totalorder %s21924_s12, %s19085_s11  ;;  %p19091_p12 = scmp.lt.u32.totalorder %s19085_s11, %s21924_s12 }
  0xf3   : > { %p19087_p6 = pnand %p19086_p11, %p16935_p10 }
  0xf5   : > { %p19088_p5 = pneg %p19087_p6 }
  0xf7   : > { %p19093_p13 = pnand %p19091_p12, %p19088_p5 }
  0xf9   : > { %19096 = shalt.err (!%p19093_p13)
}
  0xfa   : > { %s19097_s8 = scalar_lea.vmem %s20346_s18, 32  ;;  %p19104_p3 = scmp.lt.s32.totalorder %s20346_s18, %s20346_s18 }
  0xfb   : > { %p19098_p0 = scmp.ne.s32.totalorder %s20346_s18, %s19097_s8  ;;  %p19105_p4 = scmp.lt.s32.totalorder %s19097_s8, %s19097_s8 }
  0xfd   : > { %p19099_p1 = pnand %p19098_p0, %p16935_p10  ;;  %p19106_p7 = por %p19105_p4, %p19104_p3 }
  0xff   : > { %p19100_p2 = pneg %p19099_p1 }
 0x101   : > { %p19107_p8 = pnand %p19106_p7, %p19100_p2 }
 0x103   : > { %19110 = shalt.err (!%p19107_p8)
}
 0x104   : > { %16820 = dma.hbm_to_vmem [thread:$0]  (%p16935_p10), %s21924_s12, 32, %s20346_s18, [#allocation25]  }
 0x105   : > { %s19996_s0 = smov [#allocation27]   ;;  %s19997_s23 = smov [#allocation30]  }
 0x106   : > { %s1083_s10 = sshll.u32 %s19996_s0, 4  ;;  %s1108_s16 = sshll.u32 %s19997_s23, 4  ;;  %s1084_s10 = int_to_ptr.vmem [resolvable:$true] %s1083_s10  ;;  %s20373_s16 = int_to_ptr.vmem [resolvable:$true] %s1108_s16 }
 0x107   : > { %s19111_s11 = scalar_lea.hbm %s20118_s27, 12288 }
 0x108   : > { %p19112_p11 = scmp.ne.s32.totalorder %s20118_s27, %s19111_s11  ;;  %p19117_p12 = scmp.lt.u32.totalorder %s19111_s11, %s20118_s27 }
 0x10a   : > { %p19113_p6 = pnand %p19112_p11, %p16935_p10 }
 0x10c   : > { %p19114_p5 = pneg %p19113_p6 }
 0x10e   : > { %p19119_p13 = pnand %p19117_p12, %p19114_p5 }
 0x110   : > { %19122 = shalt.err (!%p19119_p13)
}
 0x111   : > { %s19123_s8 = scalar_lea.vmem %s1084_s10, 12288  ;;  %p19130_p3 = scmp.lt.s32.totalorder %s1084_s10, %s1084_s10 }
 0x112   : > { %p19124_p0 = scmp.ne.s32.totalorder %s1084_s10, %s19123_s8  ;;  %p19131_p4 = scmp.lt.s32.totalorder %s19123_s8, %s19123_s8 }
 0x114   : > { %p19125_p1 = pnand %p19124_p0, %p16935_p10  ;;  %p19132_p7 = por %p19131_p4, %p19130_p3 }
 0x116   : > { %p19126_p2 = pneg %p19125_p1 }
 0x118   : > { %p19133_p8 = pnand %p19132_p7, %p19126_p2 }
 0x11a   : > { %19136 = shalt.err (!%p19133_p8)
}
 0x11b   : > { %16824 = dma.hbm_to_vmem [thread:$0]  (%p16935_p10), %s20118_s27, 12288, %s1084_s10, [#allocation28], %s21872_s1, %s21872_s1, %s21874_s15  }
 0x11c   : > { %s19137_s18 = scalar_lea.hbm %s21926_s5, 32 }
 0x11d   : > { %p19138_p11 = scmp.ne.s32.totalorder %s21926_s5, %s19137_s18  ;;  %p19143_p12 = scmp.lt.u32.totalorder %s19137_s18, %s21926_s5 }
 0x11f   : > { %p19139_p6 = pnand %p19138_p11, %p16935_p10 }
 0x121   : > { %p19140_p5 = pneg %p19139_p6 }
 0x123   : > { %p19145_p13 = pnand %p19143_p12, %p19140_p5 }
 0x125   : > { %19148 = shalt.err (!%p19145_p13)
}
 0x126   : > { %s19149_s0 = scalar_lea.vmem %s20373_s16, 32  ;;  %p19156_p3 = scmp.lt.s32.totalorder %s20373_s16, %s20373_s16 }
 0x127   : > { %p19150_p0 = scmp.ne.s32.totalorder %s20373_s16, %s19149_s0  ;;  %p19157_p4 = scmp.lt.s32.totalorder %s19149_s0, %s19149_s0 }
 0x129   : > { %p19151_p1 = pnand %p19150_p0, %p16935_p10  ;;  %p19158_p7 = por %p19157_p4, %p19156_p3 }
 0x12b   : > { %p19152_p2 = pneg %p19151_p1 }
 0x12d   : > { %p19159_p8 = pnand %p19158_p7, %p19152_p2 }
 0x12f   : > { %19162 = shalt.err (!%p19159_p8)
}
 0x130   : > { %16828 = dma.hbm_to_vmem [thread:$0]  (%p16935_p10), %s21926_s5, 32, %s20373_s16, [#allocation31]  }
 0x131   : > { %s19998_s10 = smov [#allocation33]   ;;  %s19999_s11 = smov [#allocation36]  }
 0x132   : > { %s1132_s23 = sshll.u32 %s19998_s10, 4  ;;  %s1153_s8 = sshll.u32 %s19999_s11, 4  ;;  %s1133_s23 = int_to_ptr.vmem [resolvable:$true] %s1132_s23  ;;  %s20403_s8 = int_to_ptr.vmem [resolvable:$true] %s1153_s8 }
 0x133   : > { %s19163_s18 = scalar_lea.hbm %s21925_s6, 32 }
 0x134   : > { %p19164_p11 = scmp.ne.s32.totalorder %s21925_s6, %s19163_s18  ;;  %p19169_p12 = scmp.lt.u32.totalorder %s19163_s18, %s21925_s6 }
 0x136   : > { %p19165_p6 = pnand %p19164_p11, %p16935_p10 }
 0x138   : > { %p19166_p5 = pneg %p19165_p6 }
 0x13a   : > { %p19171_p13 = pnand %p19169_p12, %p19166_p5 }
 0x13c   : > { %19174 = shalt.err (!%p19171_p13)
}
 0x13d   : > { %s19175_s0 = scalar_lea.vmem %s1133_s23, 32  ;;  %p19182_p3 = scmp.lt.s32.totalorder %s1133_s23, %s1133_s23 }
 0x13e   : > { %p19176_p0 = scmp.ne.s32.totalorder %s1133_s23, %s19175_s0  ;;  %p19183_p4 = scmp.lt.s32.totalorder %s19175_s0, %s19175_s0 }
 0x140   : > { %p19177_p1 = pnand %p19176_p0, %p16935_p10  ;;  %p19184_p7 = por %p19183_p4, %p19182_p3 }
 0x142   : > { %p19178_p2 = pneg %p19177_p1 }
 0x144   : > { %p19185_p8 = pnand %p19184_p7, %p19178_p2 }
 0x146   : > { %19188 = shalt.err (!%p19185_p8)
}
 0x147   : > { %16832 = dma.hbm_to_vmem [thread:$0]  (%p16935_p10), %s21925_s6, 32, %s1133_s23, [#allocation34]  }
 0x148   : > { %s19189_s16 = scalar_lea.hbm %s20148_s24, 12288 }
 0x149   : > { %p19190_p11 = scmp.ne.s32.totalorder %s20148_s24, %s19189_s16  ;;  %p19195_p12 = scmp.lt.u32.totalorder %s19189_s16, %s20148_s24 }
 0x14b   : > { %p19191_p6 = pnand %p19190_p11, %p16935_p10 }
 0x14d   : > { %p19192_p5 = pneg %p19191_p6 }
 0x14f   : > { %p19197_p13 = pnand %p19195_p12, %p19192_p5 }
 0x151   : > { %19200 = shalt.err (!%p19197_p13)
}
 0x152   : > { %s19201_s10 = scalar_lea.vmem %s20403_s8, 12288  ;;  %p19208_p3 = scmp.lt.s32.totalorder %s20403_s8, %s20403_s8 }
 0x153   : > { %p19202_p0 = scmp.ne.s32.totalorder %s20403_s8, %s19201_s10  ;;  %p19209_p4 = scmp.lt.s32.totalorder %s19201_s10, %s19201_s10 }
 0x155   : > { %p19203_p1 = pnand %p19202_p0, %p16935_p10  ;;  %p19210_p7 = por %p19209_p4, %p19208_p3 }
 0x157   : > { %p19204_p2 = pneg %p19203_p1 }
 0x159   : > { %p19211_p8 = pnand %p19210_p7, %p19204_p2 }
 0x15b   : > { %19214 = shalt.err (!%p19211_p8)
}
 0x15c   : > { %16836 = dma.hbm_to_vmem [thread:$0]  (%p16935_p10), %s20148_s24, 12288, %s20403_s8, [#allocation37], %s21872_s1, %s21872_s1, %s21874_s15  }
 0x15d   : > { %s20000_s23 = smov [#allocation39]   ;;  %s20001_s18 = smov [#allocation42]  }
 0x15e   : > { %s1178_s11 = sshll.u32 %s20000_s23, 4  ;;  %s1202_s0 = sshll.u32 %s20001_s18, 4  ;;  %s1179_s11 = int_to_ptr.vmem [resolvable:$true] %s1178_s11  ;;  %s20433_s0 = int_to_ptr.vmem [resolvable:$true] %s1202_s0 }
 0x15f   : > { %s19215_s16 = scalar_lea.hbm %s21922_s14, 32 }
 0x160   : > { %p19216_p11 = scmp.ne.s32.totalorder %s21922_s14, %s19215_s16  ;;  %p19221_p12 = scmp.lt.u32.totalorder %s19215_s16, %s21922_s14 }
 0x162   : > { %p19217_p6 = pnand %p19216_p11, %p16935_p10 }
 0x164   : > { %p19218_p5 = pneg %p19217_p6 }
 0x166   : > { %p19223_p13 = pnand %p19221_p12, %p19218_p5 }
 0x168   : > { %19226 = shalt.err (!%p19223_p13)
}
 0x169   : > { %s19227_s10 = scalar_lea.vmem %s1179_s11, 32  ;;  %p19234_p3 = scmp.lt.s32.totalorder %s1179_s11, %s1179_s11 }
 0x16a   : > { %p19228_p0 = scmp.ne.s32.totalorder %s1179_s11, %s19227_s10  ;;  %p19235_p4 = scmp.lt.s32.totalorder %s19227_s10, %s19227_s10 }
 0x16c   : > { %p19229_p1 = pnand %p19228_p0, %p16935_p10  ;;  %p19236_p7 = por %p19235_p4, %p19234_p3 }
 0x16e   : > { %p19230_p2 = pneg %p19229_p1 }
 0x170   : > { %p19237_p8 = pnand %p19236_p7, %p19230_p2 }
 0x172   : > { %19240 = shalt.err (!%p19237_p8)
}
 0x173   : > { %16840 = dma.hbm_to_vmem [thread:$0]  (%p16935_p10), %s21922_s14, 32, %s1179_s11, [#allocation40]  }
 0x174   : > { %s19241_s8 = scalar_lea.hbm %s21927_s3, 32 }
 0x175   : > { %p19242_p11 = scmp.ne.s32.totalorder %s21927_s3, %s19241_s8  ;;  %p19247_p12 = scmp.lt.u32.totalorder %s19241_s8, %s21927_s3 }
 0x177   : > { %p19243_p6 = pnand %p19242_p11, %p16935_p10 }
 0x179   : > { %p19244_p5 = pneg %p19243_p6 }
 0x17b   : > { %p19249_p13 = pnand %p19247_p12, %p19244_p5 }
 0x17d   : > { %19252 = shalt.err (!%p19249_p13)
}
 0x17e   : > { %s19253_s23 = scalar_lea.vmem %s20433_s0, 32  ;;  %p19260_p3 = scmp.lt.s32.totalorder %s20433_s0, %s20433_s0 }
 0x17f   : > { %p19254_p0 = scmp.ne.s32.totalorder %s20433_s0, %s19253_s23  ;;  %p19261_p4 = scmp.lt.s32.totalorder %s19253_s23, %s19253_s23 }
 0x181   : > { %p19255_p1 = pnand %p19254_p0, %p16935_p10  ;;  %p19262_p7 = por %p19261_p4, %p19260_p3 }
 0x183   : > { %p19256_p2 = pneg %p19255_p1 }
 0x185   : > { %p19263_p8 = pnand %p19262_p7, %p19256_p2 }
 0x187   : > { %19266 = shalt.err (!%p19263_p8)
}
 0x188   : > { %16844 = dma.hbm_to_vmem [thread:$0]  (%p16935_p10), %s21927_s3, 32, %s20433_s0, [#allocation43]  }
 0x189   : > { %s20002_s11 = smov [#allocation45]   ;;  %s19267_s16 = scalar_lea.hbm %s20178_s25, 24576 }
 0x18a   : > { %s1223_s18 = sshll.u32 %s20002_s11, 4  ;;  %p19268_p11 = scmp.ne.s32.totalorder %s20178_s25, %s19267_s16  ;;  %s1224_s18 = int_to_ptr.vmem [resolvable:$true] %s1223_s18 }
 0x18b   : > { %p19273_p12 = scmp.lt.u32.totalorder %s19267_s16, %s20178_s25 }
 0x18c   : > { %p19269_p6 = pnand %p19268_p11, %p16935_p10 }
 0x18e   : > { %p19270_p5 = pneg %p19269_p6 }
 0x190   : > { %p19275_p13 = pnand %p19273_p12, %p19270_p5 }
 0x192   : > { %19278 = shalt.err (!%p19275_p13)
}
 0x193   : > { %s19279_s10 = scalar_lea.vmem %s1224_s18, 24576  ;;  %p19286_p3 = scmp.lt.s32.totalorder %s1224_s18, %s1224_s18 }
 0x194   : > { %p19280_p0 = scmp.ne.s32.totalorder %s1224_s18, %s19279_s10  ;;  %p19287_p4 = scmp.lt.s32.totalorder %s19279_s10, %s19279_s10 }
 0x196   : > { %p19281_p1 = pnand %p19280_p0, %p16935_p10  ;;  %p19288_p7 = por %p19287_p4, %p19286_p3 }
 0x198   : > { %p19282_p2 = pneg %p19281_p1 }
 0x19a   : > { %p19289_p8 = pnand %p19288_p7, %p19282_p2 }
 0x19c   : > { %19292 = shalt.err (!%p19289_p8)
}
 0x19d   : > { %s21877_s0 = smov 256   ;;  %s21937_s8 = sld [smem:[#allocation99_spill]] }
 0x19e   : > { %s21878_s23 = smov 16   ;;  %s20005_s11 = smov [#allocation48]  }
 0x19f   : > { %16848 = dma.hbm_to_vmem [thread:$0]  (%p16935_p10), %s20178_s25, 24576, %s1224_s18, [#allocation46], %s21877_s0, %s21877_s0, %s21878_s23  }
 0x1a0   : > { %s1248_s16 = sshll.u32 %s20005_s11, 4  ;;  %s20006_s10 = smov [#allocation51]   ;;  %s1249_s16 = int_to_ptr.vmem [resolvable:$true] %s1248_s16 }
 0x1a1   : > { %s1272_s1 = sshll.u32 %s20006_s10, 4  ;;  %s1273_s1 = int_to_ptr.vmem [resolvable:$true] %s1272_s1 }
 0x1a3   : > { %s19293_s15 = scalar_lea.hbm %s21937_s8, 64 }
 0x1a4   : > { %p19294_p11 = scmp.ne.s32.totalorder %s21937_s8, %s19293_s15  ;;  %p19299_p12 = scmp.lt.u32.totalorder %s19293_s15, %s21937_s8 }
 0x1a6   : > { %p19295_p6 = pnand %p19294_p11, %p16935_p10 }
 0x1a8   : > { %p19296_p5 = pneg %p19295_p6 }
 0x1aa   : > { %p19301_p13 = pnand %p19299_p12, %p19296_p5 }
 0x1ac   : > { %19304 = shalt.err (!%p19301_p13)
}
 0x1ad   : > { %s19305_s3 = scalar_lea.vmem %s1249_s16, 64  ;;  %p19312_p3 = scmp.lt.s32.totalorder %s1249_s16, %s1249_s16 }
 0x1ae   : > { %p19306_p0 = scmp.ne.s32.totalorder %s1249_s16, %s19305_s3  ;;  %p19313_p4 = scmp.lt.s32.totalorder %s19305_s3, %s19305_s3 }
 0x1b0   : > { %p19307_p1 = pnand %p19306_p0, %p16935_p10  ;;  %p19314_p7 = por %p19313_p4, %p19312_p3 }
 0x1b2   : > { %p19308_p2 = pneg %p19307_p1 }
 0x1b4   : > { %p19315_p8 = pnand %p19314_p7, %p19308_p2 }
 0x1b6   : > { %19318 = shalt.err (!%p19315_p8)
}
 0x1b7   : > { %s21938_s18 = sld [smem:[#allocation101_spill]] }
 0x1b8   : > { %16852 = dma.hbm_to_vmem [thread:$0]  (%p16935_p10), %s21937_s8, 64, %s1249_s16, [#allocation49]  }
 0x1bd   : > { %s19319_s15 = scalar_lea.hbm %s21938_s18, 64 }
 0x1be   : > { %p19320_p11 = scmp.ne.s32.totalorder %s21938_s18, %s19319_s15  ;;  %p19325_p12 = scmp.lt.u32.totalorder %s19319_s15, %s21938_s18 }
 0x1c0   : > { %p19321_p6 = pnand %p19320_p11, %p16935_p10 }
 0x1c2   : > { %p19322_p5 = pneg %p19321_p6 }
 0x1c4   : > { %p19327_p13 = pnand %p19325_p12, %p19322_p5 }
 0x1c6   : > { %19330 = shalt.err (!%p19327_p13)
}
 0x1c7   : > { %s19331_s3 = scalar_lea.vmem %s1273_s1, 64  ;;  %p19338_p3 = scmp.lt.s32.totalorder %s1273_s1, %s1273_s1 }
 0x1c8   : > { %p19332_p0 = scmp.ne.s32.totalorder %s1273_s1, %s19331_s3  ;;  %p19339_p4 = scmp.lt.s32.totalorder %s19331_s3, %s19331_s3 }
 0x1ca   : > { %p19333_p1 = pnand %p19332_p0, %p16935_p10  ;;  %p19340_p7 = por %p19339_p4, %p19338_p3 }
 0x1cc   : > { %p19334_p2 = pneg %p19333_p1 }
 0x1ce   : > { %p19341_p8 = pnand %p19340_p7, %p19334_p2 }
 0x1d0   : > { %19344 = shalt.err (!%p19341_p8)
}
 0x1d1   : > { %s21939_s11 = sld [smem:[#allocation77_spill]]  ;;  %s20007_s16 = smov [#allocation3]  }
 0x1d2   : > { %16856 = dma.hbm_to_vmem [thread:$0]  (%p16935_p10), %s21938_s18, 64, %s1273_s1, [#allocation52]  }
 0x1d3   : > { %s908_s10 = sshll.u32 %s20007_s16, 4  ;;  %s20008_s15 = smov [#allocation8]   ;;  %s909_s10 = int_to_ptr.vmem [resolvable:$true] %s908_s10 }
 0x1d4   : > { %s933_s0 = sshll.u32 %s20008_s15, 4  ;;  %s20493_s0 = int_to_ptr.vmem [resolvable:$true] %s933_s0 }
 0x1d7   : > { %s19345_s23 = scalar_lea.hbm %s21939_s11, 9216 }
 0x1d8   : > { %p19346_p11 = scmp.ne.s32.totalorder %s21939_s11, %s19345_s23  ;;  %p19351_p12 = scmp.lt.u32.totalorder %s19345_s23, %s21939_s11 }
 0x1da   : > { %p19347_p6 = pnand %p19346_p11, %p16935_p10 }
 0x1dc   : > { %p19348_p5 = pneg %p19347_p6 }
 0x1de   : > { %p19353_p13 = pnand %p19351_p12, %p19348_p5 }
 0x1e0   : > { %19356 = shalt.err (!%p19353_p13)
}
 0x1e1   : > { %s19357_s3 = scalar_lea.vmem %s909_s10, 9216  ;;  %p19364_p3 = scmp.lt.s32.totalorder %s909_s10, %s909_s10 }
 0x1e2   : > { %p19358_p0 = scmp.ne.s32.totalorder %s909_s10, %s19357_s3  ;;  %p19365_p4 = scmp.lt.s32.totalorder %s19357_s3, %s19357_s3 }
 0x1e4   : > { %p19359_p1 = pnand %p19358_p0, %p16935_p10  ;;  %p19366_p7 = por %p19365_p4, %p19364_p3 }
 0x1e6   : > { %p19360_p2 = pneg %p19359_p1 }
 0x1e8   : > { %p19367_p8 = pnand %p19366_p7, %p19360_p2 }
 0x1ea   : > { %19370 = shalt.err (!%p19367_p8)
}
 0x1eb   : > { %s21940_s1 = smov 4   ;;  %s21941_s16 = smov 64  }
 0x1ec   : > { %s21942_s23 = sld [smem:[#allocation79_spill]] }
 0x1ed   : > { %16794 = dma.hbm_to_vmem [thread:$0]  (%p16935_p10), %s21939_s11, 9216, %s909_s10, [#allocation4], %s21941_s16, %s21941_s16, %s21940_s1  }
 0x1f2   : > { %s19371_s15 = scalar_lea.hbm %s21942_s23, 16 }
 0x1f3   : > { %p19372_p11 = scmp.ne.s32.totalorder %s21942_s23, %s19371_s15  ;;  %p19377_p12 = scmp.lt.u32.totalorder %s19371_s15, %s21942_s23 }
 0x1f5   : > { %p19373_p6 = pnand %p19372_p11, %p16935_p10 }
 0x1f7   : > { %p19374_p5 = pneg %p19373_p6 }
 0x1f9   : > { %p19379_p13 = pnand %p19377_p12, %p19374_p5 }
 0x1fb   : > { %19382 = shalt.err (!%p19379_p13)
}
 0x1fc   : > { %s19383_s3 = scalar_lea.vmem %s20493_s0, 16  ;;  %s19389_s5 = scalar_lea.vmem %s20493_s0, 32 }
 0x1fd   : > { %p19384_p0 = scmp.ne.s32.totalorder %s20493_s0, %s19383_s3  ;;  %p19390_p3 = scmp.lt.s32.totalorder %s20493_s0, %s20493_s0 }
 0x1fe   : > { %p19391_p4 = scmp.lt.s32.totalorder %s19389_s5, %s19383_s3 }
 0x1ff   : > { %p19385_p1 = pnand %p19384_p0, %p16935_p10 }
 0x200   : > { %p19392_p7 = por %p19391_p4, %p19390_p3 }
 0x201   : > { %p19386_p2 = pneg %p19385_p1 }
 0x203   : > { %p19393_p8 = pnand %p19392_p7, %p19386_p2 }
 0x205   : > { %19396 = shalt.err (!%p19393_p8)
}
 0x206   : > { %s21943_s10 = sld [smem:[#allocation80_spill]]  ;;  %s20009_s15 = smov [#allocation11]  }
 0x207   : > { %16798 = dma.hbm_to_vmem [thread:$0]  (%p16935_p10), %s21942_s23, 16, %s20493_s0, [#allocation7]  }
 0x208   : > { %s957_s6 = sshll.u32 %s20009_s15, 4  ;;  %s20010_s8 = smov [#allocation14]   ;;  %s958_s6 = int_to_ptr.vmem [resolvable:$true] %s957_s6 }
 0x209   : > { %s978_s11 = sshll.u32 %s20010_s8, 4  ;;  %s20524_s11 = int_to_ptr.vmem [resolvable:$true] %s978_s11 }
 0x20c   : > { %s19397_s5 = scalar_lea.hbm %s21943_s10, 16 }
 0x20d   : > { %p19398_p11 = scmp.ne.s32.totalorder %s21943_s10, %s19397_s5  ;;  %p19403_p12 = scmp.lt.u32.totalorder %s19397_s5, %s21943_s10 }
 0x20f   : > { %p19399_p6 = pnand %p19398_p11, %p16935_p10 }
 0x211   : > { %p19400_p5 = pneg %p19399_p6 }
 0x213   : > { %p19405_p13 = pnand %p19403_p12, %p19400_p5 }
 0x215   : > { %19408 = shalt.err (!%p19405_p13)
}
 0x216   : > { %s19409_s3 = scalar_lea.vmem %s958_s6, 16  ;;  %s19415_s0 = scalar_lea.vmem %s958_s6, 32 }
 0x217   : > { %p19410_p0 = scmp.ne.s32.totalorder %s958_s6, %s19409_s3  ;;  %p19416_p3 = scmp.lt.s32.totalorder %s958_s6, %s958_s6 }
 0x218   : > { %p19417_p4 = scmp.lt.s32.totalorder %s19415_s0, %s19409_s3 }
 0x219   : > { %p19411_p1 = pnand %p19410_p0, %p16935_p10 }
 0x21a   : > { %p19418_p7 = por %p19417_p4, %p19416_p3 }
 0x21b   : > { %p19412_p2 = pneg %p19411_p1 }
 0x21d   : > { %p19419_p8 = pnand %p19418_p7, %p19412_p2 }
 0x21f   : > { %19422 = shalt.err (!%p19419_p8)
}
 0x220   : > { %s21944_s8 = sld [smem:[#allocation81_spill]] }
 0x221   : > { %16802 = dma.hbm_to_vmem [thread:$0]  (%p16935_p10), %s21943_s10, 16, %s958_s6, [#allocation10]  }
 0x226   : > { %s19423_s15 = scalar_lea.hbm %s21944_s8, 3072 }
 0x227   : > { %p19424_p11 = scmp.ne.s32.totalorder %s21944_s8, %s19423_s15  ;;  %p19429_p12 = scmp.lt.u32.totalorder %s19423_s15, %s21944_s8 }
 0x229   : > { %p19425_p6 = pnand %p19424_p11, %p16935_p10 }
 0x22b   : > { %p19426_p5 = pneg %p19425_p6 }
 0x22d   : > { %p19431_p13 = pnand %p19429_p12, %p19426_p5 }
 0x22f   : > { %19434 = shalt.err (!%p19431_p13)
}
 0x230   : > { %s19435_s5 = scalar_lea.vmem %s20524_s11, 3072  ;;  %p19442_p3 = scmp.lt.s32.totalorder %s20524_s11, %s20524_s11 }
 0x231   : > { %p19436_p0 = scmp.ne.s32.totalorder %s20524_s11, %s19435_s5  ;;  %p19443_p4 = scmp.lt.s32.totalorder %s19435_s5, %s19435_s5 }
 0x233   : > { %p19437_p1 = pnand %p19436_p0, %p16935_p10  ;;  %p19444_p7 = por %p19443_p4, %p19442_p3 }
 0x235   : > { %p19438_p2 = pneg %p19437_p1 }
 0x237   : > { %p19445_p8 = pnand %p19444_p7, %p19438_p2 }
 0x239   : > { %19448 = shalt.err (!%p19445_p8)
}
 0x23a   : > { %s21945_s6 = sld [smem:[#allocation83_spill]]  ;;  %s20011_s3 = smov [#allocation17]  }
 0x23b   : > { %16806 = dma.hbm_to_vmem [thread:$0]  (%p16935_p10), %s21944_s8, 3072, %s20524_s11, [#allocation13], %s21941_s16, %s21941_s16, %s21940_s1  }
 0x23c   : > { %s1003_s0 = sshll.u32 %s20011_s3, 4  ;;  %s20012_s15 = smov [#allocation20]   ;;  %s1004_s0 = int_to_ptr.vmem [resolvable:$true] %s1003_s0 }
 0x23d   : > { %s1027_s10 = sshll.u32 %s20012_s15, 4  ;;  %s20554_s10 = int_to_ptr.vmem [resolvable:$true] %s1027_s10 }
 0x240   : > { %s19449_s5 = scalar_lea.hbm %s21945_s6, 16 }
 0x241   : > { %p19450_p11 = scmp.ne.s32.totalorder %s21945_s6, %s19449_s5  ;;  %p19455_p12 = scmp.lt.u32.totalorder %s19449_s5, %s21945_s6 }
 0x243   : > { %p19451_p6 = pnand %p19450_p11, %p16935_p10 }
 0x245   : > { %p19452_p5 = pneg %p19451_p6 }
 0x247   : > { %p19457_p13 = pnand %p19455_p12, %p19452_p5 }
 0x249   : > { %19460 = shalt.err (!%p19457_p13)
}
 0x24a   : > { %s19461_s12 = scalar_lea.vmem %s1004_s0, 16  ;;  %s19467_s11 = scalar_lea.vmem %s1004_s0, 32 }
 0x24b   : > { %p19462_p0 = scmp.ne.s32.totalorder %s1004_s0, %s19461_s12  ;;  %p19468_p3 = scmp.lt.s32.totalorder %s1004_s0, %s1004_s0 }
 0x24c   : > { %p19469_p4 = scmp.lt.s32.totalorder %s19467_s11, %s19461_s12 }
 0x24d   : > { %p19463_p1 = pnand %p19462_p0, %p16935_p10 }
 0x24e   : > { %p19470_p7 = por %p19469_p4, %p19468_p3 }
 0x24f   : > { %p19464_p2 = pneg %p19463_p1 }
 0x251   : > { %p19471_p8 = pnand %p19470_p7, %p19464_p2 }
 0x253   : > { %19474 = shalt.err (!%p19471_p8)
}
 0x254   : > { %s21946_s1 = sld [smem:[#allocation84_spill]] }
 0x255   : > { %16810 = dma.hbm_to_vmem [thread:$0]  (%p16935_p10), %s21945_s6, 16, %s1004_s0, [#allocation16]  }
 0x25a   : > { %s21947_s16 = smov %s21946_s1  ;;  %s19475_s3 = scalar_lea.hbm %s21946_s1, 32 }
 0x25b   : > { %p19476_p11 = scmp.ne.s32.totalorder %s21947_s16, %s19475_s3  ;;  %p19481_p12 = scmp.lt.u32.totalorder %s19475_s3, %s21947_s16 }
 0x25d   : > { %p19477_p6 = pnand %p19476_p11, %p16935_p10 }
 0x25f   : > { %p19478_p5 = pneg %p19477_p6 }
 0x261   : > { %p19483_p13 = pnand %p19481_p12, %p19478_p5 }
 0x263   : > { %19486 = shalt.err (!%p19483_p13)
}
 0x264   : > { %s19487_s12 = scalar_lea.vmem %s20554_s10, 32  ;;  %p19494_p3 = scmp.lt.s32.totalorder %s20554_s10, %s20554_s10 }
 0x265   : > { %p19488_p0 = scmp.ne.s32.totalorder %s20554_s10, %s19487_s12  ;;  %p19495_p4 = scmp.lt.s32.totalorder %s19487_s12, %s19487_s12 }
 0x267   : > { %p19489_p1 = pnand %p19488_p0, %p16935_p10  ;;  %p19496_p7 = por %p19495_p4, %p19494_p3 }
 0x269   : > { %p19490_p2 = pneg %p19489_p1 }
 0x26b   : > { %p19497_p8 = pnand %p19496_p7, %p19490_p2 }
 0x26d   : > { %19500 = shalt.err (!%p19497_p8)
}
 0x26e   : > { %s21948_s0 = sld [smem:[#allocation85_spill]]  ;;  %s20013_s5 = smov [#allocation23]  }
 0x26f   : > { %16814 = dma.hbm_to_vmem [thread:$0]  (%p16935_p10), %s21947_s16, 32, %s20554_s10, [#allocation19]  }
 0x270   : > { %s1048_s11 = sshll.u32 %s20013_s5, 4  ;;  %s20014_s1 = smov [#allocation26]   ;;  %s1049_s11 = int_to_ptr.vmem [resolvable:$true] %s1048_s11 }
 0x271   : > { %s1073_s3 = sshll.u32 %s20014_s1, 4  ;;  %s20581_s3 = int_to_ptr.vmem [resolvable:$true] %s1073_s3 }
 0x274   : > { %s21949_s15 = smov %s21948_s0  ;;  %s19501_s12 = scalar_lea.hbm %s21948_s0, 12288 }
 0x275   : > { %p19502_p11 = scmp.ne.s32.totalorder %s21949_s15, %s19501_s12  ;;  %p19507_p12 = scmp.lt.u32.totalorder %s19501_s12, %s21949_s15 }
 0x277   : > { %p19503_p6 = pnand %p19502_p11, %p16935_p10 }
 0x279   : > { %p19504_p5 = pneg %p19503_p6 }
 0x27b   : > { %p19509_p13 = pnand %p19507_p12, %p19504_p5 }
 0x27d   : > { %19512 = shalt.err (!%p19509_p13)
}
 0x27e   : > { %s19513_s6 = scalar_lea.vmem %s1049_s11, 12288  ;;  %p19520_p3 = scmp.lt.s32.totalorder %s1049_s11, %s1049_s11 }
 0x27f   : > { %p19514_p0 = scmp.ne.s32.totalorder %s1049_s11, %s19513_s6  ;;  %p19521_p4 = scmp.lt.s32.totalorder %s19513_s6, %s19513_s6 }
 0x281   : > { %p19515_p1 = pnand %p19514_p0, %p16935_p10  ;;  %p19522_p7 = por %p19521_p4, %p19520_p3 }
 0x283   : > { %p19516_p2 = pneg %p19515_p1 }
 0x285   : > { %p19523_p8 = pnand %p19522_p7, %p19516_p2 }
 0x287   : > { %19526 = shalt.err (!%p19523_p8)
}
 0x288   : > { %s21950_s10 = smov 8   ;;  %s21951_s0 = smov 128  }
 0x289   : > { %s21952_s5 = sld [smem:[#allocation87_spill]] }
 0x28a   : > { %16818 = dma.hbm_to_vmem [thread:$0]  (%p16935_p10), %s21949_s15, 12288, %s1049_s11, [#allocation22], %s21951_s0, %s21951_s0, %s21950_s10  }
 0x28f   : > { %s19527_s1 = scalar_lea.hbm %s21952_s5, 32 }
 0x290   : > { %p19528_p11 = scmp.ne.s32.totalorder %s21952_s5, %s19527_s1  ;;  %p19533_p12 = scmp.lt.u32.totalorder %s19527_s1, %s21952_s5 }
 0x292   : > { %p19529_p6 = pnand %p19528_p11, %p16935_p10 }
 0x294   : > { %p19530_p5 = pneg %p19529_p6 }
 0x296   : > { %p19535_p13 = pnand %p19533_p12, %p19530_p5 }
 0x298   : > { %19538 = shalt.err (!%p19535_p13)
}
 0x299   : > { %s19539_s6 = scalar_lea.vmem %s20581_s3, 32  ;;  %p19546_p3 = scmp.lt.s32.totalorder %s20581_s3, %s20581_s3 }
 0x29a   : > { %p19540_p0 = scmp.ne.s32.totalorder %s20581_s3, %s19539_s6  ;;  %p19547_p4 = scmp.lt.s32.totalorder %s19539_s6, %s19539_s6 }
 0x29c   : > { %p19541_p1 = pnand %p19540_p0, %p16935_p10  ;;  %p19548_p7 = por %p19547_p4, %p19546_p3 }
 0x29e   : > { %p19542_p2 = pneg %p19541_p1 }
 0x2a0   : > { %p19549_p8 = pnand %p19548_p7, %p19542_p2 }
 0x2a2   : > { %19552 = shalt.err (!%p19549_p8)
}
 0x2a3   : > { %s21953_s11 = sld [smem:[#allocation88_spill]]  ;;  %s20015_s12 = smov [#allocation29]  }
 0x2a4   : > { %16822 = dma.hbm_to_vmem [thread:$0]  (%p16935_p10), %s21952_s5, 32, %s20581_s3, [#allocation25]  }
 0x2a5   : > { %s1097_s1 = sshll.u32 %s20015_s12, 4  ;;  %s20016_s8 = smov [#allocation32]   ;;  %s1098_s1 = int_to_ptr.vmem [resolvable:$true] %s1097_s1 }
 0x2a6   : > { %s1118_s13 = sshll.u32 %s20016_s8, 4  ;;  %s20611_s13 = int_to_ptr.vmem [resolvable:$true] %s1118_s13 }
 0x2a9   : > { %s19553_s6 = scalar_lea.hbm %s21953_s11, 32 }
 0x2aa   : > { %p19554_p11 = scmp.ne.s32.totalorder %s21953_s11, %s19553_s6  ;;  %p19559_p12 = scmp.lt.u32.totalorder %s19553_s6, %s21953_s11 }
 0x2ac   : > { %p19555_p6 = pnand %p19554_p11, %p16935_p10 }
 0x2ae   : > { %p19556_p5 = pneg %p19555_p6 }
 0x2b0   : > { %p19561_p13 = pnand %p19559_p12, %p19556_p5 }
 0x2b2   : > { %19564 = shalt.err (!%p19561_p13)
}
 0x2b3   : > { %s19565_s14 = scalar_lea.vmem %s1098_s1, 32  ;;  %p19572_p3 = scmp.lt.s32.totalorder %s1098_s1, %s1098_s1 }
 0x2b4   : > { %p19566_p0 = scmp.ne.s32.totalorder %s1098_s1, %s19565_s14  ;;  %p19573_p4 = scmp.lt.s32.totalorder %s19565_s14, %s19565_s14 }
 0x2b6   : > { %p19567_p1 = pnand %p19566_p0, %p16935_p10  ;;  %p19574_p7 = por %p19573_p4, %p19572_p3 }
 0x2b8   : > { %p19568_p2 = pneg %p19567_p1 }
 0x2ba   : > { %p19575_p8 = pnand %p19574_p7, %p19568_p2 }
 0x2bc   : > { %19578 = shalt.err (!%p19575_p8)
}
 0x2bd   : > { %s21954_s8 = sld [smem:[#allocation90_spill]] }
 0x2be   : > { %16826 = dma.hbm_to_vmem [thread:$0]  (%p16935_p10), %s21953_s11, 32, %s1098_s1, [#allocation28]  }
 0x2c3   : > { %s19579_s3 = scalar_lea.hbm %s21954_s8, 12288 }
 0x2c4   : > { %p19580_p11 = scmp.ne.s32.totalorder %s21954_s8, %s19579_s3  ;;  %p19585_p12 = scmp.lt.u32.totalorder %s19579_s3, %s21954_s8 }
 0x2c6   : > { %p19581_p6 = pnand %p19580_p11, %p16935_p10 }
 0x2c8   : > { %p19582_p5 = pneg %p19581_p6 }
 0x2ca   : > { %p19587_p13 = pnand %p19585_p12, %p19582_p5 }
 0x2cc   : > { %19590 = shalt.err (!%p19587_p13)
}
 0x2cd   : > { %s19591_s14 = scalar_lea.vmem %s20611_s13, 12288  ;;  %p19598_p3 = scmp.lt.s32.totalorder %s20611_s13, %s20611_s13 }
 0x2ce   : > { %p19592_p0 = scmp.ne.s32.totalorder %s20611_s13, %s19591_s14  ;;  %p19599_p4 = scmp.lt.s32.totalorder %s19591_s14, %s19591_s14 }
 0x2d0   : > { %p19593_p1 = pnand %p19592_p0, %p16935_p10  ;;  %p19600_p7 = por %p19599_p4, %p19598_p3 }
 0x2d2   : > { %p19594_p2 = pneg %p19593_p1 }
 0x2d4   : > { %p19601_p8 = pnand %p19600_p7, %p19594_p2 }
 0x2d6   : > { %19604 = shalt.err (!%p19601_p8)
}
 0x2d7   : > { %s21955_s12 = sld [smem:[#allocation92_spill]]  ;;  %s20017_s1 = smov [#allocation35]  }
 0x2d8   : > { %16830 = dma.hbm_to_vmem [thread:$0]  (%p16935_p10), %s21954_s8, 12288, %s20611_s13, [#allocation31], %s21951_s0, %s21951_s0, %s21950_s10  }
 0x2d9   : > { %s1143_s6 = sshll.u32 %s20017_s1, 4  ;;  %s20018_s3 = smov [#allocation38]   ;;  %s1144_s6 = int_to_ptr.vmem [resolvable:$true] %s1143_s6 }
 0x2da   : > { %s1167_s5 = sshll.u32 %s20018_s3, 4  ;;  %s20641_s5 = int_to_ptr.vmem [resolvable:$true] %s1167_s5 }
 0x2dd   : > { %s19605_s14 = scalar_lea.hbm %s21955_s12, 32 }
 0x2de   : > { %p19606_p11 = scmp.ne.s32.totalorder %s21955_s12, %s19605_s14  ;;  %p19611_p12 = scmp.lt.u32.totalorder %s19605_s14, %s21955_s12 }
 0x2e0   : > { %p19607_p6 = pnand %p19606_p11, %p16935_p10 }
 0x2e2   : > { %p19608_p5 = pneg %p19607_p6 }
 0x2e4   : > { %p19613_p13 = pnand %p19611_p12, %p19608_p5 }
 0x2e6   : > { %19616 = shalt.err (!%p19613_p13)
}
 0x2e7   : > { %s19617_s11 = scalar_lea.vmem %s1144_s6, 32  ;;  %p19624_p3 = scmp.lt.s32.totalorder %s1144_s6, %s1144_s6 }
 0x2e8   : > { %p19618_p0 = scmp.ne.s32.totalorder %s1144_s6, %s19617_s11  ;;  %p19625_p4 = scmp.lt.s32.totalorder %s19617_s11, %s19617_s11 }
 0x2ea   : > { %p19619_p1 = pnand %p19618_p0, %p16935_p10  ;;  %p19626_p7 = por %p19625_p4, %p19624_p3 }
 0x2ec   : > { %p19620_p2 = pneg %p19619_p1 }
 0x2ee   : > { %p19627_p8 = pnand %p19626_p7, %p19620_p2 }
 0x2f0   : > { %19630 = shalt.err (!%p19627_p8)
}
 0x2f1   : > { %s21956_s13 = sld [smem:[#allocation93_spill]] }
 0x2f2   : > { %16834 = dma.hbm_to_vmem [thread:$0]  (%p16935_p10), %s21955_s12, 32, %s1144_s6, [#allocation34]  }
 0x2f7   : > { %s19631_s1 = scalar_lea.hbm %s21956_s13, 32 }
 0x2f8   : > { %p19632_p11 = scmp.ne.s32.totalorder %s21956_s13, %s19631_s1  ;;  %p19637_p12 = scmp.lt.u32.totalorder %s19631_s1, %s21956_s13 }
 0x2fa   : > { %p19633_p6 = pnand %p19632_p11, %p16935_p10 }
 0x2fc   : > { %p19634_p5 = pneg %p19633_p6 }
 0x2fe   : > { %p19639_p13 = pnand %p19637_p12, %p19634_p5 }
 0x300   : > { %19642 = shalt.err (!%p19639_p13)
}
 0x301   : > { %s19643_s11 = scalar_lea.vmem %s20641_s5, 32  ;;  %p19650_p3 = scmp.lt.s32.totalorder %s20641_s5, %s20641_s5 }
 0x302   : > { %p19644_p0 = scmp.ne.s32.totalorder %s20641_s5, %s19643_s11  ;;  %p19651_p4 = scmp.lt.s32.totalorder %s19643_s11, %s19643_s11 }
 0x304   : > { %p19645_p1 = pnand %p19644_p0, %p16935_p10  ;;  %p19652_p7 = por %p19651_p4, %p19650_p3 }
 0x306   : > { %p19646_p2 = pneg %p19645_p1 }
 0x308   : > { %p19653_p8 = pnand %p19652_p7, %p19646_p2 }
 0x30a   : > { %19656 = shalt.err (!%p19653_p8)
}
 0x30b   : > { %s21957_s6 = sld [smem:[#allocation95_spill]]  ;;  %s20019_s3 = smov [#allocation41]  }
 0x30c   : > { %16838 = dma.hbm_to_vmem [thread:$0]  (%p16935_p10), %s21956_s13, 32, %s20641_s5, [#allocation37]  }
 0x30d   : > { %s1188_s14 = sshll.u32 %s20019_s3, 4  ;;  %s20020_s1 = smov [#allocation44]   ;;  %s1189_s14 = int_to_ptr.vmem [resolvable:$true] %s1188_s14 }
 0x30e   : > { %s1213_s8 = sshll.u32 %s20020_s1, 4  ;;  %s20668_s8 = int_to_ptr.vmem [resolvable:$true] %s1213_s8 }
 0x311   : > { %s19657_s11 = scalar_lea.hbm %s21957_s6, 12288 }
 0x312   : > { %p19658_p11 = scmp.ne.s32.totalorder %s21957_s6, %s19657_s11  ;;  %p19663_p12 = scmp.lt.u32.totalorder %s19657_s11, %s21957_s6 }
 0x314   : > { %p19659_p6 = pnand %p19658_p11, %p16935_p10 }
 0x316   : > { %p19660_p5 = pneg %p19659_p6 }
 0x318   : > { %p19665_p13 = pnand %p19663_p12, %p19660_p5 }
 0x31a   : > { %19668 = shalt.err (!%p19665_p13)
}
 0x31b   : > { %s19669_s12 = scalar_lea.vmem %s1189_s14, 12288  ;;  %p19676_p3 = scmp.lt.s32.totalorder %s1189_s14, %s1189_s14 }
 0x31c   : > { %p19670_p0 = scmp.ne.s32.totalorder %s1189_s14, %s19669_s12  ;;  %p19677_p4 = scmp.lt.s32.totalorder %s19669_s12, %s19669_s12 }
 0x31e   : > { %p19671_p1 = pnand %p19670_p0, %p16935_p10  ;;  %p19678_p7 = por %p19677_p4, %p19676_p3 }
 0x320   : > { %p19672_p2 = pneg %p19671_p1 }
 0x322   : > { %p19679_p8 = pnand %p19678_p7, %p19672_p2 }
 0x324   : > { %19682 = shalt.err (!%p19679_p8)
}
 0x325   : > { %s21958_s5 = sld [smem:[#allocation97_spill]] }
 0x326   : > { %16842 = dma.hbm_to_vmem [thread:$0]  (%p16935_p10), %s21957_s6, 12288, %s1189_s14, [#allocation40], %s21951_s0, %s21951_s0, %s21950_s10  }
 0x32b   : > { %s19683_s3 = scalar_lea.hbm %s21958_s5, 32 }
 0x32c   : > { %p19684_p11 = scmp.ne.s32.totalorder %s21958_s5, %s19683_s3  ;;  %p19689_p12 = scmp.lt.u32.totalorder %s19683_s3, %s21958_s5 }
 0x32e   : > { %p19685_p6 = pnand %p19684_p11, %p16935_p10 }
 0x330   : > { %p19686_p5 = pneg %p19685_p6 }
 0x332   : > { %p19691_p13 = pnand %p19689_p12, %p19686_p5 }
 0x334   : > { %19694 = shalt.err (!%p19691_p13)
}
 0x335   : > { %s19695_s12 = scalar_lea.vmem %s20668_s8, 32  ;;  %p19702_p3 = scmp.lt.s32.totalorder %s20668_s8, %s20668_s8 }
 0x336   : > { %p19696_p0 = scmp.ne.s32.totalorder %s20668_s8, %s19695_s12  ;;  %p19703_p4 = scmp.lt.s32.totalorder %s19695_s12, %s19695_s12 }
 0x338   : > { %p19697_p1 = pnand %p19696_p0, %p16935_p10  ;;  %p19704_p7 = por %p19703_p4, %p19702_p3 }
 0x33a   : > { %p19698_p2 = pneg %p19697_p1 }
 0x33c   : > { %p19705_p8 = pnand %p19704_p7, %p19698_p2 }
 0x33e   : > { %19708 = shalt.err (!%p19705_p8)
}
 0x33f   : > { %s21959_s10 = sld [smem:[#allocation98_spill]]  ;;  %s20021_s0 = smov [#allocation47]  }
 0x340   : > { %16846 = dma.hbm_to_vmem [thread:$0]  (%p16935_p10), %s21958_s5, 32, %s20668_s8, [#allocation43]  }
 0x341   : > { %s1237_s14 = sshll.u32 %s20021_s0, 4  ;;  %s20022_s1 = smov [#allocation50]   ;;  %s1238_s14 = int_to_ptr.vmem [resolvable:$true] %s1237_s14 }
 0x342   : > { %s1258_s11 = sshll.u32 %s20022_s1, 4  ;;  %s20698_s11 = int_to_ptr.vmem [resolvable:$true] %s1258_s11 }
 0x345   : > { %s19709_s3 = scalar_lea.hbm %s21959_s10, 64 }
 0x346   : > { %p19710_p11 = scmp.ne.s32.totalorder %s21959_s10, %s19709_s3  ;;  %p19715_p12 = scmp.lt.u32.totalorder %s19709_s3, %s21959_s10 }
 0x348   : > { %p19711_p6 = pnand %p19710_p11, %p16935_p10 }
 0x34a   : > { %p19712_p5 = pneg %p19711_p6 }
 0x34c   : > { %p19717_p13 = pnand %p19715_p12, %p19712_p5 }
 0x34e   : > { %19720 = shalt.err (!%p19717_p13)
}
 0x34f   : > { %s19721_s12 = scalar_lea.vmem %s1238_s14, 64  ;;  %p19728_p3 = scmp.lt.s32.totalorder %s1238_s14, %s1238_s14 }
 0x350   : > { %p19722_p0 = scmp.ne.s32.totalorder %s1238_s14, %s19721_s12  ;;  %p19729_p4 = scmp.lt.s32.totalorder %s19721_s12, %s19721_s12 }
 0x352   : > { %p19723_p1 = pnand %p19722_p0, %p16935_p10  ;;  %p19730_p7 = por %p19729_p4, %p19728_p3 }
 0x354   : > { %p19724_p2 = pneg %p19723_p1 }
 0x356   : > { %p19731_p8 = pnand %p19730_p7, %p19724_p2 }
 0x358   : > { %19734 = shalt.err (!%p19731_p8)
}
 0x359   : > { %s21960_s8 = sld [smem:[#allocation100_spill]] }
 0x35a   : > { %16850 = dma.hbm_to_vmem [thread:$0]  (%p16935_p10), %s21959_s10, 64, %s1238_s14, [#allocation46]  }
 0x35f   : > { %s19735_s0 = scalar_lea.hbm %s21960_s8, 49152 }
 0x360   : > { %p19736_p11 = scmp.ne.s32.totalorder %s21960_s8, %s19735_s0  ;;  %p19741_p12 = scmp.lt.u32.totalorder %s19735_s0, %s21960_s8 }
 0x362   : > { %p19737_p6 = pnand %p19736_p11, %p16935_p10 }
 0x364   : > { %p19738_p5 = pneg %p19737_p6 }
 0x366   : > { %p19743_p13 = pnand %p19741_p12, %p19738_p5 }
 0x368   : > { %19746 = shalt.err (!%p19743_p13)
}
 0x369   : > { %s19747_s1 = scalar_lea.vmem %s20698_s11, 49152  ;;  %p19754_p3 = scmp.lt.s32.totalorder %s20698_s11, %s20698_s11 }
 0x36a   : > { %p19748_p0 = scmp.ne.s32.totalorder %s20698_s11, %s19747_s1  ;;  %p19755_p4 = scmp.lt.s32.totalorder %s19747_s1, %s19747_s1 }
 0x36c   : > { %p19749_p1 = pnand %p19748_p0, %p16935_p10  ;;  %p19756_p7 = por %p19755_p4, %p19754_p3 }
 0x36e   : > { %p19750_p2 = pneg %p19749_p1 }
 0x370   : > { %p19757_p8 = pnand %p19756_p7, %p19750_p2 }
 0x372   : > { %19760 = shalt.err (!%p19757_p8)
}
 0x373   : > { %s21961_s14 = smov 16   ;;  %s21962_s3 = smov 256  }
 0x374   : > { %16854 = dma.hbm_to_vmem [thread:$0]  (%p16935_p10), %s21960_s8, 49152, %s20698_s11, [#allocation49], %s21962_s3, %s21962_s3, %s21961_s14  }
 0x375   : > { %s20023_s12 = smov [#allocation53]   ;;  %s20024_s5 = smov [#allocation54]  }
 0x376   : > { %s1283_s0 = sshll.u32 %s20023_s12, 4  ;;  %s1297_s6 = sshll.u32 %s20024_s5, 4  ;;  %s1284_s0 = int_to_ptr.vmem [resolvable:$true] %s1283_s0  ;;  %s20728_s6 = int_to_ptr.vmem [resolvable:$true] %s1297_s6 }
 0x377   : > { %s19761_s1 = scalar_lea.hbm %s20203_s4, 64 }
 0x378   : > { %p19762_p11 = scmp.ne.s32.totalorder %s20203_s4, %s19761_s1  ;;  %p19767_p12 = scmp.lt.u32.totalorder %s19761_s1, %s20203_s4 }
 0x37a   : > { %p19763_p6 = pnand %p19762_p11, %p16935_p10 }
 0x37c   : > { %p19764_p5 = pneg %p19763_p6 }
 0x37e   : > { %p19769_p13 = pnand %p19767_p12, %p19764_p5 }
 0x380   : > { %19772 = shalt.err (!%p19769_p13)
}
 0x381   : > { %s19773_s10 = scalar_lea.vmem %s1284_s0, 64  ;;  %p19780_p3 = scmp.lt.s32.totalorder %s1284_s0, %s1284_s0 }
 0x382   : > { %p19774_p0 = scmp.ne.s32.totalorder %s1284_s0, %s19773_s10  ;;  %p19781_p4 = scmp.lt.s32.totalorder %s19773_s10, %s19773_s10 }
 0x384   : > { %p19775_p1 = pnand %p19774_p0, %p16935_p10  ;;  %p19782_p7 = por %p19781_p4, %p19780_p3 }
 0x386   : > { %p19776_p2 = pneg %p19775_p1 }
 0x388   : > { %p19783_p8 = pnand %p19782_p7, %p19776_p2 }
 0x38a   : > { %19786 = shalt.err (!%p19783_p8)
}
 0x38b   : > { %16858 = dma.hbm_to_vmem [thread:$0]  (%p16935_p10), %s20203_s4, 64, %s1284_s0, [#allocation52]  }
 0x38c   : > { %s19787_s5 = scalar_lea.hbm %s20213_s20, 16 }
 0x38d   : > { %p19788_p11 = scmp.ne.s32.totalorder %s20213_s20, %s19787_s5  ;;  %p19793_p12 = scmp.lt.u32.totalorder %s19787_s5, %s20213_s20 }
 0x38f   : > { %p19789_p6 = pnand %p19788_p11, %p16935_p10 }
 0x391   : > { %p19790_p5 = pneg %p19789_p6 }
 0x393   : > { %p19795_p13 = pnand %p19793_p12, %p19790_p5 }
 0x395   : > { %19798 = shalt.err (!%p19795_p13)
}
 0x396   : > { %s19799_s10 = scalar_lea.vmem %s20728_s6, 16  ;;  %s19805_s11 = scalar_lea.vmem %s20728_s6, 32 }
 0x397   : > { %p19800_p0 = scmp.ne.s32.totalorder %s20728_s6, %s19799_s10  ;;  %p19806_p3 = scmp.lt.s32.totalorder %s20728_s6, %s20728_s6 }
 0x398   : > { %p19807_p4 = scmp.lt.s32.totalorder %s19805_s11, %s19799_s10 }
 0x399   : > { %p19801_p1 = pnand %p19800_p0, %p16935_p10 }
 0x39a   : > { %p19808_p7 = por %p19807_p4, %p19806_p3 }
 0x39b   : > { %p19802_p2 = pneg %p19801_p1 }
 0x39d   : > { %p19809_p8 = pnand %p19808_p7, %p19802_p2 }
 0x39f   : > { %19812 = shalt.err (!%p19809_p8)
}
 0x3a0   : > { %16860 = dma.hbm_to_vmem [thread:$0]  (%p16935_p10), %s20213_s20, 16, %s20728_s6, [#allocation55]  }
 0x3a1 PF: > { %1318 = sbr.rel (%p20268_p9) target bundleno = 5929 (0x1729), region = 164  ;;  %p16969_p11 = scmp.eq.s32.totalorder (!%p20268_p9), %s20241_s7, 0 }
 0x3a8   : > { %19858 = dma.done.wait (%p16969_p11), [#allocation4], 9216  }
 0x3a9   : > { %19860 = vsyncadd (%p16969_p11), [#allocation4], 4294958080 }
 0x3aa   : > { %19862 = dma.done.wait (%p16969_p11), [#allocation7], 32  }
 0x3ab   : > { %19864 = vsyncadd (%p16969_p11), [#allocation7], 4294967264 }
 0x3ac   : > { %19866 = dma.done.wait (%p16969_p11), [#allocation10], 3088  }
 0x3ad   : > { %19868 = vsyncadd (%p16969_p11), [#allocation10], 4294964208 }
 0x3ae   : > { %19870 = dma.done.wait (%p16969_p11), [#allocation13], 3088  }
 0x3af   : > { %19872 = vsyncadd (%p16969_p11), [#allocation13], 4294964208 }
 0x3b0   : > { %19874 = dma.done.wait (%p16969_p11), [#allocation16], 32  }
 0x3b1   : > { %19876 = vsyncadd (%p16969_p11), [#allocation16], 4294967264 }
 0x3b2   : > { %19878 = dma.done.wait (%p16969_p11), [#allocation19], 6176  }
 0x3b3   : > { %19880 = vsyncadd (%p16969_p11), [#allocation19], 4294961120 }
 0x3b4   : > { %19882 = dma.done.wait (%p16969_p11), [#allocation22], 12320  }
 0x3b5   : > { %19884 = vsyncadd (%p16969_p11), [#allocation22], 4294954976 }
 0x3b6   : > { %19886 = dma.done.wait (%p16969_p11), [#allocation25], 64  }
 0x3b7   : > { %19888 = vsyncadd (%p16969_p11), [#allocation25], 4294967232 }
 0x3b8   : > { %19890 = dma.done.wait (%p16969_p11), [#allocation28], 12320  }
 0x3b9   : > { %19892 = vsyncadd (%p16969_p11), [#allocation28], 4294954976 }
 0x3ba   : > { %19894 = dma.done.wait (%p16969_p11), [#allocation31], 12320  }
 0x3bb   : > { %19896 = vsyncadd (%p16969_p11), [#allocation31], 4294954976 }
 0x3bc   : > { %19898 = dma.done.wait (%p16969_p11), [#allocation34], 64  }
 0x3bd   : > { %19900 = vsyncadd (%p16969_p11), [#allocation34], 4294967232 }
 0x3be   : > { %19902 = dma.done.wait (%p16969_p11), [#allocation37], 12320  }
 0x3bf   : > { %19904 = vsyncadd (%p16969_p11), [#allocation37], 4294954976 }
 0x3c0   : > { %19906 = dma.done.wait (%p16969_p11), [#allocation40], 12320  }
 0x3c1   : > { %19908 = vsyncadd (%p16969_p11), [#allocation40], 4294954976 }
 0x3c2   : > { %19910 = dma.done.wait (%p16969_p11), [#allocation43], 64  }
 0x3c3   : > { %19912 = vsyncadd (%p16969_p11), [#allocation43], 4294967232 }
 0x3c4   : > { %19914 = dma.done.wait (%p16969_p11), [#allocation46], 24640  }
 0x3c5   : > { %19916 = vsyncadd (%p16969_p11), [#allocation46], 4294942656 }
 0x3c6   : > { %19918 = dma.done.wait (%p16969_p11), [#allocation49], 49216  }
 0x3c7   : > { %19920 = vsyncadd (%p16969_p11), [#allocation49], 4294918080 }
 0x3c8   : > { %19922 = dma.done.wait (%p16969_p11), [#allocation52], 128  }
 0x3c9   : > { %19924 = vsyncadd (%p16969_p11), [#allocation52], 4294967168 }
 0x3ca   : > { %19926 = dma.done.wait (%p16969_p11), [#allocation55], 16  }
 0x3cb   : > { %19928 = vsyncadd (%p16969_p11), [#allocation55], 4294967280  ;;  %v20025_v0 = vmov 0.0   ;;  %vm20026_vm0 = vmmov 0   ;;  %v17116_v1 = vld [vmem:[#allocation3 + $0x100] sm:$0xff]   ;;  %p1539_p9 = scmp.lt.s32.totalorder %s20241_s7, 1 }
 0x3cc   : > { %16316 = vmatprep.subr.bf16.mxu1 %v20025_v0  ;;  %16332 = vmatprep.mubr.msk.bf16.mxu1 %vm20026_vm0, %v20025_v0  ;;  %v17117_v2 = vld [vmem:[#allocation3 + $0xc0] sm:$0xff]   ;;  %s21963_s26 = sld [smem:[#allocation76_spill]]  ;;  %v17118_v3 = vld [vmem:[#allocation3 + $0x108] sm:$0xff]   ;;  %v17120_v5 = vld [vmem:[#allocation3 + $0x110] sm:$0xff]   ;;  %vm1692_vm1 = vsmask.f32 7424 }
 0x3cd   : > { %16046 = vmatprep.subr.bf16.mxu0 %v17116_v1  ;;  %v17119_v4 = vld [vmem:[#allocation3 + $0xc8] sm:$0xff]   ;;  %s1540_s6 = scalar_select %p1539_p9, %s20241_s7, 1  ;;  %v17121_v6 = vld [vmem:[#allocation3 + $0xd0] sm:$0xff]   ;;  %v17122_v7 = vld [vmem:[#allocation3 + $0x118] sm:$0xff]   ;;  %vm2667_vm2 = vcmask 1040384   ;;  %vm2673_vm6 = vcmask 1046534  }
 0x3ce   : > { %16047 = vmatpush3.bf16.msra.mxu0 %v17117_v2  ;;  %v17123_v8 = vld [vmem:[#allocation3 + $0xd8] sm:$0xff]   ;;  %v17124_v9 = vld [vmem:[#allocation3 + $0x120] sm:$0xff]   ;;  %v17126_v11 = vld [vmem:[#allocation3 + $0x128] sm:$0xff]   ;;  %vm2668_vm3 = vsmask.f32 256  ;;  %vm3444_vm9 = vcmask 1043459  }
 0x3cf   : > { %16048 = vmatprep.subr.bf16.mxu0 %v17118_v3  ;;  %s16792_s14 = smul.u32 144, %s1540_s6  ;;  %v17125_v10 = vld [vmem:[#allocation3 + $0xe0] sm:$0xff]   ;;  %v17127_v23 = vld [vmem:[#allocation3 + $0xe8] sm:$0xff]   ;;  %v17128_v28 = vld [vmem:[#allocation3 + $0x130] sm:$0xff]   ;;  %vm2674_vm5 = vsmask.f32 7962 }
 0x3d0   : > { %v17133_v27 = vld [vmem:[#allocation3 + $0x80] sm:$0xff]   ;;  %v17129_v31 = vld [vmem:[#allocation3 + $0xf0] sm:$0xff]   ;;  %vm20865_vm4 = vmand %vm2667_vm2, %vm2668_vm3  ;;  %vm3445_vm8 = vsmask.f32 7950  ;;  %vm2348_vm11 = vcmask 1046528   ;;  %vm2708_vm12 = vcmask 1047552  }
 0x3d1   : > { %16317 = vmatpush3.bf16.msra.mxu1 %v17133_v27  ;;  %v17135_v39 = vld [vmem:[#allocation3 + $0x88] sm:$0xff]   ;;  %v17130_v40 = vld [vmem:[#allocation3 + $0x138] sm:$0xff]   ;;  %v17137_v43 = vld [vmem:[#allocation3 + $0x90] sm:$0xff]   ;;  %vm2709_vm13 = vsmask.f32 7938  ;;  %s1537_s12 = sand.u32 1, %s19939_s28  }
 0x3d2   : > { %16049 = vmatpush3.bf16.msra.mxu0 %v17119_v4  ;;  %s20837_s3 = scalar_lea.vmem %s21963_s26, %s16792_s14  ;;  %16318 = vmatprep.subr.bf16.mxu1 %v20025_v0  ;;  %v17131_v41 = vld [vmem:[#allocation3 + $0xf8] sm:$0xff]   ;;  %v17132_v58 = vld [vmem:[#allocation3 + $0x140] sm:$0xff]   ;;  %vm20886_vm7 = vmand %vm2673_vm6, %vm2674_vm5  ;;  %vm2715_vm15 = vsmask.f32 6400  ;;  %vm3516_vm5 = vcmask 1042434   ;;  %s16043_s0 = sshll.u32 %s20241_s7, 4 }
 0x3d3   : > { %16050 = vmatprep.subr.bf16.mxu0 %v17120_v5  ;;  %v1546_v12 = vld [vmem:[%s20837_s3 + $0x8] sm:$0xff]  ;;  %v1549_v13 = vld [vmem:[%s20837_s3 + $0x20] sm:$0xff]  ;;  %v1552_v14 = vld [vmem:[%s20837_s3 + $0x38] sm:$0xff]  ;;  %s1538_s1 = scalar_lea.vmem [#allocation56], %s1537_s12  ;;  %s21804_s10 = scalar_lea.hbm %s20218_s9, %s16043_s0 }
 0x3d4   : > { %v1555_v15 = vld [vmem:[%s20837_s3 + $0x50] sm:$0xff]  ;;  %v20843_v16 = vpack.c.bf16 %v1549_v13, %v1546_v12  ;;  %v1545_v17 = vld [vmem:[%s20837_s3] sm:$0xff]  ;;  %v1548_v18 = vld [vmem:[%s20837_s3 + $0x18] sm:$0xff]  ;;  %s14291_s5 = sshll.u32 %s1538_s1, 4  ;;  %s14279_s11 = scalar_lea.sflag [#allocation5], %s1537_s12  ;;  %s21806_s5 = int_to_ptr.vmem [resolvable:$true] %s14291_s5 }
 0x3d5   : > { %v20847_v19 = vpack.c.bf16 %v1555_v15, %v1552_v14  ;;  %v1551_v20 = vld [vmem:[%s20837_s3 + $0x30] sm:$0xff]  ;;  %v1554_v21 = vld [vmem:[%s20837_s3 + $0x48] sm:$0xff]  ;;  %v20851_v22 = vpack.c.bf16 %v1548_v18, %v1545_v17  ;;  %16319 = vmatpush3.bf16.msra.mxu1 %v17135_v39  ;;  %v1561_v46 = vld [vmem:[%s20837_s3 + $0x80] sm:$0x3f]  ;;  %s19813_s26 = scalar_lea.vmem %s21806_s5, 16  ;;  %p21976_p6 = scmp.ne.s32.totalorder %s21933_s22, 0 }
 0x3d6   : > { %16051 = vmatpush3.bf16.msra.mxu0 %v17121_v6  ;;  %1573 = vst [vmem:[#allocation2 + $0x8] sm:$0xff] %v20843_v16  ;;  %v1706_v24 = vshrl.u32 %v20843_v16, 16  ;;  %v1708_v25 = vshll.u32 %v20843_v16, 16  ;;  %v20856_v26 = vpack.c.bf16 %v1554_v21, %v1551_v20  ;;  %v1558_v44 = vld [vmem:[%s20837_s3 + $0x68] sm:$0xff]  ;;  %16320 = vmatprep.subr.bf16.mxu1 %v20025_v0  ;;  %v1557_v53 = vld [vmem:[%s20837_s3 + $0x60] sm:$0xff]  ;;  %v17139_v56 = vld [vmem:[#allocation3 + $0x98] sm:$0xff]   ;;  %p19814_p10 = scmp.ne.s32.totalorder %s21806_s5, %s19813_s26 }
 0x3d7   : > { %16052 = vmatprep.subr.bf16.mxu0 %v17122_v7  ;;  %1576 = vst [vmem:[#allocation2 + $0x28] sm:$0xff] %v20847_v19  ;;  %v1713_v29 = vshll.u32 %v20847_v19, 16  ;;  %1572 = vst [vmem:[#allocation2] sm:$0xff] %v20851_v22  ;;  %v1696_v30 = vshll.u32 %v20851_v22, 16  ;;  %v1694_v33 = vshrl.u32 %v20851_v22, 16  ;;  %v1570_v51 = vpack.c.bf16 %v1561_v46, %v1558_v44  ;;  %v17141_v60 = vld [vmem:[#allocation3 + $0xa0] sm:$0xff]  }
 0x3d8   : > { %v1710_v32 = vrot.slane %v1708_v25, 1  ;;  %v1701_v36 = vshll.u32 %v20856_v26, 16  ;;  %v1560_v54 = vld [vmem:[%s20837_s3 + $0x78] sm:$0x3f]  ;;  %v1737_v59 = vshrl.u32 %v20847_v19, 16  ;;  %v17134_v62 = vld [vmem:[#allocation3 + $0x148] sm:$0xff]   ;;  %vm20925_vm10 = vmand %vm3444_vm9, %vm3445_vm8  ;;  %p19815_p5 = pnand %p19814_p10, %p21976_p6 }
 0x3d9   : > { %v1715_v34 = vrot.slane %v1713_v29, 1  ;;  %v1698_v38 = vrot.slane %v1696_v30, 1  ;;  %16321 = vmatpush3.bf16.msra.mxu1 %v17137_v43  ;;  %1579 = vst [vmem:[#allocation2 + $0x48] sm:$0x7f] %v1570_v51  ;;  %v1569_v55 = vpack.c.bf16 %v1560_v54, %v1557_v53  ;;  %v1729_v63 = vshrl.u32 %v20856_v26, 16  ;;  %v17143_v2 = vld [vmem:[#allocation3 + $0xa8] sm:$0xff]   ;;  %vm21007_vm14 = vmand %vm2708_vm12, %vm2709_vm13 }
 0x3da   : > { %16053 = vmatpush3.bf16.msra.mxu0 %v17123_v8  ;;  %v1711_v37 = vor.u32 %v1710_v32, %v1706_v24  ;;  %v1703_v49 = vrot.slane %v1701_v36, 1  ;;  %16322 = vmatprep.subr.bf16.mxu1 %v20025_v0  ;;  %v1547_v6 = vld [vmem:[%s20837_s3 + $0x10] sm:$0xff]  ;;  %v1550_v7 = vld [vmem:[%s20837_s3 + $0x28] sm:$0xff]  ;;  %v1553_v8 = vld [vmem:[%s20837_s3 + $0x40] sm:$0xff]  ;;  %vm3522_vm8 = vcmask 1045509   ;;  %vm3526_vm12 = vcmask 1047559   ;;  %p19816_p12 = pneg %p19815_p5 }
 0x3db   : > { %16054 = vmatprep.subr.bf16.mxu0 %v17124_v9  ;;  %v1699_v48 = vor.u32 %v1698_v38, %v1694_v33  ;;  %1578 = vst [vmem:[#allocation2 + $0x40] sm:$0x7f] %v1569_v55  ;;  %v1739_v3 = vor.u32 %v1737_v59, %v1715_v34  ;;  %v20904_v12 = vpack.c.bf16 %v1550_v7, %v1547_v6  ;;  %v17136_v13 = vld [vmem:[#allocation3 + $0x150] sm:$0xff]   ;;  %v17138_v27 = vld [vmem:[#allocation3 + $0x158] sm:$0xff]   ;;  %v1562_v32 = vld [vmem:[%s20837_s3 + $0x88] sm:$0x3f] }
 0x3dc   : > { %v1716_v42 = vsel %vm1692_vm1, %v1711_v37, %v1715_v34  ;;  %v1731_v15 = vor.u32 %v1729_v63, %v1703_v49  ;;  %v17145_v25 = vld [vmem:[#allocation3 + $0xb0] sm:$0xff]   ;;  %v17148_v30 = vld [vmem:[#allocation3 + $0xb8] sm:$0xff]   ;;  %v17140_v33 = vld [vmem:[#allocation3 + $0x160] sm:$0xff]   ;;  %vm3528_vm13 = vcmask 1041409   ;;  %s20029_s7 = smov [#allocation56]  }
 0x3dd   : > { %1947 = vmatprep.mubr.bf16.mxu0 %v1716_v42  ;;  %v4500_v45 = vld [vmem:[#allocation2 + $0x8] sm:$0x1]  ;;  %v1704_v57 = vsel %vm1692_vm1, %v1699_v48, %v1703_v49  ;;  %16323 = vmatpush3.bf16.msra.mxu1 %v17139_v56  ;;  %1574 = vst [vmem:[#allocation2 + $0x10] sm:$0xff] %v20904_v12  ;;  %v17151_v42 = vld [vmem:[#allocation3 + $0x200] sm:$0xff]   ;;  %v1720_v44 = vshll.u32 %v20904_v12, 16  ;;  %v1718_v46 = vshrl.u32 %v20904_v12, 16  ;;  %vm21024_vm2 = vmand %vm2348_vm11, %vm2715_vm15 }
 0x3de   : > { %16055 = vmatpush3.bf16.msra.mxu0 %v17125_v10  ;;  %v4501_v47 = vsel %vm20865_vm4, 0, %v4500_v45  ;;  %v2670_v50 = vld [vmem:[#allocation2] sm:$0x1]  ;;  %16324 = vmatprep.subr.bf16.mxu1 %v20025_v0  ;;  %v17142_v43 = vld [vmem:[#allocation3 + $0x168] sm:$0xff]   ;;  %v17144_v45 = vld [vmem:[#allocation3 + $0x170] sm:$0xff]   ;;  %vm3549_vm15 = vcmask 1043456  }
 0x3df   : > { %16056 = vmatprep.subr.bf16.mxu0 %v17126_v11  ;;  %4502 = vst [vmem:[#allocation2 + $0x8] sm:$0x1] %v4501_v47  ;;  %v2671_v52 = vsel %vm20865_vm4, 0, %v2670_v50  ;;  %v1556_v11 = vld [vmem:[%s20837_s3 + $0x58] sm:$0xff]  ;;  %v17154_v47 = vld [vmem:[#allocation3 + $0x208] sm:$0xff]   ;;  %v1722_v48 = vrot.slane %v1720_v44, 1 }
 0x3e0   : > { %2672 = vst [vmem:[#allocation2] sm:$0x1] %v2671_v52  ;;  %v20893_v1 = vld [vmem:[#allocation2 + $0x48] sm:$0x7f]  ;;  %v20910_v20 = vpack.c.bf16 %v1556_v11, %v1553_v8  ;;  %v17146_v50 = vld [vmem:[#allocation3 + $0x178] sm:$0xff]   ;;  %v17157_v51 = vld [vmem:[#allocation3 + $0x210] sm:$0xff]  }
 0x3e1   : > { %v1741_v4 = vshll.u32 %v20893_v1, 16  ;;  %16325 = vmatpush3.bf16.msra.mxu1 %v17141_v60  ;;  %v1756_v5 = vshrl.u32 %v20893_v1, 16  ;;  %v1723_v52 = vor.u32 %v1722_v48, %v1718_v46  ;;  %v17147_v54 = vld [vmem:[#allocation3 + $0x40] sm:$0xff]   ;;  %v17150_v61 = vld [vmem:[#allocation3 + $0x48] sm:$0xff]   ;;  %v17155_v8 = vld [vmem:[#allocation3 + $0x10] sm:$0xff]   ;;  %s19817_s6 = sshll.u32 %s20029_s7, 4  ;;  %s19818_s6 = int_to_ptr.vmem [resolvable:$false] %s19817_s6 }
 0x3e2   : > { %16057 = vmatpush3.bf16.msra.mxu0 %v17127_v23  ;;  %v20900_v9 = vld [vmem:[#allocation2 + $0x40] sm:$0x7f]  ;;  %16326 = vmatprep.subr.bf16.mxu1 %v20025_v0  ;;  %1577 = vst [vmem:[#allocation2 + $0x30] sm:$0xff] %v20910_v20  ;;  %v1725_v49 = vshll.u32 %v20910_v20, 16  ;;  %v1745_v59 = vshrl.u32 %v20910_v20, 16  ;;  %v17166_v6 = vld [vmem:[#allocation3 + $0x228] sm:$0xff]   ;;  %p19820_p13 = scmp.lt.s32.totalorder %s21806_s5, %s19818_s6 }
 0x3e3   : > { %16058 = vmatprep.subr.bf16.mxu0 %v17128_v28  ;;  %v2676_v10 = vld [vmem:[#allocation2 + $0x40] sm:$0x40]  ;;  %v1743_v14 = vrot.slane %v1741_v4, 1  ;;  %v1733_v17 = vshll.u32 %v20900_v9, 16  ;;  %v1753_v29 = vshrl.u32 %v20900_v9, 16  ;;  %v17178_v44 = vld [vmem:[#allocation3 + $0x1d8] sm:$0xff]  }
 0x3e4   : > { %v2677_v18 = vsel %vm20886_vm7, 0, %v2676_v10  ;;  %v10658_v34 = vld [vmem:[#allocation2 + $0x10] sm:$0x1]  ;;  %v1727_v53 = vrot.slane %v1725_v49, 1  ;;  %v17149_v56 = vld [vmem:[#allocation3] sm:$0xff]   ;;  %v17156_v10 = vld [vmem:[#allocation3 + $0x58] sm:$0xff]  }
 0x3e5   : > { %2678 = vst [vmem:[#allocation2 + $0x40] sm:$0x40] %v2677_v18  ;;  %v1744_v21 = vsel %vm1692_vm1, %v1739_v3, %v1743_v14  ;;  %v1735_v23 = vrot.slane %v1733_v17, 1  ;;  %v1758_v24 = vor.u32 %v1756_v5, %v1743_v14  ;;  %16327 = vmatpush3.bf16.msra.mxu1 %v17143_v2  ;;  %v10659_v39 = vsel %vm20865_vm4, 0, %v10658_v34  ;;  %v17152_v2 = vld [vmem:[#allocation3 + $0x8] sm:$0xff]   ;;  %v17153_v5 = vld [vmem:[#allocation3 + $0x50] sm:$0xff]  }
 0x3e6   : > { %16059 = vmatpush3.bf16.msra.mxu0 %v17129_v31  ;;  %16328 = vmatprep.subr.bf16.mxu1 %v20025_v0  ;;  %v1559_v31 = vld [vmem:[%s20837_s3 + $0x70] sm:$0xff]  ;;  %10660 = vst [vmem:[#allocation2 + $0x10] sm:$0x1] %v10659_v39  ;;  %v1747_v3 = vor.u32 %v1745_v59, %v1727_v53  ;;  %v2356_v17 = vrot.slane %v20910_v20, 1  ;;  %v17168_v34 = vld [vmem:[#allocation3 + $0x78] sm:$0xff]   ;;  %v17173_v39 = vld [vmem:[#allocation3 + $0x180] sm:$0xff]  }
 0x3e7   : > { %16060 = vmatprep.subr.bf16.mxu0 %v17130_v40  ;;  %v1736_v28 = vsel %vm1692_vm1, %v1731_v15, %v1735_v23  ;;  %v1571_v36 = vpack.c.bf16 %v1562_v32, %v1559_v31  ;;  %v1755_v37 = vor.u32 %v1753_v29, %v1735_v23  ;;  %v2289_v14 = vld [vmem:[#allocation2 + $0x10] sm:$0xfe]  ;;  %v17159_v15 = vld [vmem:[#allocation3 + $0x60] sm:$0xff]   ;;  %v2288_v31 = vld [vmem:[#allocation2 + $0x8] sm:$0xfe]  ;;  %v2360_v59 = vrot.slane %v20893_v1, 1 }
 0x3e8   : > { %v2355_v23 = vrot.slane %v2289_v14, 1  ;;  %v17165_v29 = vld [vmem:[#allocation3 + $0x70] sm:$0xff]   ;;  %v17179_v46 = vld [vmem:[#allocation3 + $0x198] sm:$0xff]   ;;  %v1589_v48 = vld [vmem:[#allocation2 + $0x40] sm:$0x3f]  ;;  %vm3520_vm7 = vcmask 1044484  }
 0x3e9   : > { %16329 = vmatpush3.bf16.msra.mxu1 %v17145_v25  ;;  %v10670_v40 = vld [vmem:[#allocation2 + $0x30] sm:$0x8]  ;;  %1580 = vst [vmem:[#allocation2 + $0x50] sm:$0x7f] %v1571_v36  ;;  %v17162_v25 = vld [vmem:[#allocation3 + $0x68] sm:$0xff]   ;;  %v17170_v36 = vld [vmem:[#allocation3 + $0x38] sm:$0xff]  }
 0x3ea   : > { %16061 = vmatpush3.bf16.msra.mxu0 %v17131_v41  ;;  %16330 = vmatprep.subr.bf16.mxu1 %v20025_v0  ;;  %v10671_v41 = vsel %vm20925_vm10, 0, %v10670_v40  ;;  %v17167_v32 = vld [vmem:[#allocation3 + $0x30] sm:$0xff]   ;;  %v17174_v40 = vld [vmem:[#allocation3 + $0x1c8] sm:$0xff]   ;;  %s19819_s14 = scalar_lea.vmem %s19818_s6, 32 }
 0x3eb   : > { %16288 = vmatprep.subr.bf16.mxu0 %v20025_v0  ;;  %10672 = vst [vmem:[#allocation2 + $0x30] sm:$0x8] %v10671_v41  ;;  %v17175_v41 = vld [vmem:[#allocation3 + $0x188] sm:$0xff]   ;;  %v17190_v1 = vld [vmem:[#allocation9 + $0x50] sm:$0xff]   ;;  %p19821_p0 = scmp.lt.s32.totalorder %s19819_s14, %s19813_s26 }
 0x3ec   : > { %v17182_v49 = vld [vmem:[#allocation3 + $0x1e8] sm:$0xff]  }
 0x3ed   : > { %1948 = vmatmul.mubr.bf16.vlgmr.msra.gmra.mrb[0].mxu0 %v1704_v57  ;;  %16331 = vmatpush3.bf16.msra.mxu1 %v17148_v30  ;;  %v17160_v57 = vld [vmem:[#allocation3 + $0x218] sm:$0xff]   ;;  %p19822_p1 = por %p19821_p0, %p19820_p13 }
 0x3ee   : > { %16289 = vmatpush3.bf16.msra.mxu0 %v17132_v58  ;;  %1955 = vmatprep.mubr.bf16.mxu0 %v1744_v21  ;;  %v1728_v58 = vsel %vm1692_vm1, %v1723_v52, %v1727_v53  ;;  %v17172_v21 = vld [vmem:[#allocation3 + $0x238] sm:$0xff]   ;;  %v17184_v52 = vld [vmem:[#allocation3 + $0x1f0] sm:$0xff]  }
 0x3ef   : > { %16290 = vmatprep.subr.bf16.mxu0 %v20025_v0  ;;  %16344 = vmatprep.subr.bf16.mxu1 %v20025_v0  ;;  %v17185_v53 = vld [vmem:[#allocation3 + $0x1b0] sm:$0xff]   ;;  %p19823_p2 = pnand %p19822_p1, %p19816_p12 }
 0x3f0   : > { %16333 = vmatmul.mubr.bf16.vlgmr.msra.gmra.mrb[0].mxu1 %v20904_v12  ;;  %v20947_v55 = vld [vmem:[#allocation2 + $0x50] sm:$0x7f] }
 0x3f1   : > { %16345 = vmatpush3.bf16.msra.mxu1 %v17151_v42  ;;  %16336 = vmatprep.mubr.msk.bf16.mxu1 %vm20026_vm0, %v20025_v0  ;;  %v1749_v60 = vshll.u32 %v20947_v55, 16  ;;  %v1591_v63 = vld [vmem:[#allocation2 + $0x50] sm:$0x3f]  ;;  %v1759_v11 = vshrl.u32 %v20947_v55, 16  ;;  %v2362_v30 = vrot.slane %v20947_v55, 1 }
 0x3f2   : > { %16291 = vmatpush3.bf16.msra.mxu0 %v17134_v62  ;;  %16346 = vmatprep.subr.bf16.mxu1 %v20025_v0  ;;  %v17163_v62 = vld [vmem:[#allocation3 + $0x220] sm:$0xff]   ;;  %v17169_v12 = vld [vmem:[#allocation3 + $0x230] sm:$0xff]  }
 0x3f3   : > { %16292 = vmatprep.subr.bf16.mxu0 %v20025_v0  ;;  %v1751_v4 = vrot.slane %v1749_v60, 1  ;;  %v17176_v42 = vld [vmem:[#allocation3 + $0x1d0] sm:$0xff]   ;;  %v2287_v55 = vld [vmem:[#allocation2] sm:$0xfe] }
 0x3f5   : > { %1956 = vmatmul.mubr.bf16.gmra.mrb[4].mxu0 %v1736_v28  ;;  %16347 = vmatpush3.bf16.msra.mxu1 %v17154_v47  ;;  %v1752_v7 = vsel %vm1692_vm1, %v1747_v3, %v1751_v4  ;;  %v1761_v18 = vor.u32 %v1759_v11, %v1751_v4  ;;  %v17164_v28 = vld [vmem:[#allocation3 + $0x28] sm:$0xff]   ;;  %v17180_v47 = vld [vmem:[#allocation3 + $0x1e0] sm:$0xff]   ;;  %v17194_v4 = vld [vmem:[#allocation9 + $0x70] sm:$0xff]  }
 0x3f6   : > { %16293 = vmatpush3.bf16.msra.mxu0 %v17136_v13  ;;  %1963 = vmatprep.mubr.bf16.mxu0 %v1758_v24  ;;  %v17158_v13 = vld [vmem:[#allocation3 + $0x18] sm:$0xff]   ;;  %v17161_v24 = vld [vmem:[#allocation3 + $0x20] sm:$0xff]   ;;  %v17193_v3 = vld [vmem:[#allocation9 + $0x68] sm:$0xff]  }
 0x3f7   : > { %16294 = vmatprep.subr.bf16.mxu0 %v20025_v0  ;;  %16348 = vmatprep.subr.bf16.mxu1 %v20025_v0 }
 0x3f8   : > { %16337 = vmatmul.mubr.bf16.gmra.mrb[4].mxu1 %v20910_v20  ;;  %v2353_v20 = vrot.slane %v20847_v19, 1 }
 0x3f9   : > { %16349 = vmatpush3.bf16.msra.mxu1 %v17157_v51  ;;  %16340 = vmatprep.mubr.msk.bf16.mxu1 %vm20026_vm0, %v20025_v0  ;;  %v17183_v51 = vld [vmem:[#allocation3 + $0x1a8] sm:$0xff]  }
 0x3fa   : > { %16295 = vmatpush3.bf16.msra.mxu0 %v17138_v27  ;;  %16350 = vmatprep.subr.bf16.mxu1 %v20025_v0  ;;  %v2357_v27 = vsel %vm2348_vm11, %v2355_v23, %v2356_v17 }
 0x3fb   : > { %16296 = vmatprep.subr.bf16.mxu0 %v20025_v0 }
 0x3fd   : > { %1964 = vmatmul.mubr.bf16.gmra.mrb[8].mxu0 %v1755_v37  ;;  %16351 = vmatpush3.bf16.msra.mxu1 %v17160_v57  ;;  %v17171_v37 = vld [vmem:[#allocation3 + $0x1c0] sm:$0xff]   ;;  %v2349_v57 = vrot.slane %v2287_v55, 1 }
 0x3fe   : > { %16297 = vmatpush3.bf16.msra.mxu0 %v17140_v33  ;;  %16304 = vmatprep.mubr.msk.bf16.mxu0 %vm20026_vm0, %v20025_v0  ;;  %v2352_v33 = vrot.slane %v2288_v31, 1 }
 0x3ff   : > { %16298 = vmatprep.subr.bf16.mxu0 %v20025_v0  ;;  %16352 = vmatprep.subr.bf16.mxu1 %v20025_v0 }
 0x400   : > { %16341 = vmatmul.mubr.bf16.gmra.mrb[8].mxu1 %v1591_v63 }
 0x401   : > { %16353 = vmatpush3.bf16.msra.mxu1 %v17163_v62  ;;  %16360 = vmatprep.mubr.msk.bf16.mxu1 %vm20026_vm0, %v20025_v0  ;;  %v2358_v62 = vrot.slane %v20900_v9, 1  ;;  %v17191_v9 = vld [vmem:[#allocation9 + $0x58] sm:$0xff]  }
 0x402   : > { %16299 = vmatpush3.bf16.msra.mxu0 %v17142_v43  ;;  %16354 = vmatprep.subr.bf16.mxu1 %v20025_v0  ;;  %v17177_v43 = vld [vmem:[#allocation3 + $0x190] sm:$0xff]  }
 0x403   : > { %16300 = vmatprep.subr.bf16.mxu0 %v20025_v0 }
 0x405   : > { %16355 = vmatpush3.bf16.msra.mxu1 %v17166_v6 }
 0x406   : > { %16301 = vmatpush3.bf16.msra.mxu0 %v17144_v45  ;;  %16356 = vmatprep.subr.bf16.mxu1 %v20025_v0  ;;  %v1590_v45 = vld [vmem:[#allocation2 + $0x48] sm:$0x3f] }
 0x407   : > { %16302 = vmatprep.subr.bf16.mxu0 %v20025_v0 }
 0x409   : > { %16357 = vmatpush3.bf16.msra.mxu1 %v17169_v12 }
 0x40a   : > { %16303 = vmatpush3.bf16.msra.mxu0 %v17146_v50  ;;  %16358 = vmatprep.subr.bf16.mxu1 %v20025_v0  ;;  %v2354_v50 = vsel %vm2348_vm11, %v2352_v33, %v2353_v20 }
 0x40b   : > { %16091 = vmatprep.subr.bf16.mxu0 %v17147_v54  ;;  %v17186_v54 = vld [vmem:[#allocation3 + $0x1f8] sm:$0xff]  }
 0x40d   : > { %16305 = vmatmul.mubr.bf16.vlgmr.msra.gmra.mrb[12].mxu0 %v1728_v58  ;;  %16359 = vmatpush3.bf16.msra.mxu1 %v17172_v21  ;;  %v2350_v58 = vrot.slane %v20856_v26, 1 }
 0x40e   : > { %16092 = vmatpush3.bf16.msra.mxu0 %v17149_v56  ;;  %16308 = vmatprep.mubr.msk.bf16.mxu0 %vm20026_vm0, %v20025_v0  ;;  %v17187_v56 = vld [vmem:[#allocation3 + $0x1b8] sm:$0xff]  }
 0x40f   : > { %16093 = vmatprep.subr.bf16.mxu0 %v17150_v61  ;;  %v2351_v60 = vsel %vm2348_vm11, %v2349_v57, %v2350_v58  ;;  %v2361_v61 = vsel %vm2348_vm11, %v2353_v20, %v2360_v59  ;;  %v2359_v63 = vsel %vm2348_vm11, %v2350_v58, %v2358_v62 }
 0x410   : > { %16361 = vmatmul.mubr.bf16.vlgmr.msra.gmra.mrb[0].mxu1 %v2357_v27 }
 0x411   : > { %16364 = vmatprep.mubr.msk.bf16.mxu1 %vm20026_vm0, %v20025_v0 }
 0x412   : > { %16094 = vmatpush3.bf16.msra.mxu0 %v17152_v2  ;;  %v17192_v2 = vld [vmem:[#allocation9 + $0x60] sm:$0xff]  }
 0x413   : > { %16095 = vmatprep.subr.bf16.mxu0 %v17153_v5 }
 0x415   : > { %16309 = vmatmul.mubr.bf16.gmra.mrb[16].mxu0 %v1752_v7 }
 0x416   : > { %16096 = vmatpush3.bf16.msra.mxu0 %v17155_v8  ;;  %16312 = vmatprep.mubr.msk.bf16.mxu0 %vm20026_vm0, %v20025_v0 }
 0x417   : > { %16097 = vmatprep.subr.bf16.mxu0 %v17156_v10  ;;  %v17195_v10 = vld [vmem:[#allocation9 + $0x78] sm:$0xff]  }
 0x41a   : > { %16098 = vmatpush3.bf16.msra.mxu0 %v17158_v13 }
 0x41b   : > { %16099 = vmatprep.subr.bf16.mxu0 %v17159_v15 }
 0x41d   : > { %16313 = vmatmul.mubr.bf16.gmra.mrb[20].mxu0 %v1761_v18 }
 0x41e   : > { %16100 = vmatpush3.bf16.msra.mxu0 %v17161_v24  ;;  %2205 = vmatprep.mubr.bf16.mxu0 %v20843_v16  ;;  %v2363_v16 = vsel %vm2348_vm11, %v2356_v17, %v2362_v30 }
 0x41f   : > { %16101 = vmatprep.subr.bf16.mxu0 %v17162_v25  ;;  %16365 = vmatmul.mubr.bf16.gmra.mrb[4].mxu1 %v2363_v16 }
 0x420   : > { %16368 = vmatprep.mubr.msk.bf16.mxu1 %vm20026_vm0, %v20025_v0 }
 0x422   : > { %16102 = vmatpush3.bf16.msra.mxu0 %v17164_v28 }
 0x423   : > { %16103 = vmatprep.subr.bf16.mxu0 %v17165_v29 }
 0x426   : > { %16104 = vmatpush3.bf16.msra.mxu0 %v17167_v32 }
 0x427   : > { %16105 = vmatprep.subr.bf16.mxu0 %v17168_v34  ;;  %16369 = vmatmul.mubr.bf16.gmra.mrb[8].mxu1 %v2362_v30 }
 0x42a   : > { %16106 = vmatpush3.bf16.msra.mxu0 %v17170_v36 }
 0x42b   : > { %16136 = vmatprep.subr.bf16.mxu0 %v17171_v37 }
 0x42d   : > { %2206 = vmatmul.mubr.bf16.vlgmr.msra.gmra.mrb[24].mxu0 %v20851_v22  ;;  %v17181_v22 = vld [vmem:[#allocation3 + $0x1a0] sm:$0xff]  }
 0x42e   : > { %16137 = vmatpush3.bf16.msra.mxu0 %v17173_v39  ;;  %2213 = vmatprep.mubr.bf16.mxu0 %v20847_v19  ;;  %v17189_v19 = vld [vmem:[#allocation9 + $0x48] sm:$0xff]  }
 0x42f   : > { %16138 = vmatprep.subr.bf16.mxu0 %v17174_v40 }
 0x432   : > { %16139 = vmatpush3.bf16.msra.mxu0 %v17175_v41 }
 0x433   : > { %16140 = vmatprep.subr.bf16.mxu0 %v17176_v42 }
 0x435   : > { %2214 = vmatmul.mubr.bf16.gmra.mrb[28].mxu0 %v20856_v26  ;;  %v17188_v26 = vld [vmem:[#allocation9 + $0x40] sm:$0xff]  }
 0x436   : > { %16141 = vmatpush3.bf16.msra.mxu0 %v17177_v43  ;;  %2221 = vmatprep.mubr.bf16.mxu0 %v1590_v45 }
 0x437   : > { %16142 = vmatprep.subr.bf16.mxu0 %v17178_v44 }
 0x43a   : > { %16143 = vmatpush3.bf16.msra.mxu0 %v17179_v46 }
 0x43b   : > { %16144 = vmatprep.subr.bf16.mxu0 %v17180_v47 }
 0x43d   : > { %2222 = vmatmul.mubr.bf16.gmra.mrb[32].mxu0 %v1589_v48 }
 0x43e   : > { %16145 = vmatpush3.bf16.msra.mxu0 %v17181_v22  ;;  %2549 = vmatprep.mubr.bf16.mxu0 %v2354_v50 }
 0x43f   : > { %16146 = vmatprep.subr.bf16.mxu0 %v17182_v49 }
 0x442   : > { %16147 = vmatpush3.bf16.msra.mxu0 %v17183_v51 }
 0x443   : > { %16148 = vmatprep.subr.bf16.mxu0 %v17184_v52 }
 0x446   : > { %16149 = vmatpush3.bf16.msra.mxu0 %v17185_v53 }
 0x447   : > { %16150 = vmatprep.subr.bf16.mxu0 %v17186_v54 }
 0x44a   : > { %16151 = vmatpush3.bf16.msra.mxu0 %v17187_v56 }
 0x44b   : > { %16372 = vmatprep.subr.bf16.mxu0 %v20025_v0 }
 0x44d   : > { %2550 = vmatmul.mubr.bf16.vlgmr.msra.gmra.mrb[36].mxu0 %v2351_v60 }
 0x44e   : > { %2557 = vmatprep.mubr.bf16.mxu0 %v2361_v61  ;;  %16373 = vmatpush3.bf16.msra.mxu0 %v17188_v26 }
 0x44f   : > { %16374 = vmatprep.subr.bf16.mxu0 %v20025_v0 }
 0x452   : > { %16375 = vmatpush3.bf16.msra.mxu0 %v17189_v19 }
 0x453   : > { %16376 = vmatprep.subr.bf16.mxu0 %v20025_v0 }
 0x455   : > { %2558 = vmatmul.mubr.bf16.gmra.mrb[40].mxu0 %v2359_v63 }
 0x456   : > { %2565 = vmatprep.mubr.bf16.mxu0 %v2360_v59  ;;  %16377 = vmatpush3.bf16.msra.mxu0 %v17190_v1 }
 0x457   : > { %16378 = vmatprep.subr.bf16.mxu0 %v20025_v0 }
 0x45a   : > { %16379 = vmatpush3.bf16.msra.mxu0 %v17191_v9 }
 0x45b   : > { %16380 = vmatprep.subr.bf16.mxu0 %v20025_v0 }
 0x45d   : > { %2566 = vmatmul.mubr.bf16.gmra.mrb[44].mxu0 %v2358_v62 }
 0x45e   : > { %16388 = vmatprep.mubr.msk.bf16.mxu0 %vm20026_vm0, %v20025_v0  ;;  %16381 = vmatpush3.bf16.msra.mxu0 %v17192_v2 }
 0x45f   : > { %16382 = vmatprep.subr.bf16.mxu0 %v20025_v0 }
 0x462   : > { %16383 = vmatpush3.bf16.msra.mxu0 %v17193_v3 }
 0x463   : > { %16384 = vmatprep.subr.bf16.mxu0 %v20025_v0 }
 0x466   : > { %16385 = vmatpush3.bf16.msra.mxu0 %v17194_v4 }
 0x467   : > { %16386 = vmatprep.subr.bf16.mxu0 %v20025_v0 }
 0x46a   : > { %16387 = vmatpush3.bf16.msra.mxu0 %v17195_v10 }
 0x46b   : > { %16400 = vmatprep.subr.bf16.mxu0 %v20025_v0 }
 0x4c0   : > { %v16062_v5 = vpop.f32.mrb[0].mxu0 }
 0x4c1   : > { %v16063_v6 = vpop.f32.mrb[1].mxu0 }
 0x4c2   : > { %v16064_v7 = vadd.f32 %v16063_v6, %v16062_v5  ;;  %v16065_v8 = vpop.f32.mrb[2].mxu0 }
 0x4c3   : > { %v16066_v11 = vpop.f32.mrb[3].mxu0 }
 0x4c4   : > { %v16067_v12 = vadd.f32 %v16066_v11, %v16065_v8 }
 0x4c8   : > { %v16068_v13 = vpop.f32.mrb[4].mxu0 }
 0x4c9   : > { %v16069_v14 = vpop.f32.mrb[5].mxu0 }
 0x4ca   : > { %v16070_v15 = vadd.f32 %v16069_v14, %v16068_v13  ;;  %v16071_v17 = vpop.f32.mrb[6].mxu0 }
 0x4cb   : > { %v16072_v18 = vpop.f32.mrb[7].mxu0 }
 0x4cc   : > { %v16073_v21 = vadd.f32 %v16072_v18, %v16071_v17 }
 0x4d0   : > { %v16074_v23 = vpop.f32.mrb[8].mxu0 }
 0x4d1   : > { %v16075_v24 = vpop.f32.mrb[9].mxu0 }
 0x4d2   : > { %v16076_v25 = vadd.f32 %v16075_v24, %v16074_v23  ;;  %v16077_v27 = vpop.f32.mrb[10].mxu0 }
 0x4d3   : > { %v16078_v28 = vpop.f32.mrb[11].mxu0 }
 0x4d4   : > { %v16079_v20 = vadd.f32 %v16078_v28, %v16077_v27  ;;  %v14853_v27 = vld [vmem:[#allocation6] ss:$0 sm:$0xff] }
 0x4e0   : > { %v2006_v29 = vpop.f32.mrb[12].mxu0 }
 0x4e1   : > { %v2007_v30 = vadd.f32 %v16064_v7, %v2006_v29  ;;  %v16306_v31 = vpop.f32.mrb[13].mxu0 }
 0x4e2   : > { %v2009_v32 = vpop.f32.mrb[14].mxu0 }
 0x4e3   : > { %v2010_v33 = vadd.f32 %v16067_v12, %v2009_v32  ;;  %v16307_v34 = vpop.f32.mrb[15].mxu0  ;;  %v2608_v48 = vpop.f32.mrb[0].mxu1 }
 0x4e4   : > { %v16362_v22 = vpop.f32.mrb[1].mxu1 }
 0x4e5   : > { %v2611_v49 = vpop.f32.mrb[2].mxu1 }
 0x4e6   : > { %v16363_v50 = vpop.f32.mrb[3].mxu1 }
 0x4e8   : > { %v2014_v36 = vpop.f32.mrb[16].mxu0 }
 0x4e9   : > { %v2015_v37 = vadd.f32 %v16070_v15, %v2014_v36  ;;  %v16310_v16 = vpop.f32.mrb[17].mxu0 }
 0x4ea   : > { %v2017_v39 = vpop.f32.mrb[18].mxu0 }
 0x4eb   : > { %v2018_v40 = vadd.f32 %v16073_v21, %v2017_v39  ;;  %v16311_v41 = vpop.f32.mrb[19].mxu0 }
 0x4f0   : > { %v2022_v42 = vpop.f32.mrb[20].mxu0 }
 0x4f1   : > { %v2023_v43 = vadd.f32 %v16076_v25, %v2022_v42  ;;  %v16314_v44 = vpop.f32.mrb[21].mxu0 }
 0x4f2   : > { %v2025_v45 = vpop.f32.mrb[22].mxu0  ;;  %v2616_v51 = vpop.f32.mrb[4].mxu1 }
 0x4f3   : > { %v2026_v46 = vadd.f32 %v16079_v20, %v2025_v45  ;;  %v16315_v47 = vpop.f32.mrb[23].mxu0  ;;  %v16366_v52 = vpop.f32.mrb[5].mxu1 }
 0x4f4   : > { %v2619_v53 = vpop.f32.mrb[6].mxu1 }
 0x4f5   : > { %v16367_v54 = vpop.f32.mrb[7].mxu1 }
 0x4fa   : > { %v21003_v60 = vpop.f32.mrb[8].mxu1 }
 0x4fb   : > { %v16370_v63 = vpop.f32.mrb[9].mxu1 }
 0x4fc   : > { %v21005_v26 = vpop.f32.mrb[10].mxu1 }
 0x4fd   : > { %v16371_v1 = vpop.f32.mrb[11].mxu1 }
 0x500   : > { %v16107_v55 = vpop.f32.mrb[24].mxu0 }
 0x501   : > { %v16108_v56 = vpop.f32.mrb[25].mxu0 }
 0x502   : > { %v16109_v57 = vadd.f32 %v16108_v56, %v16107_v55  ;;  %v16110_v58 = vpop.f32.mrb[26].mxu0 }
 0x503   : > { %v16111_v59 = vpop.f32.mrb[27].mxu0 }
 0x504   : > { %v2208_v61 = vadd.f32 %v16109_v57, %v2007_v30  ;;  %v16112_v62 = vadd.f32 %v16111_v59, %v16110_v58  ;;  %v14854_v30 = vld [vmem:[#allocation8] ss:$0 sm:$0xff] }
 0x506   : > { %v2211_v19 = vadd.f32 %v16112_v62, %v2010_v33  ;;  %v2711_v62 = vld [vmem:[#allocation2] sm:$0xff] }
 0x508   : > { %v16113_v9 = vpop.f32.mrb[28].mxu0 }
 0x509   : > { %v16114_v2 = vpop.f32.mrb[29].mxu0 }
 0x50a   : > { %v16115_v3 = vadd.f32 %v16114_v2, %v16113_v9  ;;  %v16116_v4 = vpop.f32.mrb[30].mxu0 }
 0x50b   : > { %v16117_v5 = vpop.f32.mrb[31].mxu0 }
 0x50c   : > { %v2216_v6 = vadd.f32 %v16115_v3, %v2015_v37  ;;  %v16118_v7 = vadd.f32 %v16117_v5, %v16116_v4 }
 0x50e   : > { %v2219_v8 = vadd.f32 %v16118_v7, %v2018_v40 }
 0x510   : > { %v16119_v10 = vpop.f32.mrb[32].mxu0 }
 0x511   : > { %v16120_v11 = vpop.f32.mrb[33].mxu0 }
 0x512   : > { %v16121_v12 = vadd.f32 %v16120_v11, %v16119_v10  ;;  %v16122_v13 = vpop.f32.mrb[34].mxu0 }
 0x513   : > { %v16123_v14 = vpop.f32.mrb[35].mxu0 }
 0x514   : > { %v2224_v15 = vadd.f32 %v16121_v12, %v2023_v43  ;;  %v16124_v17 = vadd.f32 %v16123_v14, %v16122_v13 }
 0x516   : > { %v2227_v18 = vadd.f32 %v16124_v17, %v2026_v46 }
 0x520   : > { %v16152_v21 = vpop.f32.mrb[36].mxu0 }
 0x521   : > { %v16153_v23 = vpop.f32.mrb[37].mxu0 }
 0x522   : > { %v16154_v24 = vadd.f32 %v16153_v23, %v16152_v21  ;;  %v16155_v25 = vpop.f32.mrb[38].mxu0 }
 0x523   : > { %v16156_v28 = vpop.f32.mrb[39].mxu0 }
 0x524   : > { %v16518_v20 = vadd.f32 %v16154_v24, %v2208_v61  ;;  %v16157_v29 = vadd.f32 %v16156_v28, %v16155_v25 }
 0x526   : > { %v16519_v31 = vadd.f32 %v16518_v20, %v2608_v48  ;;  %v16522_v32 = vadd.f32 %v16157_v29, %v2211_v19 }
 0x528   : > { %v2643_v33 = vmul.f32 %v16519_v31, %v14853_v27  ;;  %v16523_v34 = vadd.f32 %v16522_v32, %v2611_v49  ;;  %v16158_v36 = vpop.f32.mrb[40].mxu0 }
 0x529   : > { %v16159_v37 = vpop.f32.mrb[41].mxu0 }
 0x52a   : > { %v2655_v16 = vadd.f32 %v14854_v30, %v2643_v33  ;;  %v2644_v39 = vmul.f32 %v16523_v34, %v14853_v27  ;;  %v16160_v40 = vadd.f32 %v16159_v37, %v16158_v36  ;;  %v16161_v41 = vpop.f32.mrb[42].mxu0  ;;  %v17196_v33 = vld [vmem:[#allocation9] sm:$0xff]  }
 0x52b   : > { %v16162_v42 = vpop.f32.mrb[43].mxu0 }
 0x52c   : > { %v2656_v43 = vadd.f32 %v14854_v30, %v2644_v39  ;;  %v16526_v44 = vadd.f32 %v16160_v40, %v2216_v6  ;;  %v16163_v45 = vadd.f32 %v16162_v42, %v16161_v41  ;;  %v2661_v47 = vmax.f32 %v2655_v16, 0.0  ;;  %v2717_v40 = vld [vmem:[#allocation2 + $0x40] sm:$0x7f]  ;;  %v17197_v42 = vld [vmem:[#allocation9 + $0x8] sm:$0xff]  }
 0x52e   : > { %v2662_v48 = vmax.f32 %v2656_v43, 0.0  ;;  %v16527_v22 = vadd.f32 %v16526_v44, %v2616_v51  ;;  %v16530_v49 = vadd.f32 %v16163_v45, %v2219_v8 }
 0x530   : > { %v2679_v50 = vpack.c.bf16 %v2662_v48, %v2661_v47  ;;  %v2645_v52 = vmul.f32 %v16527_v22, %v14853_v27  ;;  %v16531_v54 = vadd.f32 %v16530_v49, %v2619_v53  ;;  %v16164_v55 = vpop.f32.mrb[44].mxu0  ;;  %v17198_v22 = vld [vmem:[#allocation9 + $0x10] sm:$0xff]   ;;  %v17199_v49 = vld [vmem:[#allocation9 + $0x18] sm:$0xff]  }
 0x531   : > { %v16165_v56 = vpop.f32.mrb[45].mxu0 }
 0x532   : > { %v2683_v57 = vshrl.u32 %v2679_v50, 16  ;;  %v2657_v58 = vadd.f32 %v14854_v30, %v2645_v52  ;;  %v2646_v59 = vmul.f32 %v16531_v54, %v14853_v27  ;;  %v16167_v61 = vpop.f32.mrb[46].mxu0  ;;  %v16166_v63 = vadd.f32 %v16165_v56, %v16164_v55  ;;  %v17200_v55 = vld [vmem:[#allocation9 + $0x20] sm:$0xff]  }
 0x533   : > { %v16168_v19 = vpop.f32.mrb[47].mxu0  ;;  %v2686_v9 = vshll.u32 %v2679_v50, 16 }
 0x534   : > { %v2685_v1 = vrot.slane %v2683_v57, 7  ;;  %v2658_v2 = vadd.f32 %v14854_v30, %v2646_v59  ;;  %v16169_v3 = vadd.f32 %v16168_v19, %v16167_v61  ;;  %v16534_v4 = vadd.f32 %v16166_v63, %v2224_v15  ;;  %v17201_v59 = vld [vmem:[#allocation9 + $0x28] sm:$0xff]   ;;  %v17202_v61 = vld [vmem:[#allocation9 + $0x30] sm:$0xff]   ;;  %v17203_v19 = vld [vmem:[#allocation9 + $0x38] sm:$0xff]  }
 0x535   : > { %v2663_v51 = vmax.f32 %v2657_v58, 0.0 }
 0x536   : > { %v2688_v5 = vor.u32 %v2686_v9, %v2685_v1  ;;  %v2664_v6 = vmax.f32 %v2658_v2, 0.0  ;;  %v16538_v7 = vadd.f32 %v16169_v3, %v2227_v18  ;;  %v16535_v53 = vadd.f32 %v16534_v4, %v21003_v60  ;;  %v17205_v9 = vld [vmem:[#allocation9 + $0x88] sm:$0xff]   ;;  %v17206_v2 = vld [vmem:[#allocation9 + $0x90] sm:$0xff]   ;;  %v17207_v3 = vld [vmem:[#allocation9 + $0x98] sm:$0xff]  }
 0x537   : > { %v17208_v4 = vld [vmem:[#allocation9 + $0xa0] sm:$0xff]  }
 0x538   : > { %v21014_v8 = vsel %vm21007_vm14, %v2688_v5, %v2711_v62  ;;  %v2680_v10 = vpack.c.bf16 %v2664_v6, %v2663_v51  ;;  %v16539_v11 = vadd.f32 %v16538_v7, %v21005_v26  ;;  %v2647_v12 = vmul.f32 %v16535_v53, %v14853_v27  ;;  %v17209_v51 = vld [vmem:[#allocation9 + $0xa8] sm:$0xff]   ;;  %v17210_v6 = vld [vmem:[#allocation9 + $0xb0] sm:$0xff]   ;;  %v17211_v53 = vld [vmem:[#allocation9 + $0xb8] sm:$0xff]  }
 0x539   : > { %2713 = vst [vmem:[#allocation2] sm:$0xff] %v21014_v8  ;;  %v2762_v15 = vshll.u32 %v21014_v8, 16  ;;  %v2760_v31 = vshrl.u32 %v21014_v8, 16 }
 0x53a   : > { %v2690_v13 = vshrl.u32 %v2680_v10, 16  ;;  %v2648_v14 = vmul.f32 %v16539_v11, %v14853_v27  ;;  %v2659_v17 = vadd.f32 %v14854_v30, %v2647_v12  ;;  %v2693_v23 = vshll.u32 %v2680_v10, 16 }
 0x53b   : > { %v2764_v28 = vrot.slane %v2762_v15, 1  ;;  %v17214_v15 = vld [vmem:[#allocation14 + $0x50] sm:$0xff]  }
 0x53c   : > { %v2692_v21 = vrot.slane %v2690_v13, 7  ;;  %v2660_v18 = vadd.f32 %v14854_v30, %v2648_v14  ;;  %v2665_v24 = vmax.f32 %v2659_v17, 0.0  ;;  %v17212_v14 = vld [vmem:[#allocation14 + $0x40] sm:$0xff]   ;;  %v17213_v17 = vld [vmem:[#allocation14 + $0x48] sm:$0xff]  }
 0x53d   : > { %v2765_v36 = vor.u32 %v2764_v28, %v2760_v31  ;;  %16456 = vmatprep.subr.bf16.mxu1 %v17212_v14  ;;  %v21088_v31 = vld [vmem:[#allocation12] ss:$0 sm:$0xff] }
 0x53e   : > { %v2695_v60 = vor.u32 %v2693_v23, %v2692_v21  ;;  %v2666_v25 = vmax.f32 %v2660_v18, 0.0  ;;  %16457 = vmatpush3.bf16.msra.mxu1 %v17212_v14  ;;  %v17216_v23 = vld [vmem:[#allocation14 + $0x60] sm:$0xff]   ;;  %v17217_v18 = vld [vmem:[#allocation14 + $0x68] sm:$0xff]  }
 0x53f   : > { %16458 = vmatprep.subr.bf16.mxu1 %v17213_v17 }
 0x540   : > { %v21020_v20 = vsel %vm2668_vm3, %v2685_v1, %v2695_v60  ;;  %v2681_v26 = vpack.c.bf16 %v2666_v25, %v2665_v24  ;;  %v3441_v29 = vld [vmem:[#allocation2] sm:$0x1]  ;;  %v17204_v1 = vld [vmem:[#allocation9 + $0x80] sm:$0xff]   ;;  %v20027_v25 = vmov 1983009808  }
 0x541   : > { %2714 = vst [vmem:[#allocation2 + $0x20] sm:$0xff] %v21020_v20  ;;  %v2767_v30 = vshll.u32 %v21020_v20, 16  ;;  %v3442_v32 = vsel %vm20865_vm4, 0, %v3441_v29  ;;  %v2771_v52 = vshrl.u32 %v21020_v20, 16  ;;  %v2995_v7 = vld [vmem:[#allocation2] sm:$0xfe]  ;;  %v3173_v28 = vunpack.c.l.s4 %v20027_v25 }
 0x542   : > { %v2698_v34 = vshrl.u32 %v2681_v26, 16  ;;  %3443 = vst [vmem:[#allocation2] sm:$0x1] %v3442_v32  ;;  %v2701_v39 = vshll.u32 %v2681_v26, 16  ;;  %v3017_v10 = vrot.slane %v21020_v20, 1  ;;  %16459 = vmatpush3.bf16.msra.mxu1 %v17213_v17  ;;  %v17219_v60 = vld [vmem:[#allocation14 + $0x78] sm:$0xff]  }
 0x543   : > { %v2769_v37 = vrot.slane %v2767_v30, 1  ;;  %16460 = vmatprep.subr.bf16.mxu1 %v17214_v15  ;;  %v21081_v24 = vld [vmem:[#allocation14] sm:$0xff]   ;;  %v21084_v26 = vld [vmem:[#allocation11] ss:$0 sm:$0xff]  ;;  %v3174_v29 = vunpack.c.0.s8 %v3173_v28 }
 0x544   : > { %v2700_v16 = vrot.slane %v2698_v34, 7 }
 0x545   : > { %v2770_v41 = vsel %vm1692_vm1, %v2765_v36, %v2769_v37  ;;  %v2773_v56 = vor.u32 %v2771_v52, %v2769_v37 }
 0x546   : > { %v2703_v43 = vor.u32 %v2701_v39, %v2700_v16  ;;  %16389 = vmatmul.mubr.bf16.vlgmr.msra.gmra.mrb[48].mxu0 %v2770_v41  ;;  %16461 = vmatpush3.bf16.msra.mxu1 %v17214_v15 }
 0x547   : > { %16401 = vmatpush3.bf16.msra.mxu0 %v17196_v33  ;;  %16392 = vmatprep.mubr.msk.bf16.mxu0 %vm20026_vm0, %v20025_v0 }
 0x548   : > { %v3447_v44 = vld [vmem:[#allocation2 + $0x20] sm:$0x8]  ;;  %v2704_v45 = vsel %vm2668_vm3, %v2692_v21, %v2703_v43  ;;  %16402 = vmatprep.subr.bf16.mxu0 %v20025_v0 }
 0x549   : > { %v3448_v47 = vsel %vm20925_vm10, 0, %v3447_v44  ;;  %v2718_v48 = vsel %vm21024_vm2, %v2704_v45, %v2717_v40  ;;  %v17215_v21 = vld [vmem:[#allocation14 + $0x58] sm:$0xff]   ;;  %vm3550_vm2 = vsmask.f32 3328 }
 0x54a   : > { %3449 = vst [vmem:[#allocation2 + $0x20] sm:$0x8] %v3448_v47  ;;  %2719 = vst [vmem:[#allocation2 + $0x40] sm:$0x7f] %v2718_v48  ;;  %16462 = vmatprep.subr.bf16.mxu1 %v17215_v21 }
 0x54b   : > { %16403 = vmatpush3.bf16.msra.mxu0 %v17197_v42  ;;  %16463 = vmatpush3.bf16.msra.mxu1 %v17215_v21 }
 0x54c   : > { %16404 = vmatprep.subr.bf16.mxu0 %v20025_v0  ;;  %16464 = vmatprep.subr.bf16.mxu1 %v17216_v23 }
 0x54f   : > { %16405 = vmatpush3.bf16.msra.mxu0 %v17198_v22  ;;  %16465 = vmatpush3.bf16.msra.mxu1 %v17216_v23 }
 0x550   : > { %16406 = vmatprep.subr.bf16.mxu0 %v20025_v0  ;;  %16466 = vmatprep.subr.bf16.mxu1 %v17217_v18 }
 0x551   : > { %v21043_v50 = vld [vmem:[#allocation2 + $0x40] sm:$0x7f] }
 0x552   : > { %v2775_v54 = vshll.u32 %v21043_v50, 16  ;;  %v2779_v62 = vshrl.u32 %v21043_v50, 16  ;;  %v2724_v5 = vld [vmem:[#allocation2 + $0x40] sm:$0x3f]  ;;  %v3019_v12 = vrot.slane %v21043_v50, 1 }
 0x553   : > { %16407 = vmatpush3.bf16.msra.mxu0 %v17199_v49  ;;  %16467 = vmatpush3.bf16.msra.mxu1 %v17217_v18 }
 0x554   : > { %v2777_v57 = vrot.slane %v2775_v54, 1  ;;  %16408 = vmatprep.subr.bf16.mxu0 %v20025_v0  ;;  %v3020_v13 = vsel %vm2348_vm11, %v3017_v10, %v3019_v12 }
 0x556   : > { %v2778_v58 = vsel %vm1692_vm1, %v2773_v56, %v2777_v57  ;;  %v2781_v63 = vor.u32 %v2779_v62, %v2777_v57 }
 0x557   : > { %16393 = vmatmul.mubr.bf16.gmra.mrb[52].mxu0 %v2778_v58 }
 0x558   : > { %16396 = vmatprep.mubr.msk.bf16.mxu0 %vm20026_vm0, %v20025_v0  ;;  %16409 = vmatpush3.bf16.msra.mxu0 %v17200_v55 }
 0x559   : > { %16410 = vmatprep.subr.bf16.mxu0 %v20025_v0 }
 0x55c   : > { %16411 = vmatpush3.bf16.msra.mxu0 %v17201_v59 }
 0x55d   : > { %16412 = vmatprep.subr.bf16.mxu0 %v20025_v0 }
 0x55f   : > { %16397 = vmatmul.mubr.bf16.gmra.mrb[56].mxu0 %v2781_v63 }
 0x560   : > { %16413 = vmatpush3.bf16.msra.mxu0 %v17202_v61  ;;  %16416 = vmatprep.mubr.msk.bf16.mxu0 %vm20026_vm0, %v20025_v0 }
 0x561   : > { %16414 = vmatprep.subr.bf16.mxu0 %v20025_v0 }
 0x564   : > { %16415 = vmatpush3.bf16.msra.mxu0 %v17203_v19 }
 0x565   : > { %16428 = vmatprep.subr.bf16.mxu0 %v20025_v0 }
 0x567   : > { %16417 = vmatmul.mubr.bf16.vlgmr.msra.gmra.mrb[48].mxu0 %v21014_v8  ;;  %v3016_v8 = vrot.slane %v2995_v7, 1 }
 0x568   : > { %16429 = vmatpush3.bf16.msra.mxu0 %v17204_v1  ;;  %16420 = vmatprep.mubr.msk.bf16.mxu0 %vm20026_vm0, %v20025_v0 }
 0x569   : > { %16430 = vmatprep.subr.bf16.mxu0 %v20025_v0  ;;  %v3018_v11 = vsel %vm2348_vm11, %v3016_v8, %v3017_v10 }
 0x56c   : > { %16431 = vmatpush3.bf16.msra.mxu0 %v17205_v9 }
 0x56d   : > { %16432 = vmatprep.subr.bf16.mxu0 %v20025_v0 }
 0x56f   : > { %16421 = vmatmul.mubr.bf16.gmra.mrb[52].mxu0 %v21020_v20  ;;  %v3175_v20 = vlaneseq }
 0x570   : > { %16433 = vmatpush3.bf16.msra.mxu0 %v17206_v2  ;;  %16424 = vmatprep.mubr.msk.bf16.mxu0 %vm20026_vm0, %v20025_v0 }
 0x571   : > { %16434 = vmatprep.subr.bf16.mxu0 %v20025_v0  ;;  %v21086_v27 = vshrl.u32 %v3175_v20, 7 }
 0x573   : > { %v21093_v37 = vsub.s32 %v3174_v29, %v21086_v27 }
 0x574   : > { %16435 = vmatpush3.bf16.msra.mxu0 %v17207_v3 }
 0x575   : > { %16436 = vmatprep.subr.bf16.mxu0 %v20025_v0 }
 0x577   : > { %16425 = vmatmul.mubr.bf16.gmra.mrb[56].mxu0 %v2724_v5 }
 0x578   : > { %16437 = vmatpush3.bf16.msra.mxu0 %v17208_v4  ;;  %16444 = vmatprep.mubr.msk.bf16.mxu0 %vm20026_vm0, %v20025_v0 }
 0x579   : > { %16438 = vmatprep.subr.bf16.mxu0 %v20025_v0 }
 0x57c   : > { %16439 = vmatpush3.bf16.msra.mxu0 %v17209_v51 }
 0x57d   : > { %16440 = vmatprep.subr.bf16.mxu0 %v20025_v0 }
 0x580   : > { %16441 = vmatpush3.bf16.msra.mxu0 %v17210_v6 }
 0x581   : > { %16442 = vmatprep.subr.bf16.mxu0 %v20025_v0 }
 0x584   : > { %16443 = vmatpush3.bf16.msra.mxu0 %v17211_v53 }
 0x587   : > { %16445 = vmatmul.mubr.bf16.vlgmr.msra.gmra.mrb[48].mxu0 %v3018_v11 }
 0x588   : > { %16448 = vmatprep.mubr.msk.bf16.mxu0 %vm20026_vm0, %v20025_v0 }
 0x58f   : > { %16449 = vmatmul.mubr.bf16.gmra.mrb[52].mxu0 %v3020_v13 }
 0x590   : > { %16452 = vmatprep.mubr.msk.bf16.mxu0 %vm20026_vm0, %v20025_v0  ;;  %v17218_v0 = vld [vmem:[#allocation14 + $0x70] sm:$0xff]   ;;  %vm3286_vm0 = vcmask 1041408  }
 0x591   : > { %16468 = vmatprep.subr.bf16.mxu1 %v17218_v0 }
 0x592   : > { %16469 = vmatpush3.bf16.msra.mxu1 %v17218_v0 }
 0x593   : > { %16470 = vmatprep.subr.bf16.mxu1 %v17219_v60 }
 0x596   : > { %16471 = vmatpush3.bf16.msra.mxu1 %v17219_v60 }
 0x597   : > { %16453 = vmatmul.mubr.bf16.gmra.mrb[56].mxu0 %v3019_v12  ;;  %16476 = vmatprep.subr.bf16.mxu1 %v21081_v24 }
 0x65a   : > { %v3106_v30 = vpop.f32.mrb[48].mxu0 }
 0x65b   : > { %v3141_v32 = vmul.f32 %v21084_v26, %v3106_v30  ;;  %v16446_v33 = vpop.f32.mrb[49].mxu0 }
 0x65c   : > { %v3109_v34 = vpop.f32.mrb[50].mxu0 }
 0x65d   : > { %v3153_v36 = vadd.f32 %v21088_v31, %v3141_v32  ;;  %v3142_v16 = vmul.f32 %v21084_v26, %v3109_v34  ;;  %v16447_v39 = vpop.f32.mrb[51].mxu0 }
 0x65f   : > { %v3159_v40 = vmax.f32 %v3153_v36, 0.0  ;;  %v3154_v41 = vadd.f32 %v21088_v31, %v3142_v16 }
 0x661   : > { %v3171_v42 = vcombine.high %v3159_v40, %v3159_v40  ;;  %v3178_v43 = vrot.slane %v3159_v40, %v21093_v37  ;;  %v3160_v44 = vmax.f32 %v3154_v41, 0.0 }
 0x662   : > { %v3114_v45 = vpop.f32.mrb[52].mxu0 }
 0x663   : > { %v3185_v47 = vrot.slane %v3171_v42, %v21093_v37  ;;  %v3186_v48 = vcombine.high %v3178_v43, %v3178_v43  ;;  %v3287_v22 = vsel %vm3286_vm0, %v3178_v43, -inf  ;;  %v3188_v49 = vcombine.high %v3160_v44, %v3160_v44  ;;  %v16450_v50 = vpop.f32.mrb[53].mxu0 }
 0x664   : > { %v3288_v52 = vrot.slane %v3287_v22, 4  ;;  %v3195_v54 = vrot.slane %v3160_v44, %v21093_v37  ;;  %v21102_v55 = vmul.f32 %v21084_v26, %v3114_v45  ;;  %v21104_v56 = vpop.f32.mrb[54].mxu0 }
 0x665   : > { %v3187_v57 = vcombine.high %v3185_v47, %v3185_v47  ;;  %v3294_v58 = vsel %vm3286_vm0, %v3186_v48, -inf  ;;  %v3301_v59 = vsel %vm3286_vm0, %v3185_v47, -inf  ;;  %v3202_v61 = vrot.slane %v3188_v49, %v21093_v37  ;;  %v16451_v62 = vpop.f32.mrb[55].mxu0 }
 0x666   : > { %v3289_v63 = vmax.f32 %v3287_v22, %v3288_v52  ;;  %v3295_v19 = vrot.slane %v3294_v58, 4  ;;  %v3302_v1 = vrot.slane %v3301_v59, 4  ;;  %v3203_v9 = vcombine.high %v3195_v54, %v3195_v54 }
 0x667   : > { %v3308_v2 = vsel %vm3286_vm0, %v3187_v57, -inf  ;;  %v3204_v3 = vcombine.high %v3202_v61, %v3202_v61  ;;  %v3315_v4 = vsel %vm3286_vm0, %v3195_v54, -inf  ;;  %v3329_v5 = vsel %vm3286_vm0, %v3202_v61, -inf }
 0x668   : > { %v3290_v51 = vrot.slane %v3289_v63, 2  ;;  %v3296_v6 = vmax.f32 %v3294_v58, %v3295_v19  ;;  %v3303_v7 = vmax.f32 %v3301_v59, %v3302_v1  ;;  %v3309_v53 = vrot.slane %v3308_v2, 4 }
 0x669   : > { %v3316_v8 = vrot.slane %v3315_v4, 4  ;;  %v3322_v10 = vsel %vm3286_vm0, %v3203_v9, -inf  ;;  %v3330_v11 = vrot.slane %v3329_v5, 4  ;;  %v3336_v12 = vsel %vm3286_vm0, %v3204_v3, -inf }
 0x66a   : > { %v3291_v13 = vmax.f32 %v3289_v63, %v3290_v51  ;;  %v3297_v14 = vrot.slane %v3296_v6, 2  ;;  %v3304_v17 = vrot.slane %v3303_v7, 2  ;;  %v3310_v15 = vmax.f32 %v3308_v2, %v3309_v53  ;;  %v21114_v21 = vpop.f32.mrb[56].mxu0 }
 0x66b   : > { %v3317_v23 = vmax.f32 %v3315_v4, %v3316_v8  ;;  %v3323_v18 = vrot.slane %v3322_v10, 4  ;;  %v3331_v0 = vmax.f32 %v3329_v5, %v3330_v11  ;;  %v3337_v60 = vrot.slane %v3336_v12, 4  ;;  %v16454_v25 = vpop.f32.mrb[57].mxu0 }
 0x66c   : > { %v3292_v28 = vrot.slane %v3291_v13, 1  ;;  %v3298_v20 = vmax.f32 %v3296_v6, %v3297_v14  ;;  %v3305_v29 = vmax.f32 %v3303_v7, %v3304_v17  ;;  %v3311_v30 = vrot.slane %v3310_v15, 2  ;;  %v21116_v32 = vpop.f32.mrb[58].mxu0 }
 0x66d   : > { %v3318_v33 = vrot.slane %v3317_v23, 2  ;;  %v3324_v34 = vmax.f32 %v3322_v10, %v3323_v18  ;;  %v3332_v36 = vrot.slane %v3331_v0, 2  ;;  %v3338_v16 = vmax.f32 %v3336_v12, %v3337_v60  ;;  %v16455_v39 = vpop.f32.mrb[59].mxu0 }
 0x66e   : > { %v3293_v40 = vmax.f32 %v3291_v13, %v3292_v28  ;;  %v3299_v41 = vrot.slane %v3298_v20, 1  ;;  %v3306_v42 = vrot.slane %v3305_v29, 1  ;;  %v3312_v43 = vmax.f32 %v3310_v15, %v3311_v30 }
 0x66f   : > { %v3319_v44 = vmax.f32 %v3317_v23, %v3318_v33  ;;  %v3325_v45 = vrot.slane %v3324_v34, 2  ;;  %v3333_v47 = vmax.f32 %v3331_v0, %v3332_v36  ;;  %v3339_v48 = vrot.slane %v3338_v16, 2 }
 0x670   : > { %v3300_v22 = vmax.f32 %v3298_v20, %v3299_v41  ;;  %v3307_v49 = vmax.f32 %v3305_v29, %v3306_v42  ;;  %v3313_v50 = vrot.slane %v3312_v43, 1  ;;  %v3450_v52 = vpack.c.bf16 %v3293_v40, %v3293_v40 }
 0x671   : > { %v3320_v54 = vrot.slane %v3319_v44, 1  ;;  %v3326_v57 = vmax.f32 %v3324_v34, %v3325_v45  ;;  %v3334_v58 = vrot.slane %v3333_v47, 1  ;;  %v3340_v59 = vmax.f32 %v3338_v16, %v3339_v48 }
 0x672   : > { %v3314_v61 = vmax.f32 %v3312_v43, %v3313_v50  ;;  %v3451_v62 = vpack.c.bf16 %v3300_v22, %v3300_v22  ;;  %v3452_v63 = vpack.c.bf16 %v3307_v49, %v3307_v49  ;;  %v3494_v19 = vunpack.c.l.b16 %v3450_v52 }
 0x673   : > { %v3321_v1 = vmax.f32 %v3319_v44, %v3320_v54  ;;  %v3327_v9 = vrot.slane %v3326_v57, 1  ;;  %v3335_v2 = vmax.f32 %v3333_v47, %v3334_v58  ;;  %v3341_v3 = vrot.slane %v3340_v59, 1 }
 0x674   : > { %v3453_v4 = vpack.c.bf16 %v3314_v61, %v3314_v61  ;;  %v3495_v5 = vunpack.c.l.b16 %v3451_v62  ;;  %v3496_v51 = vunpack.c.l.b16 %v3452_v63  ;;  %v3155_v6 = vadd.f32 %v21088_v31, %v21102_v55 }
 0x675   : > { %v3328_v7 = vmax.f32 %v3326_v57, %v3327_v9  ;;  %v3342_v53 = vmax.f32 %v3340_v59, %v3341_v3  ;;  %v3454_v8 = vpack.c.bf16 %v3321_v1, %v3321_v1  ;;  %v3456_v10 = vpack.c.bf16 %v3335_v2, %v3335_v2 }
 0x676   : > { %v3497_v11 = vunpack.c.l.b16 %v3453_v4  ;;  %v3517_v12 = vsel %vm3516_vm5, %v3495_v5, %v3494_v19  ;;  %v3161_v13 = vmax.f32 %v3155_v6, 0.0  ;;  %v3144_v14 = vmul.f32 %v21084_v26, %v21104_v56 }
 0x677   : > { %v3519_v17 = vsel %vm3444_vm9, %v3496_v51, %v3517_v12  ;;  %v3455_v15 = vpack.c.bf16 %v3328_v7, %v3328_v7  ;;  %v3498_v23 = vunpack.c.l.b16 %v3454_v8  ;;  %v3457_v18 = vpack.c.bf16 %v3342_v53, %v3342_v53 }
 0x678   : > { %v3521_v0 = vsel %vm3520_vm7, %v3497_v11, %v3519_v17  ;;  %v3205_v55 = vcombine.high %v3161_v13, %v3161_v13  ;;  %v3212_v60 = vrot.slane %v3161_v13, %v21093_v37  ;;  %v3500_v28 = vunpack.c.l.b16 %v3456_v10 }
 0x679   : > { %v3499_v25 = vunpack.c.l.b16 %v3455_v15  ;;  %v3523_v20 = vsel %vm3522_vm8, %v3498_v23, %v3521_v0  ;;  %v3156_v29 = vadd.f32 %v21088_v31, %v3144_v14  ;;  %v3145_v34 = vmul.f32 %v21084_v26, %v21114_v21 }
 0x67a   : > { %v3219_v30 = vrot.slane %v3205_v55, %v21093_v37  ;;  %v3220_v56 = vcombine.high %v3212_v60, %v3212_v60  ;;  %v3343_v33 = vsel %vm3286_vm0, %v3212_v60, -inf  ;;  %v3501_v22 = vunpack.c.l.b16 %v3457_v18 }
 0x67b   : > { %v3525_v36 = vsel %vm2673_vm6, %v3499_v25, %v3523_v20  ;;  %v3344_v16 = vrot.slane %v3343_v33, 4  ;;  %v3162_v39 = vmax.f32 %v3156_v29, 0.0  ;;  %v3157_v50 = vadd.f32 %v21088_v31, %v3145_v34 }
 0x67c   : > { %v21134_v40 = vsel %vm3526_vm12, %v3500_v28, %v3525_v36  ;;  %v3221_v41 = vcombine.high %v3219_v30, %v3219_v30  ;;  %v3350_v42 = vsel %vm3286_vm0, %v3220_v56, -inf  ;;  %v3357_v43 = vsel %vm3286_vm0, %v3219_v30, -inf }
 0x67d   : > { %v3345_v44 = vmax.f32 %v3343_v33, %v3344_v16  ;;  %v3351_v45 = vrot.slane %v3350_v42, 4  ;;  %v3358_v47 = vrot.slane %v3357_v43, 4  ;;  %v3222_v48 = vcombine.high %v3162_v39, %v3162_v39 }
 0x67e   : > { %v3364_v49 = vsel %vm3286_vm0, %v3221_v41, -inf  ;;  %v3229_v21 = vrot.slane %v3162_v39, %v21093_v37  ;;  %v3163_v63 = vmax.f32 %v3157_v50, 0.0 }
 0x67f   : > { %v3346_v52 = vrot.slane %v3345_v44, 2  ;;  %v3352_v54 = vmax.f32 %v3350_v42, %v3351_v45  ;;  %v3359_v57 = vmax.f32 %v3357_v43, %v3358_v47  ;;  %v3365_v58 = vrot.slane %v3364_v49, 4 }
 0x680   : > { %v3236_v59 = vrot.slane %v3222_v48, %v21093_v37  ;;  %v3237_v61 = vcombine.high %v3229_v21, %v3229_v21  ;;  %v3371_v62 = vsel %vm3286_vm0, %v3229_v21, -inf }
 0x681   : > { %v3347_v19 = vmax.f32 %v3345_v44, %v3346_v52  ;;  %v3353_v1 = vrot.slane %v3352_v54, 2  ;;  %v3360_v9 = vrot.slane %v3359_v57, 2  ;;  %v3366_v2 = vmax.f32 %v3364_v49, %v3365_v58 }
 0x682   : > { %v3238_v3 = vcombine.high %v3236_v59, %v3236_v59  ;;  %v3372_v4 = vrot.slane %v3371_v62, 4  ;;  %v3378_v5 = vsel %vm3286_vm0, %v3237_v61, -inf  ;;  %v3385_v51 = vsel %vm3286_vm0, %v3236_v59, -inf }
 0x683   : > { %v3348_v6 = vrot.slane %v3347_v19, 1  ;;  %v3354_v7 = vmax.f32 %v3352_v54, %v3353_v1  ;;  %v3361_v53 = vmax.f32 %v3359_v57, %v3360_v9  ;;  %v3367_v8 = vrot.slane %v3366_v2, 2 }
 0x684   : > { %v3373_v10 = vmax.f32 %v3371_v62, %v3372_v4  ;;  %v3379_v11 = vrot.slane %v3378_v5, 4  ;;  %v3386_v12 = vrot.slane %v3385_v51, 4  ;;  %v3392_v13 = vsel %vm3286_vm0, %v3238_v3, -inf }
 0x685   : > { %v3349_v14 = vmax.f32 %v3347_v19, %v3348_v6  ;;  %v3355_v17 = vrot.slane %v3354_v7, 1  ;;  %v3362_v15 = vrot.slane %v3361_v53, 1  ;;  %v3368_v23 = vmax.f32 %v3366_v2, %v3367_v8 }
 0x686   : > { %v3374_v18 = vrot.slane %v3373_v10, 2  ;;  %v3380_v0 = vmax.f32 %v3378_v5, %v3379_v11  ;;  %v3387_v55 = vmax.f32 %v3385_v51, %v3386_v12  ;;  %v3393_v60 = vrot.slane %v3392_v13, 4 }
 0x687   : > { %v3356_v25 = vmax.f32 %v3354_v7, %v3355_v17  ;;  %v3363_v28 = vmax.f32 %v3361_v53, %v3362_v15  ;;  %v3369_v20 = vrot.slane %v3368_v23, 1  ;;  %v3458_v29 = vpack.c.bf16 %v3349_v14, %v3349_v14 }
 0x688   : > { %v3375_v30 = vmax.f32 %v3373_v10, %v3374_v18  ;;  %v3381_v56 = vrot.slane %v3380_v0, 2  ;;  %v3388_v33 = vrot.slane %v3387_v55, 2  ;;  %v3394_v34 = vmax.f32 %v3392_v13, %v3393_v60 }
 0x689   : > { %v3370_v36 = vmax.f32 %v3368_v23, %v3369_v20  ;;  %v3459_v16 = vpack.c.bf16 %v3356_v25, %v3356_v25  ;;  %v3460_v39 = vpack.c.bf16 %v3363_v28, %v3363_v28  ;;  %v3502_v41 = vunpack.c.l.b16 %v3458_v29 }
 0x68a   : > { %v3376_v42 = vrot.slane %v3375_v30, 1  ;;  %v3382_v43 = vmax.f32 %v3380_v0, %v3381_v56  ;;  %v3389_v44 = vmax.f32 %v3387_v55, %v3388_v33  ;;  %v3395_v45 = vrot.slane %v3394_v34, 2  ;;  %v3546_v33 = vld [vmem:[#allocation2] sm:$0xff] }
 0x68b   : > { %v3461_v47 = vpack.c.bf16 %v3370_v36, %v3370_v36  ;;  %v3503_v48 = vunpack.c.l.b16 %v3459_v16  ;;  %v3504_v49 = vunpack.c.l.b16 %v3460_v39  ;;  %v3529_v21 = vsel %vm3528_vm13, %v3502_v41, %v3501_v22 }
 0x68c   : > { %v3377_v50 = vmax.f32 %v3375_v30, %v3376_v42  ;;  %v3383_v52 = vrot.slane %v3382_v43, 1  ;;  %v3390_v54 = vrot.slane %v3389_v44, 1  ;;  %v3146_v57 = vmul.f32 %v21084_v26, %v21116_v32 }
 0x68d   : > { %v3505_v58 = vunpack.c.l.b16 %v3461_v47  ;;  %v3530_v59 = vsel %vm3516_vm5, %v3503_v48, %v3529_v21  ;;  %v3239_v61 = vcombine.high %v3163_v63, %v3163_v63  ;;  %v3246_v62 = vrot.slane %v3163_v63, %v21093_v37 }
 0x68e   : > { %v3531_v19 = vsel %vm3444_vm9, %v3504_v49, %v3530_v59  ;;  %v3384_v1 = vmax.f32 %v3382_v43, %v3383_v52  ;;  %v3391_v9 = vmax.f32 %v3389_v44, %v3390_v54  ;;  %v3396_v2 = vmax.f32 %v3394_v34, %v3395_v45 }
 0x68f   : > { %v3462_v3 = vpack.c.bf16 %v3377_v50, %v3377_v50  ;;  %v3532_v22 = vsel %vm3520_vm7, %v3505_v58, %v3531_v19  ;;  %v3253_v4 = vrot.slane %v3239_v61, %v21093_v37  ;;  %v3254_v5 = vcombine.high %v3246_v62, %v3246_v62 }
 0x690   : > { %v3463_v51 = vpack.c.bf16 %v3384_v1, %v3384_v1  ;;  %v3464_v6 = vpack.c.bf16 %v3391_v9, %v3391_v9  ;;  %v3399_v26 = vsel %vm3286_vm0, %v3246_v62, -inf  ;;  %v3158_v32 = vadd.f32 %v21088_v31, %v3146_v57 }
 0x691   : > { %v3506_v7 = vunpack.c.l.b16 %v3462_v3  ;;  %v3255_v53 = vcombine.high %v3253_v4, %v3253_v4  ;;  %v3400_v63 = vrot.slane %v3399_v26, 4  ;;  %v3406_v8 = vsel %vm3286_vm0, %v3254_v5, -inf }
 0x692   : > { %v3397_v10 = vrot.slane %v3396_v2, 1  ;;  %v3507_v11 = vunpack.c.l.b16 %v3463_v51  ;;  %v3508_v12 = vunpack.c.l.b16 %v3464_v6  ;;  %v3407_v13 = vrot.slane %v3406_v8, 4 }
 0x693   : > { %v3533_v14 = vsel %vm3522_vm8, %v3506_v7, %v3532_v22  ;;  %v3401_v17 = vmax.f32 %v3399_v26, %v3400_v63  ;;  %v3413_v15 = vsel %vm3286_vm0, %v3253_v4, -inf  ;;  %v3420_v23 = vsel %vm3286_vm0, %v3255_v53, -inf }
 0x694   : > { %v3534_v18 = vsel %vm2673_vm6, %v3507_v11, %v3533_v14  ;;  %v3408_v0 = vmax.f32 %v3406_v8, %v3407_v13  ;;  %v3414_v31 = vrot.slane %v3413_v15, 4  ;;  %v3421_v25 = vrot.slane %v3420_v23, 4 }
 0x695   : > { %v3535_v55 = vsel %vm3526_vm12, %v3508_v12, %v3534_v18  ;;  %v3402_v60 = vrot.slane %v3401_v17, 2  ;;  %v3164_v28 = vmax.f32 %v3158_v32, 0.0  ;;  %v3398_v56 = vmax.f32 %v3396_v2, %v3397_v10 }
 0x696   : > { %v3542_v20 = vpack.c.b16 %v3535_v55, %v21134_v40  ;;  %v3409_v29 = vrot.slane %v3408_v0, 2  ;;  %v3415_v30 = vmax.f32 %v3413_v15, %v3414_v31  ;;  %v3422_v36 = vmax.f32 %v3420_v23, %v3421_v25 }
 0x697   : > { %v3403_v34 = vmax.f32 %v3401_v17, %v3402_v60  ;;  %v3262_v16 = vrot.slane %v3164_v28, %v21093_v37  ;;  %v3465_v21 = vpack.c.bf16 %v3398_v56, %v3398_v56 }
 0x698   : > { %v21166_v39 = vsel %vm21007_vm14, %v3542_v20, %v3546_v33  ;;  %v3410_v41 = vmax.f32 %v3408_v0, %v3409_v29  ;;  %v3416_v42 = vrot.slane %v3415_v30, 2  ;;  %v3423_v44 = vrot.slane %v3422_v36, 2 }
 0x699   : > { %3548 = vst [vmem:[#allocation2] sm:$0xff] %v21166_v39  ;;  %v3404_v43 = vrot.slane %v3403_v34, 1  ;;  %v3263_v45 = vcombine.high %v3262_v16, %v3262_v16  ;;  %v3427_v40 = vsel %vm3286_vm0, %v3262_v16, -inf  ;;  %v3509_v3 = vunpack.c.l.b16 %v3465_v21  ;;  %v17222_v21 = vld [vmem:[#allocation14 + $0x10] sm:$0xff]  }
 0x69a   : > { %v3411_v47 = vrot.slane %v3410_v41, 1  ;;  %v3417_v48 = vmax.f32 %v3415_v30, %v3416_v42  ;;  %v3428_v49 = vrot.slane %v3427_v40, 4  ;;  %v3424_v52 = vmax.f32 %v3422_v36, %v3423_v44  ;;  %v3552_v30 = vld [vmem:[#allocation2 + $0x20] sm:$0xf] }
 0x69b   : > { %v3405_v50 = vmax.f32 %v3403_v34, %v3404_v43  ;;  %v3434_v37 = vsel %vm3286_vm0, %v3263_v45, -inf  ;;  %vm21179_vm0 = vmand %vm3549_vm15, %vm3550_vm2  ;;  %v3596_v33 = vshll.u32 %v21166_v39, 16  ;;  %v3594_v42 = vshrl.u32 %v21166_v39, 16 }
 0x69c   : > { %v3412_v54 = vmax.f32 %v3410_v41, %v3411_v47  ;;  %v3418_v57 = vrot.slane %v3417_v48, 1  ;;  %v3429_v58 = vmax.f32 %v3427_v40, %v3428_v49  ;;  %v3435_v59 = vrot.slane %v3434_v37, 4  ;;  %v17221_v49 = vld [vmem:[#allocation14 + $0x8] sm:$0xff]  }
 0x69d   : > { %v3425_v61 = vrot.slane %v3424_v52, 1  ;;  %v3466_v62 = vpack.c.bf16 %v3405_v50, %v3405_v50  ;;  %v3598_v34 = vrot.slane %v3596_v33, 1  ;;  %v17223_v50 = vld [vmem:[#allocation14 + $0x18] sm:$0xff]  }
 0x69e   : > { %v3419_v19 = vmax.f32 %v3417_v48, %v3418_v57  ;;  %v3467_v1 = vpack.c.bf16 %v3412_v54, %v3412_v54  ;;  %v3430_v9 = vrot.slane %v3429_v58, 2  ;;  %v3436_v2 = vmax.f32 %v3434_v37, %v3435_v59  ;;  %v17225_v37 = vld [vmem:[#allocation14 + $0x28] sm:$0xff]   ;;  %v17226_v54 = vld [vmem:[#allocation14 + $0x30] sm:$0xff]   ;;  %v17227_v57 = vld [vmem:[#allocation14 + $0x38] sm:$0xff]  }
 0x69f   : > { %v3426_v22 = vmax.f32 %v3424_v52, %v3425_v61  ;;  %v3510_v4 = vunpack.c.l.b16 %v3466_v62  ;;  %v3599_v44 = vor.u32 %v3598_v34, %v3594_v42  ;;  %v17224_v52 = vld [vmem:[#allocation14 + $0x20] sm:$0xff]   ;;  %v17229_v61 = vld [vmem:[#allocation14 + $0x88] sm:$0xff]  }
 0x6a0   : > { %v3468_v5 = vpack.c.bf16 %v3419_v19, %v3419_v19  ;;  %v3511_v51 = vunpack.c.l.b16 %v3467_v1  ;;  %v3431_v6 = vmax.f32 %v3429_v58, %v3430_v9  ;;  %v3437_v26 = vrot.slane %v3436_v2, 2  ;;  %v3947_v32 = vld [vmem:[#allocation2] sm:$0x1]  ;;  %v17230_v1 = vld [vmem:[#allocation14 + $0x90] sm:$0xff]  }
 0x6a1   : > { %v3469_v7 = vpack.c.bf16 %v3426_v22, %v3426_v22  ;;  %v3536_v53 = vsel %vm3528_vm13, %v3510_v4, %v3509_v3  ;;  %v3948_v63 = vsel %vm20865_vm4, 0, %v3947_v32  ;;  %v17231_v9 = vld [vmem:[#allocation14 + $0x98] sm:$0xff]   ;;  %v17233_v3 = vld [vmem:[#allocation14 + $0xa8] sm:$0xff]   ;;  %v17234_v22 = vld [vmem:[#allocation14 + $0xb0] sm:$0xff]  }
 0x6a2   : > { %v3512_v8 = vunpack.c.l.b16 %v3468_v5  ;;  %v3537_v10 = vsel %vm3516_vm5, %v3511_v51, %v3536_v53  ;;  %v3432_v11 = vrot.slane %v3431_v6, 1  ;;  %v3438_v12 = vmax.f32 %v3436_v2, %v3437_v26  ;;  %3949 = vst [vmem:[#allocation2] sm:$0x1] %v3948_v63  ;;  %v17232_v2 = vld [vmem:[#allocation14 + $0xa0] sm:$0xff]   ;;  %v17235_v4 = vld [vmem:[#allocation14 + $0xb8] sm:$0xff]  }
 0x6a3   : > { %v3513_v13 = vunpack.c.l.b16 %v3469_v7  ;;  %v17238_v5 = vld [vmem:[#allocation18 + $0x84] ss:$8 sps:$4 sm:$0xff]   ;;  %v17236_v51 = vld [vmem:[#allocation18 + $0x80] ss:$8 sps:$4 sm:$0xff]   ;;  %v17239_v26 = vld [vmem:[#allocation18 + $0x90] ss:$8 sps:$4 sm:$0xff]  }
 0x6a4   : > { %v3538_v14 = vsel %vm3444_vm9, %v3512_v8, %v3537_v10  ;;  %v3433_v17 = vmax.f32 %v3431_v6, %v3432_v11  ;;  %v3439_v15 = vrot.slane %v3438_v12, 1  ;;  %4113 = vmatprep.subr.bf16.mxu0 %v17238_v5  ;;  %v17241_v6 = vld [vmem:[#allocation18 + $0x94] ss:$8 sps:$4 sm:$0xff]   ;;  %v17244_v32 = vld [vmem:[#allocation18 + $0xa4] ss:$8 sps:$4 sm:$0xff]  }
 0x6a5   : > { %v3539_v23 = vsel %vm3520_vm7, %v3513_v13, %v3538_v14  ;;  %4114 = vmatpush1.bf16.msra.mxu0 %v17236_v51  ;;  %v17242_v7 = vld [vmem:[#allocation18 + $0xa0] ss:$8 sps:$4 sm:$0xff]   ;;  %v17247_v53 = vld [vmem:[#allocation18 + $0xb4] ss:$8 sps:$4 sm:$0xff]   ;;  %v17245_v63 = vld [vmem:[#allocation18 + $0xb0] ss:$8 sps:$4 sm:$0xff]  }
 0x6a6   : > { %v3440_v18 = vmax.f32 %v3438_v12, %v3439_v15  ;;  %v3470_v0 = vpack.c.bf16 %v3433_v17, %v3433_v17  ;;  %4115 = vmatprep.subr.bf16.mxu0 %v17241_v6  ;;  %v17250_v8 = vld [vmem:[#allocation18 + $0xc4] ss:$8 sps:$4 sm:$0xff]   ;;  %v17248_v10 = vld [vmem:[#allocation18 + $0xc0] ss:$8 sps:$4 sm:$0xff]   ;;  %v17253_v11 = vld [vmem:[#allocation18 + $0xd4] ss:$8 sps:$4 sm:$0xff]  }
 0x6a7   : > { %v17251_v12 = vld [vmem:[#allocation18 + $0xd0] ss:$8 sps:$4 sm:$0xff]   ;;  %v17256_v13 = vld [vmem:[#allocation18 + $0xe4] ss:$8 sps:$4 sm:$0xff]   ;;  %v17254_v14 = vld [vmem:[#allocation18 + $0xe0] ss:$8 sps:$4 sm:$0xff]  }
 0x6a8   : > { %v3471_v31 = vpack.c.bf16 %v3440_v18, %v3440_v18  ;;  %v3514_v55 = vunpack.c.l.b16 %v3470_v0  ;;  %v17259_v17 = vld [vmem:[#allocation18 + $0xf4] ss:$8 sps:$4 sm:$0xff]   ;;  %v17257_v15 = vld [vmem:[#allocation18 + $0xf0] ss:$8 sps:$4 sm:$0xff]   ;;  %v20028_v18 = vmov 0  }
 0x6a9   : > { %4116 = vmatpush1.bf16.msra.mxu0 %v17239_v26  ;;  %4145 = vmatprep.mubr.bf16.mxu0 %v20028_v18  ;;  %v14905_v0 = vld [vmem:[#allocation15] ss:$0 sm:$0xff]  ;;  %v17263_v26 = vld [vmem:[#allocation18 + $0x10] ss:$8 sps:$4 sm:$0xff]  }
 0x6aa   : > { %v3515_v60 = vunpack.c.l.b16 %v3471_v31  ;;  %v3540_v25 = vsel %vm3522_vm8, %v3514_v55, %v3539_v23  ;;  %4117 = vmatprep.subr.bf16.mxu0 %v17244_v32  ;;  %v17262_v23 = vld [vmem:[#allocation18 + $0x4] ss:$8 sps:$4 sm:$0xff]   ;;  %v14906_v31 = vld [vmem:[#allocation17] ss:$0 sm:$0xff] }
 0x6ab   : > { %v17265_v51 = vld [vmem:[#allocation18 + $0x14] ss:$8 sps:$4 sm:$0xff]   ;;  %v17268_v32 = vld [vmem:[#allocation18 + $0x24] ss:$8 sps:$4 sm:$0xff]  }
 0x6ac   : > { %v3541_v28 = vsel %vm2673_vm6, %v3515_v60, %v3540_v25 }
 0x6ad   : > { %v3543_v29 = vpack.c.b16 %v3541_v28, %v3541_v28  ;;  %4118 = vmatpush1.bf16.msra.mxu0 %v17242_v7 }
 0x6ae   : > { %4119 = vmatprep.subr.bf16.mxu0 %v17247_v53  ;;  %v17266_v53 = vld [vmem:[#allocation18 + $0x20] ss:$8 sps:$4 sm:$0xff]  }
 0x6af   : > { %v3553_v56 = vsel %vm21179_vm0, %v3543_v29, %v3552_v30 }
 0x6b0   : > { %3554 = vst [vmem:[#allocation2 + $0x20] sm:$0xf] %v3553_v56 }
 0x6b1   : > { %4120 = vmatpush1.bf16.msra.mxu0 %v17245_v63 }
 0x6b2   : > { %4121 = vmatprep.subr.bf16.mxu0 %v17250_v8  ;;  %v17271_v8 = vld [vmem:[#allocation18 + $0x34] ss:$8 sps:$4 sm:$0xff]  }
 0x6b5   : > { %4122 = vmatpush1.bf16.msra.mxu0 %v17248_v10  ;;  %v17269_v10 = vld [vmem:[#allocation18 + $0x30] ss:$8 sps:$4 sm:$0xff]  }
 0x6b6   : > { %4123 = vmatprep.subr.bf16.mxu0 %v17253_v11  ;;  %v17274_v11 = vld [vmem:[#allocation18 + $0x44] ss:$8 sps:$4 sm:$0xff]  }
 0x6b7   : > { %v21186_v36 = vld [vmem:[#allocation2 + $0x20] sm:$0xf] }
 0x6b8   : > { %v3950_v16 = vld [vmem:[#allocation2 + $0x20] sm:$0x8]  ;;  %v3601_v43 = vshll.u32 %v21186_v36, 16  ;;  %v3605_v40 = vshrl.u32 %v21186_v36, 16  ;;  %v3823_v58 = vrot.slane %v21186_v36, 1 }
 0x6b9   : > { %v3951_v41 = vsel %vm20925_vm10, 0, %v3950_v16  ;;  %v3558_v62 = vld [vmem:[#allocation2 + $0x20] sm:$0x7]  ;;  %4124 = vmatpush1.bf16.msra.mxu0 %v17251_v12  ;;  %v17272_v12 = vld [vmem:[#allocation18 + $0x40] ss:$8 sps:$4 sm:$0xff]  }
 0x6ba   : > { %3952 = vst [vmem:[#allocation2 + $0x20] sm:$0x8] %v3951_v41  ;;  %v3603_v45 = vrot.slane %v3601_v43, 1  ;;  %4125 = vmatprep.subr.bf16.mxu0 %v17256_v13  ;;  %v17277_v13 = vld [vmem:[#allocation18 + $0x54] ss:$8 sps:$4 sm:$0xff]  }
 0x6bc   : > { %v3604_v47 = vsel %vm1692_vm1, %v3599_v44, %v3603_v45  ;;  %v3607_v48 = vor.u32 %v3605_v40, %v3603_v45 }
 0x6bd   : > { %16472 = vmatprep.mubr.bf16.mxu1 %v3604_v47  ;;  %4126 = vmatpush1.bf16.msra.mxu0 %v17254_v14  ;;  %v17275_v14 = vld [vmem:[#allocation18 + $0x50] ss:$8 sps:$4 sm:$0xff]  }
 0x6be   : > { %16473 = vmatmul.mubr.bf16.vlgmr.msra.gmra.mrb[12].mxu1 %v3607_v48  ;;  %4127 = vmatprep.subr.bf16.mxu0 %v17259_v17  ;;  %v17280_v17 = vld [vmem:[#allocation18 + $0x64] ss:$8 sps:$4 sm:$0xff]  }
 0x6bf   : > { %16477 = vmatpush3.bf16.msra.mxu1 %v21081_v24  ;;  %16492 = vmatprep.mubr.bf16.mxu1 %v21166_v39  ;;  %v17228_v24 = vld [vmem:[#allocation14 + $0x80] sm:$0xff]   ;;  %v3802_v39 = vld [vmem:[#allocation2] sm:$0xfe] }
 0x6c0   : > { %16478 = vmatprep.subr.bf16.mxu1 %v17221_v49  ;;  %v3822_v59 = vrot.slane %v3802_v39, 1 }
 0x6c1   : > { %4128 = vmatpush1.bf16.msra.mxu0 %v17257_v15  ;;  %v17278_v15 = vld [vmem:[#allocation18 + $0x60] ss:$8 sps:$4 sm:$0xff]  }
 0x6c2   : > { %v3824_v19 = vsel %vm2348_vm11, %v3822_v59, %v3823_v58  ;;  %4244 = vmatprep.subr.bf16.mxu0 %v17262_v23  ;;  %v17283_v23 = vld [vmem:[#allocation18 + $0x74] ss:$8 sps:$4 sm:$0xff]  }
 0x6c3   : > { %16479 = vmatpush3.bf16.msra.mxu1 %v17221_v49 }
 0x6c4   : > { %16480 = vmatprep.subr.bf16.mxu1 %v17222_v21 }
 0x6c7   : > { %16481 = vmatpush3.bf16.msra.mxu1 %v17222_v21 }
 0x6c8   : > { %16482 = vmatprep.subr.bf16.mxu1 %v17223_v50 }
 0x6cb   : > { %16483 = vmatpush3.bf16.msra.mxu1 %v17223_v50 }
 0x6cc   : > { %16484 = vmatprep.subr.bf16.mxu1 %v17224_v52 }
 0x6cf   : > { %16485 = vmatpush3.bf16.msra.mxu1 %v17224_v52  ;;  %v3975_v52 = vld [vmem:[#allocation2 + $0x20] sm:$0xf] }
 0x6d0   : > { %16486 = vmatprep.subr.bf16.mxu1 %v17225_v37 }
 0x6d3   : > { %16487 = vmatpush3.bf16.msra.mxu1 %v17225_v37 }
 0x6d4   : > { %16488 = vmatprep.subr.bf16.mxu1 %v17226_v54 }
 0x6d7   : > { %16489 = vmatpush3.bf16.msra.mxu1 %v17226_v54 }
 0x6d8   : > { %16490 = vmatprep.subr.bf16.mxu1 %v17227_v57 }
 0x6db   : > { %16491 = vmatpush3.bf16.msra.mxu1 %v17227_v57  ;;  %v3972_v57 = vld [vmem:[#allocation2] sm:$0xff] }
 0x6dc   : > { %16496 = vmatprep.subr.bf16.mxu1 %v17228_v24 }
 0x6de   : > { %16493 = vmatmul.mubr.bf16.vlgmr.msra.gmra.mrb[12].mxu1 %v3558_v62 }
 0x6df   : > { %16497 = vmatpush3.bf16.msra.mxu1 %v17228_v24  ;;  %16512 = vmatprep.mubr.bf16.mxu1 %v3824_v19 }
 0x6e0   : > { %16498 = vmatprep.subr.bf16.mxu1 %v17229_v61 }
 0x6e3   : > { %16499 = vmatpush3.bf16.msra.mxu1 %v17229_v61 }
 0x6e4   : > { %16500 = vmatprep.subr.bf16.mxu1 %v17230_v1 }
 0x6e7   : > { %16501 = vmatpush3.bf16.msra.mxu1 %v17230_v1 }
 0x6e8   : > { %16502 = vmatprep.subr.bf16.mxu1 %v17231_v9 }
 0x6eb   : > { %16503 = vmatpush3.bf16.msra.mxu1 %v17231_v9 }
 0x6ec   : > { %16504 = vmatprep.subr.bf16.mxu1 %v17232_v2 }
 0x6ef   : > { %16505 = vmatpush3.bf16.msra.mxu1 %v17232_v2 }
 0x6f0   : > { %16506 = vmatprep.subr.bf16.mxu1 %v17233_v3 }
 0x6f3   : > { %16507 = vmatpush3.bf16.msra.mxu1 %v17233_v3 }
 0x6f4   : > { %16508 = vmatprep.subr.bf16.mxu1 %v17234_v22 }
 0x6f7   : > { %16509 = vmatpush3.bf16.msra.mxu1 %v17234_v22  ;;  %v17260_v22 = vld [vmem:[#allocation18] ss:$8 sps:$4 sm:$0xff]  }
 0x6f8   : > { %16510 = vmatprep.subr.bf16.mxu1 %v17235_v4 }
 0x6fb   : > { %16511 = vmatpush3.bf16.msra.mxu1 %v17235_v4 }
 0x6fe   : > { %16513 = vmatmul.mubr.bf16.vlgmr.msra.gmra.mrb[12].mxu1 %v3823_v58 }
 0x7d1   : > { %v16514_v55 = vpop.f32.mrb[12].mxu1 }
 0x7d2   : > { %v3934_v60 = vmul.f32 %v16514_v55, %v14905_v0  ;;  %v3909_v25 = vpop.f32.mrb[13].mxu1  ;;  %v17284_v55 = vld [vmem:[#allocation18 + $0x100] ss:$8 sps:$4 sm:$0xff]  }
 0x7d3   : > { %v3932_v28 = vmul.f32 %v14905_v0, %v3909_v25  ;;  %v16515_v29 = vpop.f32.mrb[14].mxu1  ;;  %v17287_v25 = vld [vmem:[#allocation18 + $0x110] ss:$8 sps:$4 sm:$0xff]  }
 0x7d4   : > { %v3943_v30 = vadd.f32 %v14906_v31, %v3934_v60  ;;  %v3912_v56 = vpop.f32.mrb[15].mxu1  ;;  %v17289_v60 = vld [vmem:[#allocation18 + $0x114] ss:$8 sps:$4 sm:$0xff]   ;;  %v17290_v29 = vld [vmem:[#allocation18 + $0x120] ss:$8 sps:$4 sm:$0xff]  }
 0x7d5   : > { %v3941_v33 = vadd.f32 %v14906_v31, %v3932_v28  ;;  %v3933_v34 = vmul.f32 %v14905_v0, %v3912_v56  ;;  %v17281_v0 = vld [vmem:[#allocation18 + $0x70] ss:$8 sps:$4 sm:$0xff]   ;;  %v17292_v28 = vld [vmem:[#allocation18 + $0x124] ss:$8 sps:$4 sm:$0xff]  }
 0x7d6   : > { %v3946_v36 = vmax.f32 %v3943_v30, 0.0  ;;  %v17295_v30 = vld [vmem:[#allocation18 + $0x134] ss:$8 sps:$4 sm:$0xff]  }
 0x7d7   : > { %v3942_v16 = vadd.f32 %v14906_v31, %v3933_v34  ;;  %v3944_v42 = vmax.f32 %v3941_v33, 0.0  ;;  %v17286_v31 = vld [vmem:[#allocation18 + $0x104] ss:$8 sps:$4 sm:$0xff]   ;;  %v17293_v33 = vld [vmem:[#allocation18 + $0x130] ss:$8 sps:$4 sm:$0xff]  }
 0x7d8   : > { %v3954_v41 = vpack.c.bf16 %v3946_v36, %v3946_v36  ;;  %v17298_v34 = vld [vmem:[#allocation18 + $0x144] ss:$8 sps:$4 sm:$0xff]   ;;  %v17296_v36 = vld [vmem:[#allocation18 + $0x140] ss:$8 sps:$4 sm:$0xff]  }
 0x7d9   : > { %v3945_v43 = vmax.f32 %v3942_v16, 0.0  ;;  %v17301_v16 = vld [vmem:[#allocation18 + $0x154] ss:$8 sps:$4 sm:$0xff]  }
 0x7da   : > { %v3963_v44 = vshrl.u32 %v3954_v41, 16  ;;  %v3966_v47 = vshll.u32 %v3954_v41, 16  ;;  %v17299_v41 = vld [vmem:[#allocation18 + $0x150] ss:$8 sps:$4 sm:$0xff]  }
 0x7db   : > { %v3953_v45 = vpack.c.bf16 %v3945_v43, %v3944_v42  ;;  %v17304_v42 = vld [vmem:[#allocation18 + $0x164] ss:$8 sps:$4 sm:$0xff]   ;;  %v17302_v43 = vld [vmem:[#allocation18 + $0x160] ss:$8 sps:$4 sm:$0xff]  }
 0x7dc   : > { %v3965_v40 = vrot.slane %v3963_v44, 7  ;;  %v17307_v44 = vld [vmem:[#allocation18 + $0x174] ss:$8 sps:$4 sm:$0xff]  }
 0x7dd   : > { %v3956_v48 = vshrl.u32 %v3953_v45, 16  ;;  %v3959_v50 = vshll.u32 %v3953_v45, 16 }
 0x7de   : > { %v3968_v49 = vor.u32 %v3966_v47, %v3965_v40  ;;  %v17305_v40 = vld [vmem:[#allocation18 + $0x170] ss:$8 sps:$4 sm:$0xff]  }
 0x7df   : > { %v3958_v21 = vrot.slane %v3956_v48, 7  ;;  %v17310_v47 = vld [vmem:[#allocation23 + $0x104] ss:$8 sps:$4 sm:$0xff]  }
 0x7e1   : > { %v3961_v37 = vor.u32 %v3959_v50, %v3958_v21  ;;  %v3969_v54 = vsel %vm2668_vm3, %v3958_v21, %v3968_v49  ;;  %v17308_v21 = vld [vmem:[#allocation23 + $0x100] ss:$8 sps:$4 sm:$0xff]   ;;  %v17313_v50 = vld [vmem:[#allocation23 + $0x114] ss:$8 sps:$4 sm:$0xff]  }
 0x7e2   : > { %v3976_v24 = vsel %vm21179_vm0, %v3969_v54, %v3975_v52  ;;  %v17316_v54 = vld [vmem:[#allocation23 + $0x124] ss:$8 sps:$4 sm:$0xff]  }
 0x7e3   : > { %v3973_v39 = vsel %vm21007_vm14, %v3961_v37, %v3972_v57  ;;  %3977 = vst [vmem:[#allocation2 + $0x20] sm:$0xf] %v3976_v24  ;;  %v17311_v37 = vld [vmem:[#allocation23 + $0x110] ss:$8 sps:$4 sm:$0xff]   ;;  %v17314_v57 = vld [vmem:[#allocation23 + $0x120] ss:$8 sps:$4 sm:$0xff]  }
 0x7e4   : > { %3974 = vst [vmem:[#allocation2] sm:$0xff] %v3973_v39  ;;  %v4019_v58 = vshll.u32 %v3973_v39, 16  ;;  %v4017_v1 = vshrl.u32 %v3973_v39, 16  ;;  %v17319_v24 = vld [vmem:[#allocation23 + $0x134] ss:$8 sps:$4 sm:$0xff]  }
 0x7e6   : > { %v4021_v59 = vrot.slane %v4019_v58, 1  ;;  %v17322_v58 = vld [vmem:[#allocation23 + $0x144] ss:$8 sps:$4 sm:$0xff]  }
 0x7e8   : > { %v4022_v4 = vor.u32 %v4021_v59, %v4017_v1  ;;  %v17320_v59 = vld [vmem:[#allocation23 + $0x140] ss:$8 sps:$4 sm:$0xff]   ;;  %v17331_v1 = vld [vmem:[#allocation23 + $0x174] ss:$8 sps:$4 sm:$0xff]  }
 0x7ea   : > { %v21204_v61 = vld [vmem:[#allocation2 + $0x20] sm:$0xf] }
 0x7eb   : > { %v4503_v62 = vld [vmem:[#allocation2 + $0x20] sm:$0x8]  ;;  %v4024_v9 = vshll.u32 %v21204_v61, 16  ;;  %v4497_v2 = vld [vmem:[#allocation2] sm:$0x1]  ;;  %v4028_v7 = vshrl.u32 %v21204_v61, 16 }
 0x7ec   : > { %v4504_v19 = vsel %vm20925_vm10, 0, %v4503_v62  ;;  %v4498_v3 = vsel %vm20865_vm4, 0, %v4497_v2  ;;  %v3981_v56 = vld [vmem:[#allocation2 + $0x20] sm:$0x7]  ;;  %v4316_v49 = vrot.slane %v21204_v61, 1 }
 0x7ed   : > { %4505 = vst [vmem:[#allocation2 + $0x20] sm:$0x8] %v4504_v19  ;;  %v4026_v5 = vrot.slane %v4024_v9, 1  ;;  %4499 = vst [vmem:[#allocation2] sm:$0x1] %v4498_v3 }
 0x7ee   : > { %v4295_v45 = vld [vmem:[#allocation2] sm:$0xfe]  ;;  %v17326_v19 = vld [vmem:[#allocation23 + $0x160] ss:$8 sps:$4 sm:$0xff]   ;;  %v17334_v2 = vld [vmem:[#allocation23 + $0x184] ss:$8 sps:$4 sm:$0xff]  }
 0x7ef   : > { %v4027_v6 = vsel %vm1692_vm1, %v4022_v4, %v4026_v5  ;;  %v4030_v63 = vor.u32 %v4028_v7, %v4026_v5  ;;  %v4315_v48 = vrot.slane %v4295_v45, 1  ;;  %v17325_v61 = vld [vmem:[#allocation23 + $0x154] ss:$8 sps:$4 sm:$0xff]   ;;  %v17323_v62 = vld [vmem:[#allocation23 + $0x150] ss:$8 sps:$4 sm:$0xff]  }
 0x7f0   : > { %4146 = vmatmul.mubr.bf16.vlgmr.msra.gmra.mrb[60].mxu0 %v4027_v6  ;;  %v17329_v9 = vld [vmem:[#allocation23 + $0x170] ss:$8 sps:$4 sm:$0xff]   ;;  %v17332_v3 = vld [vmem:[#allocation23 + $0x180] ss:$8 sps:$4 sm:$0xff]   ;;  %v17340_v5 = vld [vmem:[#allocation23 + $0x1a4] ss:$8 sps:$4 sm:$0xff]  }
 0x7f1   : > { %4245 = vmatpush1.bf16.msra.mxu0 %v17260_v22  ;;  %4155 = vmatprep.mubr.bf16.mxu0 %v20028_v18  ;;  %v4317_v52 = vsel %vm2348_vm11, %v4315_v48, %v4316_v49  ;;  %v17337_v22 = vld [vmem:[#allocation23 + $0x194] ss:$8 sps:$4 sm:$0xff]   ;;  %v17335_v4 = vld [vmem:[#allocation23 + $0x190] ss:$8 sps:$4 sm:$0xff]  }
 0x7f2   : > { %4246 = vmatprep.subr.bf16.mxu0 %v17265_v51  ;;  %v17338_v51 = vld [vmem:[#allocation23 + $0x1a0] ss:$8 sps:$4 sm:$0xff]   ;;  %v4506_v6 = vld [vmem:[#allocation2 + $0x28] sm:$0x8] }
 0x7f3   : > { %v17341_v7 = vld [vmem:[#allocation23 + $0x1b0] ss:$8 sps:$4 sm:$0xff]  }
 0x7f5   : > { %4247 = vmatpush1.bf16.msra.mxu0 %v17263_v26  ;;  %v4507_v26 = vsel %vm20925_vm10, 0, %v4506_v6 }
 0x7f6   : > { %4248 = vmatprep.subr.bf16.mxu0 %v17268_v32  ;;  %4508 = vst [vmem:[#allocation2 + $0x28] sm:$0x8] %v4507_v26  ;;  %v17343_v32 = vld [vmem:[#allocation23 + $0x1b4] ss:$8 sps:$4 sm:$0xff]  }
 0x7f8   : > { %4156 = vmatmul.mubr.bf16.gmra.mrb[64].mxu0 %v4030_v63  ;;  %v17344_v63 = vld [vmem:[#allocation23 + $0x1c0] ss:$8 sps:$4 sm:$0xff]  }
 0x7f9   : > { %4249 = vmatpush1.bf16.msra.mxu0 %v17266_v53  ;;  %4276 = vmatprep.mubr.bf16.mxu0 %v20028_v18  ;;  %v17346_v53 = vld [vmem:[#allocation23 + $0x1c4] ss:$8 sps:$4 sm:$0xff]  }
 0x7fa   : > { %4250 = vmatprep.subr.bf16.mxu0 %v17271_v8  ;;  %v17349_v8 = vld [vmem:[#allocation23 + $0x1d4] ss:$8 sps:$4 sm:$0xff]  }
 0x7fd   : > { %4251 = vmatpush1.bf16.msra.mxu0 %v17269_v10  ;;  %v17347_v10 = vld [vmem:[#allocation23 + $0x1d0] ss:$8 sps:$4 sm:$0xff]  }
 0x7fe   : > { %4252 = vmatprep.subr.bf16.mxu0 %v17274_v11  ;;  %v17352_v11 = vld [vmem:[#allocation23 + $0x1e4] ss:$8 sps:$4 sm:$0xff]  }
 0x801   : > { %4253 = vmatpush1.bf16.msra.mxu0 %v17272_v12  ;;  %v17350_v12 = vld [vmem:[#allocation23 + $0x1e0] ss:$8 sps:$4 sm:$0xff]  }
 0x802   : > { %4254 = vmatprep.subr.bf16.mxu0 %v17277_v13  ;;  %v17355_v13 = vld [vmem:[#allocation23 + $0x1f4] ss:$8 sps:$4 sm:$0xff]  }
 0x805   : > { %4255 = vmatpush1.bf16.msra.mxu0 %v17275_v14  ;;  %v17353_v14 = vld [vmem:[#allocation23 + $0x1f0] ss:$8 sps:$4 sm:$0xff]  }
 0x806   : > { %4256 = vmatprep.subr.bf16.mxu0 %v17280_v17  ;;  %v17358_v17 = vld [vmem:[#allocation23 + $0x4] ss:$8 sps:$4 sm:$0xff]  }
 0x809   : > { %4257 = vmatpush1.bf16.msra.mxu0 %v17278_v15  ;;  %v21223_v15 = vsub.s32 0, %v21086_v27 }
 0x80a   : > { %4258 = vmatprep.subr.bf16.mxu0 %v17283_v23  ;;  %v21226_v23 = vsub.s32 1, %v21086_v27 }
 0x80d   : > { %4259 = vmatpush1.bf16.msra.mxu0 %v17281_v0  ;;  %v3978_v0 = vld [vmem:[#allocation20] sm:$0x3] }
 0x80e   : > { %4400 = vmatprep.subr.bf16.mxu0 %v17286_v31  ;;  %v3979_v31 = vld [vmem:[#allocation21] sm:$0x3] }
 0x810   : > { %4277 = vmatmul.mubr.bf16.vlgmr.msra.gmra.mrb[60].mxu0 %v3973_v39  ;;  %v17317_v39 = vld [vmem:[#allocation23 + $0x130] ss:$8 sps:$4 sm:$0xff]  }
 0x811   : > { %4401 = vmatpush1.bf16.msra.mxu0 %v17284_v55  ;;  %4286 = vmatprep.mubr.bf16.mxu0 %v20028_v18  ;;  %v4461_v55 = vrot.slane %v3978_v0, %v21223_v15 }
 0x812   : > { %4402 = vmatprep.subr.bf16.mxu0 %v17289_v60  ;;  %v4465_v60 = vrot.slane %v3978_v0, %v21226_v23 }
 0x815   : > { %4403 = vmatpush1.bf16.msra.mxu0 %v17287_v25  ;;  %v4478_v25 = vrot.slane %v3979_v31, %v21223_v15 }
 0x816   : > { %4404 = vmatprep.subr.bf16.mxu0 %v17292_v28 }
 0x818   : > { %4287 = vmatmul.mubr.bf16.gmra.mrb[64].mxu0 %v3981_v56 }
 0x819   : > { %4405 = vmatpush1.bf16.msra.mxu0 %v17290_v29  ;;  %4432 = vmatprep.mubr.bf16.mxu0 %v20028_v18  ;;  %v4482_v29 = vrot.slane %v3979_v31, %v21226_v23  ;;  %v4553_v31 = vld [vmem:[#allocation2 + $0x20] sm:$0xf] }
 0x81a   : > { %4406 = vmatprep.subr.bf16.mxu0 %v17295_v30 }
 0x81d   : > { %4407 = vmatpush1.bf16.msra.mxu0 %v17293_v33 }
 0x81e   : > { %4408 = vmatprep.subr.bf16.mxu0 %v17298_v34 }
 0x821   : > { %4409 = vmatpush1.bf16.msra.mxu0 %v17296_v36 }
 0x822   : > { %4410 = vmatprep.subr.bf16.mxu0 %v17301_v16 }
 0x825   : > { %4411 = vmatpush1.bf16.msra.mxu0 %v17299_v41 }
 0x826   : > { %4412 = vmatprep.subr.bf16.mxu0 %v17304_v42 }
 0x829   : > { %4413 = vmatpush1.bf16.msra.mxu0 %v17302_v43 }
 0x82a   : > { %4414 = vmatprep.subr.bf16.mxu0 %v17307_v44 }
 0x82d   : > { %4415 = vmatpush1.bf16.msra.mxu0 %v17305_v40 }
 0x82e   : > { %4826 = vmatprep.subr.bf16.mxu0 %v17310_v47 }
 0x830   : > { %4433 = vmatmul.mubr.bf16.vlgmr.msra.gmra.mrb[60].mxu0 %v4317_v52 }
 0x831   : > { %4442 = vmatprep.mubr.bf16.mxu0 %v20028_v18  ;;  %4827 = vmatpush1.bf16.msra.mxu0 %v17308_v21  ;;  %v17328_v18 = vld [vmem:[#allocation23 + $0x164] ss:$8 sps:$4 sm:$0xff]  }
 0x832   : > { %4828 = vmatprep.subr.bf16.mxu0 %v17313_v50 }
 0x835   : > { %4829 = vmatpush1.bf16.msra.mxu0 %v17311_v37 }
 0x836   : > { %4830 = vmatprep.subr.bf16.mxu0 %v17316_v54 }
 0x838   : > { %4443 = vmatmul.mubr.bf16.gmra.mrb[64].mxu0 %v4316_v49 }
 0x839   : > { %4831 = vmatpush1.bf16.msra.mxu0 %v17314_v57 }
 0x83a   : > { %4832 = vmatprep.subr.bf16.mxu0 %v17319_v24 }
 0x83d   : > { %4833 = vmatpush1.bf16.msra.mxu0 %v17317_v39 }
 0x83e   : > { %4834 = vmatprep.subr.bf16.mxu0 %v17322_v58 }
 0x841   : > { %4835 = vmatpush1.bf16.msra.mxu0 %v17320_v59 }
 0x842   : > { %4836 = vmatprep.subr.bf16.mxu0 %v17325_v61 }
 0x845   : > { %4837 = vmatpush1.bf16.msra.mxu0 %v17323_v62 }
 0x846   : > { %4838 = vmatprep.subr.bf16.mxu0 %v17328_v18 }
 0x849   : > { %4839 = vmatpush1.bf16.msra.mxu0 %v17326_v19 }
 0x84a   : > { %4840 = vmatprep.subr.bf16.mxu0 %v17331_v1 }
 0x84d   : > { %4841 = vmatpush1.bf16.msra.mxu0 %v17329_v9 }
 0x84e   : > { %4842 = vmatprep.subr.bf16.mxu0 %v17334_v2 }
 0x851   : > { %4843 = vmatpush1.bf16.msra.mxu0 %v17332_v3 }
 0x852   : > { %4844 = vmatprep.subr.bf16.mxu0 %v17337_v22 }
 0x855   : > { %4845 = vmatpush1.bf16.msra.mxu0 %v17335_v4  ;;  %v4550_v4 = vld [vmem:[#allocation2 + $0x8] sm:$0xff] }
 0x856   : > { %4846 = vmatprep.subr.bf16.mxu0 %v17340_v5 }
 0x859   : > { %4847 = vmatpush1.bf16.msra.mxu0 %v17338_v51  ;;  %v4547_v51 = vld [vmem:[#allocation2] sm:$0xff] }
 0x85a   : > { %4848 = vmatprep.subr.bf16.mxu0 %v17343_v32 }
 0x85d   : > { %4849 = vmatpush1.bf16.msra.mxu0 %v17341_v7 }
 0x85e   : > { %4850 = vmatprep.subr.bf16.mxu0 %v17346_v53 }
 0x861   : > { %4851 = vmatpush1.bf16.msra.mxu0 %v17344_v63 }
 0x862   : > { %4852 = vmatprep.subr.bf16.mxu0 %v17349_v8 }
 0x865   : > { %4853 = vmatpush1.bf16.msra.mxu0 %v17347_v10 }
 0x866   : > { %4854 = vmatprep.subr.bf16.mxu0 %v17352_v11 }
 0x869   : > { %4855 = vmatpush1.bf16.msra.mxu0 %v17350_v12 }
 0x86a   : > { %4856 = vmatprep.subr.bf16.mxu0 %v17355_v13 }
 0x86d   : > { %4857 = vmatpush1.bf16.msra.mxu0 %v17353_v14 }
 0x86e   : > { %5037 = vmatprep.subr.bf16.mxu0 %v17358_v17  ;;  %v4556_v17 = vld [vmem:[#allocation2 + $0x28] sm:$0xf] }
 0x903   : > { %v4434_v28 = vpop.f32.mrb[60].mxu0 }
 0x904   : > { %v4468_v30 = vmul.f32 %v4461_v55, %v4434_v28  ;;  %v4436_v56 = vpop.f32.mrb[61].mxu0 }
 0x905   : > { %v4469_v33 = vmul.f32 %v4465_v60, %v4436_v56  ;;  %v4438_v34 = vpop.f32.mrb[62].mxu0 }
 0x906   : > { %v4485_v36 = vadd.f32 %v4478_v25, %v4468_v30  ;;  %v4470_v16 = vmul.f32 %v4461_v55, %v4438_v34  ;;  %v4440_v41 = vpop.f32.mrb[63].mxu0 }
 0x907   : > { %v4486_v42 = vadd.f32 %v4482_v29, %v4469_v33  ;;  %v4471_v43 = vmul.f32 %v4465_v60, %v4440_v41 }
 0x908   : > { %v4487_v44 = vadd.f32 %v4478_v25, %v4470_v16  ;;  %v4491_v40 = vmax.f32 %v4485_v36, 0.0 }
 0x909   : > { %v4488_v45 = vadd.f32 %v4482_v29, %v4471_v43  ;;  %v4492_v48 = vmax.f32 %v4486_v42, 0.0 }
 0x90a   : > { %v4493_v47 = vmax.f32 %v4487_v44, 0.0 }
 0x90b   : > { %v4494_v49 = vmax.f32 %v4488_v45, 0.0  ;;  %v4444_v21 = vpop.f32.mrb[64].mxu0 }
 0x90c   : > { %v4509_v50 = vpack.c.bf16 %v4493_v47, %v4491_v40  ;;  %v4472_v52 = vmul.f32 %v4461_v55, %v4444_v21  ;;  %v4446_v37 = vpop.f32.mrb[65].mxu0 }
 0x90d   : > { %v4510_v54 = vpack.c.bf16 %v4494_v49, %v4492_v48  ;;  %v4473_v57 = vmul.f32 %v4465_v60, %v4446_v37  ;;  %v4448_v24 = vpop.f32.mrb[66].mxu0 }
 0x90e   : > { %v4514_v39 = vshrl.u32 %v4509_v50, 16  ;;  %v4489_v58 = vadd.f32 %v4478_v25, %v4472_v52  ;;  %v4449_v59 = vpop.f32.mrb[67].mxu0  ;;  %v4517_v19 = vshll.u32 %v4509_v50, 16 }
 0x90f   : > { %v4521_v61 = vshrl.u32 %v4510_v54, 16  ;;  %v4490_v62 = vadd.f32 %v4482_v29, %v4473_v57  ;;  %v4524_v2 = vshll.u32 %v4510_v54, 16  ;;  %v17356_v57 = vld [vmem:[#allocation23] ss:$8 sps:$4 sm:$0xff]   ;;  %v17361_v59 = vld [vmem:[#allocation23 + $0x14] ss:$8 sps:$4 sm:$0xff]  }
 0x910   : > { %v4516_v18 = vrot.slane %v4514_v39, 7  ;;  %v4495_v1 = vmax.f32 %v4489_v58, 0.0 }
 0x911   : > { %v4523_v9 = vrot.slane %v4521_v61, 7  ;;  %v4496_v3 = vmax.f32 %v4490_v62, 0.0  ;;  %v17359_v62 = vld [vmem:[#allocation23 + $0x10] ss:$8 sps:$4 sm:$0xff]  }
 0x912   : > { %v4519_v22 = vor.u32 %v4517_v19, %v4516_v18  ;;  %v4511_v5 = vpack.c.bf16 %v4495_v1, %v4495_v1  ;;  %v17362_v1 = vld [vmem:[#allocation23 + $0x20] ss:$8 sps:$4 sm:$0xff]  }
 0x913   : > { %v4526_v6 = vor.u32 %v4524_v2, %v4523_v9  ;;  %v4512_v26 = vpack.c.bf16 %v4496_v3, %v4496_v3  ;;  %v17367_v2 = vld [vmem:[#allocation23 + $0x34] ss:$8 sps:$4 sm:$0xff]   ;;  %v17365_v3 = vld [vmem:[#allocation23 + $0x30] ss:$8 sps:$4 sm:$0xff]  }
 0x914   : > { %v21234_v32 = vsel %vm21007_vm14, %v4519_v22, %v4547_v51  ;;  %v4528_v7 = vshrl.u32 %v4511_v5, 16  ;;  %v4531_v10 = vshll.u32 %v4511_v5, 16  ;;  %v17370_v22 = vld [vmem:[#allocation23 + $0x44] ss:$8 sps:$4 sm:$0xff]   ;;  %v17373_v5 = vld [vmem:[#allocation23 + $0x54] ss:$8 sps:$4 sm:$0xff]  }
 0x915   : > { %4549 = vst [vmem:[#allocation2] sm:$0xff] %v21234_v32  ;;  %v21239_v53 = vsel %vm21007_vm14, %v4526_v6, %v4550_v4  ;;  %v4536_v63 = vshrl.u32 %v4512_v26, 16  ;;  %v4539_v12 = vshll.u32 %v4512_v26, 16  ;;  %v4635_v34 = vshll.u32 %v21234_v32, 16  ;;  %v17368_v4 = vld [vmem:[#allocation23 + $0x40] ss:$8 sps:$4 sm:$0xff]  }
 0x916   : > { %4552 = vst [vmem:[#allocation2 + $0x8] sm:$0xff] %v21239_v53  ;;  %v4530_v8 = vrot.slane %v4528_v7, 7  ;;  %v4647_v33 = vshll.u32 %v21239_v53, 16  ;;  %v4645_v47 = vshrl.u32 %v21239_v53, 16  ;;  %v4633_v49 = vshrl.u32 %v21234_v32, 16 }
 0x917   : > { %v4538_v11 = vrot.slane %v4536_v63, 7  ;;  %v4637_v44 = vrot.slane %v4635_v34, 1  ;;  %v17371_v51 = vld [vmem:[#allocation23 + $0x50] ss:$8 sps:$4 sm:$0xff]   ;;  %v17376_v6 = vld [vmem:[#allocation23 + $0x64] ss:$8 sps:$4 sm:$0xff]  }
 0x918   : > { %v4533_v13 = vor.u32 %v4531_v10, %v4530_v8  ;;  %v4649_v16 = vrot.slane %v4647_v33, 1  ;;  %v17374_v26 = vld [vmem:[#allocation23 + $0x60] ss:$8 sps:$4 sm:$0xff]   ;;  %v17379_v7 = vld [vmem:[#allocation23 + $0x74] ss:$8 sps:$4 sm:$0xff]  }
 0x919   : > { %v4541_v14 = vor.u32 %v4539_v12, %v4538_v11  ;;  %v4638_v24 = vor.u32 %v4637_v44, %v4633_v49  ;;  %v17377_v63 = vld [vmem:[#allocation23 + $0x70] ss:$8 sps:$4 sm:$0xff]   ;;  %v17382_v8 = vld [vmem:[#allocation23 + $0x84] ss:$8 sps:$4 sm:$0xff]   ;;  %v17385_v10 = vld [vmem:[#allocation23 + $0x94] ss:$8 sps:$4 sm:$0xff]  }
 0x91a   : > { %v4534_v0 = vsel %vm2668_vm3, %v4516_v18, %v4533_v13  ;;  %v4650_v50 = vor.u32 %v4649_v16, %v4645_v47  ;;  %v17364_v18 = vld [vmem:[#allocation23 + $0x24] ss:$8 sps:$4 sm:$0xff]   ;;  %v17383_v11 = vld [vmem:[#allocation23 + $0x90] ss:$8 sps:$4 sm:$0xff]   ;;  %v17386_v13 = vld [vmem:[#allocation23 + $0xa0] ss:$8 sps:$4 sm:$0xff]  }
 0x91b   : > { %v4554_v55 = vsel %vm21179_vm0, %v4534_v0, %v4553_v31  ;;  %v4542_v60 = vsel %vm2668_vm3, %v4523_v9, %v4541_v14  ;;  %v17388_v12 = vld [vmem:[#allocation23 + $0xa4] ss:$8 sps:$4 sm:$0xff]   ;;  %v17391_v14 = vld [vmem:[#allocation23 + $0xb4] ss:$8 sps:$4 sm:$0xff]   ;;  %v17392_v31 = vld [vmem:[#allocation23 + $0xc0] ss:$8 sps:$4 sm:$0xff]  }
 0x91c   : > { %4555 = vst [vmem:[#allocation2 + $0x20] sm:$0xf] %v4554_v55  ;;  %v4557_v25 = vsel %vm21179_vm0, %v4542_v60, %v4556_v17  ;;  %v5394_v28 = vld [vmem:[#allocation2] sm:$0x1]  ;;  %v17394_v0 = vld [vmem:[#allocation23 + $0xc4] ss:$8 sps:$4 sm:$0xff]  }
 0x91d   : > { %4558 = vst [vmem:[#allocation2 + $0x28] sm:$0xf] %v4557_v25  ;;  %v5397_v29 = vld [vmem:[#allocation2 + $0x8] sm:$0x1]  ;;  %v5395_v30 = vsel %vm20865_vm4, 0, %v5394_v28 }
 0x91e   : > { %v5398_v56 = vsel %vm20865_vm4, 0, %v5397_v29  ;;  %5396 = vst [vmem:[#allocation2] sm:$0x1] %v5395_v30  ;;  %v17389_v17 = vld [vmem:[#allocation23 + $0xb0] ss:$8 sps:$4 sm:$0xff]  }
 0x91f   : > { %5399 = vst [vmem:[#allocation2 + $0x8] sm:$0x1] %v5398_v56  ;;  %v17397_v55 = vld [vmem:[#allocation23 + $0xd4] ss:$8 sps:$4 sm:$0xff]   ;;  %v17395_v60 = vld [vmem:[#allocation23 + $0xd0] ss:$8 sps:$4 sm:$0xff]  }
 0x920   : > { %v17400_v25 = vld [vmem:[#allocation23 + $0xe4] ss:$8 sps:$4 sm:$0xff]   ;;  %v17398_v28 = vld [vmem:[#allocation23 + $0xe0] ss:$8 sps:$4 sm:$0xff]   ;;  %v17403_v29 = vld [vmem:[#allocation23 + $0xf4] ss:$8 sps:$4 sm:$0xff]  }
 0x921   : > { %v17401_v30 = vld [vmem:[#allocation23 + $0xf0] ss:$8 sps:$4 sm:$0xff]   ;;  %v17406_v56 = vld [vmem:[#allocation23 + $0x204] ss:$8 sps:$4 sm:$0xff]   ;;  %v17404_v33 = vld [vmem:[#allocation23 + $0x200] ss:$8 sps:$4 sm:$0xff]  }
 0x922   : > { %v17409_v34 = vld [vmem:[#allocation23 + $0x214] ss:$8 sps:$4 sm:$0xff]   ;;  %v17407_v16 = vld [vmem:[#allocation23 + $0x210] ss:$8 sps:$4 sm:$0xff]  }
 0x923   : > { %v5400_v36 = vld [vmem:[#allocation2 + $0x20] sm:$0x8]  ;;  %v5089_v44 = vld [vmem:[#allocation2 + $0x8] sm:$0xfe]  ;;  %v4563_v49 = vld [vmem:[#allocation2 + $0x20] sm:$0x7] }
 0x924   : > { %v21254_v41 = vld [vmem:[#allocation2 + $0x20] sm:$0xf]  ;;  %v21256_v42 = vld [vmem:[#allocation2 + $0x28] sm:$0xf]  ;;  %v5401_v54 = vsel %vm20925_vm10, 0, %v5400_v36  ;;  %v5130_v47 = vrot.slane %v5089_v44, 1 }
 0x925   : > { %v5403_v43 = vld [vmem:[#allocation2 + $0x28] sm:$0x8]  ;;  %v4640_v45 = vshll.u32 %v21254_v41, 16  ;;  %v4652_v48 = vshll.u32 %v21256_v42, 16  ;;  %v4659_v37 = vshrl.u32 %v21256_v42, 16  ;;  %v4656_v19 = vshrl.u32 %v21254_v41, 16 }
 0x926   : > { %v5404_v40 = vsel %vm20925_vm10, 0, %v5403_v43  ;;  %5402 = vst [vmem:[#allocation2 + $0x20] sm:$0x8] %v5401_v54  ;;  %v4564_v36 = vld [vmem:[#allocation2 + $0x28] sm:$0x7] }
 0x927   : > { %5405 = vst [vmem:[#allocation2 + $0x28] sm:$0x8] %v5404_v40  ;;  %v4642_v21 = vrot.slane %v4640_v45, 1  ;;  %v4654_v52 = vrot.slane %v4652_v48, 1  ;;  %v17412_v43 = vld [vmem:[#allocation23 + $0x224] ss:$8 sps:$4 sm:$0xff]  }
 0x928   : > { %v5131_v45 = vrot.slane %v21256_v42, 1  ;;  %v17410_v40 = vld [vmem:[#allocation23 + $0x220] ss:$8 sps:$4 sm:$0xff]   ;;  %v17415_v48 = vld [vmem:[#allocation23 + $0x234] ss:$8 sps:$4 sm:$0xff]  }
 0x929   : > { %v4655_v39 = vsel %vm1692_vm1, %v4650_v50, %v4654_v52  ;;  %v4661_v58 = vor.u32 %v4659_v37, %v4654_v52  ;;  %v4643_v61 = vsel %vm1692_vm1, %v4638_v24, %v4642_v21  ;;  %v4658_v9 = vor.u32 %v4656_v19, %v4642_v21  ;;  %v17413_v21 = vld [vmem:[#allocation23 + $0x230] ss:$8 sps:$4 sm:$0xff]   ;;  %v17418_v50 = vld [vmem:[#allocation23 + $0x244] ss:$8 sps:$4 sm:$0xff]   ;;  %v17416_v52 = vld [vmem:[#allocation23 + $0x240] ss:$8 sps:$4 sm:$0xff]  }
 0x92a   : > { %4858 = vmatprep.mubr.bf16.mxu0 %v4655_v39  ;;  %v17421_v37 = vld [vmem:[#allocation23 + $0x254] ss:$8 sps:$4 sm:$0xff]   ;;  %v17419_v54 = vld [vmem:[#allocation23 + $0x250] ss:$8 sps:$4 sm:$0xff]   ;;  %v17422_v24 = vld [vmem:[#allocation23 + $0x260] ss:$8 sps:$4 sm:$0xff]  }
 0x92b   : > { %4859 = vmatmul.mubr.bf16.vlgmr.msra.gmra.mrb[68].mxu0 %v4643_v61  ;;  %v17427_v39 = vld [vmem:[#allocation23 + $0x274] ss:$8 sps:$4 sm:$0xff]   ;;  %v17428_v61 = vld [vmem:[#allocation23 + $0x280] ss:$8 sps:$4 sm:$0xff]   ;;  %v17436_v19 = vld [vmem:[#allocation23 + $0x2a4] ss:$8 sps:$4 sm:$0xff]  }
 0x92c   : > { %5038 = vmatpush1.bf16.msra.mxu0 %v17356_v57  ;;  %4868 = vmatprep.mubr.bf16.mxu0 %v4661_v58  ;;  %v17424_v57 = vld [vmem:[#allocation23 + $0x264] ss:$8 sps:$4 sm:$0xff]   ;;  %v17425_v58 = vld [vmem:[#allocation23 + $0x270] ss:$8 sps:$4 sm:$0xff]   ;;  %v17467_v42 = vld [vmem:[#allocation27 + $0x150] ss:$8 sps:$4 sm:$0xff]  }
 0x92d   : > { %5039 = vmatprep.subr.bf16.mxu0 %v17361_v59  ;;  %v17430_v59 = vld [vmem:[#allocation23 + $0x284] ss:$8 sps:$4 sm:$0xff]  }
 0x92e   : > { %v17482_v44 = vld [vmem:[#allocation27 + $0x1a0] ss:$8 sps:$4 sm:$0xff]  }
 0x930   : > { %5040 = vmatpush1.bf16.msra.mxu0 %v17359_v62  ;;  %v17433_v62 = vld [vmem:[#allocation23 + $0x294] ss:$8 sps:$4 sm:$0xff]  }
 0x931   : > { %5041 = vmatprep.subr.bf16.mxu0 %v17364_v18  ;;  %v17431_v18 = vld [vmem:[#allocation23 + $0x290] ss:$8 sps:$4 sm:$0xff]  }
 0x933   : > { %4869 = vmatmul.mubr.bf16.gmra.mrb[72].mxu0 %v4658_v9  ;;  %v17439_v9 = vld [vmem:[#allocation23 + $0x2b4] ss:$8 sps:$4 sm:$0xff]  }
 0x934   : > { %5042 = vmatpush1.bf16.msra.mxu0 %v17362_v1  ;;  %5069 = vmatprep.mubr.bf16.mxu0 %v21239_v53  ;;  %v17380_v53 = vld [vmem:[#allocation23 + $0x80] ss:$8 sps:$4 sm:$0xff]  }
 0x935   : > { %5043 = vmatprep.subr.bf16.mxu0 %v17367_v2  ;;  %v17434_v1 = vld [vmem:[#allocation23 + $0x2a0] ss:$8 sps:$4 sm:$0xff]   ;;  %v17437_v2 = vld [vmem:[#allocation23 + $0x2b0] ss:$8 sps:$4 sm:$0xff]  }
 0x938   : > { %5044 = vmatpush1.bf16.msra.mxu0 %v17365_v3  ;;  %v17442_v3 = vld [vmem:[#allocation23 + $0x2c4] ss:$8 sps:$4 sm:$0xff]  }
 0x939   : > { %5045 = vmatprep.subr.bf16.mxu0 %v17370_v22  ;;  %v17440_v22 = vld [vmem:[#allocation23 + $0x2c0] ss:$8 sps:$4 sm:$0xff]  }
 0x93c   : > { %5046 = vmatpush1.bf16.msra.mxu0 %v17368_v4  ;;  %v17445_v4 = vld [vmem:[#allocation23 + $0x2d4] ss:$8 sps:$4 sm:$0xff]  }
 0x93d   : > { %5047 = vmatprep.subr.bf16.mxu0 %v17373_v5  ;;  %v17443_v5 = vld [vmem:[#allocation23 + $0x2d0] ss:$8 sps:$4 sm:$0xff]  }
 0x940   : > { %5048 = vmatpush1.bf16.msra.mxu0 %v17371_v51  ;;  %v17448_v51 = vld [vmem:[#allocation23 + $0x2e4] ss:$8 sps:$4 sm:$0xff]  }
 0x941   : > { %5049 = vmatprep.subr.bf16.mxu0 %v17376_v6  ;;  %v17446_v6 = vld [vmem:[#allocation23 + $0x2e0] ss:$8 sps:$4 sm:$0xff]  }
 0x944   : > { %5050 = vmatpush1.bf16.msra.mxu0 %v17374_v26  ;;  %v17451_v26 = vld [vmem:[#allocation23 + $0x2f4] ss:$8 sps:$4 sm:$0xff]  }
 0x945   : > { %5051 = vmatprep.subr.bf16.mxu0 %v17379_v7  ;;  %v17449_v7 = vld [vmem:[#allocation23 + $0x2f0] ss:$8 sps:$4 sm:$0xff]  }
 0x948   : > { %5052 = vmatpush1.bf16.msra.mxu0 %v17377_v63  ;;  %v5088_v63 = vld [vmem:[#allocation2] sm:$0xfe] }
 0x949   : > { %5053 = vmatprep.subr.bf16.mxu0 %v17382_v8  ;;  %v17454_v8 = vld [vmem:[#allocation27 + $0x104] ss:$8 sps:$4 sm:$0xff]  }
 0x94c   : > { %5054 = vmatpush1.bf16.msra.mxu0 %v17380_v53  ;;  %v5128_v53 = vrot.slane %v21254_v41, 1  ;;  %v17461_v41 = vld [vmem:[#allocation27 + $0x130] ss:$8 sps:$4 sm:$0xff]  }
 0x94d   : > { %5055 = vmatprep.subr.bf16.mxu0 %v17385_v10  ;;  %v5127_v10 = vrot.slane %v5088_v63, 1 }
 0x950   : > { %5056 = vmatpush1.bf16.msra.mxu0 %v17383_v11  ;;  %v17452_v11 = vld [vmem:[#allocation27 + $0x100] ss:$8 sps:$4 sm:$0xff]  }
 0x951   : > { %5057 = vmatprep.subr.bf16.mxu0 %v17388_v12  ;;  %v17457_v12 = vld [vmem:[#allocation27 + $0x114] ss:$8 sps:$4 sm:$0xff]  }
 0x954   : > { %5058 = vmatpush1.bf16.msra.mxu0 %v17386_v13  ;;  %v5129_v13 = vsel %vm2348_vm11, %v5127_v10, %v5128_v53 }
 0x955   : > { %5059 = vmatprep.subr.bf16.mxu0 %v17391_v14  ;;  %v17455_v14 = vld [vmem:[#allocation27 + $0x110] ss:$8 sps:$4 sm:$0xff]  }
 0x958   : > { %5060 = vmatpush1.bf16.msra.mxu0 %v17389_v17  ;;  %v17460_v17 = vld [vmem:[#allocation27 + $0x124] ss:$8 sps:$4 sm:$0xff]  }
 0x959   : > { %5061 = vmatprep.subr.bf16.mxu0 %v17394_v0  ;;  %v17458_v0 = vld [vmem:[#allocation27 + $0x120] ss:$8 sps:$4 sm:$0xff]  }
 0x95c   : > { %5062 = vmatpush1.bf16.msra.mxu0 %v17392_v31  ;;  %v17463_v31 = vld [vmem:[#allocation27 + $0x134] ss:$8 sps:$4 sm:$0xff]  }
 0x95d   : > { %5063 = vmatprep.subr.bf16.mxu0 %v17397_v55  ;;  %v17466_v55 = vld [vmem:[#allocation27 + $0x144] ss:$8 sps:$4 sm:$0xff]  }
 0x960   : > { %5064 = vmatpush1.bf16.msra.mxu0 %v17395_v60  ;;  %v17464_v60 = vld [vmem:[#allocation27 + $0x140] ss:$8 sps:$4 sm:$0xff]  }
 0x961   : > { %5065 = vmatprep.subr.bf16.mxu0 %v17400_v25  ;;  %v17469_v25 = vld [vmem:[#allocation27 + $0x154] ss:$8 sps:$4 sm:$0xff]  }
 0x964   : > { %5066 = vmatpush1.bf16.msra.mxu0 %v17398_v28  ;;  %v17472_v28 = vld [vmem:[#allocation27 + $0x164] ss:$8 sps:$4 sm:$0xff]  }
 0x965   : > { %5067 = vmatprep.subr.bf16.mxu0 %v17403_v29  ;;  %v17470_v29 = vld [vmem:[#allocation27 + $0x160] ss:$8 sps:$4 sm:$0xff]  }
 0x968   : > { %5068 = vmatpush1.bf16.msra.mxu0 %v17401_v30  ;;  %v17475_v30 = vld [vmem:[#allocation27 + $0x174] ss:$8 sps:$4 sm:$0xff]  }
 0x969   : > { %5297 = vmatprep.subr.bf16.mxu0 %v17406_v56  ;;  %v17473_v56 = vld [vmem:[#allocation27 + $0x170] ss:$8 sps:$4 sm:$0xff]  }
 0x96b   : > { %5070 = vmatmul.mubr.bf16.vlgmr.msra.gmra.mrb[68].mxu0 %v21234_v32  ;;  %v5132_v32 = vsel %vm2348_vm11, %v5130_v47, %v5131_v45  ;;  %v17490_v47 = vld [vmem:[#allocation27 + $0x1c4] ss:$8 sps:$4 sm:$0xff]  }
 0x96c   : > { %5079 = vmatprep.mubr.bf16.mxu0 %v4564_v36  ;;  %5298 = vmatpush1.bf16.msra.mxu0 %v17404_v33  ;;  %v17478_v33 = vld [vmem:[#allocation27 + $0x184] ss:$8 sps:$4 sm:$0xff]   ;;  %v17481_v36 = vld [vmem:[#allocation27 + $0x194] ss:$8 sps:$4 sm:$0xff]  }
 0x96d   : > { %5299 = vmatprep.subr.bf16.mxu0 %v17409_v34  ;;  %v17476_v34 = vld [vmem:[#allocation27 + $0x180] ss:$8 sps:$4 sm:$0xff]  }
 0x970   : > { %5300 = vmatpush1.bf16.msra.mxu0 %v17407_v16  ;;  %v17479_v16 = vld [vmem:[#allocation27 + $0x190] ss:$8 sps:$4 sm:$0xff]  }
 0x971   : > { %5301 = vmatprep.subr.bf16.mxu0 %v17412_v43  ;;  %v17484_v43 = vld [vmem:[#allocation27 + $0x1a4] ss:$8 sps:$4 sm:$0xff]  }
 0x973   : > { %5080 = vmatmul.mubr.bf16.gmra.mrb[72].mxu0 %v4563_v49  ;;  %v17493_v49 = vld [vmem:[#allocation27 + $0x1d4] ss:$8 sps:$4 sm:$0xff]  }
 0x974   : > { %5302 = vmatpush1.bf16.msra.mxu0 %v17410_v40  ;;  %5329 = vmatprep.mubr.bf16.mxu0 %v5132_v32  ;;  %v17485_v40 = vld [vmem:[#allocation27 + $0x1b0] ss:$8 sps:$4 sm:$0xff]  }
 0x975   : > { %5303 = vmatprep.subr.bf16.mxu0 %v17415_v48  ;;  %v17488_v48 = vld [vmem:[#allocation27 + $0x1c0] ss:$8 sps:$4 sm:$0xff]   ;;  %v17491_v32 = vld [vmem:[#allocation27 + $0x1d0] ss:$8 sps:$4 sm:$0xff]  }
 0x978   : > { %5304 = vmatpush1.bf16.msra.mxu0 %v17413_v21  ;;  %v17496_v21 = vld [vmem:[#allocation27 + $0x1e4] ss:$8 sps:$4 sm:$0xff]  }
 0x979   : > { %5305 = vmatprep.subr.bf16.mxu0 %v17418_v50  ;;  %v17494_v50 = vld [vmem:[#allocation27 + $0x1e0] ss:$8 sps:$4 sm:$0xff]  }
 0x97c   : > { %5306 = vmatpush1.bf16.msra.mxu0 %v17416_v52  ;;  %v17499_v52 = vld [vmem:[#allocation27 + $0x1f4] ss:$8 sps:$4 sm:$0xff]  }
 0x97d   : > { %5307 = vmatprep.subr.bf16.mxu0 %v17421_v37  ;;  %v17497_v37 = vld [vmem:[#allocation27 + $0x1f0] ss:$8 sps:$4 sm:$0xff]  }
 0x980   : > { %5308 = vmatpush1.bf16.msra.mxu0 %v17419_v54  ;;  %v17502_v54 = vld [vmem:[#allocation27 + $0x4] ss:$8 sps:$4 sm:$0xff]  }
 0x981   : > { %5309 = vmatprep.subr.bf16.mxu0 %v17424_v57  ;;  %v4559_v57 = vld [vmem:[#allocation24] sm:$0x3] }
 0x984   : > { %5310 = vmatpush1.bf16.msra.mxu0 %v17422_v24  ;;  %v4560_v24 = vld [vmem:[#allocation26] sm:$0x3] }
 0x985   : > { %5311 = vmatprep.subr.bf16.mxu0 %v17427_v39  ;;  %v5358_v39 = vrot.slane %v4559_v57, %v21223_v15 }
 0x988   : > { %5312 = vmatpush1.bf16.msra.mxu0 %v17425_v58  ;;  %v5362_v58 = vrot.slane %v4559_v57, %v21226_v23  ;;  %v5450_v57 = vld [vmem:[#allocation2 + $0x20] sm:$0xf] }
 0x989   : > { %5313 = vmatprep.subr.bf16.mxu0 %v17430_v59  ;;  %v5375_v59 = vrot.slane %v4560_v24, %v21223_v15 }
 0x98c   : > { %5314 = vmatpush1.bf16.msra.mxu0 %v17428_v61 }
 0x98d   : > { %5315 = vmatprep.subr.bf16.mxu0 %v17433_v62  ;;  %v5379_v62 = vrot.slane %v4560_v24, %v21226_v23 }
 0x990   : > { %5316 = vmatpush1.bf16.msra.mxu0 %v17431_v18 }
 0x991   : > { %5317 = vmatprep.subr.bf16.mxu0 %v17436_v19 }
 0x994   : > { %5318 = vmatpush1.bf16.msra.mxu0 %v17434_v1 }
 0x995   : > { %5319 = vmatprep.subr.bf16.mxu0 %v17439_v9 }
 0x998   : > { %5320 = vmatpush1.bf16.msra.mxu0 %v17437_v2 }
 0x999   : > { %5321 = vmatprep.subr.bf16.mxu0 %v17442_v3 }
 0x99c   : > { %5322 = vmatpush1.bf16.msra.mxu0 %v17440_v22 }
 0x99d   : > { %5323 = vmatprep.subr.bf16.mxu0 %v17445_v4 }
 0x9a0   : > { %5324 = vmatpush1.bf16.msra.mxu0 %v17443_v5 }
 0x9a1   : > { %5325 = vmatprep.subr.bf16.mxu0 %v17448_v51 }
 0x9a4   : > { %5326 = vmatpush1.bf16.msra.mxu0 %v17446_v6 }
 0x9a5   : > { %5327 = vmatprep.subr.bf16.mxu0 %v17451_v26 }
 0x9a8   : > { %5328 = vmatpush1.bf16.msra.mxu0 %v17449_v7 }
 0x9a9   : > { %5723 = vmatprep.subr.bf16.mxu0 %v17454_v8 }
 0x9ab   : > { %5330 = vmatmul.mubr.bf16.vlgmr.msra.gmra.mrb[68].mxu0 %v5129_v13 }
 0x9ac   : > { %5339 = vmatprep.mubr.bf16.mxu0 %v5131_v45  ;;  %5724 = vmatpush1.bf16.msra.mxu0 %v17452_v11  ;;  %v17487_v45 = vld [vmem:[#allocation27 + $0x1b4] ss:$8 sps:$4 sm:$0xff]  }
 0x9ad   : > { %5725 = vmatprep.subr.bf16.mxu0 %v17457_v12 }
 0x9b0   : > { %5726 = vmatpush1.bf16.msra.mxu0 %v17455_v14 }
 0x9b1   : > { %5727 = vmatprep.subr.bf16.mxu0 %v17460_v17 }
 0x9b3   : > { %5340 = vmatmul.mubr.bf16.gmra.mrb[72].mxu0 %v5128_v53 }
 0x9b4   : > { %5728 = vmatpush1.bf16.msra.mxu0 %v17458_v0 }
 0x9b5   : > { %5729 = vmatprep.subr.bf16.mxu0 %v17463_v31 }
 0x9b8   : > { %5730 = vmatpush1.bf16.msra.mxu0 %v17461_v41 }
 0x9b9   : > { %5731 = vmatprep.subr.bf16.mxu0 %v17466_v55 }
 0x9bc   : > { %5732 = vmatpush1.bf16.msra.mxu0 %v17464_v60 }
 0x9bd   : > { %5733 = vmatprep.subr.bf16.mxu0 %v17469_v25 }
 0x9c0   : > { %5734 = vmatpush1.bf16.msra.mxu0 %v17467_v42 }
 0x9c1   : > { %5735 = vmatprep.subr.bf16.mxu0 %v17472_v28 }
 0x9c4   : > { %5736 = vmatpush1.bf16.msra.mxu0 %v17470_v29 }
 0x9c5   : > { %5737 = vmatprep.subr.bf16.mxu0 %v17475_v30 }
 0x9c8   : > { %5738 = vmatpush1.bf16.msra.mxu0 %v17473_v56 }
 0x9c9   : > { %5739 = vmatprep.subr.bf16.mxu0 %v17478_v33 }
 0x9cc   : > { %5740 = vmatpush1.bf16.msra.mxu0 %v17476_v34 }
 0x9cd   : > { %5741 = vmatprep.subr.bf16.mxu0 %v17481_v36  ;;  %v5444_v36 = vld [vmem:[#allocation2] sm:$0xff] }
 0x9d0   : > { %5742 = vmatpush1.bf16.msra.mxu0 %v17479_v16 }
 0x9d1   : > { %5743 = vmatprep.subr.bf16.mxu0 %v17484_v43 }
 0x9d4   : > { %5744 = vmatpush1.bf16.msra.mxu0 %v17482_v44 }
 0x9d5   : > { %5745 = vmatprep.subr.bf16.mxu0 %v17487_v45  ;;  %v5447_v45 = vld [vmem:[#allocation2 + $0x8] sm:$0xff] }
 0x9d8   : > { %5746 = vmatpush1.bf16.msra.mxu0 %v17485_v40 }
 0x9d9   : > { %5747 = vmatprep.subr.bf16.mxu0 %v17490_v47 }
 0x9dc   : > { %5748 = vmatpush1.bf16.msra.mxu0 %v17488_v48 }
 0x9dd   : > { %5749 = vmatprep.subr.bf16.mxu0 %v17493_v49 }
 0x9e0   : > { %5750 = vmatpush1.bf16.msra.mxu0 %v17491_v32 }
 0x9e1   : > { %5751 = vmatprep.subr.bf16.mxu0 %v17496_v21 }
 0x9e4   : > { %5752 = vmatpush1.bf16.msra.mxu0 %v17494_v50 }
 0x9e5   : > { %5753 = vmatprep.subr.bf16.mxu0 %v17499_v52 }
 0x9e8   : > { %5754 = vmatpush1.bf16.msra.mxu0 %v17497_v37 }
 0x9e9   : > { %5934 = vmatprep.subr.bf16.mxu0 %v17502_v54 }
 0xa7e   : > { %v5331_v61 = vpop.f32.mrb[68].mxu0 }
 0xa7f   : > { %v5365_v18 = vmul.f32 %v5358_v39, %v5331_v61  ;;  %v5333_v19 = vpop.f32.mrb[69].mxu0 }
 0xa80   : > { %v5366_v1 = vmul.f32 %v5362_v58, %v5333_v19  ;;  %v5335_v9 = vpop.f32.mrb[70].mxu0 }
 0xa81   : > { %v5382_v2 = vadd.f32 %v5375_v59, %v5365_v18  ;;  %v5367_v3 = vmul.f32 %v5358_v39, %v5335_v9  ;;  %v5337_v22 = vpop.f32.mrb[71].mxu0 }
 0xa82   : > { %v5383_v4 = vadd.f32 %v5379_v62, %v5366_v1  ;;  %v5368_v5 = vmul.f32 %v5362_v58, %v5337_v22 }
 0xa83   : > { %v5384_v51 = vadd.f32 %v5375_v59, %v5367_v3  ;;  %v5388_v26 = vmax.f32 %v5382_v2, 0.0 }
 0xa84   : > { %v5385_v6 = vadd.f32 %v5379_v62, %v5368_v5  ;;  %v5389_v63 = vmax.f32 %v5383_v4, 0.0 }
 0xa85   : > { %v5390_v7 = vmax.f32 %v5384_v51, 0.0 }
 0xa86   : > { %v5391_v8 = vmax.f32 %v5385_v6, 0.0  ;;  %v5341_v53 = vpop.f32.mrb[72].mxu0 }
 0xa87   : > { %v5406_v10 = vpack.c.bf16 %v5390_v7, %v5388_v26  ;;  %v5369_v11 = vmul.f32 %v5358_v39, %v5341_v53  ;;  %v5343_v12 = vpop.f32.mrb[73].mxu0 }
 0xa88   : > { %v5407_v13 = vpack.c.bf16 %v5391_v8, %v5389_v63  ;;  %v5370_v14 = vmul.f32 %v5362_v58, %v5343_v12  ;;  %v5345_v17 = vpop.f32.mrb[74].mxu0  ;;  %v5453_v58 = vld [vmem:[#allocation2 + $0x28] sm:$0xf] }
 0xa89   : > { %v5411_v0 = vshrl.u32 %v5406_v10, 16  ;;  %v5386_v31 = vadd.f32 %v5375_v59, %v5369_v11  ;;  %v5346_v41 = vpop.f32.mrb[75].mxu0  ;;  %v5414_v42 = vshll.u32 %v5406_v10, 16 }
 0xa8a   : > { %v5418_v55 = vshrl.u32 %v5407_v13, 16  ;;  %v5387_v60 = vadd.f32 %v5379_v62, %v5370_v14  ;;  %v5421_v30 = vshll.u32 %v5407_v13, 16  ;;  %v17500_v13 = vld [vmem:[#allocation27] ss:$8 sps:$4 sm:$0xff]   ;;  %v17505_v41 = vld [vmem:[#allocation27 + $0x14] ss:$8 sps:$4 sm:$0xff]  }
 0xa8b   : > { %v5413_v25 = vrot.slane %v5411_v0, 7  ;;  %v5392_v28 = vmax.f32 %v5386_v31, 0.0 }
 0xa8c   : > { %v5420_v29 = vrot.slane %v5418_v55, 7  ;;  %v5393_v56 = vmax.f32 %v5387_v60, 0.0  ;;  %v17503_v60 = vld [vmem:[#allocation27 + $0x10] ss:$8 sps:$4 sm:$0xff]  }
 0xa8d   : > { %v5416_v33 = vor.u32 %v5414_v42, %v5413_v25  ;;  %v5408_v34 = vpack.c.bf16 %v5392_v28, %v5392_v28  ;;  %v17506_v28 = vld [vmem:[#allocation27 + $0x20] ss:$8 sps:$4 sm:$0xff]  }
 0xa8e   : > { %v5423_v16 = vor.u32 %v5421_v30, %v5420_v29  ;;  %v5409_v43 = vpack.c.bf16 %v5393_v56, %v5393_v56  ;;  %v17511_v30 = vld [vmem:[#allocation27 + $0x34] ss:$8 sps:$4 sm:$0xff]   ;;  %v17596_v56 = vld [vmem:[#allocation32 + $0x100] ss:$8 sps:$4 sm:$0xff]  }
 0xa8f   : > { %v21286_v44 = vsel %vm21007_vm14, %v5416_v33, %v5444_v36  ;;  %v5425_v40 = vshrl.u32 %v5408_v34, 16  ;;  %v5428_v32 = vshll.u32 %v5408_v34, 16  ;;  %v17598_v33 = vld [vmem:[#allocation32 + $0x104] ss:$8 sps:$4 sm:$0xff]   ;;  %v17601_v36 = vld [vmem:[#allocation32 + $0x114] ss:$8 sps:$4 sm:$0xff]  }
 0xa90   : > { %5446 = vst [vmem:[#allocation2] sm:$0xff] %v21286_v44  ;;  %v21291_v47 = vsel %vm21007_vm14, %v5423_v16, %v5447_v45  ;;  %v5433_v48 = vshrl.u32 %v5409_v43, 16  ;;  %v5436_v50 = vshll.u32 %v5409_v43, 16  ;;  %v5532_v9 = vshll.u32 %v21286_v44, 16  ;;  %v17509_v34 = vld [vmem:[#allocation27 + $0x30] ss:$8 sps:$4 sm:$0xff]   ;;  %6620 = vmatprep.subr.bf16.mxu1 %v17598_v33 }
 0xa91   : > { %5449 = vst [vmem:[#allocation2 + $0x8] sm:$0xff] %v21291_v47  ;;  %v5427_v49 = vrot.slane %v5425_v40, 7  ;;  %v5544_v1 = vshll.u32 %v21291_v47, 16  ;;  %v5542_v26 = vshrl.u32 %v21291_v47, 16  ;;  %v5530_v63 = vshrl.u32 %v21286_v44, 16  ;;  %6621 = vmatpush1.bf16.msra.mxu1 %v17596_v56 }
 0xa92   : > { %v5435_v21 = vrot.slane %v5433_v48, 7  ;;  %v5534_v5 = vrot.slane %v5532_v9, 1  ;;  %v17514_v16 = vld [vmem:[#allocation27 + $0x44] ss:$8 sps:$4 sm:$0xff]   ;;  %v17599_v43 = vld [vmem:[#allocation32 + $0x110] ss:$8 sps:$4 sm:$0xff]   ;;  %6622 = vmatprep.subr.bf16.mxu1 %v17601_v36 }
 0xa93   : > { %v5430_v52 = vor.u32 %v5428_v32, %v5427_v49  ;;  %v5546_v2 = vrot.slane %v5544_v1, 1  ;;  %v17604_v45 = vld [vmem:[#allocation32 + $0x124] ss:$8 sps:$4 sm:$0xff]   ;;  %v17517_v48 = vld [vmem:[#allocation27 + $0x54] ss:$8 sps:$4 sm:$0xff]  }
 0xa94   : > { %v5438_v37 = vor.u32 %v5436_v50, %v5435_v21  ;;  %v5535_v14 = vor.u32 %v5534_v5, %v5530_v63  ;;  %v17512_v40 = vld [vmem:[#allocation27 + $0x40] ss:$8 sps:$4 sm:$0xff]   ;;  %v17602_v49 = vld [vmem:[#allocation32 + $0x120] ss:$8 sps:$4 sm:$0xff]   ;;  %v17515_v21 = vld [vmem:[#allocation27 + $0x50] ss:$8 sps:$4 sm:$0xff]  }
 0xa95   : > { %v5431_v54 = vsel %vm2668_vm3, %v5413_v25, %v5430_v52  ;;  %v5547_v53 = vor.u32 %v5546_v2, %v5542_v26  ;;  %v17508_v25 = vld [vmem:[#allocation27 + $0x24] ss:$8 sps:$4 sm:$0xff]   ;;  %6623 = vmatpush1.bf16.msra.mxu1 %v17599_v43  ;;  %v17607_v32 = vld [vmem:[#allocation32 + $0x134] ss:$8 sps:$4 sm:$0xff]   ;;  %v17605_v50 = vld [vmem:[#allocation32 + $0x130] ss:$8 sps:$4 sm:$0xff]  }
 0xa96   : > { %v5451_v24 = vsel %vm21179_vm0, %v5431_v54, %v5450_v57  ;;  %v5439_v39 = vsel %vm2668_vm3, %v5420_v29, %v5438_v37  ;;  %6624 = vmatprep.subr.bf16.mxu1 %v17604_v45  ;;  %v17610_v52 = vld [vmem:[#allocation32 + $0x144] ss:$8 sps:$4 sm:$0xff]   ;;  %v17523_v54 = vld [vmem:[#allocation27 + $0x74] ss:$8 sps:$4 sm:$0xff]   ;;  %v17608_v57 = vld [vmem:[#allocation32 + $0x140] ss:$8 sps:$4 sm:$0xff]  }
 0xa97   : > { %5452 = vst [vmem:[#allocation2 + $0x20] sm:$0xf] %v5451_v24  ;;  %v5454_v59 = vsel %vm21179_vm0, %v5439_v39, %v5453_v58  ;;  %v6291_v61 = vld [vmem:[#allocation2] sm:$0x1]  ;;  %v17518_v37 = vld [vmem:[#allocation27 + $0x60] ss:$8 sps:$4 sm:$0xff]  }
 0xa98   : > { %5455 = vst [vmem:[#allocation2 + $0x28] sm:$0xf] %v5454_v59  ;;  %v6294_v62 = vld [vmem:[#allocation2 + $0x8] sm:$0x1]  ;;  %v6292_v18 = vsel %vm20865_vm4, 0, %v6291_v61 }
 0xa99   : > { %v6295_v19 = vsel %vm20865_vm4, 0, %v6294_v62  ;;  %6293 = vst [vmem:[#allocation2] sm:$0x1] %v6292_v18  ;;  %6625 = vmatpush1.bf16.msra.mxu1 %v17602_v49  ;;  %v17613_v24 = vld [vmem:[#allocation32 + $0x154] ss:$8 sps:$4 sm:$0xff]  }
 0xa9a   : > { %6296 = vst [vmem:[#allocation2 + $0x8] sm:$0x1] %v6295_v19  ;;  %6626 = vmatprep.subr.bf16.mxu1 %v17607_v32  ;;  %v17521_v39 = vld [vmem:[#allocation27 + $0x70] ss:$8 sps:$4 sm:$0xff]   ;;  %v17526_v58 = vld [vmem:[#allocation27 + $0x84] ss:$8 sps:$4 sm:$0xff]  }
 0xa9b   : > { %v17611_v59 = vld [vmem:[#allocation32 + $0x150] ss:$8 sps:$4 sm:$0xff]   ;;  %v17616_v61 = vld [vmem:[#allocation32 + $0x164] ss:$8 sps:$4 sm:$0xff]   ;;  %v17614_v19 = vld [vmem:[#allocation32 + $0x160] ss:$8 sps:$4 sm:$0xff]  }
 0xa9c   : > { %v17524_v62 = vld [vmem:[#allocation27 + $0x80] ss:$8 sps:$4 sm:$0xff]   ;;  %v17529_v18 = vld [vmem:[#allocation27 + $0x94] ss:$8 sps:$4 sm:$0xff]   ;;  %v17527_v1 = vld [vmem:[#allocation27 + $0x90] ss:$8 sps:$4 sm:$0xff]  }
 0xa9d   : > { %6627 = vmatpush1.bf16.msra.mxu1 %v17605_v50  ;;  %v17532_v9 = vld [vmem:[#allocation27 + $0xa4] ss:$8 sps:$4 sm:$0xff]   ;;  %v17530_v2 = vld [vmem:[#allocation27 + $0xa0] ss:$8 sps:$4 sm:$0xff]   ;;  %v17533_v5 = vld [vmem:[#allocation27 + $0xb0] ss:$8 sps:$4 sm:$0xff]  }
 0xa9e   : > { %v21306_v3 = vld [vmem:[#allocation2 + $0x20] sm:$0xf]  ;;  %6628 = vmatprep.subr.bf16.mxu1 %v17610_v52  ;;  %v17541_v26 = vld [vmem:[#allocation27 + $0xd4] ss:$8 sps:$4 sm:$0xff]   ;;  %v17563_v33 = vld [vmem:[#allocation27 + $0x250] ss:$8 sps:$4 sm:$0xff]  }
 0xa9f   : > { %v6297_v22 = vld [vmem:[#allocation2 + $0x20] sm:$0x8]  ;;  %v21308_v4 = vld [vmem:[#allocation2 + $0x28] sm:$0xf]  ;;  %v5537_v51 = vshll.u32 %v21306_v3, 16  ;;  %v5553_v42 = vshrl.u32 %v21306_v3, 16 }
 0xaa0   : > { %v6300_v6 = vld [vmem:[#allocation2 + $0x28] sm:$0x8]  ;;  %v5549_v7 = vshll.u32 %v21308_v4, 16  ;;  %v5556_v11 = vshrl.u32 %v21308_v4, 16  ;;  %v6298_v12 = vsel %vm20925_vm10, 0, %v6297_v22 }
 0xaa1   : > { %v5539_v8 = vrot.slane %v5537_v51, 1  ;;  %6299 = vst [vmem:[#allocation2 + $0x20] sm:$0x8] %v6298_v12  ;;  %v6301_v17 = vsel %vm20925_vm10, 0, %v6300_v6  ;;  %6629 = vmatpush1.bf16.msra.mxu1 %v17608_v57  ;;  %v17535_v22 = vld [vmem:[#allocation27 + $0xb4] ss:$8 sps:$4 sm:$0xff]  }
 0xaa2   : > { %v5551_v10 = vrot.slane %v5549_v7, 1  ;;  %6302 = vst [vmem:[#allocation2 + $0x28] sm:$0x8] %v6301_v17  ;;  %6630 = vmatprep.subr.bf16.mxu1 %v17613_v24  ;;  %v17538_v51 = vld [vmem:[#allocation27 + $0xc4] ss:$8 sps:$4 sm:$0xff]  }
 0xaa3   : > { %v5540_v55 = vsel %vm1692_vm1, %v5535_v14, %v5539_v8  ;;  %v5555_v29 = vor.u32 %v5553_v42, %v5539_v8  ;;  %v17536_v6 = vld [vmem:[#allocation27 + $0xc0] ss:$8 sps:$4 sm:$0xff]   ;;  %v17539_v7 = vld [vmem:[#allocation27 + $0xd0] ss:$8 sps:$4 sm:$0xff]   ;;  %v17544_v63 = vld [vmem:[#allocation27 + $0xe4] ss:$8 sps:$4 sm:$0xff]  }
 0xaa4   : > { %v5552_v0 = vsel %vm1692_vm1, %v5547_v53, %v5551_v10  ;;  %v5558_v31 = vor.u32 %v5556_v11, %v5551_v10  ;;  %v17542_v8 = vld [vmem:[#allocation27 + $0xe0] ss:$8 sps:$4 sm:$0xff]   ;;  %v17547_v53 = vld [vmem:[#allocation27 + $0xf4] ss:$8 sps:$4 sm:$0xff]   ;;  %v17545_v10 = vld [vmem:[#allocation27 + $0xf0] ss:$8 sps:$4 sm:$0xff]  }
 0xaa5   : > { %5755 = vmatprep.mubr.bf16.mxu0 %v5552_v0  ;;  %6631 = vmatpush1.bf16.msra.mxu1 %v17611_v59  ;;  %v17550_v11 = vld [vmem:[#allocation27 + $0x204] ss:$8 sps:$4 sm:$0xff]   ;;  %v17548_v12 = vld [vmem:[#allocation27 + $0x200] ss:$8 sps:$4 sm:$0xff]   ;;  %v5461_v14 = vld [vmem:[#allocation2 + $0x28] sm:$0x7] }
 0xaa6   : > { %5756 = vmatmul.mubr.bf16.vlgmr.msra.gmra.mrb[76].mxu0 %v5540_v55  ;;  %6632 = vmatprep.subr.bf16.mxu1 %v17616_v61  ;;  %v17551_v17 = vld [vmem:[#allocation27 + $0x210] ss:$8 sps:$4 sm:$0xff]   ;;  %v17556_v0 = vld [vmem:[#allocation27 + $0x224] ss:$8 sps:$4 sm:$0xff]   ;;  %v17554_v55 = vld [vmem:[#allocation27 + $0x220] ss:$8 sps:$4 sm:$0xff]  }
 0xaa7   : > { %5935 = vmatpush1.bf16.msra.mxu0 %v17500_v13  ;;  %5765 = vmatprep.mubr.bf16.mxu0 %v5558_v31  ;;  %v17553_v13 = vld [vmem:[#allocation27 + $0x214] ss:$8 sps:$4 sm:$0xff]   ;;  %v5460_v42 = vld [vmem:[#allocation2 + $0x20] sm:$0x7]  ;;  %v17566_v36 = vld [vmem:[#allocation27 + $0x260] ss:$8 sps:$4 sm:$0xff]  }
 0xaa8   : > { %5936 = vmatprep.subr.bf16.mxu0 %v17505_v41  ;;  %v5986_v31 = vld [vmem:[#allocation2 + $0x8] sm:$0xfe]  ;;  %v6028_v41 = vrot.slane %v21308_v4, 1  ;;  %v17574_v45 = vld [vmem:[#allocation27 + $0x284] ss:$8 sps:$4 sm:$0xff]  }
 0xaa9   : > { %6633 = vmatpush1.bf16.msra.mxu1 %v17614_v19  ;;  %v17565_v56 = vld [vmem:[#allocation27 + $0x254] ss:$8 sps:$4 sm:$0xff]   ;;  %v17569_v43 = vld [vmem:[#allocation27 + $0x270] ss:$8 sps:$4 sm:$0xff]   ;;  %v17580_v32 = vld [vmem:[#allocation27 + $0x2a4] ss:$8 sps:$4 sm:$0xff]  }
 0xaaa   : > { %v17575_v49 = vld [vmem:[#allocation27 + $0x290] ss:$8 sps:$4 sm:$0xff]   ;;  %v17586_v52 = vld [vmem:[#allocation27 + $0x2c4] ss:$8 sps:$4 sm:$0xff]   ;;  %v17629_v4 = vld [vmem:[#allocation32 + $0x1b0] ss:$8 sps:$4 sm:$0xff]  }
 0xaab   : > { %5937 = vmatpush1.bf16.msra.mxu0 %v17503_v60  ;;  %v6027_v60 = vrot.slane %v5986_v31, 1  ;;  %v17581_v50 = vld [vmem:[#allocation27 + $0x2b0] ss:$8 sps:$4 sm:$0xff]   ;;  %v17592_v24 = vld [vmem:[#allocation27 + $0x2e4] ss:$8 sps:$4 sm:$0xff]  }
 0xaac   : > { %5938 = vmatprep.subr.bf16.mxu0 %v17508_v25  ;;  %v17559_v25 = vld [vmem:[#allocation27 + $0x234] ss:$8 sps:$4 sm:$0xff]   ;;  %v17587_v57 = vld [vmem:[#allocation27 + $0x2d0] ss:$8 sps:$4 sm:$0xff]  }
 0xaad   : > { %v17593_v59 = vld [vmem:[#allocation27 + $0x2f0] ss:$8 sps:$4 sm:$0xff]  }
 0xaae   : > { %5766 = vmatmul.mubr.bf16.gmra.mrb[80].mxu0 %v5555_v29  ;;  %v17562_v29 = vld [vmem:[#allocation27 + $0x244] ss:$8 sps:$4 sm:$0xff]  }
 0xaaf   : > { %5939 = vmatpush1.bf16.msra.mxu0 %v17506_v28  ;;  %5966 = vmatprep.mubr.bf16.mxu0 %v21291_v47  ;;  %v17520_v47 = vld [vmem:[#allocation27 + $0x64] ss:$8 sps:$4 sm:$0xff]   ;;  %v17557_v28 = vld [vmem:[#allocation27 + $0x230] ss:$8 sps:$4 sm:$0xff]  }
 0xab0   : > { %5940 = vmatprep.subr.bf16.mxu0 %v17511_v30  ;;  %v17560_v30 = vld [vmem:[#allocation27 + $0x240] ss:$8 sps:$4 sm:$0xff]   ;;  %v5985_v61 = vld [vmem:[#allocation2] sm:$0xfe] }
 0xab3   : > { %5941 = vmatpush1.bf16.msra.mxu0 %v17509_v34  ;;  %v17568_v34 = vld [vmem:[#allocation27 + $0x264] ss:$8 sps:$4 sm:$0xff]  }
 0xab4   : > { %5942 = vmatprep.subr.bf16.mxu0 %v17514_v16  ;;  %v17571_v16 = vld [vmem:[#allocation27 + $0x274] ss:$8 sps:$4 sm:$0xff]  }
 0xab7   : > { %5943 = vmatpush1.bf16.msra.mxu0 %v17512_v40  ;;  %v17572_v40 = vld [vmem:[#allocation27 + $0x280] ss:$8 sps:$4 sm:$0xff]  }
 0xab8   : > { %5944 = vmatprep.subr.bf16.mxu0 %v17517_v48  ;;  %v17577_v48 = vld [vmem:[#allocation27 + $0x294] ss:$8 sps:$4 sm:$0xff]  }
 0xabb   : > { %5945 = vmatpush1.bf16.msra.mxu0 %v17515_v21  ;;  %v17578_v21 = vld [vmem:[#allocation27 + $0x2a0] ss:$8 sps:$4 sm:$0xff]  }
 0xabc   : > { %5946 = vmatprep.subr.bf16.mxu0 %v17520_v47  ;;  %v17583_v47 = vld [vmem:[#allocation27 + $0x2b4] ss:$8 sps:$4 sm:$0xff]  }
 0xabf   : > { %5947 = vmatpush1.bf16.msra.mxu0 %v17518_v37  ;;  %v17584_v37 = vld [vmem:[#allocation27 + $0x2c0] ss:$8 sps:$4 sm:$0xff]  }
 0xac0   : > { %5948 = vmatprep.subr.bf16.mxu0 %v17523_v54  ;;  %v17589_v54 = vld [vmem:[#allocation27 + $0x2d4] ss:$8 sps:$4 sm:$0xff]  }
 0xac3   : > { %5949 = vmatpush1.bf16.msra.mxu0 %v17521_v39  ;;  %v17590_v39 = vld [vmem:[#allocation27 + $0x2e0] ss:$8 sps:$4 sm:$0xff]  }
 0xac4   : > { %5950 = vmatprep.subr.bf16.mxu0 %v17526_v58  ;;  %v17595_v58 = vld [vmem:[#allocation27 + $0x2f4] ss:$8 sps:$4 sm:$0xff]  }
 0xac7   : > { %5951 = vmatpush1.bf16.msra.mxu0 %v17524_v62  ;;  %v6025_v62 = vrot.slane %v21306_v3, 1  ;;  %v17628_v3 = vld [vmem:[#allocation32 + $0x1a4] ss:$8 sps:$4 sm:$0xff]  }
 0xac8   : > { %5952 = vmatprep.subr.bf16.mxu0 %v17529_v18  ;;  %v6024_v18 = vrot.slane %v5985_v61, 1 }
 0xaca   : > { %v6026_v19 = vsel %vm2348_vm11, %v6024_v18, %v6025_v62 }
 0xacb   : > { %5953 = vmatpush1.bf16.msra.mxu0 %v17527_v1  ;;  %v17619_v1 = vld [vmem:[#allocation32 + $0x174] ss:$8 sps:$4 sm:$0xff]  }
 0xacc   : > { %5954 = vmatprep.subr.bf16.mxu0 %v17532_v9  ;;  %v17617_v9 = vld [vmem:[#allocation32 + $0x170] ss:$8 sps:$4 sm:$0xff]   ;;  %6634 = vmatprep.subr.bf16.mxu1 %v17619_v1 }
 0xacd   : > { %6635 = vmatpush1.bf16.msra.mxu1 %v17617_v9 }
 0xacf   : > { %5955 = vmatpush1.bf16.msra.mxu0 %v17530_v2  ;;  %v17622_v2 = vld [vmem:[#allocation32 + $0x184] ss:$8 sps:$4 sm:$0xff]  }
 0xad0   : > { %5956 = vmatprep.subr.bf16.mxu0 %v17535_v22  ;;  %v17620_v22 = vld [vmem:[#allocation32 + $0x180] ss:$8 sps:$4 sm:$0xff]   ;;  %6636 = vmatprep.subr.bf16.mxu1 %v17622_v2 }
 0xad1   : > { %6637 = vmatpush1.bf16.msra.mxu1 %v17620_v22 }
 0xad3   : > { %5957 = vmatpush1.bf16.msra.mxu0 %v17533_v5  ;;  %v17625_v5 = vld [vmem:[#allocation32 + $0x194] ss:$8 sps:$4 sm:$0xff]  }
 0xad4   : > { %5958 = vmatprep.subr.bf16.mxu0 %v17538_v51  ;;  %v17623_v51 = vld [vmem:[#allocation32 + $0x190] ss:$8 sps:$4 sm:$0xff]   ;;  %6638 = vmatprep.subr.bf16.mxu1 %v17625_v5  ;;  %v6341_v5 = vld [vmem:[#allocation2] sm:$0xff] }
 0xad5   : > { %6639 = vmatpush1.bf16.msra.mxu1 %v17623_v51 }
 0xad6   : > { %6640 = vmatprep.subr.bf16.mxu1 %v17628_v3 }
 0xad7   : > { %5959 = vmatpush1.bf16.msra.mxu0 %v17536_v6  ;;  %v17626_v6 = vld [vmem:[#allocation32 + $0x1a0] ss:$8 sps:$4 sm:$0xff]  }
 0xad8   : > { %5960 = vmatprep.subr.bf16.mxu0 %v17541_v26  ;;  %v17631_v26 = vld [vmem:[#allocation32 + $0x1b4] ss:$8 sps:$4 sm:$0xff]  }
 0xad9   : > { %6641 = vmatpush1.bf16.msra.mxu1 %v17626_v6 }
 0xada   : > { %6642 = vmatprep.subr.bf16.mxu1 %v17631_v26  ;;  %v6344_v26 = vld [vmem:[#allocation2 + $0x8] sm:$0xff] }
 0xadb   : > { %5961 = vmatpush1.bf16.msra.mxu0 %v17539_v7  ;;  %v17634_v7 = vld [vmem:[#allocation32 + $0x1c4] ss:$8 sps:$4 sm:$0xff]  }
 0xadc   : > { %5962 = vmatprep.subr.bf16.mxu0 %v17544_v63  ;;  %v17632_v63 = vld [vmem:[#allocation32 + $0x1c0] ss:$8 sps:$4 sm:$0xff]  }
 0xadd   : > { %6643 = vmatpush1.bf16.msra.mxu1 %v17629_v4 }
 0xade   : > { %6644 = vmatprep.subr.bf16.mxu1 %v17634_v7 }
 0xadf   : > { %5963 = vmatpush1.bf16.msra.mxu0 %v17542_v8  ;;  %v17637_v8 = vld [vmem:[#allocation32 + $0x1d4] ss:$8 sps:$4 sm:$0xff]  }
 0xae0   : > { %5964 = vmatprep.subr.bf16.mxu0 %v17547_v53  ;;  %v17635_v53 = vld [vmem:[#allocation32 + $0x1d0] ss:$8 sps:$4 sm:$0xff]  }
 0xae1   : > { %6645 = vmatpush1.bf16.msra.mxu1 %v17632_v63 }
 0xae2   : > { %6646 = vmatprep.subr.bf16.mxu1 %v17637_v8 }
 0xae3   : > { %5965 = vmatpush1.bf16.msra.mxu0 %v17545_v10  ;;  %v17640_v10 = vld [vmem:[#allocation32 + $0x1e4] ss:$8 sps:$4 sm:$0xff]  }
 0xae4   : > { %6194 = vmatprep.subr.bf16.mxu0 %v17550_v11  ;;  %v17638_v11 = vld [vmem:[#allocation32 + $0x1e0] ss:$8 sps:$4 sm:$0xff]  }
 0xae5   : > { %6647 = vmatpush1.bf16.msra.mxu1 %v17635_v53 }
 0xae6   : > { %5967 = vmatmul.mubr.bf16.vlgmr.msra.gmra.mrb[76].mxu0 %v21286_v44  ;;  %v6029_v44 = vsel %vm2348_vm11, %v6027_v60, %v6028_v41  ;;  %6648 = vmatprep.subr.bf16.mxu1 %v17640_v10 }
 0xae7   : > { %5976 = vmatprep.mubr.bf16.mxu0 %v5461_v14  ;;  %6195 = vmatpush1.bf16.msra.mxu0 %v17548_v12  ;;  %v17643_v12 = vld [vmem:[#allocation32 + $0x1f4] ss:$8 sps:$4 sm:$0xff]   ;;  %v17646_v14 = vld [vmem:[#allocation32 + $0x4] ss:$8 sps:$4 sm:$0xff]  }
 0xae8   : > { %6196 = vmatprep.subr.bf16.mxu0 %v17553_v13  ;;  %v17641_v13 = vld [vmem:[#allocation32 + $0x1f0] ss:$8 sps:$4 sm:$0xff]  }
 0xae9   : > { %6649 = vmatpush1.bf16.msra.mxu1 %v17638_v11 }
 0xaea   : > { %6650 = vmatprep.subr.bf16.mxu1 %v17643_v12 }
 0xaeb   : > { %6197 = vmatpush1.bf16.msra.mxu0 %v17551_v17  ;;  %v5456_v17 = vld [vmem:[#allocation29] sm:$0x3] }
 0xaec   : > { %6198 = vmatprep.subr.bf16.mxu0 %v17556_v0  ;;  %v5457_v0 = vld [vmem:[#allocation30] sm:$0x3]  ;;  %v6255_v31 = vrot.slane %v5456_v17, %v21223_v15 }
 0xaed   : > { %6651 = vmatpush1.bf16.msra.mxu1 %v17641_v13 }
 0xaee   : > { %5977 = vmatmul.mubr.bf16.gmra.mrb[80].mxu0 %v5460_v42  ;;  %6831 = vmatprep.subr.bf16.mxu1 %v17646_v14 }
 0xaef   : > { %6199 = vmatpush1.bf16.msra.mxu0 %v17554_v55  ;;  %6226 = vmatprep.mubr.bf16.mxu0 %v6029_v44  ;;  %v6272_v55 = vrot.slane %v5457_v0, %v21223_v15 }
 0xaf0   : > { %6200 = vmatprep.subr.bf16.mxu0 %v17559_v25  ;;  %v6276_v25 = vrot.slane %v5457_v0, %v21226_v23 }
 0xaf3   : > { %6201 = vmatpush1.bf16.msra.mxu0 %v17557_v28 }
 0xaf4   : > { %6202 = vmatprep.subr.bf16.mxu0 %v17562_v29 }
 0xaf7   : > { %6203 = vmatpush1.bf16.msra.mxu0 %v17560_v30 }
 0xaf8   : > { %6204 = vmatprep.subr.bf16.mxu0 %v17565_v56 }
 0xafb   : > { %6205 = vmatpush1.bf16.msra.mxu0 %v17563_v33 }
 0xafc   : > { %6206 = vmatprep.subr.bf16.mxu0 %v17568_v34 }
 0xaff   : > { %6207 = vmatpush1.bf16.msra.mxu0 %v17566_v36 }
 0xb00   : > { %6208 = vmatprep.subr.bf16.mxu0 %v17571_v16 }
 0xb03   : > { %6209 = vmatpush1.bf16.msra.mxu0 %v17569_v43 }
 0xb04   : > { %6210 = vmatprep.subr.bf16.mxu0 %v17574_v45 }
 0xb07   : > { %6211 = vmatpush1.bf16.msra.mxu0 %v17572_v40 }
 0xb08   : > { %6212 = vmatprep.subr.bf16.mxu0 %v17577_v48 }
 0xb0b   : > { %6213 = vmatpush1.bf16.msra.mxu0 %v17575_v49 }
 0xb0c   : > { %6214 = vmatprep.subr.bf16.mxu0 %v17580_v32 }
 0xb0f   : > { %6215 = vmatpush1.bf16.msra.mxu0 %v17578_v21 }
 0xb10   : > { %6216 = vmatprep.subr.bf16.mxu0 %v17583_v47 }
 0xb13   : > { %6217 = vmatpush1.bf16.msra.mxu0 %v17581_v50 }
 0xb14   : > { %6218 = vmatprep.subr.bf16.mxu0 %v17586_v52 }
 0xb17   : > { %6219 = vmatpush1.bf16.msra.mxu0 %v17584_v37 }
 0xb18   : > { %6220 = vmatprep.subr.bf16.mxu0 %v17589_v54 }
 0xb1b   : > { %6221 = vmatpush1.bf16.msra.mxu0 %v17587_v57 }
 0xb1c   : > { %6222 = vmatprep.subr.bf16.mxu0 %v17592_v24 }
 0xb1f   : > { %6223 = vmatpush1.bf16.msra.mxu0 %v17590_v39 }
 0xb20   : > { %6224 = vmatprep.subr.bf16.mxu0 %v17595_v58 }
 0xb23   : > { %6225 = vmatpush1.bf16.msra.mxu0 %v17593_v59 }
 0xb26   : > { %6227 = vmatmul.mubr.bf16.vlgmr.msra.gmra.mrb[76].mxu0 %v6026_v19 }
 0xb27   : > { %6236 = vmatprep.mubr.bf16.mxu0 %v6028_v41  ;;  %v6259_v41 = vrot.slane %v5456_v17, %v21226_v23  ;;  %v6347_v17 = vld [vmem:[#allocation2 + $0x20] sm:$0xf] }
 0xb2e   : > { %6237 = vmatmul.mubr.bf16.gmra.mrb[80].mxu0 %v6025_v62 }
 0xbf9   : > { %v6228_v60 = vpop.f32.mrb[76].mxu0 }
 0xbfa   : > { %v6262_v42 = vmul.f32 %v6255_v31, %v6228_v60  ;;  %v6230_v44 = vpop.f32.mrb[77].mxu0 }
 0xbfb   : > { %v6263_v28 = vmul.f32 %v6259_v41, %v6230_v44  ;;  %v6232_v29 = vpop.f32.mrb[78].mxu0 }
 0xbfc   : > { %v6279_v30 = vadd.f32 %v6272_v55, %v6262_v42  ;;  %v6264_v56 = vmul.f32 %v6255_v31, %v6232_v29  ;;  %v6234_v33 = vpop.f32.mrb[79].mxu0 }
 0xbfd   : > { %v6280_v34 = vadd.f32 %v6276_v25, %v6263_v28  ;;  %v6265_v36 = vmul.f32 %v6259_v41, %v6234_v33 }
 0xbfe   : > { %v6281_v16 = vadd.f32 %v6272_v55, %v6264_v56  ;;  %v6285_v45 = vmax.f32 %v6279_v30, 0.0 }
 0xbff   : > { %v6282_v43 = vadd.f32 %v6276_v25, %v6265_v36  ;;  %v6286_v48 = vmax.f32 %v6280_v34, 0.0 }
 0xc00   : > { %v6287_v40 = vmax.f32 %v6281_v16, 0.0 }
 0xc01   : > { %v6288_v49 = vmax.f32 %v6282_v43, 0.0  ;;  %v6238_v32 = vpop.f32.mrb[80].mxu0 }
 0xc02   : > { %v6303_v21 = vpack.c.bf16 %v6287_v40, %v6285_v45  ;;  %v6266_v47 = vmul.f32 %v6255_v31, %v6238_v32  ;;  %v6240_v50 = vpop.f32.mrb[81].mxu0 }
 0xc03   : > { %v6304_v52 = vpack.c.bf16 %v6288_v49, %v6286_v48  ;;  %v6267_v37 = vmul.f32 %v6259_v41, %v6240_v50  ;;  %v6242_v54 = vpop.f32.mrb[82].mxu0  ;;  %v6350_v41 = vld [vmem:[#allocation2 + $0x28] sm:$0xf] }
 0xc04   : > { %v6308_v57 = vshrl.u32 %v6303_v21, 16  ;;  %v6283_v24 = vadd.f32 %v6272_v55, %v6266_v47  ;;  %v6243_v39 = vpop.f32.mrb[83].mxu0  ;;  %v6311_v62 = vshll.u32 %v6303_v21, 16 }
 0xc05   : > { %v6315_v58 = vshrl.u32 %v6304_v52, 16  ;;  %v6284_v59 = vadd.f32 %v6276_v25, %v6267_v37  ;;  %v6318_v1 = vshll.u32 %v6304_v52, 16  ;;  %v17644_v52 = vld [vmem:[#allocation32] ss:$8 sps:$4 sm:$0xff]   ;;  %v17649_v39 = vld [vmem:[#allocation32 + $0x14] ss:$8 sps:$4 sm:$0xff]  }
 0xc06   : > { %v6310_v61 = vrot.slane %v6308_v57, 7  ;;  %v6289_v18 = vmax.f32 %v6283_v24, 0.0 }
 0xc07   : > { %v6317_v19 = vrot.slane %v6315_v58, 7  ;;  %v6290_v9 = vmax.f32 %v6284_v59, 0.0  ;;  %v17647_v59 = vld [vmem:[#allocation32 + $0x10] ss:$8 sps:$4 sm:$0xff]  }
 0xc08   : > { %v6313_v2 = vor.u32 %v6311_v62, %v6310_v61  ;;  %v6305_v22 = vpack.c.bf16 %v6289_v18, %v6289_v18  ;;  %v17650_v18 = vld [vmem:[#allocation32 + $0x20] ss:$8 sps:$4 sm:$0xff]  }
 0xc09   : > { %v6320_v51 = vor.u32 %v6318_v1, %v6317_v19  ;;  %v6306_v3 = vpack.c.bf16 %v6290_v9, %v6290_v9  ;;  %v17655_v1 = vld [vmem:[#allocation32 + $0x34] ss:$8 sps:$4 sm:$0xff]   ;;  %v17740_v9 = vld [vmem:[#allocation36 + $0x100] ss:$8 sps:$4 sm:$0xff]  }
 0xc0a   : > { %v21338_v6 = vsel %vm21007_vm14, %v6313_v2, %v6341_v5  ;;  %v6322_v4 = vshrl.u32 %v6305_v22, 16  ;;  %v6325_v53 = vshll.u32 %v6305_v22, 16  ;;  %v17742_v2 = vld [vmem:[#allocation36 + $0x104] ss:$8 sps:$4 sm:$0xff]   ;;  %v17745_v5 = vld [vmem:[#allocation36 + $0x114] ss:$8 sps:$4 sm:$0xff]  }
 0xc0b   : > { %6343 = vst [vmem:[#allocation2] sm:$0xff] %v21338_v6  ;;  %v21343_v7 = vsel %vm21007_vm14, %v6320_v51, %v6344_v26  ;;  %v6330_v63 = vshrl.u32 %v6306_v3, 16  ;;  %v6333_v11 = vshll.u32 %v6306_v3, 16  ;;  %v6429_v29 = vshll.u32 %v21338_v6, 16  ;;  %v17653_v22 = vld [vmem:[#allocation32 + $0x30] ss:$8 sps:$4 sm:$0xff]   ;;  %7517 = vmatprep.subr.bf16.mxu0 %v17742_v2 }
 0xc0c   : > { %6346 = vst [vmem:[#allocation2 + $0x8] sm:$0xff] %v21343_v7  ;;  %v6324_v8 = vrot.slane %v6322_v4, 7  ;;  %v6441_v28 = vshll.u32 %v21343_v7, 16  ;;  %v6439_v45 = vshrl.u32 %v21343_v7, 16  ;;  %v6427_v48 = vshrl.u32 %v21338_v6, 16  ;;  %7518 = vmatpush1.bf16.msra.mxu0 %v17740_v9 }
 0xc0d   : > { %v6332_v10 = vrot.slane %v6330_v63, 7  ;;  %v6431_v34 = vrot.slane %v6429_v29, 1  ;;  %v17658_v51 = vld [vmem:[#allocation32 + $0x44] ss:$8 sps:$4 sm:$0xff]   ;;  %v17743_v3 = vld [vmem:[#allocation36 + $0x110] ss:$8 sps:$4 sm:$0xff]   ;;  %7519 = vmatprep.subr.bf16.mxu0 %v17745_v5 }
 0xc0e   : > { %v6327_v12 = vor.u32 %v6325_v53, %v6324_v8  ;;  %v6443_v30 = vrot.slane %v6441_v28, 1  ;;  %v17748_v26 = vld [vmem:[#allocation36 + $0x124] ss:$8 sps:$4 sm:$0xff]   ;;  %v17661_v63 = vld [vmem:[#allocation32 + $0x54] ss:$8 sps:$4 sm:$0xff]  }
 0xc0f   : > { %v6335_v13 = vor.u32 %v6333_v11, %v6332_v10  ;;  %v6432_v37 = vor.u32 %v6431_v34, %v6427_v48  ;;  %v17656_v4 = vld [vmem:[#allocation32 + $0x40] ss:$8 sps:$4 sm:$0xff]   ;;  %v17746_v8 = vld [vmem:[#allocation36 + $0x120] ss:$8 sps:$4 sm:$0xff]   ;;  %v17659_v10 = vld [vmem:[#allocation32 + $0x50] ss:$8 sps:$4 sm:$0xff]  }
 0xc10   : > { %v6328_v14 = vsel %vm2668_vm3, %v6310_v61, %v6327_v12  ;;  %v6444_v32 = vor.u32 %v6443_v30, %v6439_v45  ;;  %v17652_v61 = vld [vmem:[#allocation32 + $0x24] ss:$8 sps:$4 sm:$0xff]   ;;  %7520 = vmatpush1.bf16.msra.mxu0 %v17743_v3  ;;  %v17751_v53 = vld [vmem:[#allocation36 + $0x134] ss:$8 sps:$4 sm:$0xff]   ;;  %v17749_v11 = vld [vmem:[#allocation36 + $0x130] ss:$8 sps:$4 sm:$0xff]  }
 0xc11   : > { %v6348_v0 = vsel %vm21179_vm0, %v6328_v14, %v6347_v17  ;;  %v6336_v31 = vsel %vm2668_vm3, %v6317_v19, %v6335_v13  ;;  %7521 = vmatprep.subr.bf16.mxu0 %v17748_v26  ;;  %v17754_v12 = vld [vmem:[#allocation36 + $0x144] ss:$8 sps:$4 sm:$0xff]   ;;  %v17667_v14 = vld [vmem:[#allocation32 + $0x74] ss:$8 sps:$4 sm:$0xff]   ;;  %v17752_v17 = vld [vmem:[#allocation36 + $0x140] ss:$8 sps:$4 sm:$0xff]  }
 0xc12   : > { %6349 = vst [vmem:[#allocation2 + $0x20] sm:$0xf] %v6348_v0  ;;  %v6351_v55 = vsel %vm21179_vm0, %v6336_v31, %v6350_v41  ;;  %v7188_v60 = vld [vmem:[#allocation2] sm:$0x1]  ;;  %v17757_v0 = vld [vmem:[#allocation36 + $0x154] ss:$8 sps:$4 sm:$0xff]  }
 0xc13   : > { %6352 = vst [vmem:[#allocation2 + $0x28] sm:$0xf] %v6351_v55  ;;  %v7191_v25 = vld [vmem:[#allocation2 + $0x8] sm:$0x1]  ;;  %v7189_v42 = vsel %vm20865_vm4, 0, %v7188_v60 }
 0xc14   : > { %v7192_v44 = vsel %vm20865_vm4, 0, %v7191_v25  ;;  %7190 = vst [vmem:[#allocation2] sm:$0x1] %v7189_v42  ;;  %7522 = vmatpush1.bf16.msra.mxu0 %v17746_v8  ;;  %v17662_v13 = vld [vmem:[#allocation32 + $0x60] ss:$8 sps:$4 sm:$0xff]  }
 0xc15   : > { %7193 = vst [vmem:[#allocation2 + $0x8] sm:$0x1] %v7192_v44  ;;  %7523 = vmatprep.subr.bf16.mxu0 %v17751_v53  ;;  %v17665_v31 = vld [vmem:[#allocation32 + $0x70] ss:$8 sps:$4 sm:$0xff]   ;;  %v17670_v41 = vld [vmem:[#allocation32 + $0x84] ss:$8 sps:$4 sm:$0xff]  }
 0xc16   : > { %v17755_v55 = vld [vmem:[#allocation36 + $0x150] ss:$8 sps:$4 sm:$0xff]   ;;  %v17760_v60 = vld [vmem:[#allocation36 + $0x164] ss:$8 sps:$4 sm:$0xff]   ;;  %v17758_v44 = vld [vmem:[#allocation36 + $0x160] ss:$8 sps:$4 sm:$0xff]  }
 0xc17   : > { %v17668_v25 = vld [vmem:[#allocation32 + $0x80] ss:$8 sps:$4 sm:$0xff]   ;;  %v17673_v42 = vld [vmem:[#allocation32 + $0x94] ss:$8 sps:$4 sm:$0xff]   ;;  %v17671_v28 = vld [vmem:[#allocation32 + $0x90] ss:$8 sps:$4 sm:$0xff]  }
 0xc18   : > { %7524 = vmatpush1.bf16.msra.mxu0 %v17749_v11  ;;  %v17676_v29 = vld [vmem:[#allocation32 + $0xa4] ss:$8 sps:$4 sm:$0xff]   ;;  %v17674_v30 = vld [vmem:[#allocation32 + $0xa0] ss:$8 sps:$4 sm:$0xff]   ;;  %v17679_v34 = vld [vmem:[#allocation32 + $0xb4] ss:$8 sps:$4 sm:$0xff]  }
 0xc19   : > { %v21358_v56 = vld [vmem:[#allocation2 + $0x20] sm:$0xf]  ;;  %7525 = vmatprep.subr.bf16.mxu0 %v17754_v12  ;;  %v17685_v45 = vld [vmem:[#allocation32 + $0xd4] ss:$8 sps:$4 sm:$0xff]   ;;  %v17688_v48 = vld [vmem:[#allocation32 + $0xe4] ss:$8 sps:$4 sm:$0xff]  }
 0xc1a   : > { %v21360_v33 = vld [vmem:[#allocation2 + $0x28] sm:$0xf]  ;;  %v6434_v36 = vshll.u32 %v21358_v56, 16  ;;  %v7194_v16 = vld [vmem:[#allocation2 + $0x20] sm:$0x8]  ;;  %v6450_v62 = vshrl.u32 %v21358_v56, 16 }
 0xc1b   : > { %v7197_v43 = vld [vmem:[#allocation2 + $0x28] sm:$0x8]  ;;  %v6446_v40 = vshll.u32 %v21360_v33, 16  ;;  %v6453_v47 = vshrl.u32 %v21360_v33, 16  ;;  %v7195_v50 = vsel %vm20925_vm10, 0, %v7194_v16 }
 0xc1c   : > { %v6436_v49 = vrot.slane %v6434_v36, 1  ;;  %7196 = vst [vmem:[#allocation2 + $0x20] sm:$0x8] %v7195_v50  ;;  %v7198_v54 = vsel %vm20925_vm10, 0, %v7197_v43  ;;  %7526 = vmatpush1.bf16.msra.mxu0 %v17752_v17  ;;  %v17677_v36 = vld [vmem:[#allocation32 + $0xb0] ss:$8 sps:$4 sm:$0xff]  }
 0xc1d   : > { %v6448_v21 = vrot.slane %v6446_v40, 1  ;;  %7199 = vst [vmem:[#allocation2 + $0x28] sm:$0x8] %v7198_v54  ;;  %7527 = vmatprep.subr.bf16.mxu0 %v17757_v0  ;;  %v17682_v16 = vld [vmem:[#allocation32 + $0xc4] ss:$8 sps:$4 sm:$0xff]  }
 0xc1e   : > { %v6437_v58 = vsel %vm1692_vm1, %v6432_v37, %v6436_v49  ;;  %v6452_v19 = vor.u32 %v6450_v62, %v6436_v49  ;;  %v17680_v43 = vld [vmem:[#allocation32 + $0xc0] ss:$8 sps:$4 sm:$0xff]   ;;  %v17683_v40 = vld [vmem:[#allocation32 + $0xd0] ss:$8 sps:$4 sm:$0xff]   ;;  %v17709_v9 = vld [vmem:[#allocation32 + $0x254] ss:$8 sps:$4 sm:$0xff]  }
 0xc1f   : > { %v6449_v57 = vsel %vm1692_vm1, %v6444_v32, %v6448_v21  ;;  %v6455_v24 = vor.u32 %v6453_v47, %v6448_v21  ;;  %v17686_v49 = vld [vmem:[#allocation32 + $0xe0] ss:$8 sps:$4 sm:$0xff]   ;;  %v17691_v32 = vld [vmem:[#allocation32 + $0xf4] ss:$8 sps:$4 sm:$0xff]   ;;  %v17689_v21 = vld [vmem:[#allocation32 + $0xf0] ss:$8 sps:$4 sm:$0xff]  }
 0xc20   : > { %6652 = vmatprep.mubr.bf16.mxu1 %v6449_v57  ;;  %7528 = vmatpush1.bf16.msra.mxu0 %v17755_v55  ;;  %v17694_v47 = vld [vmem:[#allocation32 + $0x204] ss:$8 sps:$4 sm:$0xff]   ;;  %v17692_v50 = vld [vmem:[#allocation32 + $0x200] ss:$8 sps:$4 sm:$0xff]   ;;  %v6358_v37 = vld [vmem:[#allocation2 + $0x28] sm:$0x7] }
 0xc21   : > { %6653 = vmatmul.mubr.bf16.vlgmr.msra.gmra.mrb[16].mxu1 %v6437_v58  ;;  %7529 = vmatprep.subr.bf16.mxu0 %v17760_v60  ;;  %v17695_v54 = vld [vmem:[#allocation32 + $0x210] ss:$8 sps:$4 sm:$0xff]   ;;  %v17700_v57 = vld [vmem:[#allocation32 + $0x224] ss:$8 sps:$4 sm:$0xff]   ;;  %v17698_v58 = vld [vmem:[#allocation32 + $0x220] ss:$8 sps:$4 sm:$0xff]  }
 0xc22   : > { %6832 = vmatpush1.bf16.msra.mxu1 %v17644_v52  ;;  %6662 = vmatprep.mubr.bf16.mxu1 %v6455_v24  ;;  %v17697_v52 = vld [vmem:[#allocation32 + $0x214] ss:$8 sps:$4 sm:$0xff]   ;;  %v6357_v62 = vld [vmem:[#allocation2 + $0x20] sm:$0x7]  ;;  %v17707_v2 = vld [vmem:[#allocation32 + $0x250] ss:$8 sps:$4 sm:$0xff]  }
 0xc23   : > { %6833 = vmatprep.subr.bf16.mxu1 %v17649_v39  ;;  %v6883_v24 = vld [vmem:[#allocation2 + $0x8] sm:$0xfe]  ;;  %v6925_v39 = vrot.slane %v21360_v33, 1  ;;  %v17710_v5 = vld [vmem:[#allocation32 + $0x260] ss:$8 sps:$4 sm:$0xff]  }
 0xc24   : > { %7530 = vmatpush1.bf16.msra.mxu0 %v17758_v44  ;;  %v17713_v3 = vld [vmem:[#allocation32 + $0x270] ss:$8 sps:$4 sm:$0xff]   ;;  %v17718_v26 = vld [vmem:[#allocation32 + $0x284] ss:$8 sps:$4 sm:$0xff]   ;;  %v17773_v33 = vld [vmem:[#allocation36 + $0x1b0] ss:$8 sps:$4 sm:$0xff]  }
 0xc25   : > { %v17719_v8 = vld [vmem:[#allocation32 + $0x290] ss:$8 sps:$4 sm:$0xff]   ;;  %v17724_v53 = vld [vmem:[#allocation32 + $0x2a4] ss:$8 sps:$4 sm:$0xff]  }
 0xc26   : > { %6834 = vmatpush1.bf16.msra.mxu1 %v17647_v59  ;;  %v6924_v59 = vrot.slane %v6883_v24, 1  ;;  %v17725_v11 = vld [vmem:[#allocation32 + $0x2b0] ss:$8 sps:$4 sm:$0xff]   ;;  %v17730_v12 = vld [vmem:[#allocation32 + $0x2c4] ss:$8 sps:$4 sm:$0xff]  }
 0xc27   : > { %6835 = vmatprep.subr.bf16.mxu1 %v17652_v61  ;;  %v17703_v61 = vld [vmem:[#allocation32 + $0x234] ss:$8 sps:$4 sm:$0xff]   ;;  %v17731_v17 = vld [vmem:[#allocation32 + $0x2d0] ss:$8 sps:$4 sm:$0xff]   ;;  %v17736_v0 = vld [vmem:[#allocation32 + $0x2e4] ss:$8 sps:$4 sm:$0xff]  }
 0xc28   : > { %v17737_v55 = vld [vmem:[#allocation32 + $0x2f0] ss:$8 sps:$4 sm:$0xff]   ;;  %v6882_v60 = vld [vmem:[#allocation2] sm:$0xfe] }
 0xc29   : > { %6663 = vmatmul.mubr.bf16.gmra.mrb[20].mxu1 %v6452_v19  ;;  %v17706_v19 = vld [vmem:[#allocation32 + $0x244] ss:$8 sps:$4 sm:$0xff]  }
 0xc2a   : > { %6836 = vmatpush1.bf16.msra.mxu1 %v17650_v18  ;;  %6863 = vmatprep.mubr.bf16.mxu1 %v21343_v7  ;;  %v17664_v7 = vld [vmem:[#allocation32 + $0x64] ss:$8 sps:$4 sm:$0xff]   ;;  %v17701_v18 = vld [vmem:[#allocation32 + $0x230] ss:$8 sps:$4 sm:$0xff]  }
 0xc2b   : > { %6837 = vmatprep.subr.bf16.mxu1 %v17655_v1  ;;  %v17704_v1 = vld [vmem:[#allocation32 + $0x240] ss:$8 sps:$4 sm:$0xff]  }
 0xc2e   : > { %6838 = vmatpush1.bf16.msra.mxu1 %v17653_v22  ;;  %v17712_v22 = vld [vmem:[#allocation32 + $0x264] ss:$8 sps:$4 sm:$0xff]  }
 0xc2f   : > { %6839 = vmatprep.subr.bf16.mxu1 %v17658_v51  ;;  %v17715_v51 = vld [vmem:[#allocation32 + $0x274] ss:$8 sps:$4 sm:$0xff]  }
 0xc32   : > { %6840 = vmatpush1.bf16.msra.mxu1 %v17656_v4  ;;  %v17716_v4 = vld [vmem:[#allocation32 + $0x280] ss:$8 sps:$4 sm:$0xff]  }
 0xc33   : > { %6841 = vmatprep.subr.bf16.mxu1 %v17661_v63  ;;  %v17721_v63 = vld [vmem:[#allocation32 + $0x294] ss:$8 sps:$4 sm:$0xff]  }
 0xc36   : > { %6842 = vmatpush1.bf16.msra.mxu1 %v17659_v10  ;;  %v17722_v10 = vld [vmem:[#allocation32 + $0x2a0] ss:$8 sps:$4 sm:$0xff]  }
 0xc37   : > { %6843 = vmatprep.subr.bf16.mxu1 %v17664_v7  ;;  %v17727_v7 = vld [vmem:[#allocation32 + $0x2b4] ss:$8 sps:$4 sm:$0xff]  }
 0xc3a   : > { %6844 = vmatpush1.bf16.msra.mxu1 %v17662_v13  ;;  %v17728_v13 = vld [vmem:[#allocation32 + $0x2c0] ss:$8 sps:$4 sm:$0xff]  }
 0xc3b   : > { %6845 = vmatprep.subr.bf16.mxu1 %v17667_v14  ;;  %v17733_v14 = vld [vmem:[#allocation32 + $0x2d4] ss:$8 sps:$4 sm:$0xff]  }
 0xc3e   : > { %6846 = vmatpush1.bf16.msra.mxu1 %v17665_v31  ;;  %v17734_v31 = vld [vmem:[#allocation32 + $0x2e0] ss:$8 sps:$4 sm:$0xff]  }
 0xc3f   : > { %6847 = vmatprep.subr.bf16.mxu1 %v17670_v41  ;;  %v17739_v41 = vld [vmem:[#allocation32 + $0x2f4] ss:$8 sps:$4 sm:$0xff]  }
 0xc42   : > { %6848 = vmatpush1.bf16.msra.mxu1 %v17668_v25  ;;  %v6922_v25 = vrot.slane %v21358_v56, 1  ;;  %v17772_v56 = vld [vmem:[#allocation36 + $0x1a4] ss:$8 sps:$4 sm:$0xff]  }
 0xc43   : > { %6849 = vmatprep.subr.bf16.mxu1 %v17673_v42  ;;  %v6921_v42 = vrot.slane %v6882_v60, 1 }
 0xc45   : > { %v6923_v44 = vsel %vm2348_vm11, %v6921_v42, %v6922_v25 }
 0xc46   : > { %6850 = vmatpush1.bf16.msra.mxu1 %v17671_v28  ;;  %v17763_v28 = vld [vmem:[#allocation36 + $0x174] ss:$8 sps:$4 sm:$0xff]  }
 0xc47   : > { %6851 = vmatprep.subr.bf16.mxu1 %v17676_v29  ;;  %v17761_v29 = vld [vmem:[#allocation36 + $0x170] ss:$8 sps:$4 sm:$0xff]   ;;  %7531 = vmatprep.subr.bf16.mxu0 %v17763_v28 }
 0xc48   : > { %7532 = vmatpush1.bf16.msra.mxu0 %v17761_v29 }
 0xc4a   : > { %6852 = vmatpush1.bf16.msra.mxu1 %v17674_v30  ;;  %v17766_v30 = vld [vmem:[#allocation36 + $0x184] ss:$8 sps:$4 sm:$0xff]  }
 0xc4b   : > { %6853 = vmatprep.subr.bf16.mxu1 %v17679_v34  ;;  %v17764_v34 = vld [vmem:[#allocation36 + $0x180] ss:$8 sps:$4 sm:$0xff]   ;;  %7533 = vmatprep.subr.bf16.mxu0 %v17766_v30 }
 0xc4c   : > { %7534 = vmatpush1.bf16.msra.mxu0 %v17764_v34 }
 0xc4e   : > { %6854 = vmatpush1.bf16.msra.mxu1 %v17677_v36  ;;  %v17769_v36 = vld [vmem:[#allocation36 + $0x194] ss:$8 sps:$4 sm:$0xff]  }
 0xc4f   : > { %6855 = vmatprep.subr.bf16.mxu1 %v17682_v16  ;;  %v17767_v16 = vld [vmem:[#allocation36 + $0x190] ss:$8 sps:$4 sm:$0xff]   ;;  %7535 = vmatprep.subr.bf16.mxu0 %v17769_v36  ;;  %v7238_v36 = vld [vmem:[#allocation2] sm:$0xff] }
 0xc50   : > { %7536 = vmatpush1.bf16.msra.mxu0 %v17767_v16 }
 0xc51   : > { %7537 = vmatprep.subr.bf16.mxu0 %v17772_v56 }
 0xc52   : > { %6856 = vmatpush1.bf16.msra.mxu1 %v17680_v43  ;;  %v17770_v43 = vld [vmem:[#allocation36 + $0x1a0] ss:$8 sps:$4 sm:$0xff]  }
 0xc53   : > { %6857 = vmatprep.subr.bf16.mxu1 %v17685_v45  ;;  %v17775_v45 = vld [vmem:[#allocation36 + $0x1b4] ss:$8 sps:$4 sm:$0xff]  }
 0xc54   : > { %7538 = vmatpush1.bf16.msra.mxu0 %v17770_v43 }
 0xc55   : > { %7539 = vmatprep.subr.bf16.mxu0 %v17775_v45  ;;  %v7241_v45 = vld [vmem:[#allocation2 + $0x8] sm:$0xff] }
 0xc56   : > { %6858 = vmatpush1.bf16.msra.mxu1 %v17683_v40  ;;  %v17778_v40 = vld [vmem:[#allocation36 + $0x1c4] ss:$8 sps:$4 sm:$0xff]  }
 0xc57   : > { %6859 = vmatprep.subr.bf16.mxu1 %v17688_v48  ;;  %v17776_v48 = vld [vmem:[#allocation36 + $0x1c0] ss:$8 sps:$4 sm:$0xff]  }
 0xc58   : > { %7540 = vmatpush1.bf16.msra.mxu0 %v17773_v33 }
 0xc59   : > { %7541 = vmatprep.subr.bf16.mxu0 %v17778_v40 }
 0xc5a   : > { %6860 = vmatpush1.bf16.msra.mxu1 %v17686_v49  ;;  %v17779_v49 = vld [vmem:[#allocation36 + $0x1d0] ss:$8 sps:$4 sm:$0xff]  }
 0xc5b   : > { %6861 = vmatprep.subr.bf16.mxu1 %v17691_v32  ;;  %v17781_v32 = vld [vmem:[#allocation36 + $0x1d4] ss:$8 sps:$4 sm:$0xff]  }
 0xc5c   : > { %7542 = vmatpush1.bf16.msra.mxu0 %v17776_v48 }
 0xc5d   : > { %7543 = vmatprep.subr.bf16.mxu0 %v17781_v32 }
 0xc5e   : > { %6862 = vmatpush1.bf16.msra.mxu1 %v17689_v21  ;;  %v17784_v21 = vld [vmem:[#allocation36 + $0x1e4] ss:$8 sps:$4 sm:$0xff]  }
 0xc5f   : > { %7091 = vmatprep.subr.bf16.mxu1 %v17694_v47  ;;  %v17782_v47 = vld [vmem:[#allocation36 + $0x1e0] ss:$8 sps:$4 sm:$0xff]  }
 0xc60   : > { %7544 = vmatpush1.bf16.msra.mxu0 %v17779_v49 }
 0xc61   : > { %6864 = vmatmul.mubr.bf16.vlgmr.msra.gmra.mrb[16].mxu1 %v21338_v6  ;;  %v6926_v6 = vsel %vm2348_vm11, %v6924_v59, %v6925_v39  ;;  %7545 = vmatprep.subr.bf16.mxu0 %v17784_v21 }
 0xc62   : > { %6873 = vmatprep.mubr.bf16.mxu1 %v6358_v37  ;;  %7092 = vmatpush1.bf16.msra.mxu1 %v17692_v50  ;;  %v17787_v50 = vld [vmem:[#allocation36 + $0x1f4] ss:$8 sps:$4 sm:$0xff]   ;;  %v17790_v37 = vld [vmem:[#allocation36 + $0x4] ss:$8 sps:$4 sm:$0xff]  }
 0xc63   : > { %7093 = vmatprep.subr.bf16.mxu1 %v17697_v52  ;;  %v17785_v52 = vld [vmem:[#allocation36 + $0x1f0] ss:$8 sps:$4 sm:$0xff]  }
 0xc64   : > { %7546 = vmatpush1.bf16.msra.mxu0 %v17782_v47 }
 0xc65   : > { %7547 = vmatprep.subr.bf16.mxu0 %v17787_v50 }
 0xc66   : > { %7094 = vmatpush1.bf16.msra.mxu1 %v17695_v54  ;;  %v6353_v54 = vld [vmem:[#allocation33] sm:$0x3] }
 0xc67   : > { %7095 = vmatprep.subr.bf16.mxu1 %v17700_v57  ;;  %v6354_v57 = vld [vmem:[#allocation35] sm:$0x3]  ;;  %v7152_v24 = vrot.slane %v6353_v54, %v21223_v15 }
 0xc68   : > { %7548 = vmatpush1.bf16.msra.mxu0 %v17785_v52 }
 0xc69   : > { %6874 = vmatmul.mubr.bf16.gmra.mrb[20].mxu1 %v6357_v62  ;;  %7728 = vmatprep.subr.bf16.mxu0 %v17790_v37 }
 0xc6a   : > { %7096 = vmatpush1.bf16.msra.mxu1 %v17698_v58  ;;  %7123 = vmatprep.mubr.bf16.mxu1 %v6926_v6  ;;  %v7169_v58 = vrot.slane %v6354_v57, %v21223_v15 }
 0xc6b   : > { %7097 = vmatprep.subr.bf16.mxu1 %v17703_v61  ;;  %v7173_v61 = vrot.slane %v6354_v57, %v21226_v23 }
 0xc6e   : > { %7098 = vmatpush1.bf16.msra.mxu1 %v17701_v18 }
 0xc6f   : > { %7099 = vmatprep.subr.bf16.mxu1 %v17706_v19 }
 0xc72   : > { %7100 = vmatpush1.bf16.msra.mxu1 %v17704_v1 }
 0xc73   : > { %7101 = vmatprep.subr.bf16.mxu1 %v17709_v9 }
 0xc76   : > { %7102 = vmatpush1.bf16.msra.mxu1 %v17707_v2 }
 0xc77   : > { %7103 = vmatprep.subr.bf16.mxu1 %v17712_v22 }
 0xc7a   : > { %7104 = vmatpush1.bf16.msra.mxu1 %v17710_v5 }
 0xc7b   : > { %7105 = vmatprep.subr.bf16.mxu1 %v17715_v51 }
 0xc7e   : > { %7106 = vmatpush1.bf16.msra.mxu1 %v17713_v3 }
 0xc7f   : > { %7107 = vmatprep.subr.bf16.mxu1 %v17718_v26 }
 0xc82   : > { %7108 = vmatpush1.bf16.msra.mxu1 %v17716_v4 }
 0xc83   : > { %7109 = vmatprep.subr.bf16.mxu1 %v17721_v63 }
 0xc86   : > { %7110 = vmatpush1.bf16.msra.mxu1 %v17719_v8 }
 0xc87   : > { %7111 = vmatprep.subr.bf16.mxu1 %v17724_v53 }
 0xc8a   : > { %7112 = vmatpush1.bf16.msra.mxu1 %v17722_v10 }
 0xc8b   : > { %7113 = vmatprep.subr.bf16.mxu1 %v17727_v7 }
 0xc8e   : > { %7114 = vmatpush1.bf16.msra.mxu1 %v17725_v11 }
 0xc8f   : > { %7115 = vmatprep.subr.bf16.mxu1 %v17730_v12 }
 0xc92   : > { %7116 = vmatpush1.bf16.msra.mxu1 %v17728_v13 }
 0xc93   : > { %7117 = vmatprep.subr.bf16.mxu1 %v17733_v14 }
 0xc96   : > { %7118 = vmatpush1.bf16.msra.mxu1 %v17731_v17 }
 0xc97   : > { %7119 = vmatprep.subr.bf16.mxu1 %v17736_v0 }
 0xc9a   : > { %7120 = vmatpush1.bf16.msra.mxu1 %v17734_v31 }
 0xc9b   : > { %7121 = vmatprep.subr.bf16.mxu1 %v17739_v41 }
 0xc9e   : > { %7122 = vmatpush1.bf16.msra.mxu1 %v17737_v55 }
 0xca1   : > { %7124 = vmatmul.mubr.bf16.vlgmr.msra.gmra.mrb[16].mxu1 %v6923_v44 }
 0xca2   : > { %7133 = vmatprep.mubr.bf16.mxu1 %v6925_v39  ;;  %v7156_v39 = vrot.slane %v6353_v54, %v21226_v23  ;;  %v7244_v54 = vld [vmem:[#allocation2 + $0x20] sm:$0xf] }
 0xca9   : > { %7134 = vmatmul.mubr.bf16.gmra.mrb[20].mxu1 %v6922_v25 }
 0xd74   : > { %v7125_v59 = vpop.f32.mrb[16].mxu1 }
 0xd75   : > { %v7159_v62 = vmul.f32 %v7152_v24, %v7125_v59  ;;  %v7127_v6 = vpop.f32.mrb[17].mxu1 }
 0xd76   : > { %v7160_v18 = vmul.f32 %v7156_v39, %v7127_v6  ;;  %v7129_v19 = vpop.f32.mrb[18].mxu1 }
 0xd77   : > { %v7176_v1 = vadd.f32 %v7169_v58, %v7159_v62  ;;  %v7161_v9 = vmul.f32 %v7152_v24, %v7129_v19  ;;  %v7131_v2 = vpop.f32.mrb[19].mxu1 }
 0xd78   : > { %v7177_v22 = vadd.f32 %v7173_v61, %v7160_v18  ;;  %v7162_v5 = vmul.f32 %v7156_v39, %v7131_v2 }
 0xd79   : > { %v7178_v51 = vadd.f32 %v7169_v58, %v7161_v9  ;;  %v7182_v26 = vmax.f32 %v7176_v1, 0.0 }
 0xd7a   : > { %v7179_v3 = vadd.f32 %v7173_v61, %v7162_v5  ;;  %v7183_v63 = vmax.f32 %v7177_v22, 0.0 }
 0xd7b   : > { %v7184_v4 = vmax.f32 %v7178_v51, 0.0 }
 0xd7c   : > { %v7185_v8 = vmax.f32 %v7179_v3, 0.0  ;;  %v7135_v53 = vpop.f32.mrb[20].mxu1 }
 0xd7d   : > { %v7200_v10 = vpack.c.bf16 %v7184_v4, %v7182_v26  ;;  %v7163_v7 = vmul.f32 %v7152_v24, %v7135_v53  ;;  %v7137_v11 = vpop.f32.mrb[21].mxu1 }
 0xd7e   : > { %v7201_v12 = vpack.c.bf16 %v7185_v8, %v7183_v63  ;;  %v7164_v13 = vmul.f32 %v7156_v39, %v7137_v11  ;;  %v7139_v14 = vpop.f32.mrb[22].mxu1  ;;  %v7247_v39 = vld [vmem:[#allocation2 + $0x28] sm:$0xf] }
 0xd7f   : > { %v7205_v17 = vshrl.u32 %v7200_v10, 16  ;;  %v7180_v0 = vadd.f32 %v7169_v58, %v7163_v7  ;;  %v7140_v31 = vpop.f32.mrb[23].mxu1  ;;  %v7208_v25 = vshll.u32 %v7200_v10, 16 }
 0xd80   : > { %v7212_v41 = vshrl.u32 %v7201_v12, 16  ;;  %v7181_v55 = vadd.f32 %v7173_v61, %v7164_v13  ;;  %v7215_v28 = vshll.u32 %v7201_v12, 16  ;;  %v17788_v12 = vld [vmem:[#allocation36] ss:$8 sps:$4 sm:$0xff]   ;;  %v17793_v31 = vld [vmem:[#allocation36 + $0x14] ss:$8 sps:$4 sm:$0xff]  }
 0xd81   : > { %v7207_v60 = vrot.slane %v7205_v17, 7  ;;  %v7186_v42 = vmax.f32 %v7180_v0, 0.0 }
 0xd82   : > { %v7214_v44 = vrot.slane %v7212_v41, 7  ;;  %v7187_v29 = vmax.f32 %v7181_v55, 0.0  ;;  %v17791_v55 = vld [vmem:[#allocation36 + $0x10] ss:$8 sps:$4 sm:$0xff]  }
 0xd83   : > { %v7210_v30 = vor.u32 %v7208_v25, %v7207_v60  ;;  %v7202_v34 = vpack.c.bf16 %v7186_v42, %v7186_v42  ;;  %v17794_v42 = vld [vmem:[#allocation36 + $0x20] ss:$8 sps:$4 sm:$0xff]  }
 0xd84   : > { %v7217_v16 = vor.u32 %v7215_v28, %v7214_v44  ;;  %v7203_v56 = vpack.c.bf16 %v7187_v29, %v7187_v29  ;;  %v17799_v28 = vld [vmem:[#allocation36 + $0x34] ss:$8 sps:$4 sm:$0xff]   ;;  %v17884_v29 = vld [vmem:[#allocation41 + $0x100] ss:$8 sps:$4 sm:$0xff]  }
 0xd85   : > { %v21390_v43 = vsel %vm21007_vm14, %v7210_v30, %v7238_v36  ;;  %v7219_v33 = vshrl.u32 %v7202_v34, 16  ;;  %v7222_v32 = vshll.u32 %v7202_v34, 16  ;;  %v17886_v30 = vld [vmem:[#allocation41 + $0x104] ss:$8 sps:$4 sm:$0xff]   ;;  %v17889_v36 = vld [vmem:[#allocation41 + $0x114] ss:$8 sps:$4 sm:$0xff]  }
 0xd86   : > { %7240 = vst [vmem:[#allocation2] sm:$0xff] %v21390_v43  ;;  %v21395_v40 = vsel %vm21007_vm14, %v7217_v16, %v7241_v45  ;;  %v7227_v48 = vshrl.u32 %v7203_v56, 16  ;;  %v7230_v47 = vshll.u32 %v7203_v56, 16  ;;  %v7326_v19 = vshll.u32 %v21390_v43, 16  ;;  %v17797_v34 = vld [vmem:[#allocation36 + $0x30] ss:$8 sps:$4 sm:$0xff]   ;;  %8414 = vmatprep.subr.bf16.mxu1 %v17886_v30 }
 0xd87   : > { %7243 = vst [vmem:[#allocation2 + $0x8] sm:$0xff] %v21395_v40  ;;  %v7221_v49 = vrot.slane %v7219_v33, 7  ;;  %v7338_v18 = vshll.u32 %v21395_v40, 16  ;;  %v7336_v3 = vshrl.u32 %v21395_v40, 16  ;;  %v7324_v4 = vshrl.u32 %v21390_v43, 16  ;;  %8415 = vmatpush1.bf16.msra.mxu1 %v17884_v29 }
 0xd88   : > { %v7229_v21 = vrot.slane %v7227_v48, 7  ;;  %v7328_v5 = vrot.slane %v7326_v19, 1  ;;  %v17802_v16 = vld [vmem:[#allocation36 + $0x44] ss:$8 sps:$4 sm:$0xff]   ;;  %v17887_v56 = vld [vmem:[#allocation41 + $0x110] ss:$8 sps:$4 sm:$0xff]   ;;  %8416 = vmatprep.subr.bf16.mxu1 %v17889_v36 }
 0xd89   : > { %v7224_v50 = vor.u32 %v7222_v32, %v7221_v49  ;;  %v7340_v1 = vrot.slane %v7338_v18, 1  ;;  %v17892_v45 = vld [vmem:[#allocation41 + $0x124] ss:$8 sps:$4 sm:$0xff]   ;;  %v17805_v48 = vld [vmem:[#allocation36 + $0x54] ss:$8 sps:$4 sm:$0xff]  }
 0xd8a   : > { %v7232_v52 = vor.u32 %v7230_v47, %v7229_v21  ;;  %v7329_v13 = vor.u32 %v7328_v5, %v7324_v4  ;;  %v17800_v33 = vld [vmem:[#allocation36 + $0x40] ss:$8 sps:$4 sm:$0xff]   ;;  %v17890_v49 = vld [vmem:[#allocation41 + $0x120] ss:$8 sps:$4 sm:$0xff]   ;;  %v17803_v21 = vld [vmem:[#allocation36 + $0x50] ss:$8 sps:$4 sm:$0xff]  }
 0xd8b   : > { %v7225_v37 = vsel %vm2668_vm3, %v7207_v60, %v7224_v50  ;;  %v7341_v53 = vor.u32 %v7340_v1, %v7336_v3  ;;  %v17796_v60 = vld [vmem:[#allocation36 + $0x24] ss:$8 sps:$4 sm:$0xff]   ;;  %8417 = vmatpush1.bf16.msra.mxu1 %v17887_v56  ;;  %v17895_v32 = vld [vmem:[#allocation41 + $0x134] ss:$8 sps:$4 sm:$0xff]   ;;  %v17893_v47 = vld [vmem:[#allocation41 + $0x130] ss:$8 sps:$4 sm:$0xff]  }
 0xd8c   : > { %v7245_v57 = vsel %vm21179_vm0, %v7225_v37, %v7244_v54  ;;  %v7233_v24 = vsel %vm2668_vm3, %v7214_v44, %v7232_v52  ;;  %8418 = vmatprep.subr.bf16.mxu1 %v17892_v45  ;;  %v17898_v50 = vld [vmem:[#allocation41 + $0x144] ss:$8 sps:$4 sm:$0xff]   ;;  %v17811_v37 = vld [vmem:[#allocation36 + $0x74] ss:$8 sps:$4 sm:$0xff]   ;;  %v17896_v54 = vld [vmem:[#allocation41 + $0x140] ss:$8 sps:$4 sm:$0xff]  }
 0xd8d   : > { %7246 = vst [vmem:[#allocation2 + $0x20] sm:$0xf] %v7245_v57  ;;  %v7248_v58 = vsel %vm21179_vm0, %v7233_v24, %v7247_v39  ;;  %v8085_v59 = vld [vmem:[#allocation2] sm:$0x1]  ;;  %v17806_v52 = vld [vmem:[#allocation36 + $0x60] ss:$8 sps:$4 sm:$0xff]  }
 0xd8e   : > { %7249 = vst [vmem:[#allocation2 + $0x28] sm:$0xf] %v7248_v58  ;;  %v8088_v61 = vld [vmem:[#allocation2 + $0x8] sm:$0x1]  ;;  %v8086_v62 = vsel %vm20865_vm4, 0, %v8085_v59 }
 0xd8f   : > { %v8089_v6 = vsel %vm20865_vm4, 0, %v8088_v61  ;;  %8087 = vst [vmem:[#allocation2] sm:$0x1] %v8086_v62  ;;  %8419 = vmatpush1.bf16.msra.mxu1 %v17890_v49  ;;  %v17901_v57 = vld [vmem:[#allocation41 + $0x154] ss:$8 sps:$4 sm:$0xff]  }
 0xd90   : > { %8090 = vst [vmem:[#allocation2 + $0x8] sm:$0x1] %v8089_v6  ;;  %8420 = vmatprep.subr.bf16.mxu1 %v17895_v32  ;;  %v17809_v24 = vld [vmem:[#allocation36 + $0x70] ss:$8 sps:$4 sm:$0xff]   ;;  %v17814_v39 = vld [vmem:[#allocation36 + $0x84] ss:$8 sps:$4 sm:$0xff]  }
 0xd91   : > { %v17899_v58 = vld [vmem:[#allocation41 + $0x150] ss:$8 sps:$4 sm:$0xff]   ;;  %v17904_v59 = vld [vmem:[#allocation41 + $0x164] ss:$8 sps:$4 sm:$0xff]   ;;  %v17902_v6 = vld [vmem:[#allocation41 + $0x160] ss:$8 sps:$4 sm:$0xff]  }
 0xd92   : > { %v17812_v61 = vld [vmem:[#allocation36 + $0x80] ss:$8 sps:$4 sm:$0xff]   ;;  %v17817_v62 = vld [vmem:[#allocation36 + $0x94] ss:$8 sps:$4 sm:$0xff]   ;;  %v17815_v18 = vld [vmem:[#allocation36 + $0x90] ss:$8 sps:$4 sm:$0xff]  }
 0xd93   : > { %8421 = vmatpush1.bf16.msra.mxu1 %v17893_v47  ;;  %v17820_v19 = vld [vmem:[#allocation36 + $0xa4] ss:$8 sps:$4 sm:$0xff]   ;;  %v17818_v1 = vld [vmem:[#allocation36 + $0xa0] ss:$8 sps:$4 sm:$0xff]   ;;  %v17821_v5 = vld [vmem:[#allocation36 + $0xb0] ss:$8 sps:$4 sm:$0xff]  }
 0xd94   : > { %v21410_v9 = vld [vmem:[#allocation2 + $0x20] sm:$0xf]  ;;  %8422 = vmatprep.subr.bf16.mxu1 %v17898_v50  ;;  %v17824_v3 = vld [vmem:[#allocation36 + $0xc0] ss:$8 sps:$4 sm:$0xff]   ;;  %v17827_v4 = vld [vmem:[#allocation36 + $0xd0] ss:$8 sps:$4 sm:$0xff]  }
 0xd95   : > { %v8091_v2 = vld [vmem:[#allocation2 + $0x20] sm:$0x8]  ;;  %v21412_v22 = vld [vmem:[#allocation2 + $0x28] sm:$0xf]  ;;  %v7331_v51 = vshll.u32 %v21410_v9, 16  ;;  %v7347_v25 = vshrl.u32 %v21410_v9, 16 }
 0xd96   : > { %v7343_v26 = vshll.u32 %v21412_v22, 16  ;;  %v8092_v8 = vsel %vm20925_vm10, 0, %v8091_v2  ;;  %v7350_v7 = vshrl.u32 %v21412_v22, 16  ;;  %v8094_v11 = vld [vmem:[#allocation2 + $0x28] sm:$0x8] }
 0xd97   : > { %v7333_v63 = vrot.slane %v7331_v51, 1  ;;  %8093 = vst [vmem:[#allocation2 + $0x20] sm:$0x8] %v8092_v8  ;;  %v8095_v14 = vsel %vm20925_vm10, 0, %v8094_v11  ;;  %8423 = vmatpush1.bf16.msra.mxu1 %v17896_v54  ;;  %v17823_v2 = vld [vmem:[#allocation36 + $0xb4] ss:$8 sps:$4 sm:$0xff]  }
 0xd98   : > { %v7345_v10 = vrot.slane %v7343_v26, 1  ;;  %8096 = vst [vmem:[#allocation2 + $0x28] sm:$0x8] %v8095_v14  ;;  %8424 = vmatprep.subr.bf16.mxu1 %v17901_v57  ;;  %v17826_v51 = vld [vmem:[#allocation36 + $0xc4] ss:$8 sps:$4 sm:$0xff]  }
 0xd99   : > { %v7334_v41 = vsel %vm1692_vm1, %v7329_v13, %v7333_v63  ;;  %v7349_v44 = vor.u32 %v7347_v25, %v7333_v63  ;;  %v17829_v26 = vld [vmem:[#allocation36 + $0xd4] ss:$8 sps:$4 sm:$0xff]   ;;  %v17832_v63 = vld [vmem:[#allocation36 + $0xe4] ss:$8 sps:$4 sm:$0xff]   ;;  %v17830_v8 = vld [vmem:[#allocation36 + $0xe0] ss:$8 sps:$4 sm:$0xff]  }
 0xd9a   : > { %v7346_v17 = vsel %vm1692_vm1, %v7341_v53, %v7345_v10  ;;  %v7352_v0 = vor.u32 %v7350_v7, %v7345_v10  ;;  %v17835_v53 = vld [vmem:[#allocation36 + $0xf4] ss:$8 sps:$4 sm:$0xff]   ;;  %v17833_v10 = vld [vmem:[#allocation36 + $0xf0] ss:$8 sps:$4 sm:$0xff]   ;;  %v17838_v7 = vld [vmem:[#allocation36 + $0x204] ss:$8 sps:$4 sm:$0xff]  }
 0xd9b   : > { %7549 = vmatprep.mubr.bf16.mxu0 %v7346_v17  ;;  %8425 = vmatpush1.bf16.msra.mxu1 %v17899_v58  ;;  %v17836_v11 = vld [vmem:[#allocation36 + $0x200] ss:$8 sps:$4 sm:$0xff]   ;;  %v7255_v13 = vld [vmem:[#allocation2 + $0x28] sm:$0x7]  ;;  %v17839_v14 = vld [vmem:[#allocation36 + $0x210] ss:$8 sps:$4 sm:$0xff]  }
 0xd9c   : > { %7550 = vmatmul.mubr.bf16.vlgmr.msra.gmra.mrb[84].mxu0 %v7334_v41  ;;  %8426 = vmatprep.subr.bf16.mxu1 %v17904_v59  ;;  %v17844_v17 = vld [vmem:[#allocation36 + $0x224] ss:$8 sps:$4 sm:$0xff]   ;;  %v17842_v41 = vld [vmem:[#allocation36 + $0x220] ss:$8 sps:$4 sm:$0xff]   ;;  %v17853_v29 = vld [vmem:[#allocation36 + $0x254] ss:$8 sps:$4 sm:$0xff]  }
 0xd9d   : > { %7729 = vmatpush1.bf16.msra.mxu0 %v17788_v12  ;;  %7559 = vmatprep.mubr.bf16.mxu0 %v7352_v0  ;;  %v17841_v12 = vld [vmem:[#allocation36 + $0x214] ss:$8 sps:$4 sm:$0xff]   ;;  %v7780_v0 = vld [vmem:[#allocation2 + $0x8] sm:$0xfe]  ;;  %v7254_v25 = vld [vmem:[#allocation2 + $0x20] sm:$0x7] }
 0xd9e   : > { %7730 = vmatprep.subr.bf16.mxu0 %v17793_v31  ;;  %v7822_v31 = vrot.slane %v21412_v22, 1  ;;  %v17851_v30 = vld [vmem:[#allocation36 + $0x250] ss:$8 sps:$4 sm:$0xff]   ;;  %v17854_v36 = vld [vmem:[#allocation36 + $0x260] ss:$8 sps:$4 sm:$0xff]  }
 0xd9f   : > { %8427 = vmatpush1.bf16.msra.mxu1 %v17902_v6  ;;  %v17857_v56 = vld [vmem:[#allocation36 + $0x270] ss:$8 sps:$4 sm:$0xff]   ;;  %v17862_v45 = vld [vmem:[#allocation36 + $0x284] ss:$8 sps:$4 sm:$0xff]   ;;  %v17917_v22 = vld [vmem:[#allocation41 + $0x1b0] ss:$8 sps:$4 sm:$0xff]  }
 0xda0   : > { %v17863_v49 = vld [vmem:[#allocation36 + $0x290] ss:$8 sps:$4 sm:$0xff]   ;;  %v17868_v32 = vld [vmem:[#allocation36 + $0x2a4] ss:$8 sps:$4 sm:$0xff]  }
 0xda1   : > { %7731 = vmatpush1.bf16.msra.mxu0 %v17791_v55  ;;  %v7821_v55 = vrot.slane %v7780_v0, 1  ;;  %v17869_v47 = vld [vmem:[#allocation36 + $0x2b0] ss:$8 sps:$4 sm:$0xff]   ;;  %v17874_v50 = vld [vmem:[#allocation36 + $0x2c4] ss:$8 sps:$4 sm:$0xff]  }
 0xda2   : > { %7732 = vmatprep.subr.bf16.mxu0 %v17796_v60  ;;  %v17847_v60 = vld [vmem:[#allocation36 + $0x234] ss:$8 sps:$4 sm:$0xff]   ;;  %v17875_v54 = vld [vmem:[#allocation36 + $0x2d0] ss:$8 sps:$4 sm:$0xff]   ;;  %v17880_v57 = vld [vmem:[#allocation36 + $0x2e4] ss:$8 sps:$4 sm:$0xff]  }
 0xda3   : > { %v17881_v58 = vld [vmem:[#allocation36 + $0x2f0] ss:$8 sps:$4 sm:$0xff]   ;;  %v7779_v59 = vld [vmem:[#allocation2] sm:$0xfe] }
 0xda4   : > { %7560 = vmatmul.mubr.bf16.gmra.mrb[88].mxu0 %v7349_v44  ;;  %v17850_v44 = vld [vmem:[#allocation36 + $0x244] ss:$8 sps:$4 sm:$0xff]  }
 0xda5   : > { %7733 = vmatpush1.bf16.msra.mxu0 %v17794_v42  ;;  %7760 = vmatprep.mubr.bf16.mxu0 %v21395_v40  ;;  %v17808_v40 = vld [vmem:[#allocation36 + $0x64] ss:$8 sps:$4 sm:$0xff]   ;;  %v17845_v42 = vld [vmem:[#allocation36 + $0x230] ss:$8 sps:$4 sm:$0xff]  }
 0xda6   : > { %7734 = vmatprep.subr.bf16.mxu0 %v17799_v28  ;;  %v17848_v28 = vld [vmem:[#allocation36 + $0x240] ss:$8 sps:$4 sm:$0xff]  }
 0xda9   : > { %7735 = vmatpush1.bf16.msra.mxu0 %v17797_v34  ;;  %v17856_v34 = vld [vmem:[#allocation36 + $0x264] ss:$8 sps:$4 sm:$0xff]  }
 0xdaa   : > { %7736 = vmatprep.subr.bf16.mxu0 %v17802_v16  ;;  %v17859_v16 = vld [vmem:[#allocation36 + $0x274] ss:$8 sps:$4 sm:$0xff]  }
 0xdad   : > { %7737 = vmatpush1.bf16.msra.mxu0 %v17800_v33  ;;  %v17860_v33 = vld [vmem:[#allocation36 + $0x280] ss:$8 sps:$4 sm:$0xff]  }
 0xdae   : > { %7738 = vmatprep.subr.bf16.mxu0 %v17805_v48  ;;  %v17865_v48 = vld [vmem:[#allocation36 + $0x294] ss:$8 sps:$4 sm:$0xff]  }
 0xdb1   : > { %7739 = vmatpush1.bf16.msra.mxu0 %v17803_v21  ;;  %v17866_v21 = vld [vmem:[#allocation36 + $0x2a0] ss:$8 sps:$4 sm:$0xff]  }
 0xdb2   : > { %7740 = vmatprep.subr.bf16.mxu0 %v17808_v40  ;;  %v17871_v40 = vld [vmem:[#allocation36 + $0x2b4] ss:$8 sps:$4 sm:$0xff]  }
 0xdb5   : > { %7741 = vmatpush1.bf16.msra.mxu0 %v17806_v52  ;;  %v17872_v52 = vld [vmem:[#allocation36 + $0x2c0] ss:$8 sps:$4 sm:$0xff]  }
 0xdb6   : > { %7742 = vmatprep.subr.bf16.mxu0 %v17811_v37  ;;  %v17877_v37 = vld [vmem:[#allocation36 + $0x2d4] ss:$8 sps:$4 sm:$0xff]  }
 0xdb9   : > { %7743 = vmatpush1.bf16.msra.mxu0 %v17809_v24  ;;  %v17878_v24 = vld [vmem:[#allocation36 + $0x2e0] ss:$8 sps:$4 sm:$0xff]  }
 0xdba   : > { %7744 = vmatprep.subr.bf16.mxu0 %v17814_v39  ;;  %v17883_v39 = vld [vmem:[#allocation36 + $0x2f4] ss:$8 sps:$4 sm:$0xff]  }
 0xdbd   : > { %7745 = vmatpush1.bf16.msra.mxu0 %v17812_v61  ;;  %v7819_v61 = vrot.slane %v21410_v9, 1  ;;  %v17916_v9 = vld [vmem:[#allocation41 + $0x1a4] ss:$8 sps:$4 sm:$0xff]  }
 0xdbe   : > { %7746 = vmatprep.subr.bf16.mxu0 %v17817_v62  ;;  %v7818_v62 = vrot.slane %v7779_v59, 1 }
 0xdc0   : > { %v7820_v6 = vsel %vm2348_vm11, %v7818_v62, %v7819_v61 }
 0xdc1   : > { %7747 = vmatpush1.bf16.msra.mxu0 %v17815_v18  ;;  %v17907_v18 = vld [vmem:[#allocation41 + $0x174] ss:$8 sps:$4 sm:$0xff]  }
 0xdc2   : > { %7748 = vmatprep.subr.bf16.mxu0 %v17820_v19  ;;  %v17905_v19 = vld [vmem:[#allocation41 + $0x170] ss:$8 sps:$4 sm:$0xff]   ;;  %8428 = vmatprep.subr.bf16.mxu1 %v17907_v18 }
 0xdc3   : > { %8429 = vmatpush1.bf16.msra.mxu1 %v17905_v19 }
 0xdc5   : > { %7749 = vmatpush1.bf16.msra.mxu0 %v17818_v1  ;;  %v17910_v1 = vld [vmem:[#allocation41 + $0x184] ss:$8 sps:$4 sm:$0xff]  }
 0xdc6   : > { %7750 = vmatprep.subr.bf16.mxu0 %v17823_v2  ;;  %v17908_v2 = vld [vmem:[#allocation41 + $0x180] ss:$8 sps:$4 sm:$0xff]   ;;  %8430 = vmatprep.subr.bf16.mxu1 %v17910_v1 }
 0xdc7   : > { %8431 = vmatpush1.bf16.msra.mxu1 %v17908_v2 }
 0xdc9   : > { %7751 = vmatpush1.bf16.msra.mxu0 %v17821_v5  ;;  %v17913_v5 = vld [vmem:[#allocation41 + $0x194] ss:$8 sps:$4 sm:$0xff]  }
 0xdca   : > { %7752 = vmatprep.subr.bf16.mxu0 %v17826_v51  ;;  %v17911_v51 = vld [vmem:[#allocation41 + $0x190] ss:$8 sps:$4 sm:$0xff]   ;;  %8432 = vmatprep.subr.bf16.mxu1 %v17913_v5  ;;  %v8135_v5 = vld [vmem:[#allocation2] sm:$0xff] }
 0xdcb   : > { %8433 = vmatpush1.bf16.msra.mxu1 %v17911_v51 }
 0xdcc   : > { %8434 = vmatprep.subr.bf16.mxu1 %v17916_v9 }
 0xdcd   : > { %7753 = vmatpush1.bf16.msra.mxu0 %v17824_v3  ;;  %v17914_v3 = vld [vmem:[#allocation41 + $0x1a0] ss:$8 sps:$4 sm:$0xff]  }
 0xdce   : > { %7754 = vmatprep.subr.bf16.mxu0 %v17829_v26  ;;  %v17919_v26 = vld [vmem:[#allocation41 + $0x1b4] ss:$8 sps:$4 sm:$0xff]  }
 0xdcf   : > { %8435 = vmatpush1.bf16.msra.mxu1 %v17914_v3 }
 0xdd0   : > { %8436 = vmatprep.subr.bf16.mxu1 %v17919_v26  ;;  %v8138_v26 = vld [vmem:[#allocation2 + $0x8] sm:$0xff] }
 0xdd1   : > { %7755 = vmatpush1.bf16.msra.mxu0 %v17827_v4  ;;  %v17922_v4 = vld [vmem:[#allocation41 + $0x1c4] ss:$8 sps:$4 sm:$0xff]  }
 0xdd2   : > { %7756 = vmatprep.subr.bf16.mxu0 %v17832_v63  ;;  %v17920_v63 = vld [vmem:[#allocation41 + $0x1c0] ss:$8 sps:$4 sm:$0xff]  }
 0xdd3   : > { %8437 = vmatpush1.bf16.msra.mxu1 %v17917_v22 }
 0xdd4   : > { %8438 = vmatprep.subr.bf16.mxu1 %v17922_v4 }
 0xdd5   : > { %7757 = vmatpush1.bf16.msra.mxu0 %v17830_v8  ;;  %v17923_v8 = vld [vmem:[#allocation41 + $0x1d0] ss:$8 sps:$4 sm:$0xff]  }
 0xdd6   : > { %7758 = vmatprep.subr.bf16.mxu0 %v17835_v53  ;;  %v17925_v53 = vld [vmem:[#allocation41 + $0x1d4] ss:$8 sps:$4 sm:$0xff]  }
 0xdd7   : > { %8439 = vmatpush1.bf16.msra.mxu1 %v17920_v63 }
 0xdd8   : > { %8440 = vmatprep.subr.bf16.mxu1 %v17925_v53 }
 0xdd9   : > { %7759 = vmatpush1.bf16.msra.mxu0 %v17833_v10  ;;  %v17928_v10 = vld [vmem:[#allocation41 + $0x1e4] ss:$8 sps:$4 sm:$0xff]  }
 0xdda   : > { %7988 = vmatprep.subr.bf16.mxu0 %v17838_v7  ;;  %v17926_v7 = vld [vmem:[#allocation41 + $0x1e0] ss:$8 sps:$4 sm:$0xff]  }
 0xddb   : > { %8441 = vmatpush1.bf16.msra.mxu1 %v17923_v8 }
 0xddc   : > { %7761 = vmatmul.mubr.bf16.vlgmr.msra.gmra.mrb[84].mxu0 %v21390_v43  ;;  %v7823_v43 = vsel %vm2348_vm11, %v7821_v55, %v7822_v31  ;;  %8442 = vmatprep.subr.bf16.mxu1 %v17928_v10 }
 0xddd   : > { %7770 = vmatprep.mubr.bf16.mxu0 %v7255_v13  ;;  %7989 = vmatpush1.bf16.msra.mxu0 %v17836_v11  ;;  %v17931_v11 = vld [vmem:[#allocation41 + $0x1f4] ss:$8 sps:$4 sm:$0xff]   ;;  %v17934_v13 = vld [vmem:[#allocation41 + $0x4] ss:$8 sps:$4 sm:$0xff]  }
 0xdde   : > { %7990 = vmatprep.subr.bf16.mxu0 %v17841_v12  ;;  %v17929_v12 = vld [vmem:[#allocation41 + $0x1f0] ss:$8 sps:$4 sm:$0xff]  }
 0xddf   : > { %8443 = vmatpush1.bf16.msra.mxu1 %v17926_v7 }
 0xde0   : > { %8444 = vmatprep.subr.bf16.mxu1 %v17931_v11 }
 0xde1   : > { %7991 = vmatpush1.bf16.msra.mxu0 %v17839_v14  ;;  %v7250_v14 = vld [vmem:[#allocation38] sm:$0x3] }
 0xde2   : > { %7992 = vmatprep.subr.bf16.mxu0 %v17844_v17  ;;  %v7251_v17 = vld [vmem:[#allocation39] sm:$0x3]  ;;  %v8049_v0 = vrot.slane %v7250_v14, %v21223_v15 }
 0xde3   : > { %8445 = vmatpush1.bf16.msra.mxu1 %v17929_v12 }
 0xde4   : > { %7771 = vmatmul.mubr.bf16.gmra.mrb[88].mxu0 %v7254_v25  ;;  %8625 = vmatprep.subr.bf16.mxu1 %v17934_v13 }
 0xde5   : > { %7993 = vmatpush1.bf16.msra.mxu0 %v17842_v41  ;;  %8020 = vmatprep.mubr.bf16.mxu0 %v7823_v43  ;;  %v8066_v41 = vrot.slane %v7251_v17, %v21223_v15 }
 0xde6   : > { %7994 = vmatprep.subr.bf16.mxu0 %v17847_v60  ;;  %v8070_v60 = vrot.slane %v7251_v17, %v21226_v23 }
 0xde9   : > { %7995 = vmatpush1.bf16.msra.mxu0 %v17845_v42 }
 0xdea   : > { %7996 = vmatprep.subr.bf16.mxu0 %v17850_v44 }
 0xded   : > { %7997 = vmatpush1.bf16.msra.mxu0 %v17848_v28 }
 0xdee   : > { %7998 = vmatprep.subr.bf16.mxu0 %v17853_v29 }
 0xdf1   : > { %7999 = vmatpush1.bf16.msra.mxu0 %v17851_v30 }
 0xdf2   : > { %8000 = vmatprep.subr.bf16.mxu0 %v17856_v34 }
 0xdf5   : > { %8001 = vmatpush1.bf16.msra.mxu0 %v17854_v36 }
 0xdf6   : > { %8002 = vmatprep.subr.bf16.mxu0 %v17859_v16 }
 0xdf9   : > { %8003 = vmatpush1.bf16.msra.mxu0 %v17857_v56 }
 0xdfa   : > { %8004 = vmatprep.subr.bf16.mxu0 %v17862_v45 }
 0xdfd   : > { %8005 = vmatpush1.bf16.msra.mxu0 %v17860_v33 }
 0xdfe   : > { %8006 = vmatprep.subr.bf16.mxu0 %v17865_v48 }
 0xe01   : > { %8007 = vmatpush1.bf16.msra.mxu0 %v17863_v49 }
 0xe02   : > { %8008 = vmatprep.subr.bf16.mxu0 %v17868_v32 }
 0xe05   : > { %8009 = vmatpush1.bf16.msra.mxu0 %v17866_v21 }
 0xe06   : > { %8010 = vmatprep.subr.bf16.mxu0 %v17871_v40 }
 0xe09   : > { %8011 = vmatpush1.bf16.msra.mxu0 %v17869_v47 }
 0xe0a   : > { %8012 = vmatprep.subr.bf16.mxu0 %v17874_v50 }
 0xe0d   : > { %8013 = vmatpush1.bf16.msra.mxu0 %v17872_v52 }
 0xe0e   : > { %8014 = vmatprep.subr.bf16.mxu0 %v17877_v37 }
 0xe11   : > { %8015 = vmatpush1.bf16.msra.mxu0 %v17875_v54 }
 0xe12   : > { %8016 = vmatprep.subr.bf16.mxu0 %v17880_v57 }
 0xe15   : > { %8017 = vmatpush1.bf16.msra.mxu0 %v17878_v24 }
 0xe16   : > { %8018 = vmatprep.subr.bf16.mxu0 %v17883_v39 }
 0xe19   : > { %8019 = vmatpush1.bf16.msra.mxu0 %v17881_v58 }
 0xe1c   : > { %8021 = vmatmul.mubr.bf16.vlgmr.msra.gmra.mrb[84].mxu0 %v7820_v6 }
 0xe1d   : > { %8030 = vmatprep.mubr.bf16.mxu0 %v7822_v31  ;;  %v8053_v31 = vrot.slane %v7250_v14, %v21226_v23  ;;  %v8141_v14 = vld [vmem:[#allocation2 + $0x20] sm:$0xf] }
 0xe24   : > { %8031 = vmatmul.mubr.bf16.gmra.mrb[88].mxu0 %v7819_v61 }
 0xeef   : > { %v8022_v55 = vpop.f32.mrb[84].mxu0 }
 0xef0   : > { %v8056_v25 = vmul.f32 %v8049_v0, %v8022_v55  ;;  %v8024_v43 = vpop.f32.mrb[85].mxu0 }
 0xef1   : > { %v8057_v42 = vmul.f32 %v8053_v31, %v8024_v43  ;;  %v8026_v44 = vpop.f32.mrb[86].mxu0 }
 0xef2   : > { %v8073_v28 = vadd.f32 %v8066_v41, %v8056_v25  ;;  %v8058_v29 = vmul.f32 %v8049_v0, %v8026_v44  ;;  %v8028_v30 = vpop.f32.mrb[87].mxu0 }
 0xef3   : > { %v8074_v34 = vadd.f32 %v8070_v60, %v8057_v42  ;;  %v8059_v36 = vmul.f32 %v8053_v31, %v8028_v30 }
 0xef4   : > { %v8075_v16 = vadd.f32 %v8066_v41, %v8058_v29  ;;  %v8079_v45 = vmax.f32 %v8073_v28, 0.0 }
 0xef5   : > { %v8076_v56 = vadd.f32 %v8070_v60, %v8059_v36  ;;  %v8080_v48 = vmax.f32 %v8074_v34, 0.0 }
 0xef6   : > { %v8081_v33 = vmax.f32 %v8075_v16, 0.0 }
 0xef7   : > { %v8082_v49 = vmax.f32 %v8076_v56, 0.0  ;;  %v8032_v32 = vpop.f32.mrb[88].mxu0 }
 0xef8   : > { %v8097_v21 = vpack.c.bf16 %v8081_v33, %v8079_v45  ;;  %v8060_v40 = vmul.f32 %v8049_v0, %v8032_v32  ;;  %v8034_v47 = vpop.f32.mrb[89].mxu0 }
 0xef9   : > { %v8098_v50 = vpack.c.bf16 %v8082_v49, %v8080_v48  ;;  %v8061_v52 = vmul.f32 %v8053_v31, %v8034_v47  ;;  %v8036_v37 = vpop.f32.mrb[90].mxu0  ;;  %v8144_v31 = vld [vmem:[#allocation2 + $0x28] sm:$0xf] }
 0xefa   : > { %v8102_v54 = vshrl.u32 %v8097_v21, 16  ;;  %v8077_v57 = vadd.f32 %v8066_v41, %v8060_v40  ;;  %v8037_v24 = vpop.f32.mrb[91].mxu0  ;;  %v8105_v61 = vshll.u32 %v8097_v21, 16 }
 0xefb   : > { %v8109_v39 = vshrl.u32 %v8098_v50, 16  ;;  %v8078_v58 = vadd.f32 %v8070_v60, %v8061_v52  ;;  %v8112_v18 = vshll.u32 %v8098_v50, 16  ;;  %v17932_v50 = vld [vmem:[#allocation41] ss:$8 sps:$4 sm:$0xff]   ;;  %v17937_v24 = vld [vmem:[#allocation41 + $0x14] ss:$8 sps:$4 sm:$0xff]  }
 0xefc   : > { %v8104_v59 = vrot.slane %v8102_v54, 7  ;;  %v8083_v62 = vmax.f32 %v8077_v57, 0.0 }
 0xefd   : > { %v8111_v6 = vrot.slane %v8109_v39, 7  ;;  %v8084_v19 = vmax.f32 %v8078_v58, 0.0  ;;  %v17935_v58 = vld [vmem:[#allocation41 + $0x10] ss:$8 sps:$4 sm:$0xff]  }
 0xefe   : > { %v8107_v1 = vor.u32 %v8105_v61, %v8104_v59  ;;  %v8099_v2 = vpack.c.bf16 %v8083_v62, %v8083_v62  ;;  %v17938_v62 = vld [vmem:[#allocation41 + $0x20] ss:$8 sps:$4 sm:$0xff]  }
 0xeff   : > { %v8114_v51 = vor.u32 %v8112_v18, %v8111_v6  ;;  %v8100_v9 = vpack.c.bf16 %v8084_v19, %v8084_v19  ;;  %v17943_v18 = vld [vmem:[#allocation41 + $0x34] ss:$8 sps:$4 sm:$0xff]  }
 0xf00   : > { %v21442_v3 = vsel %vm21007_vm14, %v8107_v1, %v8135_v5  ;;  %v8116_v22 = vshrl.u32 %v8099_v2, 16  ;;  %v8119_v53 = vshll.u32 %v8099_v2, 16  ;;  %v18028_v19 = vld [vmem:[#allocation45 + $0x200] ss:$16 sps:$4 sm:$0xff]   ;;  %v18030_v1 = vld [vmem:[#allocation45 + $0x204] ss:$16 sps:$4 sm:$0xff]  }
 0xf01   : > { %8137 = vst [vmem:[#allocation2] sm:$0xff] %v21442_v3  ;;  %v21447_v4 = vsel %vm21007_vm14, %v8114_v51, %v8138_v26  ;;  %v8124_v63 = vshrl.u32 %v8100_v9, 16  ;;  %v8127_v7 = vshll.u32 %v8100_v9, 16  ;;  %v8223_v44 = vshll.u32 %v21442_v3, 16  ;;  %v17941_v2 = vld [vmem:[#allocation41 + $0x30] ss:$8 sps:$4 sm:$0xff]   ;;  %9535 = vmatprep.subr.bf16.mxu0 %v18030_v1 }
 0xf02   : > { %8140 = vst [vmem:[#allocation2 + $0x8] sm:$0xff] %v21447_v4  ;;  %v8118_v8 = vrot.slane %v8116_v22, 7  ;;  %v8235_v42 = vshll.u32 %v21447_v4, 16  ;;  %v8233_v56 = vshrl.u32 %v21447_v4, 16  ;;  %v8221_v33 = vshrl.u32 %v21442_v3, 16  ;;  %9536 = vmatpush1.bf16.msra.mxu0 %v18028_v19 }
 0xf03   : > { %v8126_v10 = vrot.slane %v8124_v63, 7  ;;  %v8225_v36 = vrot.slane %v8223_v44, 1  ;;  %v18033_v5 = vld [vmem:[#allocation45 + $0x224] ss:$16 sps:$4 sm:$0xff]   ;;  %v17946_v51 = vld [vmem:[#allocation41 + $0x44] ss:$8 sps:$4 sm:$0xff]  }
 0xf04   : > { %v8121_v11 = vor.u32 %v8119_v53, %v8118_v8  ;;  %v8237_v28 = vrot.slane %v8235_v42, 1  ;;  %v18031_v9 = vld [vmem:[#allocation45 + $0x220] ss:$16 sps:$4 sm:$0xff]   ;;  %9537 = vmatprep.subr.bf16.mxu0 %v18033_v5  ;;  %v18036_v26 = vld [vmem:[#allocation45 + $0x244] ss:$16 sps:$4 sm:$0xff]  }
 0xf05   : > { %v8129_v12 = vor.u32 %v8127_v7, %v8126_v10  ;;  %v8226_v52 = vor.u32 %v8225_v36, %v8221_v33  ;;  %v17944_v22 = vld [vmem:[#allocation41 + $0x40] ss:$8 sps:$4 sm:$0xff]   ;;  %v17949_v63 = vld [vmem:[#allocation41 + $0x54] ss:$8 sps:$4 sm:$0xff]   ;;  %v17947_v10 = vld [vmem:[#allocation41 + $0x50] ss:$8 sps:$4 sm:$0xff]  }
 0xf06   : > { %v8122_v13 = vsel %vm2668_vm3, %v8104_v59, %v8121_v11  ;;  %v8238_v32 = vor.u32 %v8237_v28, %v8233_v56  ;;  %v17940_v59 = vld [vmem:[#allocation41 + $0x24] ss:$8 sps:$4 sm:$0xff]   ;;  %9538 = vmatpush1.bf16.msra.mxu0 %v18031_v9  ;;  %v18039_v53 = vld [vmem:[#allocation45 + $0x264] ss:$16 sps:$4 sm:$0xff]   ;;  %v17997_v19 = vld [vmem:[#allocation41 + $0x254] ss:$8 sps:$4 sm:$0xff]  }
 0xf07   : > { %v8142_v17 = vsel %vm21179_vm0, %v8122_v13, %v8141_v14  ;;  %v8130_v0 = vsel %vm2668_vm3, %v8111_v6, %v8129_v12  ;;  %v18034_v8 = vld [vmem:[#allocation45 + $0x240] ss:$16 sps:$4 sm:$0xff]   ;;  %9539 = vmatprep.subr.bf16.mxu0 %v18036_v26  ;;  %v18042_v11 = vld [vmem:[#allocation45 + $0x284] ss:$16 sps:$4 sm:$0xff]  }
 0xf08   : > { %8143 = vst [vmem:[#allocation2 + $0x20] sm:$0xf] %v8142_v17  ;;  %v8145_v41 = vsel %vm21179_vm0, %v8130_v0, %v8144_v31  ;;  %v8982_v55 = vld [vmem:[#allocation2] sm:$0x1]  ;;  %v18037_v7 = vld [vmem:[#allocation45 + $0x260] ss:$16 sps:$4 sm:$0xff]  }
 0xf09   : > { %8146 = vst [vmem:[#allocation2 + $0x28] sm:$0xf] %v8145_v41  ;;  %v8985_v60 = vld [vmem:[#allocation2 + $0x8] sm:$0x1]  ;;  %v8983_v25 = vsel %vm20865_vm4, 0, %v8982_v55 }
 0xf0a   : > { %v8986_v43 = vsel %vm20865_vm4, 0, %v8985_v60  ;;  %8984 = vst [vmem:[#allocation2] sm:$0x1] %v8983_v25  ;;  %9540 = vmatpush1.bf16.msra.mxu0 %v18034_v8  ;;  %v17950_v12 = vld [vmem:[#allocation41 + $0x60] ss:$8 sps:$4 sm:$0xff]  }
 0xf0b   : > { %8987 = vst [vmem:[#allocation2 + $0x8] sm:$0x1] %v8986_v43  ;;  %9541 = vmatprep.subr.bf16.mxu0 %v18039_v53  ;;  %v17955_v13 = vld [vmem:[#allocation41 + $0x74] ss:$8 sps:$4 sm:$0xff]   ;;  %v18045_v17 = vld [vmem:[#allocation45 + $0x2a4] ss:$16 sps:$4 sm:$0xff]  }
 0xf0c   : > { %v18040_v14 = vld [vmem:[#allocation45 + $0x280] ss:$16 sps:$4 sm:$0xff]   ;;  %v17953_v0 = vld [vmem:[#allocation41 + $0x70] ss:$8 sps:$4 sm:$0xff]   ;;  %v17956_v60 = vld [vmem:[#allocation41 + $0x80] ss:$8 sps:$4 sm:$0xff]  }
 0xf0d   : > { %v17958_v31 = vld [vmem:[#allocation41 + $0x84] ss:$8 sps:$4 sm:$0xff]   ;;  %v18048_v55 = vld [vmem:[#allocation45 + $0x2c4] ss:$16 sps:$4 sm:$0xff]   ;;  %v17961_v25 = vld [vmem:[#allocation41 + $0x94] ss:$8 sps:$4 sm:$0xff]  }
 0xf0e   : > { %9542 = vmatpush1.bf16.msra.mxu0 %v18037_v7  ;;  %v18043_v41 = vld [vmem:[#allocation45 + $0x2a0] ss:$16 sps:$4 sm:$0xff]   ;;  %v17959_v42 = vld [vmem:[#allocation41 + $0x90] ss:$8 sps:$4 sm:$0xff]   ;;  %v17962_v28 = vld [vmem:[#allocation41 + $0xa0] ss:$8 sps:$4 sm:$0xff]  }
 0xf0f   : > { %v21462_v29 = vld [vmem:[#allocation2 + $0x20] sm:$0xf]  ;;  %9543 = vmatprep.subr.bf16.mxu0 %v18042_v11  ;;  %v18046_v43 = vld [vmem:[#allocation45 + $0x2c0] ss:$16 sps:$4 sm:$0xff]   ;;  %v17965_v36 = vld [vmem:[#allocation41 + $0xb0] ss:$8 sps:$4 sm:$0xff]  }
 0xf10   : > { %v8988_v30 = vld [vmem:[#allocation2 + $0x20] sm:$0x8]  ;;  %v21464_v34 = vld [vmem:[#allocation2 + $0x28] sm:$0xf]  ;;  %v8228_v16 = vshll.u32 %v21462_v29, 16  ;;  %v8244_v61 = vshrl.u32 %v21462_v29, 16 }
 0xf11   : > { %v8240_v45 = vshll.u32 %v21464_v34, 16  ;;  %v8989_v49 = vsel %vm20925_vm10, 0, %v8988_v30  ;;  %v8247_v40 = vshrl.u32 %v21464_v34, 16  ;;  %v8991_v47 = vld [vmem:[#allocation2 + $0x28] sm:$0x8] }
 0xf12   : > { %v8230_v48 = vrot.slane %v8228_v16, 1  ;;  %8990 = vst [vmem:[#allocation2 + $0x20] sm:$0x8] %v8989_v49  ;;  %v8992_v37 = vsel %vm20925_vm10, 0, %v8991_v47  ;;  %9544 = vmatpush1.bf16.msra.mxu0 %v18040_v14  ;;  %v17964_v44 = vld [vmem:[#allocation41 + $0xa4] ss:$8 sps:$4 sm:$0xff]  }
 0xf13   : > { %v8242_v21 = vrot.slane %v8240_v45, 1  ;;  %8993 = vst [vmem:[#allocation2 + $0x28] sm:$0x8] %v8992_v37  ;;  %9545 = vmatprep.subr.bf16.mxu0 %v18045_v17  ;;  %v17967_v30 = vld [vmem:[#allocation41 + $0xb4] ss:$8 sps:$4 sm:$0xff]  }
 0xf14   : > { %v8231_v39 = vsel %vm1692_vm1, %v8226_v52, %v8230_v48  ;;  %v8246_v6 = vor.u32 %v8244_v61, %v8230_v48  ;;  %v17970_v16 = vld [vmem:[#allocation41 + $0xc4] ss:$8 sps:$4 sm:$0xff]   ;;  %v17968_v56 = vld [vmem:[#allocation41 + $0xc0] ss:$8 sps:$4 sm:$0xff]   ;;  %v17973_v45 = vld [vmem:[#allocation41 + $0xd4] ss:$8 sps:$4 sm:$0xff]  }
 0xf15   : > { %v8243_v54 = vsel %vm1692_vm1, %v8238_v32, %v8242_v21  ;;  %v8249_v57 = vor.u32 %v8247_v40, %v8242_v21  ;;  %v17971_v33 = vld [vmem:[#allocation41 + $0xd0] ss:$8 sps:$4 sm:$0xff]   ;;  %v17976_v48 = vld [vmem:[#allocation41 + $0xe4] ss:$8 sps:$4 sm:$0xff]   ;;  %v17974_v49 = vld [vmem:[#allocation41 + $0xe0] ss:$8 sps:$4 sm:$0xff]  }
 0xf16   : > { %8446 = vmatprep.mubr.bf16.mxu1 %v8243_v54  ;;  %9546 = vmatpush1.bf16.msra.mxu0 %v18043_v41  ;;  %v17979_v32 = vld [vmem:[#allocation41 + $0xf4] ss:$8 sps:$4 sm:$0xff]   ;;  %v17977_v21 = vld [vmem:[#allocation41 + $0xf0] ss:$8 sps:$4 sm:$0xff]   ;;  %v17982_v40 = vld [vmem:[#allocation41 + $0x204] ss:$8 sps:$4 sm:$0xff]  }
 0xf17   : > { %8447 = vmatmul.mubr.bf16.vlgmr.msra.gmra.mrb[24].mxu1 %v8231_v39  ;;  %9547 = vmatprep.subr.bf16.mxu0 %v18048_v55  ;;  %v17980_v47 = vld [vmem:[#allocation41 + $0x200] ss:$8 sps:$4 sm:$0xff]   ;;  %v17983_v37 = vld [vmem:[#allocation41 + $0x210] ss:$8 sps:$4 sm:$0xff]   ;;  %v17988_v54 = vld [vmem:[#allocation41 + $0x224] ss:$8 sps:$4 sm:$0xff]  }
 0xf18   : > { %8626 = vmatpush1.bf16.msra.mxu1 %v17932_v50  ;;  %8456 = vmatprep.mubr.bf16.mxu1 %v8249_v57  ;;  %v17985_v50 = vld [vmem:[#allocation41 + $0x214] ss:$8 sps:$4 sm:$0xff]   ;;  %v8152_v52 = vld [vmem:[#allocation2 + $0x28] sm:$0x7]  ;;  %v8151_v61 = vld [vmem:[#allocation2 + $0x20] sm:$0x7] }
 0xf19   : > { %8627 = vmatprep.subr.bf16.mxu1 %v17937_v24  ;;  %v8677_v57 = vld [vmem:[#allocation2 + $0x8] sm:$0xfe]  ;;  %v8719_v24 = vrot.slane %v21464_v34, 1  ;;  %v17995_v1 = vld [vmem:[#allocation41 + $0x250] ss:$8 sps:$4 sm:$0xff]  }
 0xf1a   : > { %9548 = vmatpush1.bf16.msra.mxu0 %v18046_v43  ;;  %v17986_v39 = vld [vmem:[#allocation41 + $0x220] ss:$8 sps:$4 sm:$0xff]   ;;  %v18001_v9 = vld [vmem:[#allocation41 + $0x270] ss:$8 sps:$4 sm:$0xff]   ;;  %v18006_v26 = vld [vmem:[#allocation41 + $0x284] ss:$8 sps:$4 sm:$0xff]  }
 0xf1b   : > { %v17998_v5 = vld [vmem:[#allocation41 + $0x260] ss:$8 sps:$4 sm:$0xff]   ;;  %v18007_v8 = vld [vmem:[#allocation41 + $0x290] ss:$8 sps:$4 sm:$0xff]   ;;  %v18012_v53 = vld [vmem:[#allocation41 + $0x2a4] ss:$8 sps:$4 sm:$0xff]  }
 0xf1c   : > { %8628 = vmatpush1.bf16.msra.mxu1 %v17935_v58  ;;  %v8718_v58 = vrot.slane %v8677_v57, 1  ;;  %v18013_v7 = vld [vmem:[#allocation41 + $0x2b0] ss:$8 sps:$4 sm:$0xff]   ;;  %v18018_v11 = vld [vmem:[#allocation41 + $0x2c4] ss:$8 sps:$4 sm:$0xff]  }
 0xf1d   : > { %8629 = vmatprep.subr.bf16.mxu1 %v17940_v59  ;;  %v17991_v59 = vld [vmem:[#allocation41 + $0x234] ss:$8 sps:$4 sm:$0xff]   ;;  %v18019_v14 = vld [vmem:[#allocation41 + $0x2d0] ss:$8 sps:$4 sm:$0xff]   ;;  %v18024_v17 = vld [vmem:[#allocation41 + $0x2e4] ss:$8 sps:$4 sm:$0xff]  }
 0xf1e   : > { %v18025_v41 = vld [vmem:[#allocation41 + $0x2f0] ss:$8 sps:$4 sm:$0xff]   ;;  %v8676_v55 = vld [vmem:[#allocation2] sm:$0xfe] }
 0xf1f   : > { %8457 = vmatmul.mubr.bf16.gmra.mrb[28].mxu1 %v8246_v6  ;;  %v17994_v6 = vld [vmem:[#allocation41 + $0x244] ss:$8 sps:$4 sm:$0xff]  }
 0xf20   : > { %8630 = vmatpush1.bf16.msra.mxu1 %v17938_v62  ;;  %8657 = vmatprep.mubr.bf16.mxu1 %v21447_v4  ;;  %v17952_v4 = vld [vmem:[#allocation41 + $0x64] ss:$8 sps:$4 sm:$0xff]   ;;  %v17989_v62 = vld [vmem:[#allocation41 + $0x230] ss:$8 sps:$4 sm:$0xff]  }
 0xf21   : > { %8631 = vmatprep.subr.bf16.mxu1 %v17943_v18  ;;  %v17992_v18 = vld [vmem:[#allocation41 + $0x240] ss:$8 sps:$4 sm:$0xff]   ;;  %v18061_v34 = vld [vmem:[#allocation45 + $0x360] ss:$16 sps:$4 sm:$0xff]  }
 0xf24   : > { %8632 = vmatpush1.bf16.msra.mxu1 %v17941_v2  ;;  %v18000_v2 = vld [vmem:[#allocation41 + $0x264] ss:$8 sps:$4 sm:$0xff]  }
 0xf25   : > { %8633 = vmatprep.subr.bf16.mxu1 %v17946_v51  ;;  %v18003_v51 = vld [vmem:[#allocation41 + $0x274] ss:$8 sps:$4 sm:$0xff]  }
 0xf28   : > { %8634 = vmatpush1.bf16.msra.mxu1 %v17944_v22  ;;  %v18004_v22 = vld [vmem:[#allocation41 + $0x280] ss:$8 sps:$4 sm:$0xff]  }
 0xf29   : > { %8635 = vmatprep.subr.bf16.mxu1 %v17949_v63  ;;  %v18009_v63 = vld [vmem:[#allocation41 + $0x294] ss:$8 sps:$4 sm:$0xff]  }
 0xf2c   : > { %8636 = vmatpush1.bf16.msra.mxu1 %v17947_v10  ;;  %v18010_v10 = vld [vmem:[#allocation41 + $0x2a0] ss:$8 sps:$4 sm:$0xff]  }
 0xf2d   : > { %8637 = vmatprep.subr.bf16.mxu1 %v17952_v4  ;;  %v18015_v4 = vld [vmem:[#allocation41 + $0x2b4] ss:$8 sps:$4 sm:$0xff]  }
 0xf30   : > { %8638 = vmatpush1.bf16.msra.mxu1 %v17950_v12  ;;  %v18016_v12 = vld [vmem:[#allocation41 + $0x2c0] ss:$8 sps:$4 sm:$0xff]  }
 0xf31   : > { %8639 = vmatprep.subr.bf16.mxu1 %v17955_v13  ;;  %v18021_v13 = vld [vmem:[#allocation41 + $0x2d4] ss:$8 sps:$4 sm:$0xff]  }
 0xf34   : > { %8640 = vmatpush1.bf16.msra.mxu1 %v17953_v0  ;;  %v18022_v0 = vld [vmem:[#allocation41 + $0x2e0] ss:$8 sps:$4 sm:$0xff]  }
 0xf35   : > { %8641 = vmatprep.subr.bf16.mxu1 %v17958_v31  ;;  %v18027_v31 = vld [vmem:[#allocation41 + $0x2f4] ss:$8 sps:$4 sm:$0xff]  }
 0xf38   : > { %8642 = vmatpush1.bf16.msra.mxu1 %v17956_v60  ;;  %v8716_v60 = vrot.slane %v21462_v29, 1  ;;  %v18060_v29 = vld [vmem:[#allocation45 + $0x344] ss:$16 sps:$4 sm:$0xff]  }
 0xf39   : > { %8643 = vmatprep.subr.bf16.mxu1 %v17961_v25  ;;  %v8715_v25 = vrot.slane %v8676_v55, 1 }
 0xf3b   : > { %v8717_v43 = vsel %vm2348_vm11, %v8715_v25, %v8716_v60 }
 0xf3c   : > { %8644 = vmatpush1.bf16.msra.mxu1 %v17959_v42  ;;  %v18051_v42 = vld [vmem:[#allocation45 + $0x2e4] ss:$16 sps:$4 sm:$0xff]  }
 0xf3d   : > { %8645 = vmatprep.subr.bf16.mxu1 %v17964_v44  ;;  %v18049_v44 = vld [vmem:[#allocation45 + $0x2e0] ss:$16 sps:$4 sm:$0xff]   ;;  %9549 = vmatprep.subr.bf16.mxu0 %v18051_v42 }
 0xf3e   : > { %9550 = vmatpush1.bf16.msra.mxu0 %v18049_v44 }
 0xf40   : > { %8646 = vmatpush1.bf16.msra.mxu1 %v17962_v28  ;;  %v18054_v28 = vld [vmem:[#allocation45 + $0x304] ss:$16 sps:$4 sm:$0xff]  }
 0xf41   : > { %8647 = vmatprep.subr.bf16.mxu1 %v17967_v30  ;;  %v18052_v30 = vld [vmem:[#allocation45 + $0x300] ss:$16 sps:$4 sm:$0xff]   ;;  %9551 = vmatprep.subr.bf16.mxu0 %v18054_v28 }
 0xf42   : > { %9552 = vmatpush1.bf16.msra.mxu0 %v18052_v30 }
 0xf44   : > { %8648 = vmatpush1.bf16.msra.mxu1 %v17965_v36  ;;  %v18057_v36 = vld [vmem:[#allocation45 + $0x324] ss:$16 sps:$4 sm:$0xff]  }
 0xf45   : > { %8649 = vmatprep.subr.bf16.mxu1 %v17970_v16  ;;  %v18055_v16 = vld [vmem:[#allocation45 + $0x320] ss:$16 sps:$4 sm:$0xff]   ;;  %9553 = vmatprep.subr.bf16.mxu0 %v18057_v36 }
 0xf46   : > { %9554 = vmatpush1.bf16.msra.mxu0 %v18055_v16  ;;  %v9032_v36 = vld [vmem:[#allocation2] sm:$0xff] }
 0xf47   : > { %9555 = vmatprep.subr.bf16.mxu0 %v18060_v29 }
 0xf48   : > { %8650 = vmatpush1.bf16.msra.mxu1 %v17968_v56  ;;  %v18058_v56 = vld [vmem:[#allocation45 + $0x340] ss:$16 sps:$4 sm:$0xff]  }
 0xf49   : > { %8651 = vmatprep.subr.bf16.mxu1 %v17973_v45  ;;  %v18063_v45 = vld [vmem:[#allocation45 + $0x364] ss:$16 sps:$4 sm:$0xff]  }
 0xf4a   : > { %9556 = vmatpush1.bf16.msra.mxu0 %v18058_v56 }
 0xf4b   : > { %9557 = vmatprep.subr.bf16.mxu0 %v18063_v45  ;;  %v9035_v45 = vld [vmem:[#allocation2 + $0x8] sm:$0xff] }
 0xf4c   : > { %8652 = vmatpush1.bf16.msra.mxu1 %v17971_v33  ;;  %v18066_v33 = vld [vmem:[#allocation45 + $0x384] ss:$16 sps:$4 sm:$0xff]  }
 0xf4d   : > { %8653 = vmatprep.subr.bf16.mxu1 %v17976_v48  ;;  %v18064_v48 = vld [vmem:[#allocation45 + $0x380] ss:$16 sps:$4 sm:$0xff]  }
 0xf4e   : > { %9558 = vmatpush1.bf16.msra.mxu0 %v18061_v34 }
 0xf4f   : > { %9559 = vmatprep.subr.bf16.mxu0 %v18066_v33 }
 0xf50   : > { %8654 = vmatpush1.bf16.msra.mxu1 %v17974_v49  ;;  %v18067_v49 = vld [vmem:[#allocation45 + $0x3a0] ss:$16 sps:$4 sm:$0xff]  }
 0xf51   : > { %8655 = vmatprep.subr.bf16.mxu1 %v17979_v32  ;;  %v18069_v32 = vld [vmem:[#allocation45 + $0x3a4] ss:$16 sps:$4 sm:$0xff]  }
 0xf52   : > { %9560 = vmatpush1.bf16.msra.mxu0 %v18064_v48 }
 0xf53   : > { %9561 = vmatprep.subr.bf16.mxu0 %v18069_v32 }
 0xf54   : > { %8656 = vmatpush1.bf16.msra.mxu1 %v17977_v21  ;;  %v18072_v21 = vld [vmem:[#allocation45 + $0x3c4] ss:$16 sps:$4 sm:$0xff]  }
 0xf55   : > { %8885 = vmatprep.subr.bf16.mxu1 %v17982_v40  ;;  %v18070_v40 = vld [vmem:[#allocation45 + $0x3c0] ss:$16 sps:$4 sm:$0xff]  }
 0xf56   : > { %9562 = vmatpush1.bf16.msra.mxu0 %v18067_v49 }
 0xf57   : > { %8658 = vmatmul.mubr.bf16.vlgmr.msra.gmra.mrb[24].mxu1 %v21442_v3  ;;  %v8720_v3 = vsel %vm2348_vm11, %v8718_v58, %v8719_v24  ;;  %9563 = vmatprep.subr.bf16.mxu0 %v18072_v21 }
 0xf58   : > { %8667 = vmatprep.mubr.bf16.mxu1 %v8152_v52  ;;  %8886 = vmatpush1.bf16.msra.mxu1 %v17980_v47  ;;  %v18075_v47 = vld [vmem:[#allocation45 + $0x3e4] ss:$16 sps:$4 sm:$0xff]   ;;  %v18078_v52 = vld [vmem:[#allocation45 + $0x20c] ss:$16 sps:$4 sm:$0xff]  }
 0xf59   : > { %8887 = vmatprep.subr.bf16.mxu1 %v17985_v50  ;;  %v18073_v50 = vld [vmem:[#allocation45 + $0x3e0] ss:$16 sps:$4 sm:$0xff]  }
 0xf5a   : > { %9564 = vmatpush1.bf16.msra.mxu0 %v18070_v40 }
 0xf5b   : > { %9565 = vmatprep.subr.bf16.mxu0 %v18075_v47 }
 0xf5c   : > { %8888 = vmatpush1.bf16.msra.mxu1 %v17983_v37  ;;  %v8147_v37 = vld [vmem:[#allocation42] sm:$0x3] }
 0xf5d   : > { %8889 = vmatprep.subr.bf16.mxu1 %v17988_v54  ;;  %v8148_v54 = vld [vmem:[#allocation44] sm:$0x3]  ;;  %v8946_v57 = vrot.slane %v8147_v37, %v21223_v15 }
 0xf5e   : > { %9566 = vmatpush1.bf16.msra.mxu0 %v18073_v50 }
 0xf5f   : > { %8668 = vmatmul.mubr.bf16.gmra.mrb[28].mxu1 %v8151_v61  ;;  %9586 = vmatprep.subr.bf16.mxu0 %v18078_v52 }
 0xf60   : > { %8890 = vmatpush1.bf16.msra.mxu1 %v17986_v39  ;;  %8917 = vmatprep.mubr.bf16.mxu1 %v8720_v3  ;;  %v8963_v39 = vrot.slane %v8148_v54, %v21223_v15 }
 0xf61   : > { %8891 = vmatprep.subr.bf16.mxu1 %v17991_v59  ;;  %v8967_v59 = vrot.slane %v8148_v54, %v21226_v23 }
 0xf64   : > { %8892 = vmatpush1.bf16.msra.mxu1 %v17989_v62 }
 0xf65   : > { %8893 = vmatprep.subr.bf16.mxu1 %v17994_v6 }
 0xf68   : > { %8894 = vmatpush1.bf16.msra.mxu1 %v17992_v18 }
 0xf69   : > { %8895 = vmatprep.subr.bf16.mxu1 %v17997_v19 }
 0xf6c   : > { %8896 = vmatpush1.bf16.msra.mxu1 %v17995_v1 }
 0xf6d   : > { %8897 = vmatprep.subr.bf16.mxu1 %v18000_v2 }
 0xf70   : > { %8898 = vmatpush1.bf16.msra.mxu1 %v17998_v5 }
 0xf71   : > { %8899 = vmatprep.subr.bf16.mxu1 %v18003_v51 }
 0xf74   : > { %8900 = vmatpush1.bf16.msra.mxu1 %v18001_v9 }
 0xf75   : > { %8901 = vmatprep.subr.bf16.mxu1 %v18006_v26 }
 0xf78   : > { %8902 = vmatpush1.bf16.msra.mxu1 %v18004_v22 }
 0xf79   : > { %8903 = vmatprep.subr.bf16.mxu1 %v18009_v63 }
 0xf7c   : > { %8904 = vmatpush1.bf16.msra.mxu1 %v18007_v8 }
 0xf7d   : > { %8905 = vmatprep.subr.bf16.mxu1 %v18012_v53 }
 0xf80   : > { %8906 = vmatpush1.bf16.msra.mxu1 %v18010_v10 }
 0xf81   : > { %8907 = vmatprep.subr.bf16.mxu1 %v18015_v4 }
 0xf84   : > { %8908 = vmatpush1.bf16.msra.mxu1 %v18013_v7 }
 0xf85   : > { %8909 = vmatprep.subr.bf16.mxu1 %v18018_v11 }
 0xf88   : > { %8910 = vmatpush1.bf16.msra.mxu1 %v18016_v12 }
 0xf89   : > { %8911 = vmatprep.subr.bf16.mxu1 %v18021_v13 }
 0xf8c   : > { %8912 = vmatpush1.bf16.msra.mxu1 %v18019_v14 }
 0xf8d   : > { %8913 = vmatprep.subr.bf16.mxu1 %v18024_v17 }
 0xf90   : > { %8914 = vmatpush1.bf16.msra.mxu1 %v18022_v0 }
 0xf91   : > { %8915 = vmatprep.subr.bf16.mxu1 %v18027_v31 }
 0xf94   : > { %8916 = vmatpush1.bf16.msra.mxu1 %v18025_v41 }
 0xf97   : > { %8918 = vmatmul.mubr.bf16.vlgmr.msra.gmra.mrb[24].mxu1 %v8717_v43 }
 0xf98   : > { %8927 = vmatprep.mubr.bf16.mxu1 %v8719_v24  ;;  %v8950_v24 = vrot.slane %v8147_v37, %v21226_v23  ;;  %v9038_v37 = vld [vmem:[#allocation2 + $0x20] sm:$0xf] }
 0xf9f   : > { %8928 = vmatmul.mubr.bf16.gmra.mrb[28].mxu1 %v8716_v60 }
0x106a   : > { %v8919_v58 = vpop.f32.mrb[24].mxu1 }
0x106b   : > { %v8953_v61 = vmul.f32 %v8946_v57, %v8919_v58  ;;  %v8921_v3 = vpop.f32.mrb[25].mxu1 }
0x106c   : > { %v8954_v62 = vmul.f32 %v8950_v24, %v8921_v3  ;;  %v8923_v6 = vpop.f32.mrb[26].mxu1 }
0x106d   : > { %v8970_v18 = vadd.f32 %v8963_v39, %v8953_v61  ;;  %v8955_v19 = vmul.f32 %v8946_v57, %v8923_v6  ;;  %v8925_v1 = vpop.f32.mrb[27].mxu1 }
0x106e   : > { %v8971_v2 = vadd.f32 %v8967_v59, %v8954_v62  ;;  %v8956_v5 = vmul.f32 %v8950_v24, %v8925_v1 }
0x106f   : > { %v8972_v51 = vadd.f32 %v8963_v39, %v8955_v19  ;;  %v8976_v26 = vmax.f32 %v8970_v18, 0.0 }
0x1070   : > { %v8973_v9 = vadd.f32 %v8967_v59, %v8956_v5  ;;  %v8977_v63 = vmax.f32 %v8971_v2, 0.0 }
0x1071   : > { %v8978_v22 = vmax.f32 %v8972_v51, 0.0 }
0x1072   : > { %v8979_v8 = vmax.f32 %v8973_v9, 0.0  ;;  %v8929_v53 = vpop.f32.mrb[28].mxu1 }
0x1073   : > { %v8994_v10 = vpack.c.bf16 %v8978_v22, %v8976_v26  ;;  %v8957_v4 = vmul.f32 %v8946_v57, %v8929_v53  ;;  %v8931_v7 = vpop.f32.mrb[29].mxu1 }
0x1074   : > { %v8995_v11 = vpack.c.bf16 %v8979_v8, %v8977_v63  ;;  %v8958_v12 = vmul.f32 %v8950_v24, %v8931_v7  ;;  %v8933_v13 = vpop.f32.mrb[30].mxu1  ;;  %v9041_v24 = vld [vmem:[#allocation2 + $0x28] sm:$0xf] }
0x1075   : > { %v8999_v14 = vshrl.u32 %v8994_v10, 16  ;;  %v8974_v17 = vadd.f32 %v8963_v39, %v8957_v4  ;;  %v8934_v0 = vpop.f32.mrb[31].mxu1  ;;  %v9002_v60 = vshll.u32 %v8994_v10, 16 }
0x1076   : > { %v9006_v31 = vshrl.u32 %v8995_v11, 16  ;;  %v8975_v41 = vadd.f32 %v8967_v59, %v8958_v12  ;;  %v9009_v42 = vshll.u32 %v8995_v11, 16  ;;  %v18076_v11 = vld [vmem:[#allocation45 + $0x208] ss:$16 sps:$4 sm:$0xff]  }
0x1077   : > { %v9001_v55 = vrot.slane %v8999_v14, 7  ;;  %v8980_v25 = vmax.f32 %v8974_v17, 0.0  ;;  %v18081_v17 = vld [vmem:[#allocation45 + $0x22c] ss:$16 sps:$4 sm:$0xff]  }
0x1078   : > { %v9008_v43 = vrot.slane %v9006_v31, 7  ;;  %v8981_v44 = vmax.f32 %v8975_v41, 0.0  ;;  %v18079_v41 = vld [vmem:[#allocation45 + $0x228] ss:$16 sps:$4 sm:$0xff]  }
0x1079   : > { %v9004_v28 = vor.u32 %v9002_v60, %v9001_v55  ;;  %v8996_v30 = vpack.c.bf16 %v8980_v25, %v8980_v25  ;;  %v18082_v25 = vld [vmem:[#allocation45 + $0x248] ss:$16 sps:$4 sm:$0xff]  }
0x107a   : > { %v9011_v16 = vor.u32 %v9009_v42, %v9008_v43  ;;  %v8997_v29 = vpack.c.bf16 %v8981_v44, %v8981_v44  ;;  %v18087_v42 = vld [vmem:[#allocation45 + $0x26c] ss:$16 sps:$4 sm:$0xff]   ;;  %v18085_v44 = vld [vmem:[#allocation45 + $0x268] ss:$16 sps:$4 sm:$0xff]  }
0x107b   : > { %v21494_v56 = vsel %vm21007_vm14, %v9004_v28, %v9032_v36  ;;  %v9013_v34 = vshrl.u32 %v8996_v30, 16  ;;  %v9016_v32 = vshll.u32 %v8996_v30, 16  ;;  %v18090_v28 = vld [vmem:[#allocation45 + $0x28c] ss:$16 sps:$4 sm:$0xff]   ;;  %v18088_v30 = vld [vmem:[#allocation45 + $0x288] ss:$16 sps:$4 sm:$0xff]  }
0x107c   : > { %9034 = vst [vmem:[#allocation2] sm:$0xff] %v21494_v56  ;;  %v21499_v33 = vsel %vm21007_vm14, %v9011_v16, %v9035_v45  ;;  %v9021_v48 = vshrl.u32 %v8997_v29, 16  ;;  %v9024_v40 = vshll.u32 %v8997_v29, 16  ;;  %v9184_v6 = vshll.u32 %v21494_v56, 16  ;;  %v18093_v36 = vld [vmem:[#allocation45 + $0x2ac] ss:$16 sps:$4 sm:$0xff]  }
0x107d   : > { %9037 = vst [vmem:[#allocation2 + $0x8] sm:$0xff] %v21499_v33  ;;  %v9015_v49 = vrot.slane %v9013_v34, 7  ;;  %v9196_v62 = vshll.u32 %v21499_v33, 16  ;;  %v9194_v9 = vshrl.u32 %v21499_v33, 16  ;;  %v9182_v22 = vshrl.u32 %v21494_v56, 16 }
0x107e   : > { %v9023_v21 = vrot.slane %v9021_v48, 7  ;;  %v9186_v5 = vrot.slane %v9184_v6, 1  ;;  %v18091_v16 = vld [vmem:[#allocation45 + $0x2a8] ss:$16 sps:$4 sm:$0xff]   ;;  %v18096_v29 = vld [vmem:[#allocation45 + $0x2cc] ss:$16 sps:$4 sm:$0xff]  }
0x107f   : > { %v9018_v47 = vor.u32 %v9016_v32, %v9015_v49  ;;  %v9198_v18 = vrot.slane %v9196_v62, 1  ;;  %v18094_v45 = vld [vmem:[#allocation45 + $0x2c8] ss:$16 sps:$4 sm:$0xff]   ;;  %v18099_v34 = vld [vmem:[#allocation45 + $0x2ec] ss:$16 sps:$4 sm:$0xff]  }
0x1080   : > { %v9026_v50 = vor.u32 %v9024_v40, %v9023_v21  ;;  %v9187_v12 = vor.u32 %v9186_v5, %v9182_v22  ;;  %v18097_v48 = vld [vmem:[#allocation45 + $0x2e8] ss:$16 sps:$4 sm:$0xff]   ;;  %v18102_v49 = vld [vmem:[#allocation45 + $0x30c] ss:$16 sps:$4 sm:$0xff]   ;;  %v18126_v62 = vld [vmem:[#allocation45 + $0x4] ss:$16 sps:$4 sm:$0xff]  }
0x1081   : > { %v9019_v52 = vsel %vm2668_vm3, %v9001_v55, %v9018_v47  ;;  %v9199_v53 = vor.u32 %v9198_v18, %v9194_v9  ;;  %v18084_v55 = vld [vmem:[#allocation45 + $0x24c] ss:$16 sps:$4 sm:$0xff]   ;;  %v18100_v32 = vld [vmem:[#allocation45 + $0x308] ss:$16 sps:$4 sm:$0xff]   ;;  %v18124_v6 = vld [vmem:[#allocation45] ss:$16 sps:$4 sm:$0xff]  }
0x1082   : > { %v9039_v54 = vsel %vm21179_vm0, %v9019_v52, %v9038_v37  ;;  %v9027_v57 = vsel %vm2668_vm3, %v9008_v43, %v9026_v50  ;;  %v18105_v21 = vld [vmem:[#allocation45 + $0x32c] ss:$16 sps:$4 sm:$0xff]   ;;  %v18103_v40 = vld [vmem:[#allocation45 + $0x328] ss:$16 sps:$4 sm:$0xff]   ;;  %v18129_v18 = vld [vmem:[#allocation45 + $0x24] ss:$16 sps:$4 sm:$0xff]  }
0x1083   : > { %9040 = vst [vmem:[#allocation2 + $0x20] sm:$0xf] %v9039_v54  ;;  %v9042_v39 = vsel %vm21179_vm0, %v9027_v57, %v9041_v24  ;;  %v10652_v58 = vld [vmem:[#allocation2] sm:$0x1]  ;;  %v18106_v50 = vld [vmem:[#allocation45 + $0x348] ss:$16 sps:$4 sm:$0xff]  }
0x1084   : > { %9043 = vst [vmem:[#allocation2 + $0x28] sm:$0xf] %v9042_v39  ;;  %v10655_v59 = vld [vmem:[#allocation2 + $0x8] sm:$0x1]  ;;  %v10653_v61 = vsel %vm20865_vm4, 0, %v10652_v58 }
0x1085   : > { %v10656_v3 = vsel %vm20865_vm4, 0, %v10655_v59  ;;  %10654 = vst [vmem:[#allocation2] sm:$0x1] %v10653_v61  ;;  %v18108_v47 = vld [vmem:[#allocation45 + $0x34c] ss:$16 sps:$4 sm:$0xff]  }
0x1086   : > { %10657 = vst [vmem:[#allocation2 + $0x8] sm:$0x1] %v10656_v3  ;;  %v18111_v52 = vld [vmem:[#allocation45 + $0x36c] ss:$16 sps:$4 sm:$0xff]   ;;  %v18109_v37 = vld [vmem:[#allocation45 + $0x368] ss:$16 sps:$4 sm:$0xff]  }
0x1087   : > { %v18114_v54 = vld [vmem:[#allocation45 + $0x38c] ss:$16 sps:$4 sm:$0xff]   ;;  %v18112_v57 = vld [vmem:[#allocation45 + $0x388] ss:$16 sps:$4 sm:$0xff]   ;;  %v18132_v5 = vld [vmem:[#allocation45 + $0x44] ss:$16 sps:$4 sm:$0xff]  }
0x1088   : > { %v18117_v24 = vld [vmem:[#allocation45 + $0x3ac] ss:$16 sps:$4 sm:$0xff]   ;;  %v18115_v39 = vld [vmem:[#allocation45 + $0x3a8] ss:$16 sps:$4 sm:$0xff]   ;;  %v18135_v9 = vld [vmem:[#allocation45 + $0x64] ss:$16 sps:$4 sm:$0xff]  }
0x1089   : > { %v18120_v58 = vld [vmem:[#allocation45 + $0x3cc] ss:$16 sps:$4 sm:$0xff]   ;;  %v18118_v59 = vld [vmem:[#allocation45 + $0x3c8] ss:$16 sps:$4 sm:$0xff]   ;;  %v18138_v22 = vld [vmem:[#allocation45 + $0x84] ss:$16 sps:$4 sm:$0xff]  }
0x108a   : > { %v21514_v19 = vld [vmem:[#allocation2 + $0x20] sm:$0xf]  ;;  %v18121_v3 = vld [vmem:[#allocation45 + $0x3e8] ss:$16 sps:$4 sm:$0xff]  }
0x108b   : > { %v10664_v1 = vld [vmem:[#allocation2 + $0x20] sm:$0x8]  ;;  %v21516_v2 = vld [vmem:[#allocation2 + $0x28] sm:$0xf]  ;;  %v9189_v51 = vshll.u32 %v21514_v19, 16  ;;  %v9205_v60 = vshrl.u32 %v21514_v19, 16 }
0x108c   : > { %v9201_v26 = vshll.u32 %v21516_v2, 16  ;;  %v10665_v8 = vsel %vm20925_vm10, 0, %v10664_v1  ;;  %v9208_v4 = vshrl.u32 %v21516_v2, 16  ;;  %v10667_v7 = vld [vmem:[#allocation2 + $0x28] sm:$0x8] }
0x108d   : > { %v9191_v63 = vrot.slane %v9189_v51, 1  ;;  %10666 = vst [vmem:[#allocation2 + $0x20] sm:$0x8] %v10665_v8  ;;  %v10668_v0 = vsel %vm20925_vm10, 0, %v10667_v7  ;;  %v18123_v61 = vld [vmem:[#allocation45 + $0x3ec] ss:$16 sps:$4 sm:$0xff]  }
0x108e   : > { %v9203_v10 = vrot.slane %v9201_v26, 1  ;;  %10669 = vst [vmem:[#allocation2 + $0x28] sm:$0x8] %v10668_v0  ;;  %v18127_v1 = vld [vmem:[#allocation45 + $0x20] ss:$16 sps:$4 sm:$0xff]  }
0x108f   : > { %v21531_v31 = vsel %vm1692_vm1, %v9187_v12, %v9191_v63  ;;  %v21536_v43 = vor.u32 %v9205_v60, %v9191_v63  ;;  %v18130_v51 = vld [vmem:[#allocation45 + $0x40] ss:$16 sps:$4 sm:$0xff]   ;;  %v18141_v8 = vld [vmem:[#allocation45 + $0xa4] ss:$16 sps:$4 sm:$0xff]  }
0x1090   : > { %v9204_v13 = vsel %vm1692_vm1, %v9199_v53, %v9203_v10  ;;  %v21526_v14 = vor.u32 %v9208_v4, %v9203_v10  ;;  %v18133_v26 = vld [vmem:[#allocation45 + $0x60] ss:$16 sps:$4 sm:$0xff]   ;;  %v18144_v10 = vld [vmem:[#allocation45 + $0xc4] ss:$16 sps:$4 sm:$0xff]  }
0x1091   : > { %9567 = vmatprep.mubr.bf16.mxu0 %v9204_v13  ;;  %v18136_v63 = vld [vmem:[#allocation45 + $0x80] ss:$16 sps:$4 sm:$0xff]   ;;  %v18147_v7 = vld [vmem:[#allocation45 + $0xe4] ss:$16 sps:$4 sm:$0xff]  }
0x1092   : > { %9568 = vmatmul.mubr.bf16.vlgmr.msra.gmra.mrb[92].mxu0 %v21531_v31  ;;  %v18139_v53 = vld [vmem:[#allocation45 + $0xa0] ss:$16 sps:$4 sm:$0xff]   ;;  %v18150_v12 = vld [vmem:[#allocation45 + $0x104] ss:$16 sps:$4 sm:$0xff]  }
0x1093   : > { %9587 = vmatpush1.bf16.msra.mxu0 %v18076_v11  ;;  %9577 = vmatprep.mubr.bf16.mxu0 %v21526_v14  ;;  %v18142_v4 = vld [vmem:[#allocation45 + $0xc0] ss:$16 sps:$4 sm:$0xff]   ;;  %v18156_v0 = vld [vmem:[#allocation45 + $0x144] ss:$16 sps:$4 sm:$0xff]  }
0x1094   : > { %9588 = vmatprep.subr.bf16.mxu0 %v18081_v17  ;;  %v18145_v11 = vld [vmem:[#allocation45 + $0xe0] ss:$16 sps:$4 sm:$0xff]   ;;  %v18162_v60 = vld [vmem:[#allocation45 + $0x184] ss:$16 sps:$4 sm:$0xff]  }
0x1095   : > { %v18151_v17 = vld [vmem:[#allocation45 + $0x120] ss:$16 sps:$4 sm:$0xff]  }
0x1097   : > { %9589 = vmatpush1.bf16.msra.mxu0 %v18079_v41  ;;  %v18159_v41 = vld [vmem:[#allocation45 + $0x164] ss:$16 sps:$4 sm:$0xff]  }
0x1098   : > { %9590 = vmatprep.subr.bf16.mxu0 %v18084_v55  ;;  %v18157_v55 = vld [vmem:[#allocation45 + $0x160] ss:$16 sps:$4 sm:$0xff]  }
0x109a   : > { %9578 = vmatmul.mubr.bf16.gmra.mrb[96].mxu0 %v21536_v43 }
0x109b   : > { %9591 = vmatpush1.bf16.msra.mxu0 %v18082_v25  ;;  %9618 = vmatprep.mubr.bf16.mxu0 %v9204_v13  ;;  %v18148_v13 = vld [vmem:[#allocation45 + $0x100] ss:$16 sps:$4 sm:$0xff]  }
0x109c   : > { %9592 = vmatprep.subr.bf16.mxu0 %v18087_v42  ;;  %v18160_v25 = vld [vmem:[#allocation45 + $0x180] ss:$16 sps:$4 sm:$0xff]  }
0x109d   : > { %v18163_v42 = vld [vmem:[#allocation45 + $0x1a0] ss:$16 sps:$4 sm:$0xff]  }
0x109f   : > { %9593 = vmatpush1.bf16.msra.mxu0 %v18085_v44  ;;  %v18168_v44 = vld [vmem:[#allocation45 + $0x1c4] ss:$16 sps:$4 sm:$0xff]  }
0x10a0   : > { %9594 = vmatprep.subr.bf16.mxu0 %v18090_v28  ;;  %v18166_v28 = vld [vmem:[#allocation45 + $0x1c0] ss:$16 sps:$4 sm:$0xff]  }
0x10a3   : > { %9595 = vmatpush1.bf16.msra.mxu0 %v18088_v30  ;;  %v18171_v30 = vld [vmem:[#allocation45 + $0x1e4] ss:$16 sps:$4 sm:$0xff]  }
0x10a4   : > { %9596 = vmatprep.subr.bf16.mxu0 %v18093_v36  ;;  %v18169_v36 = vld [vmem:[#allocation45 + $0x1e0] ss:$16 sps:$4 sm:$0xff]  }
0x10a7   : > { %9597 = vmatpush1.bf16.msra.mxu0 %v18091_v16  ;;  %v18174_v16 = vld [vmem:[#allocation45 + $0xc] ss:$16 sps:$4 sm:$0xff]  }
0x10a8   : > { %9598 = vmatprep.subr.bf16.mxu0 %v18096_v29  ;;  %v18172_v29 = vld [vmem:[#allocation45 + $0x8] ss:$16 sps:$4 sm:$0xff]  }
0x10ab   : > { %9599 = vmatpush1.bf16.msra.mxu0 %v18094_v45  ;;  %v18177_v45 = vld [vmem:[#allocation45 + $0x2c] ss:$16 sps:$4 sm:$0xff]  }
0x10ac   : > { %9600 = vmatprep.subr.bf16.mxu0 %v18099_v34  ;;  %v21544_v34 = vld [vmem:[#allocation2 + $0x28] sm:$0x7] }
0x10af   : > { %9601 = vmatpush1.bf16.msra.mxu0 %v18097_v48  ;;  %v18175_v48 = vld [vmem:[#allocation45 + $0x28] ss:$16 sps:$4 sm:$0xff]  }
0x10b0   : > { %9602 = vmatprep.subr.bf16.mxu0 %v18102_v49  ;;  %v18180_v49 = vld [vmem:[#allocation45 + $0x4c] ss:$16 sps:$4 sm:$0xff]  }
0x10b3   : > { %9603 = vmatpush1.bf16.msra.mxu0 %v18100_v32  ;;  %v18178_v32 = vld [vmem:[#allocation45 + $0x48] ss:$16 sps:$4 sm:$0xff]  }
0x10b4   : > { %9604 = vmatprep.subr.bf16.mxu0 %v18105_v21  ;;  %v18183_v21 = vld [vmem:[#allocation45 + $0x6c] ss:$16 sps:$4 sm:$0xff]  }
0x10b7   : > { %9605 = vmatpush1.bf16.msra.mxu0 %v18103_v40  ;;  %v21547_v40 = vld [vmem:[#allocation2 + $0x20] sm:$0x7] }
0x10b8   : > { %9606 = vmatprep.subr.bf16.mxu0 %v18108_v47  ;;  %v18181_v47 = vld [vmem:[#allocation45 + $0x68] ss:$16 sps:$4 sm:$0xff]  }
0x10bb   : > { %9607 = vmatpush1.bf16.msra.mxu0 %v18106_v50  ;;  %v18186_v50 = vld [vmem:[#allocation45 + $0x8c] ss:$16 sps:$4 sm:$0xff]  }
0x10bc   : > { %9608 = vmatprep.subr.bf16.mxu0 %v18111_v52  ;;  %v18184_v52 = vld [vmem:[#allocation45 + $0x88] ss:$16 sps:$4 sm:$0xff]  }
0x10bf   : > { %9609 = vmatpush1.bf16.msra.mxu0 %v18109_v37  ;;  %v18189_v37 = vld [vmem:[#allocation45 + $0xac] ss:$16 sps:$4 sm:$0xff]  }
0x10c0   : > { %9610 = vmatprep.subr.bf16.mxu0 %v18114_v54  ;;  %v18187_v54 = vld [vmem:[#allocation45 + $0xa8] ss:$16 sps:$4 sm:$0xff]  }
0x10c3   : > { %9611 = vmatpush1.bf16.msra.mxu0 %v18112_v57  ;;  %v18192_v57 = vld [vmem:[#allocation45 + $0xcc] ss:$16 sps:$4 sm:$0xff]  }
0x10c4   : > { %9612 = vmatprep.subr.bf16.mxu0 %v18117_v24  ;;  %v18190_v24 = vld [vmem:[#allocation45 + $0xc8] ss:$16 sps:$4 sm:$0xff]  }
0x10c7   : > { %9613 = vmatpush1.bf16.msra.mxu0 %v18115_v39  ;;  %v18195_v39 = vld [vmem:[#allocation45 + $0xec] ss:$16 sps:$4 sm:$0xff]  }
0x10c8   : > { %9614 = vmatprep.subr.bf16.mxu0 %v18120_v58  ;;  %v18193_v58 = vld [vmem:[#allocation45 + $0xe8] ss:$16 sps:$4 sm:$0xff]  }
0x10cb   : > { %9615 = vmatpush1.bf16.msra.mxu0 %v18118_v59  ;;  %v18198_v59 = vld [vmem:[#allocation45 + $0x10c] ss:$16 sps:$4 sm:$0xff]  }
0x10cc   : > { %9616 = vmatprep.subr.bf16.mxu0 %v18123_v61  ;;  %v18201_v61 = vld [vmem:[#allocation45 + $0x12c] ss:$16 sps:$4 sm:$0xff]  }
0x10cf   : > { %9617 = vmatpush1.bf16.msra.mxu0 %v18121_v3  ;;  %v18199_v3 = vld [vmem:[#allocation45 + $0x128] ss:$16 sps:$4 sm:$0xff]  }
0x10d0   : > { %9957 = vmatprep.subr.bf16.mxu0 %v18126_v62  ;;  %v18204_v62 = vld [vmem:[#allocation45 + $0x14c] ss:$16 sps:$4 sm:$0xff]  }
0x10d2   : > { %9619 = vmatmul.mubr.bf16.vlgmr.msra.gmra.mrb[100].mxu0 %v21531_v31  ;;  %v18154_v31 = vld [vmem:[#allocation45 + $0x140] ss:$16 sps:$4 sm:$0xff]  }
0x10d3   : > { %9628 = vmatprep.mubr.bf16.mxu0 %v21526_v14  ;;  %9958 = vmatpush1.bf16.msra.mxu0 %v18124_v6  ;;  %v18153_v14 = vld [vmem:[#allocation45 + $0x124] ss:$16 sps:$4 sm:$0xff]   ;;  %v18202_v6 = vld [vmem:[#allocation45 + $0x148] ss:$16 sps:$4 sm:$0xff]  }
0x10d4   : > { %9959 = vmatprep.subr.bf16.mxu0 %v18129_v18  ;;  %v18207_v18 = vld [vmem:[#allocation45 + $0x16c] ss:$16 sps:$4 sm:$0xff]  }
0x10d7   : > { %9960 = vmatpush1.bf16.msra.mxu0 %v18127_v1  ;;  %v18205_v1 = vld [vmem:[#allocation45 + $0x168] ss:$16 sps:$4 sm:$0xff]  }
0x10d8   : > { %9961 = vmatprep.subr.bf16.mxu0 %v18132_v5  ;;  %v18210_v5 = vld [vmem:[#allocation45 + $0x18c] ss:$16 sps:$4 sm:$0xff]  }
0x10da   : > { %9629 = vmatmul.mubr.bf16.gmra.mrb[104].mxu0 %v21536_v43  ;;  %v18165_v43 = vld [vmem:[#allocation45 + $0x1a4] ss:$16 sps:$4 sm:$0xff]  }
0x10db   : > { %9962 = vmatpush1.bf16.msra.mxu0 %v18130_v51  ;;  %9989 = vmatprep.mubr.bf16.mxu0 %v21499_v33  ;;  %v18208_v51 = vld [vmem:[#allocation45 + $0x188] ss:$16 sps:$4 sm:$0xff]  }
0x10dc   : > { %9963 = vmatprep.subr.bf16.mxu0 %v18135_v9  ;;  %v18213_v9 = vld [vmem:[#allocation45 + $0x1ac] ss:$16 sps:$4 sm:$0xff]  }
0x10df   : > { %9964 = vmatpush1.bf16.msra.mxu0 %v18133_v26  ;;  %v18211_v26 = vld [vmem:[#allocation45 + $0x1a8] ss:$16 sps:$4 sm:$0xff]  }
0x10e0   : > { %9965 = vmatprep.subr.bf16.mxu0 %v18138_v22  ;;  %v18216_v22 = vld [vmem:[#allocation45 + $0x1cc] ss:$16 sps:$4 sm:$0xff]  }
0x10e3   : > { %9966 = vmatpush1.bf16.msra.mxu0 %v18136_v63  ;;  %v18214_v63 = vld [vmem:[#allocation45 + $0x1c8] ss:$16 sps:$4 sm:$0xff]  }
0x10e4   : > { %9967 = vmatprep.subr.bf16.mxu0 %v18141_v8  ;;  %v18219_v8 = vld [vmem:[#allocation45 + $0x1ec] ss:$16 sps:$4 sm:$0xff]  }
0x10e7   : > { %9968 = vmatpush1.bf16.msra.mxu0 %v18139_v53  ;;  %v18217_v53 = vld [vmem:[#allocation45 + $0x1e8] ss:$16 sps:$4 sm:$0xff]  }
0x10e8   : > { %9969 = vmatprep.subr.bf16.mxu0 %v18144_v10  ;;  %v18222_v10 = vld [vmem:[#allocation45 + $0x404] ss:$16 sps:$4 sm:$0xff]  }
0x10eb   : > { %9970 = vmatpush1.bf16.msra.mxu0 %v18142_v4  ;;  %v18220_v4 = vld [vmem:[#allocation45 + $0x400] ss:$16 sps:$4 sm:$0xff]  }
0x10ec   : > { %9971 = vmatprep.subr.bf16.mxu0 %v18147_v7  ;;  %v18225_v7 = vld [vmem:[#allocation45 + $0x424] ss:$16 sps:$4 sm:$0xff]  }
0x10ef   : > { %9972 = vmatpush1.bf16.msra.mxu0 %v18145_v11  ;;  %v18223_v11 = vld [vmem:[#allocation45 + $0x420] ss:$16 sps:$4 sm:$0xff]  }
0x10f0   : > { %9973 = vmatprep.subr.bf16.mxu0 %v18150_v12  ;;  %v18228_v12 = vld [vmem:[#allocation45 + $0x444] ss:$16 sps:$4 sm:$0xff]  }
0x10f3   : > { %9974 = vmatpush1.bf16.msra.mxu0 %v18148_v13  ;;  %v10060_v13 = vld [vmem:[#allocation2 + $0x8] sm:$0xfe] }
0x10f4   : > { %9975 = vmatprep.subr.bf16.mxu0 %v18153_v14  ;;  %v21554_v14 = vrot.slane %v21516_v2, 1  ;;  %v18234_v2 = vld [vmem:[#allocation45 + $0x484] ss:$16 sps:$4 sm:$0xff]  }
0x10f7   : > { %9976 = vmatpush1.bf16.msra.mxu0 %v18151_v17  ;;  %v18226_v17 = vld [vmem:[#allocation45 + $0x440] ss:$16 sps:$4 sm:$0xff]  }
0x10f8   : > { %9977 = vmatprep.subr.bf16.mxu0 %v18156_v0  ;;  %v10133_v0 = vrot.slane %v10060_v13, 1  ;;  %v18282_v13 = vld [vmem:[#allocation45 + $0x48c] ss:$16 sps:$4 sm:$0xff]  }
0x10fb   : > { %9978 = vmatpush1.bf16.msra.mxu0 %v18154_v31  ;;  %v18231_v31 = vld [vmem:[#allocation45 + $0x464] ss:$16 sps:$4 sm:$0xff]  }
0x10fc   : > { %9979 = vmatprep.subr.bf16.mxu0 %v18159_v41  ;;  %v18316_v41 = vld [vmem:[#allocation50 + $0x400] ss:$16 sps:$4 sm:$0xff]  }
0x10ff   : > { %9980 = vmatpush1.bf16.msra.mxu0 %v18157_v55  ;;  %v18318_v55 = vld [vmem:[#allocation50 + $0x404] ss:$16 sps:$4 sm:$0xff]  }
0x1100   : > { %9981 = vmatprep.subr.bf16.mxu0 %v18162_v60  ;;  %v18229_v60 = vld [vmem:[#allocation45 + $0x460] ss:$16 sps:$4 sm:$0xff]   ;;  %11755 = vmatprep.subr.bf16.mxu1 %v18318_v55  ;;  %v18286_v55 = vld [vmem:[#allocation45 + $0x4c8] ss:$16 sps:$4 sm:$0xff]  }
0x1101   : > { %11756 = vmatpush1.bf16.msra.mxu1 %v18316_v41  ;;  %v18288_v41 = vld [vmem:[#allocation45 + $0x4cc] ss:$16 sps:$4 sm:$0xff]  }
0x1103   : > { %9982 = vmatpush1.bf16.msra.mxu0 %v18160_v25  ;;  %v18321_v25 = vld [vmem:[#allocation50 + $0x424] ss:$16 sps:$4 sm:$0xff]  }
0x1104   : > { %9983 = vmatprep.subr.bf16.mxu0 %v18165_v43  ;;  %v18319_v43 = vld [vmem:[#allocation50 + $0x420] ss:$16 sps:$4 sm:$0xff]   ;;  %11757 = vmatprep.subr.bf16.mxu1 %v18321_v25 }
0x1105   : > { %11758 = vmatpush1.bf16.msra.mxu1 %v18319_v43  ;;  %v18289_v25 = vld [vmem:[#allocation45 + $0x4e8] ss:$16 sps:$4 sm:$0xff]   ;;  %v18297_v43 = vld [vmem:[#allocation45 + $0x52c] ss:$16 sps:$4 sm:$0xff]  }
0x1107   : > { %9984 = vmatpush1.bf16.msra.mxu0 %v18163_v42  ;;  %v18324_v42 = vld [vmem:[#allocation50 + $0x444] ss:$16 sps:$4 sm:$0xff]  }
0x1108   : > { %9985 = vmatprep.subr.bf16.mxu0 %v18168_v44  ;;  %v18232_v44 = vld [vmem:[#allocation45 + $0x480] ss:$16 sps:$4 sm:$0xff]   ;;  %11759 = vmatprep.subr.bf16.mxu1 %v18324_v42  ;;  %v18295_v42 = vld [vmem:[#allocation45 + $0x528] ss:$16 sps:$4 sm:$0xff]  }
0x110b   : > { %9986 = vmatpush1.bf16.msra.mxu0 %v18166_v28  ;;  %v18237_v28 = vld [vmem:[#allocation45 + $0x4a4] ss:$16 sps:$4 sm:$0xff]  }
0x110c   : > { %9987 = vmatprep.subr.bf16.mxu0 %v18171_v30  ;;  %v18322_v30 = vld [vmem:[#allocation50 + $0x440] ss:$16 sps:$4 sm:$0xff]  }
0x110d   : > { %11760 = vmatpush1.bf16.msra.mxu1 %v18322_v30  ;;  %v18303_v30 = vld [vmem:[#allocation45 + $0x56c] ss:$16 sps:$4 sm:$0xff]  }
0x110f   : > { %9988 = vmatpush1.bf16.msra.mxu0 %v18169_v36  ;;  %v18327_v36 = vld [vmem:[#allocation50 + $0x464] ss:$16 sps:$4 sm:$0xff]  }
0x1110   : > { %10008 = vmatprep.subr.bf16.mxu0 %v18174_v16  ;;  %v18235_v16 = vld [vmem:[#allocation45 + $0x4a0] ss:$16 sps:$4 sm:$0xff]   ;;  %11761 = vmatprep.subr.bf16.mxu1 %v18327_v36  ;;  %v18301_v36 = vld [vmem:[#allocation45 + $0x568] ss:$16 sps:$4 sm:$0xff]  }
0x1112   : > { %9990 = vmatmul.mubr.bf16.vlgmr.msra.gmra.mrb[92].mxu0 %v21494_v56 }
0x1113   : > { %9999 = vmatprep.mubr.bf16.mxu0 %v21544_v34  ;;  %10009 = vmatpush1.bf16.msra.mxu0 %v18172_v29  ;;  %v18240_v29 = vld [vmem:[#allocation45 + $0x4c4] ss:$16 sps:$4 sm:$0xff]  }
0x1114   : > { %10010 = vmatprep.subr.bf16.mxu0 %v18177_v45  ;;  %v18325_v45 = vld [vmem:[#allocation50 + $0x460] ss:$16 sps:$4 sm:$0xff]  }
0x1115   : > { %11762 = vmatpush1.bf16.msra.mxu1 %v18325_v45  ;;  %v18309_v45 = vld [vmem:[#allocation45 + $0x5ac] ss:$16 sps:$4 sm:$0xff]  }
0x1117   : > { %10011 = vmatpush1.bf16.msra.mxu0 %v18175_v48  ;;  %v18238_v48 = vld [vmem:[#allocation45 + $0x4c0] ss:$16 sps:$4 sm:$0xff]  }
0x1118   : > { %10012 = vmatprep.subr.bf16.mxu0 %v18180_v49  ;;  %v18243_v49 = vld [vmem:[#allocation45 + $0x4e4] ss:$16 sps:$4 sm:$0xff]  }
0x111a   : > { %10000 = vmatmul.mubr.bf16.gmra.mrb[96].mxu0 %v21547_v40 }
0x111b   : > { %10013 = vmatpush1.bf16.msra.mxu0 %v18178_v32  ;;  %10040 = vmatprep.mubr.bf16.mxu0 %v21499_v33  ;;  %v18196_v33 = vld [vmem:[#allocation45 + $0x108] ss:$16 sps:$4 sm:$0xff]  }
0x111c   : > { %10014 = vmatprep.subr.bf16.mxu0 %v18183_v21  ;;  %v18328_v32 = vld [vmem:[#allocation50 + $0x480] ss:$16 sps:$4 sm:$0xff]   ;;  %v18333_v21 = vld [vmem:[#allocation50 + $0x4a4] ss:$16 sps:$4 sm:$0xff]  }
0x111f   : > { %10015 = vmatpush1.bf16.msra.mxu0 %v18181_v47  ;;  %v18246_v47 = vld [vmem:[#allocation45 + $0x504] ss:$16 sps:$4 sm:$0xff]  }
0x1120   : > { %10016 = vmatprep.subr.bf16.mxu0 %v18186_v50  ;;  %v18331_v50 = vld [vmem:[#allocation50 + $0x4a0] ss:$16 sps:$4 sm:$0xff]  }
0x1123   : > { %10017 = vmatpush1.bf16.msra.mxu0 %v18184_v52  ;;  %v18336_v52 = vld [vmem:[#allocation50 + $0x4c4] ss:$16 sps:$4 sm:$0xff]  }
0x1124   : > { %10018 = vmatprep.subr.bf16.mxu0 %v18189_v37  ;;  %v18244_v37 = vld [vmem:[#allocation45 + $0x500] ss:$16 sps:$4 sm:$0xff]  }
0x1127   : > { %10019 = vmatpush1.bf16.msra.mxu0 %v18187_v54  ;;  %v18249_v54 = vld [vmem:[#allocation45 + $0x524] ss:$16 sps:$4 sm:$0xff]  }
0x1128   : > { %10020 = vmatprep.subr.bf16.mxu0 %v18192_v57  ;;  %v18334_v57 = vld [vmem:[#allocation50 + $0x4c0] ss:$16 sps:$4 sm:$0xff]  }
0x112b   : > { %10021 = vmatpush1.bf16.msra.mxu0 %v18190_v24  ;;  %v18247_v24 = vld [vmem:[#allocation45 + $0x520] ss:$16 sps:$4 sm:$0xff]  }
0x112c   : > { %10022 = vmatprep.subr.bf16.mxu0 %v18195_v39  ;;  %v18252_v39 = vld [vmem:[#allocation45 + $0x544] ss:$16 sps:$4 sm:$0xff]  }
0x112f   : > { %10023 = vmatpush1.bf16.msra.mxu0 %v18193_v58  ;;  %v18250_v58 = vld [vmem:[#allocation45 + $0x540] ss:$16 sps:$4 sm:$0xff]  }
0x1130   : > { %10024 = vmatprep.subr.bf16.mxu0 %v18198_v59  ;;  %v18255_v59 = vld [vmem:[#allocation45 + $0x564] ss:$16 sps:$4 sm:$0xff]  }
0x1133   : > { %10025 = vmatpush1.bf16.msra.mxu0 %v18196_v33  ;;  %v18253_v33 = vld [vmem:[#allocation45 + $0x560] ss:$16 sps:$4 sm:$0xff]  }
0x1134   : > { %10026 = vmatprep.subr.bf16.mxu0 %v18201_v61  ;;  %v18258_v61 = vld [vmem:[#allocation45 + $0x584] ss:$16 sps:$4 sm:$0xff]  }
0x1137   : > { %10027 = vmatpush1.bf16.msra.mxu0 %v18199_v3  ;;  %v18256_v3 = vld [vmem:[#allocation45 + $0x580] ss:$16 sps:$4 sm:$0xff]  }
0x1138   : > { %10028 = vmatprep.subr.bf16.mxu0 %v18204_v62  ;;  %v18261_v62 = vld [vmem:[#allocation45 + $0x5a4] ss:$16 sps:$4 sm:$0xff]  }
0x113b   : > { %10029 = vmatpush1.bf16.msra.mxu0 %v18202_v6  ;;  %v18259_v6 = vld [vmem:[#allocation45 + $0x5a0] ss:$16 sps:$4 sm:$0xff]  }
0x113c   : > { %10030 = vmatprep.subr.bf16.mxu0 %v18207_v18  ;;  %v18264_v18 = vld [vmem:[#allocation45 + $0x5c4] ss:$16 sps:$4 sm:$0xff]  }
0x113f   : > { %10031 = vmatpush1.bf16.msra.mxu0 %v18205_v1  ;;  %v18262_v1 = vld [vmem:[#allocation45 + $0x5c0] ss:$16 sps:$4 sm:$0xff]  }
0x1140   : > { %10032 = vmatprep.subr.bf16.mxu0 %v18210_v5  ;;  %v18267_v5 = vld [vmem:[#allocation45 + $0x5e4] ss:$16 sps:$4 sm:$0xff]  }
0x1143   : > { %10033 = vmatpush1.bf16.msra.mxu0 %v18208_v51  ;;  %v18265_v51 = vld [vmem:[#allocation45 + $0x5e0] ss:$16 sps:$4 sm:$0xff]  }
0x1144   : > { %10034 = vmatprep.subr.bf16.mxu0 %v18213_v9  ;;  %v10059_v9 = vld [vmem:[#allocation2] sm:$0xfe] }
0x1147   : > { %10035 = vmatpush1.bf16.msra.mxu0 %v18211_v26  ;;  %v18270_v26 = vld [vmem:[#allocation45 + $0x40c] ss:$16 sps:$4 sm:$0xff]  }
0x1148   : > { %10036 = vmatprep.subr.bf16.mxu0 %v18216_v22  ;;  %v21563_v22 = vrot.slane %v21514_v19, 1  ;;  %v18274_v19 = vld [vmem:[#allocation45 + $0x448] ss:$16 sps:$4 sm:$0xff]  }
0x114b   : > { %10037 = vmatpush1.bf16.msra.mxu0 %v18214_v63  ;;  %v10130_v63 = vrot.slane %v10059_v9, 1  ;;  %v10673_v9 = vld [vmem:[#allocation2 + $0x38] sm:$0x8] }
0x114c   : > { %10038 = vmatprep.subr.bf16.mxu0 %v18219_v8  ;;  %v18268_v8 = vld [vmem:[#allocation45 + $0x408] ss:$16 sps:$4 sm:$0xff]  }
0x114f   : > { %10039 = vmatpush1.bf16.msra.mxu0 %v18217_v53  ;;  %v18273_v53 = vld [vmem:[#allocation45 + $0x42c] ss:$16 sps:$4 sm:$0xff]  }
0x1150   : > { %10460 = vmatprep.subr.bf16.mxu0 %v18222_v10  ;;  %v21567_v10 = vsel %vm2348_vm11, %v10130_v63, %v21563_v22  ;;  %v21582_v63 = vld [vmem:[#allocation48] sm:$0xf] }
0x1151   : > { %v10611_v35 = vrot.slane %v21582_v63, %v21223_v15 }
0x1152   : > { %10041 = vmatmul.mubr.bf16.vlgmr.msra.gmra.mrb[100].mxu0 %v21494_v56  ;;  %v21559_v56 = vsel %vm2348_vm11, %v10133_v0, %v21554_v14  ;;  %v18285_v0 = vld [vmem:[#allocation45 + $0x4ac] ss:$16 sps:$4 sm:$0xff]  }
0x1153   : > { %10050 = vmatprep.mubr.bf16.mxu0 %v21544_v34  ;;  %10461 = vmatpush1.bf16.msra.mxu0 %v18220_v4  ;;  %v18330_v34 = vld [vmem:[#allocation50 + $0x484] ss:$16 sps:$4 sm:$0xff]   ;;  %v18271_v4 = vld [vmem:[#allocation45 + $0x428] ss:$16 sps:$4 sm:$0xff]  }
0x1154   : > { %10462 = vmatprep.subr.bf16.mxu0 %v18225_v7  ;;  %11763 = vmatprep.subr.bf16.mxu1 %v18330_v34  ;;  %v18276_v7 = vld [vmem:[#allocation45 + $0x44c] ss:$16 sps:$4 sm:$0xff]   ;;  %v18307_v34 = vld [vmem:[#allocation45 + $0x5a8] ss:$16 sps:$4 sm:$0xff]  }
0x1155   : > { %11764 = vmatpush1.bf16.msra.mxu1 %v18328_v32  ;;  %v18315_v32 = vld [vmem:[#allocation45 + $0x5ec] ss:$16 sps:$4 sm:$0xff]  }
0x1156   : > { %11765 = vmatprep.subr.bf16.mxu1 %v18333_v21  ;;  %v18313_v21 = vld [vmem:[#allocation45 + $0x5e8] ss:$16 sps:$4 sm:$0xff]  }
0x1157   : > { %10463 = vmatpush1.bf16.msra.mxu0 %v18223_v11  ;;  %v18279_v11 = vld [vmem:[#allocation45 + $0x46c] ss:$16 sps:$4 sm:$0xff]  }
0x1158   : > { %10464 = vmatprep.subr.bf16.mxu0 %v18228_v12  ;;  %v18277_v12 = vld [vmem:[#allocation45 + $0x468] ss:$16 sps:$4 sm:$0xff]  }
0x1159   : > { %11766 = vmatpush1.bf16.msra.mxu1 %v18331_v50  ;;  %v18342_v50 = vld [vmem:[#allocation50 + $0x504] ss:$16 sps:$4 sm:$0xff]  }
0x115a   : > { %10051 = vmatmul.mubr.bf16.gmra.mrb[104].mxu0 %v21547_v40  ;;  %v18241_v40 = vld [vmem:[#allocation45 + $0x4e0] ss:$16 sps:$4 sm:$0xff]   ;;  %11767 = vmatprep.subr.bf16.mxu1 %v18336_v52  ;;  %v18340_v52 = vld [vmem:[#allocation50 + $0x500] ss:$16 sps:$4 sm:$0xff]  }
0x115b   : > { %10465 = vmatpush1.bf16.msra.mxu0 %v18226_v17  ;;  %10492 = vmatprep.mubr.bf16.mxu0 %v21559_v56  ;;  %v18280_v17 = vld [vmem:[#allocation45 + $0x488] ss:$16 sps:$4 sm:$0xff]  }
0x115c   : > { %10466 = vmatprep.subr.bf16.mxu0 %v18231_v31  ;;  %v18283_v31 = vld [vmem:[#allocation45 + $0x4a8] ss:$16 sps:$4 sm:$0xff]  }
0x115d   : > { %11768 = vmatpush1.bf16.msra.mxu1 %v18334_v57  ;;  %v18348_v57 = vld [vmem:[#allocation50 + $0x544] ss:$16 sps:$4 sm:$0xff]  }
0x115f   : > { %10467 = vmatpush1.bf16.msra.mxu0 %v18229_v60  ;;  %v18291_v60 = vld [vmem:[#allocation45 + $0x4ec] ss:$16 sps:$4 sm:$0xff]  }
0x1160   : > { %10468 = vmatprep.subr.bf16.mxu0 %v18234_v2  ;;  %v18294_v2 = vld [vmem:[#allocation45 + $0x50c] ss:$16 sps:$4 sm:$0xff]  }
0x1163   : > { %10469 = vmatpush1.bf16.msra.mxu0 %v18232_v44  ;;  %v18300_v44 = vld [vmem:[#allocation45 + $0x54c] ss:$16 sps:$4 sm:$0xff]  }
0x1164   : > { %10470 = vmatprep.subr.bf16.mxu0 %v18237_v28  ;;  %v18298_v28 = vld [vmem:[#allocation45 + $0x548] ss:$16 sps:$4 sm:$0xff]  }
0x1167   : > { %10471 = vmatpush1.bf16.msra.mxu0 %v18235_v16  ;;  %v18306_v16 = vld [vmem:[#allocation45 + $0x58c] ss:$16 sps:$4 sm:$0xff]  }
0x1168   : > { %10472 = vmatprep.subr.bf16.mxu0 %v18240_v29  ;;  %v18304_v29 = vld [vmem:[#allocation45 + $0x588] ss:$16 sps:$4 sm:$0xff]  }
0x116b   : > { %10473 = vmatpush1.bf16.msra.mxu0 %v18238_v48  ;;  %v18312_v48 = vld [vmem:[#allocation45 + $0x5cc] ss:$16 sps:$4 sm:$0xff]  }
0x116c   : > { %10474 = vmatprep.subr.bf16.mxu0 %v18243_v49  ;;  %v18310_v49 = vld [vmem:[#allocation45 + $0x5c8] ss:$16 sps:$4 sm:$0xff]  }
0x116f   : > { %10475 = vmatpush1.bf16.msra.mxu0 %v18241_v40  ;;  %v18339_v40 = vld [vmem:[#allocation50 + $0x4e4] ss:$16 sps:$4 sm:$0xff]  }
0x1170   : > { %10476 = vmatprep.subr.bf16.mxu0 %v18246_v47  ;;  %v18337_v47 = vld [vmem:[#allocation50 + $0x4e0] ss:$16 sps:$4 sm:$0xff]   ;;  %11769 = vmatprep.subr.bf16.mxu1 %v18339_v40 }
0x1171   : > { %11770 = vmatpush1.bf16.msra.mxu1 %v18337_v47 }
0x1172   : > { %11771 = vmatprep.subr.bf16.mxu1 %v18342_v50 }
0x1173   : > { %10477 = vmatpush1.bf16.msra.mxu0 %v18244_v37  ;;  %v18345_v37 = vld [vmem:[#allocation50 + $0x524] ss:$16 sps:$4 sm:$0xff]  }
0x1174   : > { %10478 = vmatprep.subr.bf16.mxu0 %v18249_v54  ;;  %v18343_v54 = vld [vmem:[#allocation50 + $0x520] ss:$16 sps:$4 sm:$0xff]  }
0x1175   : > { %11772 = vmatpush1.bf16.msra.mxu1 %v18340_v52 }
0x1176   : > { %11773 = vmatprep.subr.bf16.mxu1 %v18345_v37 }
0x1177   : > { %10479 = vmatpush1.bf16.msra.mxu0 %v18247_v24  ;;  %v18346_v24 = vld [vmem:[#allocation50 + $0x540] ss:$16 sps:$4 sm:$0xff]  }
0x1178   : > { %10480 = vmatprep.subr.bf16.mxu0 %v18252_v39  ;;  %v18351_v39 = vld [vmem:[#allocation50 + $0x564] ss:$16 sps:$4 sm:$0xff]  }
0x1179   : > { %11774 = vmatpush1.bf16.msra.mxu1 %v18343_v54 }
0x117a   : > { %11775 = vmatprep.subr.bf16.mxu1 %v18348_v57  ;;  %v10752_v57 = vld [vmem:[#allocation2] sm:$0xff] }
0x117b   : > { %10481 = vmatpush1.bf16.msra.mxu0 %v18250_v58  ;;  %v18354_v58 = vld [vmem:[#allocation50 + $0x584] ss:$16 sps:$4 sm:$0xff]  }
0x117c   : > { %10482 = vmatprep.subr.bf16.mxu0 %v18255_v59  ;;  %v18352_v59 = vld [vmem:[#allocation50 + $0x580] ss:$16 sps:$4 sm:$0xff]  }
0x117d   : > { %11776 = vmatpush1.bf16.msra.mxu1 %v18346_v24 }
0x117e   : > { %11777 = vmatprep.subr.bf16.mxu1 %v18351_v39 }
0x117f   : > { %10483 = vmatpush1.bf16.msra.mxu0 %v18253_v33  ;;  %v18357_v33 = vld [vmem:[#allocation50 + $0x5a4] ss:$16 sps:$4 sm:$0xff]  }
0x1180   : > { %10484 = vmatprep.subr.bf16.mxu0 %v18258_v61  ;;  %v18355_v61 = vld [vmem:[#allocation50 + $0x5a0] ss:$16 sps:$4 sm:$0xff]  }
0x1183   : > { %10485 = vmatpush1.bf16.msra.mxu0 %v18256_v3  ;;  %v18360_v3 = vld [vmem:[#allocation50 + $0x5c4] ss:$16 sps:$4 sm:$0xff]  }
0x1184   : > { %10486 = vmatprep.subr.bf16.mxu0 %v18261_v62  ;;  %v18358_v62 = vld [vmem:[#allocation50 + $0x5c0] ss:$16 sps:$4 sm:$0xff]  }
0x1187   : > { %10487 = vmatpush1.bf16.msra.mxu0 %v18259_v6  ;;  %v18363_v6 = vld [vmem:[#allocation50 + $0x5e4] ss:$16 sps:$4 sm:$0xff]  }
0x1188   : > { %10488 = vmatprep.subr.bf16.mxu0 %v18264_v18  ;;  %v18361_v18 = vld [vmem:[#allocation50 + $0x5e0] ss:$16 sps:$4 sm:$0xff]  }
0x118b   : > { %10489 = vmatpush1.bf16.msra.mxu0 %v18262_v1  ;;  %v18366_v1 = vld [vmem:[#allocation50 + $0x604] ss:$16 sps:$4 sm:$0xff]  }
0x118c   : > { %10490 = vmatprep.subr.bf16.mxu0 %v18267_v5  ;;  %v10661_v5 = vld [vmem:[#allocation2 + $0x18] sm:$0x1] }
0x118f   : > { %10491 = vmatpush1.bf16.msra.mxu0 %v18265_v51  ;;  %v10662_v51 = vsel %vm20865_vm4, 0, %v10661_v5 }
0x1190   : > { %10511 = vmatprep.subr.bf16.mxu0 %v18270_v26  ;;  %10663 = vst [vmem:[#allocation2 + $0x18] sm:$0x1] %v10662_v51  ;;  %v10674_v26 = vsel %vm20925_vm10, 0, %v10673_v9  ;;  %v10764_v9 = vld [vmem:[#allocation2 + $0x20] sm:$0xf] }
0x1191   : > { %10675 = vst [vmem:[#allocation2 + $0x38] sm:$0x8] %v10674_v26 }
0x1192   : > { %10493 = vmatmul.mubr.bf16.vlgmr.msra.gmra.mrb[92].mxu0 %v21567_v10 }
0x1193   : > { %10502 = vmatprep.mubr.bf16.mxu0 %v21554_v14  ;;  %10512 = vmatpush1.bf16.msra.mxu0 %v18268_v8 }
0x1194   : > { %10513 = vmatprep.subr.bf16.mxu0 %v18273_v53 }
0x1197   : > { %10514 = vmatpush1.bf16.msra.mxu0 %v18271_v4  ;;  %v10615_v4 = vrot.slane %v21582_v63, %v21226_v23 }
0x1198   : > { %10515 = vmatprep.subr.bf16.mxu0 %v18276_v7 }
0x119a   : > { %10503 = vmatmul.mubr.bf16.gmra.mrb[96].mxu0 %v21563_v22 }
0x119b   : > { %10516 = vmatpush1.bf16.msra.mxu0 %v18274_v19  ;;  %10543 = vmatprep.mubr.bf16.mxu0 %v21559_v56  ;;  %v18292_v56 = vld [vmem:[#allocation45 + $0x508] ss:$16 sps:$4 sm:$0xff]  }
0x119c   : > { %10517 = vmatprep.subr.bf16.mxu0 %v18279_v11 }
0x119f   : > { %10518 = vmatpush1.bf16.msra.mxu0 %v18277_v12 }
0x11a0   : > { %10519 = vmatprep.subr.bf16.mxu0 %v18282_v13 }
0x11a3   : > { %10520 = vmatpush1.bf16.msra.mxu0 %v18280_v17 }
0x11a4   : > { %10521 = vmatprep.subr.bf16.mxu0 %v18285_v0 }
0x11a7   : > { %10522 = vmatpush1.bf16.msra.mxu0 %v18283_v31 }
0x11a8   : > { %10523 = vmatprep.subr.bf16.mxu0 %v18288_v41 }
0x11ab   : > { %10524 = vmatpush1.bf16.msra.mxu0 %v18286_v55 }
0x11ac   : > { %10525 = vmatprep.subr.bf16.mxu0 %v18291_v60 }
0x11af   : > { %10526 = vmatpush1.bf16.msra.mxu0 %v18289_v25 }
0x11b0   : > { %10527 = vmatprep.subr.bf16.mxu0 %v18294_v2 }
0x11b3   : > { %10528 = vmatpush1.bf16.msra.mxu0 %v18292_v56 }
0x11b4   : > { %10529 = vmatprep.subr.bf16.mxu0 %v18297_v43 }
0x11b7   : > { %10530 = vmatpush1.bf16.msra.mxu0 %v18295_v42 }
0x11b8   : > { %10531 = vmatprep.subr.bf16.mxu0 %v18300_v44 }
0x11bb   : > { %10532 = vmatpush1.bf16.msra.mxu0 %v18298_v28 }
0x11bc   : > { %10533 = vmatprep.subr.bf16.mxu0 %v18303_v30 }
0x11bf   : > { %10534 = vmatpush1.bf16.msra.mxu0 %v18301_v36 }
0x11c0   : > { %10535 = vmatprep.subr.bf16.mxu0 %v18306_v16 }
0x11c3   : > { %10536 = vmatpush1.bf16.msra.mxu0 %v18304_v29 }
0x11c4   : > { %10537 = vmatprep.subr.bf16.mxu0 %v18309_v45 }
0x11c7   : > { %10538 = vmatpush1.bf16.msra.mxu0 %v18307_v34 }
0x11c8   : > { %10539 = vmatprep.subr.bf16.mxu0 %v18312_v48 }
0x11cb   : > { %10540 = vmatpush1.bf16.msra.mxu0 %v18310_v49 }
0x11cc   : > { %10541 = vmatprep.subr.bf16.mxu0 %v18315_v32 }
0x11cf   : > { %10542 = vmatpush1.bf16.msra.mxu0 %v18313_v21 }
0x11d2   : > { %10544 = vmatmul.mubr.bf16.vlgmr.msra.gmra.mrb[100].mxu0 %v21567_v10 }
0x11d3   : > { %10553 = vmatprep.mubr.bf16.mxu0 %v21554_v14  ;;  %v18349_v14 = vld [vmem:[#allocation50 + $0x560] ss:$16 sps:$4 sm:$0xff]  }
0x11d4   : > { %11778 = vmatpush1.bf16.msra.mxu1 %v18349_v14 }
0x11d5   : > { %11779 = vmatprep.subr.bf16.mxu1 %v18354_v58  ;;  %v10755_v58 = vld [vmem:[#allocation2 + $0x8] sm:$0xff] }
0x11d8   : > { %11780 = vmatpush1.bf16.msra.mxu1 %v18352_v59 }
0x11d9   : > { %11781 = vmatprep.subr.bf16.mxu1 %v18357_v33 }
0x11da   : > { %10554 = vmatmul.mubr.bf16.gmra.mrb[104].mxu0 %v21563_v22  ;;  %v21580_v22 = vld [vmem:[#allocation47] sm:$0xf] }
0x11db   : > { %v10578_v8 = vrot.slane %v21580_v22, %v21223_v15  ;;  %v10582_v53 = vrot.slane %v21580_v22, %v21226_v23 }
0x11dc   : > { %11782 = vmatpush1.bf16.msra.mxu1 %v18355_v61 }
0x11dd   : > { %11783 = vmatprep.subr.bf16.mxu1 %v18360_v3 }
0x11e0   : > { %11784 = vmatpush1.bf16.msra.mxu1 %v18358_v62 }
0x11e1   : > { %11785 = vmatprep.subr.bf16.mxu1 %v18363_v6 }
0x11e4   : > { %11786 = vmatpush1.bf16.msra.mxu1 %v18361_v18 }
0x11e5   : > { %11806 = vmatprep.subr.bf16.mxu1 %v18366_v1 }
0x1265   : > { %v10494_v10 = vpop.f32.mrb[92].mxu0 }
0x1266   : > { %v10595_v38 = vmul.f32 %v10578_v8, %v10494_v10  ;;  %v10496_v7 = vpop.f32.mrb[93].mxu0 }
0x1267   : > { %v10596_v19 = vmul.f32 %v10582_v53, %v10496_v7  ;;  %v10498_v11 = vpop.f32.mrb[94].mxu0 }
0x1268   : > { %v10628_v12 = vadd.f32 %v10611_v35, %v10595_v38  ;;  %v10599_v13 = vmul.f32 %v10578_v8, %v10498_v11  ;;  %v10500_v17 = vpop.f32.mrb[95].mxu0 }
0x1269   : > { %v10629_v0 = vadd.f32 %v10615_v4, %v10596_v19  ;;  %v10600_v31 = vmul.f32 %v10582_v53, %v10500_v17 }
0x126a   : > { %v10632_v41 = vadd.f32 %v10611_v35, %v10599_v13  ;;  %v10640_v60 = vmax.f32 %v10628_v12, 0.0 }
0x126b   : > { %v10633_v55 = vadd.f32 %v10615_v4, %v10600_v31  ;;  %v10641_v2 = vmax.f32 %v10629_v0, 0.0 }
0x126c   : > { %v10644_v25 = vmax.f32 %v10632_v41, 0.0 }
0x126d   : > { %v10645_v56 = vmax.f32 %v10633_v55, 0.0  ;;  %v10504_v43 = vpop.f32.mrb[96].mxu0 }
0x126e   : > { %v10676_v42 = vpack.c.bf16 %v10644_v25, %v10640_v60  ;;  %v10603_v44 = vmul.f32 %v10578_v8, %v10504_v43  ;;  %v10506_v28 = vpop.f32.mrb[97].mxu0  ;;  %v18364_v25 = vld [vmem:[#allocation50 + $0x600] ss:$16 sps:$4 sm:$0xff]  }
0x126f   : > { %v10677_v30 = vpack.c.bf16 %v10645_v56, %v10641_v2  ;;  %v10604_v36 = vmul.f32 %v10582_v53, %v10506_v28  ;;  %v10508_v16 = vpop.f32.mrb[98].mxu0  ;;  %v10767_v53 = vld [vmem:[#allocation2 + $0x28] sm:$0xf]  ;;  %v18367_v28 = vld [vmem:[#allocation50 + $0x620] ss:$16 sps:$4 sm:$0xff]  }
0x1270   : > { %v10685_v29 = vshrl.u32 %v10676_v42, 16  ;;  %v10636_v45 = vadd.f32 %v10611_v35, %v10603_v44  ;;  %v10509_v34 = vpop.f32.mrb[99].mxu0  ;;  %v10688_v21 = vshll.u32 %v10676_v42, 16  ;;  %v18369_v42 = vld [vmem:[#allocation50 + $0x624] ss:$16 sps:$4 sm:$0xff]  }
0x1271   : > { %v10692_v48 = vshrl.u32 %v10677_v30, 16  ;;  %v10637_v49 = vadd.f32 %v10615_v4, %v10604_v36  ;;  %v10695_v50 = vshll.u32 %v10677_v30, 16  ;;  %v18372_v30 = vld [vmem:[#allocation50 + $0x644] ss:$16 sps:$4 sm:$0xff]   ;;  %v18370_v16 = vld [vmem:[#allocation50 + $0x640] ss:$16 sps:$4 sm:$0xff]  }
0x1272   : > { %v10687_v32 = vrot.slane %v10685_v29, 7  ;;  %v10648_v40 = vmax.f32 %v10636_v45, 0.0  ;;  %v18375_v45 = vld [vmem:[#allocation50 + $0x664] ss:$16 sps:$4 sm:$0xff]   ;;  %v18373_v34 = vld [vmem:[#allocation50 + $0x660] ss:$16 sps:$4 sm:$0xff]  }
0x1273   : > { %v10694_v47 = vrot.slane %v10692_v48, 7  ;;  %v10649_v52 = vmax.f32 %v10637_v49, 0.0  ;;  %v18378_v48 = vld [vmem:[#allocation50 + $0x684] ss:$16 sps:$4 sm:$0xff]   ;;  %v18376_v49 = vld [vmem:[#allocation50 + $0x680] ss:$16 sps:$4 sm:$0xff]  }
0x1274   : > { %v10690_v37 = vor.u32 %v10688_v21, %v10687_v32  ;;  %v10680_v54 = vpack.c.bf16 %v10648_v40, %v10648_v40  ;;  %v18379_v21 = vld [vmem:[#allocation50 + $0x6a0] ss:$16 sps:$4 sm:$0xff]   ;;  %v21627_v40 = vsub.s32 2, %v21086_v27 }
0x1275   : > { %v10697_v24 = vor.u32 %v10695_v50, %v10694_v47  ;;  %v10681_v39 = vpack.c.bf16 %v10649_v52, %v10649_v52  ;;  %v21630_v50 = vsub.s32 3, %v21086_v27  ;;  %v18382_v52 = vld [vmem:[#allocation50 + $0x6c0] ss:$16 sps:$4 sm:$0xff]  }
0x1276   : > { %v21594_v14 = vsel %vm21007_vm14, %v10690_v37, %v10752_v57  ;;  %v10713_v59 = vshrl.u32 %v10680_v54, 16  ;;  %v10716_v62 = vshll.u32 %v10680_v54, 16  ;;  %v10586_v37 = vrot.slane %v21580_v22, %v21627_v40  ;;  %v18387_v57 = vld [vmem:[#allocation50 + $0x6e4] ss:$16 sps:$4 sm:$0xff]  }
0x1277   : > { %10754 = vst [vmem:[#allocation2] sm:$0xff] %v21594_v14  ;;  %v21599_v33 = vsel %vm21007_vm14, %v10697_v24, %v10755_v58  ;;  %v10721_v61 = vshrl.u32 %v10681_v39, 16  ;;  %v10724_v18 = vshll.u32 %v10681_v39, 16  ;;  %v11050_v4 = vshll.u32 %v21594_v14, 16 }
0x1278   : > { %10757 = vst [vmem:[#allocation2 + $0x8] sm:$0xff] %v21599_v33  ;;  %v10715_v3 = vrot.slane %v10713_v59, 7  ;;  %v11062_v10 = vshll.u32 %v21599_v33, 16  ;;  %v11060_v13 = vshrl.u32 %v21599_v33, 16  ;;  %v11048_v0 = vshrl.u32 %v21594_v14, 16 }
0x1279   : > { %v10723_v6 = vrot.slane %v10721_v61, 7  ;;  %v11052_v11 = vrot.slane %v11050_v4, 1  ;;  %v10590_v54 = vrot.slane %v21580_v22, %v21630_v50  ;;  %v10619_v24 = vrot.slane %v21582_v63, %v21627_v40  ;;  %v18385_v61 = vld [vmem:[#allocation50 + $0x6e0] ss:$16 sps:$4 sm:$0xff]  }
0x127a   : > { %v10718_v1 = vor.u32 %v10716_v62, %v10715_v3  ;;  %v11064_v38 = vrot.slane %v11062_v10, 1  ;;  %v10623_v58 = vrot.slane %v21582_v63, %v21630_v50 }
0x127b   : > { %v10726_v5 = vor.u32 %v10724_v18, %v10723_v6  ;;  %v11053_v2 = vor.u32 %v11052_v11, %v11048_v0  ;;  %v18390_v6 = vld [vmem:[#allocation50 + $0x704] ss:$16 sps:$4 sm:$0xff]  }
0x127c   : > { %v10719_v51 = vsel %vm2668_vm3, %v10687_v32, %v10718_v1  ;;  %v11065_v41 = vor.u32 %v11064_v38, %v11060_v13  ;;  %v18381_v32 = vld [vmem:[#allocation50 + $0x6a4] ss:$16 sps:$4 sm:$0xff]  }
0x127d   : > { %v10765_v26 = vsel %vm21179_vm0, %v10719_v51, %v10764_v9  ;;  %v10727_v8 = vsel %vm2668_vm3, %v10694_v47, %v10726_v5  ;;  %v18384_v47 = vld [vmem:[#allocation50 + $0x6c4] ss:$16 sps:$4 sm:$0xff]  }
0x127e   : > { %10766 = vst [vmem:[#allocation2 + $0x20] sm:$0xf] %v10765_v26  ;;  %v10768_v35 = vsel %vm21179_vm0, %v10727_v8, %v10767_v53  ;;  %v18388_v26 = vld [vmem:[#allocation50 + $0x700] ss:$16 sps:$4 sm:$0xff]   ;;  %v18393_v53 = vld [vmem:[#allocation50 + $0x724] ss:$16 sps:$4 sm:$0xff]  }
0x127f   : > { %10769 = vst [vmem:[#allocation2 + $0x28] sm:$0xf] %v10768_v35 }
0x1285   : > { %v10914_v7 = vld [vmem:[#allocation2 + $0x20] sm:$0xf] }
0x1286   : > { %v10915_v19 = vld [vmem:[#allocation2 + $0x28] sm:$0xf]  ;;  %v11055_v12 = vshll.u32 %v10914_v7, 16  ;;  %v11095_v36 = vshrl.u32 %v10914_v7, 16 }
0x1287   : > { %v11067_v17 = vshll.u32 %v10915_v19, 16  ;;  %v11098_v60 = vshrl.u32 %v10915_v19, 16 }
0x1288   : > { %v11057_v31 = vrot.slane %v11055_v12, 1  ;;  %v18391_v12 = vld [vmem:[#allocation50 + $0x720] ss:$16 sps:$4 sm:$0xff]  }
0x1289   : > { %v11069_v55 = vrot.slane %v11067_v17, 1 }
0x128a   : > { %v21619_v44 = vsel %vm1692_vm1, %v11053_v2, %v11057_v31  ;;  %v21623_v29 = vor.u32 %v11095_v36, %v11057_v31  ;;  %v18396_v31 = vld [vmem:[#allocation50 + $0x744] ss:$16 sps:$4 sm:$0xff]   ;;  %v18394_v36 = vld [vmem:[#allocation50 + $0x740] ss:$16 sps:$4 sm:$0xff]  }
0x128b   : > { %v21613_v56 = vsel %vm1692_vm1, %v11065_v41, %v11069_v55  ;;  %v21615_v43 = vor.u32 %v11098_v60, %v11069_v55 }
0x128c   : > { %11787 = vmatprep.mubr.bf16.mxu1 %v21613_v56 }
0x128d   : > { %11788 = vmatmul.mubr.bf16.vlgmr.msra.gmra.mrb[32].mxu1 %v21619_v44 }
0x128e   : > { %11807 = vmatpush1.bf16.msra.mxu1 %v18364_v25  ;;  %11797 = vmatprep.mubr.bf16.mxu1 %v21615_v43 }
0x128f   : > { %11808 = vmatprep.subr.bf16.mxu1 %v18369_v42 }
0x1292   : > { %11809 = vmatpush1.bf16.msra.mxu1 %v18367_v28 }
0x1293   : > { %11810 = vmatprep.subr.bf16.mxu1 %v18372_v30 }
0x1295   : > { %11798 = vmatmul.mubr.bf16.gmra.mrb[36].mxu1 %v21623_v29 }
0x1296   : > { %11811 = vmatpush1.bf16.msra.mxu1 %v18370_v16  ;;  %v10758_v16 = vld [vmem:[#allocation2 + $0x10] sm:$0xff] }
0x1297   : > { %11812 = vmatprep.subr.bf16.mxu1 %v18375_v45 }
0x129a   : > { %11813 = vmatpush1.bf16.msra.mxu1 %v18373_v34 }
0x129b   : > { %11814 = vmatprep.subr.bf16.mxu1 %v18378_v48 }
0x129e   : > { %11815 = vmatpush1.bf16.msra.mxu1 %v18376_v49  ;;  %v18399_v49 = vld [vmem:[#allocation50 + $0x764] ss:$16 sps:$4 sm:$0xff]  }
0x129f   : > { %11816 = vmatprep.subr.bf16.mxu1 %v18381_v32 }
0x12a2   : > { %11817 = vmatpush1.bf16.msra.mxu1 %v18379_v21  ;;  %v10761_v21 = vld [vmem:[#allocation2 + $0x18] sm:$0xff] }
0x12a3   : > { %11818 = vmatprep.subr.bf16.mxu1 %v18384_v47 }
0x12a5   : > { %v10545_v39 = vpop.f32.mrb[100].mxu0 }
0x12a6   : > { %v10597_v59 = vmul.f32 %v10586_v37, %v10545_v39  ;;  %11819 = vmatpush1.bf16.msra.mxu1 %v18382_v52  ;;  %v10547_v27 = vpop.f32.mrb[101].mxu0 }
0x12a7   : > { %v10598_v3 = vmul.f32 %v10590_v54, %v10547_v27  ;;  %v10549_v62 = vpop.f32.mrb[102].mxu0  ;;  %11820 = vmatprep.subr.bf16.mxu1 %v18387_v57 }
0x12a8   : > { %v10630_v18 = vadd.f32 %v10619_v24, %v10597_v59  ;;  %v10601_v1 = vmul.f32 %v10586_v37, %v10549_v62  ;;  %v10551_v5 = vpop.f32.mrb[103].mxu0  ;;  %v18402_v59 = vld [vmem:[#allocation50 + $0x784] ss:$16 sps:$4 sm:$0xff]  }
0x12a9   : > { %v10631_v22 = vadd.f32 %v10623_v58, %v10598_v3  ;;  %v10602_v51 = vmul.f32 %v10590_v54, %v10551_v5 }
0x12aa   : > { %v10634_v9 = vadd.f32 %v10619_v24, %v10601_v1  ;;  %11821 = vmatpush1.bf16.msra.mxu1 %v18385_v61  ;;  %v10642_v63 = vmax.f32 %v10630_v18, 0.0  ;;  %v10770_v18 = vld [vmem:[#allocation2 + $0x30] sm:$0xf]  ;;  %v18400_v1 = vld [vmem:[#allocation50 + $0x780] ss:$16 sps:$4 sm:$0xff]  }
0x12ab   : > { %v10635_v8 = vadd.f32 %v10623_v58, %v10602_v51  ;;  %11822 = vmatprep.subr.bf16.mxu1 %v18390_v6  ;;  %v10643_v10 = vmax.f32 %v10631_v22, 0.0  ;;  %v10773_v22 = vld [vmem:[#allocation2 + $0x38] sm:$0xf]  ;;  %v18405_v51 = vld [vmem:[#allocation50 + $0x7a4] ss:$16 sps:$4 sm:$0xff]  }
0x12ac   : > { %v10646_v35 = vmax.f32 %v10634_v9, 0.0 }
0x12ad   : > { %v10647_v4 = vmax.f32 %v10635_v8, 0.0  ;;  %v10555_v38 = vpop.f32.mrb[104].mxu0 }
0x12ae   : > { %v10678_v7 = vpack.c.bf16 %v10646_v35, %v10642_v63  ;;  %v10605_v19 = vmul.f32 %v10586_v37, %v10555_v38  ;;  %11823 = vmatpush1.bf16.msra.mxu1 %v18388_v26  ;;  %v10557_v11 = vpop.f32.mrb[105].mxu0  ;;  %v18408_v63 = vld [vmem:[#allocation50 + $0x7c4] ss:$16 sps:$4 sm:$0xff]  }
0x12af   : > { %v10679_v13 = vpack.c.bf16 %v10647_v4, %v10643_v10  ;;  %v10606_v17 = vmul.f32 %v10590_v54, %v10557_v11  ;;  %v10559_v0 = vpop.f32.mrb[106].mxu0  ;;  %11824 = vmatprep.subr.bf16.mxu1 %v18393_v53  ;;  %v18403_v53 = vld [vmem:[#allocation50 + $0x7a0] ss:$16 sps:$4 sm:$0xff]   ;;  %v18411_v38 = vld [vmem:[#allocation50 + $0x7e4] ss:$16 sps:$4 sm:$0xff]  }
0x12b0   : > { %v10699_v41 = vshrl.u32 %v10678_v7, 16  ;;  %v10638_v55 = vadd.f32 %v10619_v24, %v10605_v19  ;;  %v10560_v60 = vpop.f32.mrb[107].mxu0  ;;  %v10702_v28 = vshll.u32 %v10678_v7, 16  ;;  %v18397_v24 = vld [vmem:[#allocation50 + $0x760] ss:$16 sps:$4 sm:$0xff]  }
0x12b1   : > { %v10706_v25 = vshrl.u32 %v10679_v13, 16  ;;  %v10639_v2 = vadd.f32 %v10623_v58, %v10606_v17  ;;  %v10709_v34 = vshll.u32 %v10679_v13, 16  ;;  %v18406_v10 = vld [vmem:[#allocation50 + $0x7c0] ss:$16 sps:$4 sm:$0xff]  }
0x12b2   : > { %v10701_v42 = vrot.slane %v10699_v41, 7  ;;  %v10650_v30 = vmax.f32 %v10638_v55, 0.0  ;;  %11825 = vmatpush1.bf16.msra.mxu1 %v18391_v12  ;;  %v18409_v11 = vld [vmem:[#allocation50 + $0x7e0] ss:$16 sps:$4 sm:$0xff]  }
0x12b3   : > { %v10708_v45 = vrot.slane %v10706_v25, 7  ;;  %v10651_v48 = vmax.f32 %v10639_v2, 0.0  ;;  %11826 = vmatprep.subr.bf16.mxu1 %v18396_v31  ;;  %v18414_v31 = vld [vmem:[#allocation50 + $0x40c] ss:$16 sps:$4 sm:$0xff]  }
0x12b4   : > { %v10704_v32 = vor.u32 %v10702_v28, %v10701_v42  ;;  %v10682_v47 = vpack.c.bf16 %v10650_v30, %v10650_v30 }
0x12b5   : > { %v10711_v52 = vor.u32 %v10709_v34, %v10708_v45  ;;  %v10683_v37 = vpack.c.bf16 %v10651_v48, %v10651_v48  ;;  %v18415_v34 = vld [vmem:[#allocation50 + $0x428] ss:$16 sps:$4 sm:$0xff]   ;;  %v18420_v48 = vld [vmem:[#allocation50 + $0x44c] ss:$16 sps:$4 sm:$0xff]  }
0x12b6   : > { %v21642_v54 = vsel %vm21007_vm14, %v10704_v32, %v10758_v16  ;;  %v10729_v57 = vshrl.u32 %v10682_v47, 16  ;;  %11827 = vmatpush1.bf16.msra.mxu1 %v18394_v36  ;;  %v10732_v61 = vshll.u32 %v10682_v47, 16  ;;  %v18417_v16 = vld [vmem:[#allocation50 + $0x42c] ss:$16 sps:$4 sm:$0xff]   ;;  %v18418_v32 = vld [vmem:[#allocation50 + $0x448] ss:$16 sps:$4 sm:$0xff]  }
0x12b7   : > { %10760 = vst [vmem:[#allocation2 + $0x10] sm:$0xff] %v21642_v54  ;;  %v21647_v39 = vsel %vm21007_vm14, %v10711_v52, %v10761_v21  ;;  %v10737_v58 = vshrl.u32 %v10683_v37, 16  ;;  %11828 = vmatprep.subr.bf16.mxu1 %v18399_v49  ;;  %v10740_v62 = vshll.u32 %v10683_v37, 16  ;;  %v11074_v4 = vshll.u32 %v21642_v54, 16  ;;  %v18423_v47 = vld [vmem:[#allocation50 + $0x46c] ss:$16 sps:$4 sm:$0xff]  }
0x12b8   : > { %10763 = vst [vmem:[#allocation2 + $0x18] sm:$0xff] %v21647_v39  ;;  %v10731_v27 = vrot.slane %v10729_v57, 7  ;;  %v11086_v35 = vshll.u32 %v21647_v39, 16  ;;  %v11084_v17 = vshrl.u32 %v21647_v39, 16  ;;  %v11072_v41 = vshrl.u32 %v21642_v54, 16 }
0x12b9   : > { %v10739_v3 = vrot.slane %v10737_v58, 7  ;;  %v11076_v20 = vrot.slane %v11074_v4, 1  ;;  %v18421_v52 = vld [vmem:[#allocation50 + $0x468] ss:$16 sps:$4 sm:$0xff]   ;;  %v18426_v37 = vld [vmem:[#allocation50 + $0x48c] ss:$16 sps:$4 sm:$0xff]  }
0x12ba   : > { %v10734_v6 = vor.u32 %v10732_v61, %v10731_v27  ;;  %11829 = vmatpush1.bf16.msra.mxu1 %v18397_v24  ;;  %v11088_v7 = vrot.slane %v11086_v35, 1  ;;  %v18424_v57 = vld [vmem:[#allocation50 + $0x488] ss:$16 sps:$4 sm:$0xff]   ;;  %v18429_v24 = vld [vmem:[#allocation50 + $0x4ac] ss:$16 sps:$4 sm:$0xff]  }
0x12bb   : > { %v10742_v5 = vor.u32 %v10740_v62, %v10739_v3  ;;  %11830 = vmatprep.subr.bf16.mxu1 %v18402_v59  ;;  %v11077_v28 = vor.u32 %v11076_v20, %v11072_v41  ;;  %v18427_v58 = vld [vmem:[#allocation50 + $0x4a8] ss:$16 sps:$4 sm:$0xff]   ;;  %v18432_v59 = vld [vmem:[#allocation50 + $0x4cc] ss:$16 sps:$4 sm:$0xff]  }
0x12bc   : > { %v10735_v46 = vsel %vm2668_vm3, %v10701_v42, %v10734_v6  ;;  %v11089_v60 = vor.u32 %v11088_v7, %v11084_v17  ;;  %v18412_v42 = vld [vmem:[#allocation50 + $0x408] ss:$16 sps:$4 sm:$0xff]   ;;  %v18435_v61 = vld [vmem:[#allocation50 + $0x4ec] ss:$16 sps:$4 sm:$0xff]  }
0x12bd   : > { %v10771_v9 = vsel %vm21179_vm0, %v10735_v46, %v10770_v18  ;;  %v10743_v26 = vsel %vm2668_vm3, %v10708_v45, %v10742_v5  ;;  %v18430_v27 = vld [vmem:[#allocation50 + $0x4c8] ss:$16 sps:$4 sm:$0xff]   ;;  %v18438_v62 = vld [vmem:[#allocation50 + $0x50c] ss:$16 sps:$4 sm:$0xff]   ;;  %vm14276_vm3 = vcmask 401408  }
0x12be   : > { %10772 = vst [vmem:[#allocation2 + $0x30] sm:$0xf] %v10771_v9  ;;  %v10774_v8 = vsel %vm21179_vm0, %v10743_v26, %v10773_v22  ;;  %11831 = vmatpush1.bf16.msra.mxu1 %v18400_v1  ;;  %v18433_v3 = vld [vmem:[#allocation50 + $0x4e8] ss:$16 sps:$4 sm:$0xff]   ;;  %v18441_v6 = vld [vmem:[#allocation50 + $0x52c] ss:$16 sps:$4 sm:$0xff]  }
0x12bf   : > { %10775 = vst [vmem:[#allocation2 + $0x38] sm:$0xf] %v10774_v8  ;;  %11832 = vmatprep.subr.bf16.mxu1 %v18405_v51  ;;  %v18439_v18 = vld [vmem:[#allocation50 + $0x528] ss:$16 sps:$4 sm:$0xff]   ;;  %v18444_v1 = vld [vmem:[#allocation50 + $0x54c] ss:$16 sps:$4 sm:$0xff]  }
0x12c0   : > { %v18442_v5 = vld [vmem:[#allocation50 + $0x548] ss:$16 sps:$4 sm:$0xff]   ;;  %v18447_v22 = vld [vmem:[#allocation50 + $0x56c] ss:$16 sps:$4 sm:$0xff]  }
0x12c1   : > { %v18445_v51 = vld [vmem:[#allocation50 + $0x568] ss:$16 sps:$4 sm:$0xff]   ;;  %v18450_v46 = vld [vmem:[#allocation50 + $0x58c] ss:$16 sps:$4 sm:$0xff]  }
0x12c2   : > { %11833 = vmatpush1.bf16.msra.mxu1 %v18403_v53  ;;  %v18448_v9 = vld [vmem:[#allocation50 + $0x588] ss:$16 sps:$4 sm:$0xff]   ;;  %v18453_v26 = vld [vmem:[#allocation50 + $0x5ac] ss:$16 sps:$4 sm:$0xff]  }
0x12c3   : > { %11834 = vmatprep.subr.bf16.mxu1 %v18408_v63  ;;  %v18451_v8 = vld [vmem:[#allocation50 + $0x5a8] ss:$16 sps:$4 sm:$0xff]   ;;  %v18456_v53 = vld [vmem:[#allocation50 + $0x5cc] ss:$16 sps:$4 sm:$0xff]  }
0x12c4   : > { %v18454_v63 = vld [vmem:[#allocation50 + $0x5c8] ss:$16 sps:$4 sm:$0xff]   ;;  %v18459_v35 = vld [vmem:[#allocation50 + $0x5ec] ss:$16 sps:$4 sm:$0xff]  }
0x12c5   : > { %v10916_v19 = vld [vmem:[#allocation2 + $0x30] sm:$0xf]  ;;  %v18462_v4 = vld [vmem:[#allocation50 + $0x60c] ss:$16 sps:$4 sm:$0xff]   ;;  %v18478_v41 = vld [vmem:[#allocation50 + $0x6c8] ss:$16 sps:$4 sm:$0xff]  }
0x12c6   : > { %11835 = vmatpush1.bf16.msra.mxu1 %v18406_v10  ;;  %v10917_v12 = vld [vmem:[#allocation2 + $0x38] sm:$0xf]  ;;  %v11079_v13 = vshll.u32 %v10916_v19, 16  ;;  %v11101_v49 = vshrl.u32 %v10916_v19, 16  ;;  %v18457_v10 = vld [vmem:[#allocation50 + $0x5e8] ss:$16 sps:$4 sm:$0xff]  }
0x12c7   : > { %11836 = vmatprep.subr.bf16.mxu1 %v18411_v38  ;;  %v11091_v0 = vshll.u32 %v10917_v12, 16  ;;  %v11104_v2 = vshrl.u32 %v10917_v12, 16  ;;  %v18460_v38 = vld [vmem:[#allocation50 + $0x608] ss:$16 sps:$4 sm:$0xff]   ;;  %v18465_v7 = vld [vmem:[#allocation50 + $0x62c] ss:$16 sps:$4 sm:$0xff]  }
0x12c8   : > { %v11081_v55 = vrot.slane %v11079_v13, 1  ;;  %v18463_v19 = vld [vmem:[#allocation50 + $0x628] ss:$16 sps:$4 sm:$0xff]   ;;  %v18471_v20 = vld [vmem:[#allocation50 + $0x66c] ss:$16 sps:$4 sm:$0xff]  }
0x12c9   : > { %v11093_v25 = vrot.slane %v11091_v0, 1  ;;  %v18466_v12 = vld [vmem:[#allocation50 + $0x648] ss:$16 sps:$4 sm:$0xff]   ;;  %v18474_v17 = vld [vmem:[#allocation50 + $0x68c] ss:$16 sps:$4 sm:$0xff]  }
0x12ca   : > { %11837 = vmatpush1.bf16.msra.mxu1 %v18409_v11  ;;  %v21667_v45 = vsel %vm1692_vm1, %v11077_v28, %v11081_v55  ;;  %v21671_v21 = vor.u32 %v11101_v49, %v11081_v55  ;;  %v18468_v11 = vld [vmem:[#allocation50 + $0x64c] ss:$16 sps:$4 sm:$0xff]   ;;  %v18469_v13 = vld [vmem:[#allocation50 + $0x668] ss:$16 sps:$4 sm:$0xff]  }
0x12cb   : > { %v21661_v30 = vsel %vm1692_vm1, %v11089_v60, %v11093_v25  ;;  %11857 = vmatprep.subr.bf16.mxu1 %v18414_v31  ;;  %v21663_v36 = vor.u32 %v11104_v2, %v11093_v25  ;;  %v18475_v0 = vld [vmem:[#allocation50 + $0x6a8] ss:$16 sps:$4 sm:$0xff]   ;;  %v18480_v31 = vld [vmem:[#allocation50 + $0x6cc] ss:$16 sps:$4 sm:$0xff]   ;;  %vm13899_vm1 = vcmask 1045504  }
0x12cc   : > { %11838 = vmatprep.mubr.bf16.mxu1 %v21661_v30  ;;  %v18483_v55 = vld [vmem:[#allocation50 + $0x6ec] ss:$16 sps:$4 sm:$0xff]   ;;  %v18484_v25 = vld [vmem:[#allocation50 + $0x708] ss:$16 sps:$4 sm:$0xff]  }
0x12cd   : > { %11839 = vmatmul.mubr.bf16.vlgmr.msra.gmra.mrb[32].mxu1 %v21667_v45  ;;  %v18486_v60 = vld [vmem:[#allocation50 + $0x70c] ss:$16 sps:$4 sm:$0xff]   ;;  %v18496_v49 = vld [vmem:[#allocation50 + $0x788] ss:$16 sps:$4 sm:$0xff]  }
0x12ce   : > { %11858 = vmatpush1.bf16.msra.mxu1 %v18412_v42  ;;  %11848 = vmatprep.mubr.bf16.mxu1 %v21663_v36  ;;  %v18489_v2 = vld [vmem:[#allocation50 + $0x72c] ss:$16 sps:$4 sm:$0xff]   ;;  %v18487_v42 = vld [vmem:[#allocation50 + $0x728] ss:$16 sps:$4 sm:$0xff]  }
0x12cf   : > { %11859 = vmatprep.subr.bf16.mxu1 %v18417_v16  ;;  %v18492_v28 = vld [vmem:[#allocation50 + $0x74c] ss:$16 sps:$4 sm:$0xff]  }
0x12d0   : > { %v18495_v16 = vld [vmem:[#allocation50 + $0x76c] ss:$16 sps:$4 sm:$0xff]  }
0x12d2   : > { %11860 = vmatpush1.bf16.msra.mxu1 %v18415_v34  ;;  %v18493_v34 = vld [vmem:[#allocation50 + $0x768] ss:$16 sps:$4 sm:$0xff]  }
0x12d3   : > { %11861 = vmatprep.subr.bf16.mxu1 %v18420_v48  ;;  %v18498_v48 = vld [vmem:[#allocation50 + $0x78c] ss:$16 sps:$4 sm:$0xff]  }
0x12d5   : > { %11849 = vmatmul.mubr.bf16.gmra.mrb[36].mxu1 %v21671_v21 }
0x12d6   : > { %11862 = vmatpush1.bf16.msra.mxu1 %v18418_v32  ;;  %11889 = vmatprep.mubr.bf16.mxu1 %v21613_v56  ;;  %v18436_v56 = vld [vmem:[#allocation50 + $0x508] ss:$16 sps:$4 sm:$0xff]   ;;  %v18501_v32 = vld [vmem:[#allocation50 + $0x7ac] ss:$16 sps:$4 sm:$0xff]  }
0x12d7   : > { %11863 = vmatprep.subr.bf16.mxu1 %v18423_v47  ;;  %v18499_v47 = vld [vmem:[#allocation50 + $0x7a8] ss:$16 sps:$4 sm:$0xff]  }
0x12da   : > { %11864 = vmatpush1.bf16.msra.mxu1 %v18421_v52  ;;  %v18504_v52 = vld [vmem:[#allocation50 + $0x7cc] ss:$16 sps:$4 sm:$0xff]  }
0x12db   : > { %11865 = vmatprep.subr.bf16.mxu1 %v18426_v37  ;;  %v18502_v37 = vld [vmem:[#allocation50 + $0x7c8] ss:$16 sps:$4 sm:$0xff]  }
0x12de   : > { %11866 = vmatpush1.bf16.msra.mxu1 %v18424_v57  ;;  %v18507_v57 = vld [vmem:[#allocation50 + $0x7ec] ss:$16 sps:$4 sm:$0xff]  }
0x12df   : > { %11867 = vmatprep.subr.bf16.mxu1 %v18429_v24  ;;  %v18505_v24 = vld [vmem:[#allocation50 + $0x7e8] ss:$16 sps:$4 sm:$0xff]  }
0x12e2   : > { %11868 = vmatpush1.bf16.msra.mxu1 %v18427_v58  ;;  %v18510_v58 = vld [vmem:[#allocation50 + $0x4] ss:$16 sps:$4 sm:$0xff]  }
0x12e3   : > { %11869 = vmatprep.subr.bf16.mxu1 %v18432_v59  ;;  %v18508_v59 = vld [vmem:[#allocation50] ss:$16 sps:$4 sm:$0xff]  }
0x12e6   : > { %11870 = vmatpush1.bf16.msra.mxu1 %v18430_v27  ;;  %v18513_v27 = vld [vmem:[#allocation50 + $0x24] ss:$16 sps:$4 sm:$0xff]  }
0x12e7   : > { %11871 = vmatprep.subr.bf16.mxu1 %v18435_v61  ;;  %v18511_v61 = vld [vmem:[#allocation50 + $0x20] ss:$16 sps:$4 sm:$0xff]  }
0x12ea   : > { %11872 = vmatpush1.bf16.msra.mxu1 %v18433_v3  ;;  %v18516_v3 = vld [vmem:[#allocation50 + $0x44] ss:$16 sps:$4 sm:$0xff]  }
0x12eb   : > { %11873 = vmatprep.subr.bf16.mxu1 %v18438_v62  ;;  %v18514_v62 = vld [vmem:[#allocation50 + $0x40] ss:$16 sps:$4 sm:$0xff]  }
0x12ee   : > { %11874 = vmatpush1.bf16.msra.mxu1 %v18436_v56  ;;  %v18519_v56 = vld [vmem:[#allocation50 + $0x64] ss:$16 sps:$4 sm:$0xff]  }
0x12ef   : > { %11875 = vmatprep.subr.bf16.mxu1 %v18441_v6  ;;  %v18517_v6 = vld [vmem:[#allocation50 + $0x60] ss:$16 sps:$4 sm:$0xff]  }
0x12f2   : > { %11876 = vmatpush1.bf16.msra.mxu1 %v18439_v18  ;;  %v18522_v18 = vld [vmem:[#allocation50 + $0x84] ss:$16 sps:$4 sm:$0xff]  }
0x12f3   : > { %11877 = vmatprep.subr.bf16.mxu1 %v18444_v1  ;;  %v18523_v1 = vld [vmem:[#allocation50 + $0xa0] ss:$16 sps:$4 sm:$0xff]  }
0x12f6   : > { %11878 = vmatpush1.bf16.msra.mxu1 %v18442_v5  ;;  %v18528_v5 = vld [vmem:[#allocation50 + $0xc4] ss:$16 sps:$4 sm:$0xff]  }
0x12f7   : > { %11879 = vmatprep.subr.bf16.mxu1 %v18447_v22  ;;  %v18526_v22 = vld [vmem:[#allocation50 + $0xc0] ss:$16 sps:$4 sm:$0xff]  }
0x12fa   : > { %11880 = vmatpush1.bf16.msra.mxu1 %v18445_v51  ;;  %v18531_v51 = vld [vmem:[#allocation50 + $0xe4] ss:$16 sps:$4 sm:$0xff]  }
0x12fb   : > { %11881 = vmatprep.subr.bf16.mxu1 %v18450_v46  ;;  %v18534_v46 = vld [vmem:[#allocation50 + $0x104] ss:$16 sps:$4 sm:$0xff]  }
0x12fe   : > { %11882 = vmatpush1.bf16.msra.mxu1 %v18448_v9  ;;  %v18532_v9 = vld [vmem:[#allocation50 + $0x100] ss:$16 sps:$4 sm:$0xff]  }
0x12ff   : > { %11883 = vmatprep.subr.bf16.mxu1 %v18453_v26  ;;  %v18537_v26 = vld [vmem:[#allocation50 + $0x124] ss:$16 sps:$4 sm:$0xff]  }
0x1302   : > { %11884 = vmatpush1.bf16.msra.mxu1 %v18451_v8  ;;  %v18535_v8 = vld [vmem:[#allocation50 + $0x120] ss:$16 sps:$4 sm:$0xff]  }
0x1303   : > { %11885 = vmatprep.subr.bf16.mxu1 %v18456_v53  ;;  %v18540_v53 = vld [vmem:[#allocation50 + $0x144] ss:$16 sps:$4 sm:$0xff]  }
0x1306   : > { %11886 = vmatpush1.bf16.msra.mxu1 %v18454_v63  ;;  %v18538_v63 = vld [vmem:[#allocation50 + $0x140] ss:$16 sps:$4 sm:$0xff]  }
0x1307   : > { %11887 = vmatprep.subr.bf16.mxu1 %v18459_v35  ;;  %v18543_v35 = vld [vmem:[#allocation50 + $0x164] ss:$16 sps:$4 sm:$0xff]  }
0x130a   : > { %11888 = vmatpush1.bf16.msra.mxu1 %v18457_v10  ;;  %v18541_v10 = vld [vmem:[#allocation50 + $0x160] ss:$16 sps:$4 sm:$0xff]  }
0x130b   : > { %11908 = vmatprep.subr.bf16.mxu1 %v18462_v4  ;;  %v18546_v4 = vld [vmem:[#allocation50 + $0x184] ss:$16 sps:$4 sm:$0xff]  }
0x130d   : > { %11890 = vmatmul.mubr.bf16.vlgmr.msra.gmra.mrb[40].mxu1 %v21619_v44  ;;  %v18472_v44 = vld [vmem:[#allocation50 + $0x688] ss:$16 sps:$4 sm:$0xff]  }
0x130e   : > { %11899 = vmatprep.mubr.bf16.mxu1 %v21615_v43  ;;  %11909 = vmatpush1.bf16.msra.mxu1 %v18460_v38  ;;  %v18477_v43 = vld [vmem:[#allocation50 + $0x6ac] ss:$16 sps:$4 sm:$0xff]   ;;  %v18544_v38 = vld [vmem:[#allocation50 + $0x180] ss:$16 sps:$4 sm:$0xff]  }
0x130f   : > { %11910 = vmatprep.subr.bf16.mxu1 %v18465_v7  ;;  %v18549_v7 = vld [vmem:[#allocation50 + $0x1a4] ss:$16 sps:$4 sm:$0xff]  }
0x1312   : > { %11911 = vmatpush1.bf16.msra.mxu1 %v18463_v19  ;;  %v18547_v19 = vld [vmem:[#allocation50 + $0x1a0] ss:$16 sps:$4 sm:$0xff]  }
0x1313   : > { %11912 = vmatprep.subr.bf16.mxu1 %v18468_v11  ;;  %v18552_v11 = vld [vmem:[#allocation50 + $0x1c4] ss:$16 sps:$4 sm:$0xff]  }
0x1315   : > { %11900 = vmatmul.mubr.bf16.gmra.mrb[44].mxu1 %v21623_v29  ;;  %v18481_v29 = vld [vmem:[#allocation50 + $0x6e8] ss:$16 sps:$4 sm:$0xff]  }
0x1316   : > { %11913 = vmatpush1.bf16.msra.mxu1 %v18466_v12  ;;  %11940 = vmatprep.mubr.bf16.mxu1 %v21661_v30  ;;  %v18490_v30 = vld [vmem:[#allocation50 + $0x748] ss:$16 sps:$4 sm:$0xff]   ;;  %v18550_v12 = vld [vmem:[#allocation50 + $0x1c0] ss:$16 sps:$4 sm:$0xff]  }
0x1317   : > { %11914 = vmatprep.subr.bf16.mxu1 %v18471_v20  ;;  %v18555_v20 = vld [vmem:[#allocation50 + $0x1e4] ss:$16 sps:$4 sm:$0xff]  }
0x131a   : > { %11915 = vmatpush1.bf16.msra.mxu1 %v18469_v13  ;;  %v18553_v13 = vld [vmem:[#allocation50 + $0x1e0] ss:$16 sps:$4 sm:$0xff]  }
0x131b   : > { %11916 = vmatprep.subr.bf16.mxu1 %v18474_v17  ;;  %v18558_v17 = vld [vmem:[#allocation50 + $0x204] ss:$16 sps:$4 sm:$0xff]  }
0x131e   : > { %11917 = vmatpush1.bf16.msra.mxu1 %v18472_v44  ;;  %v18556_v44 = vld [vmem:[#allocation50 + $0x200] ss:$16 sps:$4 sm:$0xff]  }
0x131f   : > { %11918 = vmatprep.subr.bf16.mxu1 %v18477_v43  ;;  %v18561_v43 = vld [vmem:[#allocation50 + $0x224] ss:$16 sps:$4 sm:$0xff]  }
0x1322   : > { %11919 = vmatpush1.bf16.msra.mxu1 %v18475_v0  ;;  %v21684_v0 = vld [vmem:[#allocation2 + $0x28] sm:$0x7] }
0x1323   : > { %11920 = vmatprep.subr.bf16.mxu1 %v18480_v31  ;;  %v18559_v31 = vld [vmem:[#allocation50 + $0x220] ss:$16 sps:$4 sm:$0xff]  }
0x1326   : > { %11921 = vmatpush1.bf16.msra.mxu1 %v18478_v41  ;;  %v18564_v41 = vld [vmem:[#allocation50 + $0x244] ss:$16 sps:$4 sm:$0xff]  }
0x1327   : > { %11922 = vmatprep.subr.bf16.mxu1 %v18483_v55  ;;  %v18562_v55 = vld [vmem:[#allocation50 + $0x240] ss:$16 sps:$4 sm:$0xff]  }
0x132a   : > { %11923 = vmatpush1.bf16.msra.mxu1 %v18481_v29  ;;  %v18567_v29 = vld [vmem:[#allocation50 + $0x264] ss:$16 sps:$4 sm:$0xff]  }
0x132b   : > { %11924 = vmatprep.subr.bf16.mxu1 %v18486_v60  ;;  %v21687_v60 = vld [vmem:[#allocation2 + $0x20] sm:$0x7] }
0x132e   : > { %11925 = vmatpush1.bf16.msra.mxu1 %v18484_v25  ;;  %v18570_v25 = vld [vmem:[#allocation50 + $0x284] ss:$16 sps:$4 sm:$0xff]  }
0x132f   : > { %11926 = vmatprep.subr.bf16.mxu1 %v18489_v2  ;;  %v18568_v2 = vld [vmem:[#allocation50 + $0x280] ss:$16 sps:$4 sm:$0xff]  }
0x1332   : > { %11927 = vmatpush1.bf16.msra.mxu1 %v18487_v42  ;;  %v18573_v42 = vld [vmem:[#allocation50 + $0x2a4] ss:$16 sps:$4 sm:$0xff]  }
0x1333   : > { %11928 = vmatprep.subr.bf16.mxu1 %v18492_v28  ;;  %v18571_v28 = vld [vmem:[#allocation50 + $0x2a0] ss:$16 sps:$4 sm:$0xff]  }
0x1336   : > { %11929 = vmatpush1.bf16.msra.mxu1 %v18490_v30  ;;  %v18576_v30 = vld [vmem:[#allocation50 + $0x2c4] ss:$16 sps:$4 sm:$0xff]  }
0x1337   : > { %11930 = vmatprep.subr.bf16.mxu1 %v18495_v16  ;;  %v18574_v16 = vld [vmem:[#allocation50 + $0x2c0] ss:$16 sps:$4 sm:$0xff]  }
0x133a   : > { %11931 = vmatpush1.bf16.msra.mxu1 %v18493_v34  ;;  %v18579_v34 = vld [vmem:[#allocation50 + $0x2e4] ss:$16 sps:$4 sm:$0xff]  }
0x133b   : > { %11932 = vmatprep.subr.bf16.mxu1 %v18498_v48  ;;  %v18577_v48 = vld [vmem:[#allocation50 + $0x2e0] ss:$16 sps:$4 sm:$0xff]  }
0x133e   : > { %11933 = vmatpush1.bf16.msra.mxu1 %v18496_v49  ;;  %v18582_v49 = vld [vmem:[#allocation50 + $0x304] ss:$16 sps:$4 sm:$0xff]  }
0x133f   : > { %11934 = vmatprep.subr.bf16.mxu1 %v18501_v32  ;;  %v18580_v32 = vld [vmem:[#allocation50 + $0x300] ss:$16 sps:$4 sm:$0xff]  }
0x1342   : > { %11935 = vmatpush1.bf16.msra.mxu1 %v18499_v47  ;;  %v18585_v47 = vld [vmem:[#allocation50 + $0x324] ss:$16 sps:$4 sm:$0xff]  }
0x1343   : > { %11936 = vmatprep.subr.bf16.mxu1 %v18504_v52  ;;  %v18583_v52 = vld [vmem:[#allocation50 + $0x320] ss:$16 sps:$4 sm:$0xff]  }
0x1346   : > { %11937 = vmatpush1.bf16.msra.mxu1 %v18502_v37  ;;  %v18588_v37 = vld [vmem:[#allocation50 + $0x344] ss:$16 sps:$4 sm:$0xff]  }
0x1347   : > { %11938 = vmatprep.subr.bf16.mxu1 %v18507_v57  ;;  %v18586_v57 = vld [vmem:[#allocation50 + $0x340] ss:$16 sps:$4 sm:$0xff]  }
0x134a   : > { %11939 = vmatpush1.bf16.msra.mxu1 %v18505_v24  ;;  %v18591_v24 = vld [vmem:[#allocation50 + $0x364] ss:$16 sps:$4 sm:$0xff]  }
0x134b   : > { %12599 = vmatprep.subr.bf16.mxu1 %v18510_v58  ;;  %v18589_v58 = vld [vmem:[#allocation50 + $0x360] ss:$16 sps:$4 sm:$0xff]  }
0x134d   : > { %11941 = vmatmul.mubr.bf16.vlgmr.msra.gmra.mrb[40].mxu1 %v21667_v45  ;;  %v18520_v45 = vld [vmem:[#allocation50 + $0x80] ss:$16 sps:$4 sm:$0xff]  }
0x134e   : > { %11950 = vmatprep.mubr.bf16.mxu1 %v21663_v36  ;;  %12600 = vmatpush1.bf16.msra.mxu1 %v18508_v59  ;;  %v18525_v36 = vld [vmem:[#allocation50 + $0xa4] ss:$16 sps:$4 sm:$0xff]  }
0x134f   : > { %12601 = vmatprep.subr.bf16.mxu1 %v18513_v27  ;;  %v18594_v59 = vld [vmem:[#allocation50 + $0x384] ss:$16 sps:$4 sm:$0xff]   ;;  %v18592_v27 = vld [vmem:[#allocation50 + $0x380] ss:$16 sps:$4 sm:$0xff]  }
0x1352   : > { %12602 = vmatpush1.bf16.msra.mxu1 %v18511_v61  ;;  %v18597_v61 = vld [vmem:[#allocation50 + $0x3a4] ss:$16 sps:$4 sm:$0xff]  }
0x1353   : > { %12603 = vmatprep.subr.bf16.mxu1 %v18516_v3  ;;  %v18595_v3 = vld [vmem:[#allocation50 + $0x3a0] ss:$16 sps:$4 sm:$0xff]  }
0x1355   : > { %11951 = vmatmul.mubr.bf16.gmra.mrb[44].mxu1 %v21671_v21  ;;  %v18529_v21 = vld [vmem:[#allocation50 + $0xe0] ss:$16 sps:$4 sm:$0xff]  }
0x1356   : > { %12604 = vmatpush1.bf16.msra.mxu1 %v18514_v62  ;;  %12631 = vmatprep.mubr.bf16.mxu1 %v21599_v33  ;;  %v18600_v62 = vld [vmem:[#allocation50 + $0x3c4] ss:$16 sps:$4 sm:$0xff]  }
0x1357   : > { %12605 = vmatprep.subr.bf16.mxu1 %v18519_v56  ;;  %v18598_v56 = vld [vmem:[#allocation50 + $0x3c0] ss:$16 sps:$4 sm:$0xff]  }
0x135a   : > { %12606 = vmatpush1.bf16.msra.mxu1 %v18517_v6  ;;  %v18603_v6 = vld [vmem:[#allocation50 + $0x3e4] ss:$16 sps:$4 sm:$0xff]  }
0x135b   : > { %12607 = vmatprep.subr.bf16.mxu1 %v18522_v18  ;;  %v18601_v18 = vld [vmem:[#allocation50 + $0x3e0] ss:$16 sps:$4 sm:$0xff]  }
0x135e   : > { %12608 = vmatpush1.bf16.msra.mxu1 %v18520_v45  ;;  %v18606_v45 = vld [vmem:[#allocation50 + $0xc] ss:$16 sps:$4 sm:$0xff]  }
0x135f   : > { %12609 = vmatprep.subr.bf16.mxu1 %v18525_v36  ;;  %v18604_v36 = vld [vmem:[#allocation50 + $0x8] ss:$16 sps:$4 sm:$0xff]  }
0x1362   : > { %12610 = vmatpush1.bf16.msra.mxu1 %v18523_v1  ;;  %v18609_v1 = vld [vmem:[#allocation50 + $0x2c] ss:$16 sps:$4 sm:$0xff]  }
0x1363   : > { %12611 = vmatprep.subr.bf16.mxu1 %v18528_v5  ;;  %v21692_v5 = vld [vmem:[#allocation2 + $0x38] sm:$0x7] }
0x1366   : > { %12612 = vmatpush1.bf16.msra.mxu1 %v18526_v22  ;;  %v18607_v22 = vld [vmem:[#allocation50 + $0x28] ss:$16 sps:$4 sm:$0xff]  }
0x1367   : > { %12613 = vmatprep.subr.bf16.mxu1 %v18531_v51  ;;  %v18612_v51 = vld [vmem:[#allocation50 + $0x4c] ss:$16 sps:$4 sm:$0xff]  }
0x136a   : > { %12614 = vmatpush1.bf16.msra.mxu1 %v18529_v21  ;;  %v18610_v21 = vld [vmem:[#allocation50 + $0x48] ss:$16 sps:$4 sm:$0xff]  }
0x136b   : > { %12615 = vmatprep.subr.bf16.mxu1 %v18534_v46  ;;  %v18615_v46 = vld [vmem:[#allocation50 + $0x6c] ss:$16 sps:$4 sm:$0xff]  }
0x136e   : > { %12616 = vmatpush1.bf16.msra.mxu1 %v18532_v9  ;;  %v21695_v9 = vld [vmem:[#allocation2 + $0x30] sm:$0x7] }
0x136f   : > { %12617 = vmatprep.subr.bf16.mxu1 %v18537_v26  ;;  %v18613_v26 = vld [vmem:[#allocation50 + $0x68] ss:$16 sps:$4 sm:$0xff]  }
0x1372   : > { %12618 = vmatpush1.bf16.msra.mxu1 %v18535_v8  ;;  %v18618_v8 = vld [vmem:[#allocation50 + $0x8c] ss:$16 sps:$4 sm:$0xff]  }
0x1373   : > { %12619 = vmatprep.subr.bf16.mxu1 %v18540_v53  ;;  %v18616_v53 = vld [vmem:[#allocation50 + $0x88] ss:$16 sps:$4 sm:$0xff]  }
0x1376   : > { %12620 = vmatpush1.bf16.msra.mxu1 %v18538_v63  ;;  %v18621_v63 = vld [vmem:[#allocation50 + $0xac] ss:$16 sps:$4 sm:$0xff]  }
0x1377   : > { %12621 = vmatprep.subr.bf16.mxu1 %v18543_v35  ;;  %v18619_v35 = vld [vmem:[#allocation50 + $0xa8] ss:$16 sps:$4 sm:$0xff]  }
0x137a   : > { %12622 = vmatpush1.bf16.msra.mxu1 %v18541_v10  ;;  %v18624_v10 = vld [vmem:[#allocation50 + $0xcc] ss:$16 sps:$4 sm:$0xff]  }
0x137b   : > { %12623 = vmatprep.subr.bf16.mxu1 %v18546_v4  ;;  %v18622_v4 = vld [vmem:[#allocation50 + $0xc8] ss:$16 sps:$4 sm:$0xff]  }
0x137e   : > { %12624 = vmatpush1.bf16.msra.mxu1 %v18544_v38  ;;  %v18627_v38 = vld [vmem:[#allocation50 + $0xec] ss:$16 sps:$4 sm:$0xff]  }
0x137f   : > { %12625 = vmatprep.subr.bf16.mxu1 %v18549_v7  ;;  %v18625_v7 = vld [vmem:[#allocation50 + $0xe8] ss:$16 sps:$4 sm:$0xff]  }
0x1382   : > { %12626 = vmatpush1.bf16.msra.mxu1 %v18547_v19  ;;  %v18630_v19 = vld [vmem:[#allocation50 + $0x10c] ss:$16 sps:$4 sm:$0xff]  }
0x1383   : > { %12627 = vmatprep.subr.bf16.mxu1 %v18552_v11  ;;  %v18633_v11 = vld [vmem:[#allocation50 + $0x12c] ss:$16 sps:$4 sm:$0xff]  }
0x1386   : > { %12628 = vmatpush1.bf16.msra.mxu1 %v18550_v12  ;;  %v18631_v12 = vld [vmem:[#allocation50 + $0x128] ss:$16 sps:$4 sm:$0xff]  }
0x1387   : > { %12629 = vmatprep.subr.bf16.mxu1 %v18555_v20  ;;  %v18636_v20 = vld [vmem:[#allocation50 + $0x14c] ss:$16 sps:$4 sm:$0xff]  }
0x138a   : > { %12630 = vmatpush1.bf16.msra.mxu1 %v18553_v13  ;;  %v18634_v13 = vld [vmem:[#allocation50 + $0x148] ss:$16 sps:$4 sm:$0xff]  }
0x138b   : > { %12650 = vmatprep.subr.bf16.mxu1 %v18558_v17  ;;  %v18639_v17 = vld [vmem:[#allocation50 + $0x16c] ss:$16 sps:$4 sm:$0xff]  }
0x138d   : > { %12632 = vmatmul.mubr.bf16.vlgmr.msra.gmra.mrb[32].mxu1 %v21594_v14  ;;  %v18565_v14 = vld [vmem:[#allocation50 + $0x260] ss:$16 sps:$4 sm:$0xff]  }
0x138e   : > { %12641 = vmatprep.mubr.bf16.mxu1 %v21684_v0  ;;  %12651 = vmatpush1.bf16.msra.mxu1 %v18556_v44  ;;  %v18637_v44 = vld [vmem:[#allocation50 + $0x168] ss:$16 sps:$4 sm:$0xff]  }
0x138f   : > { %12652 = vmatprep.subr.bf16.mxu1 %v18561_v43  ;;  %v18642_v43 = vld [vmem:[#allocation50 + $0x18c] ss:$16 sps:$4 sm:$0xff]  }
0x1392   : > { %12653 = vmatpush1.bf16.msra.mxu1 %v18559_v31  ;;  %v18640_v31 = vld [vmem:[#allocation50 + $0x188] ss:$16 sps:$4 sm:$0xff]  }
0x1393   : > { %12654 = vmatprep.subr.bf16.mxu1 %v18564_v41  ;;  %v18645_v41 = vld [vmem:[#allocation50 + $0x1ac] ss:$16 sps:$4 sm:$0xff]  }
0x1395   : > { %12642 = vmatmul.mubr.bf16.gmra.mrb[36].mxu1 %v21687_v60 }
0x1396   : > { %12655 = vmatpush1.bf16.msra.mxu1 %v18562_v55  ;;  %12682 = vmatprep.mubr.bf16.mxu1 %v21647_v39  ;;  %v18643_v55 = vld [vmem:[#allocation50 + $0x1a8] ss:$16 sps:$4 sm:$0xff]  }
0x1397   : > { %12656 = vmatprep.subr.bf16.mxu1 %v18567_v29  ;;  %v18648_v29 = vld [vmem:[#allocation50 + $0x1cc] ss:$16 sps:$4 sm:$0xff]  }
0x139a   : > { %12657 = vmatpush1.bf16.msra.mxu1 %v18565_v14  ;;  %v18646_v14 = vld [vmem:[#allocation50 + $0x1c8] ss:$16 sps:$4 sm:$0xff]  }
0x139b   : > { %12658 = vmatprep.subr.bf16.mxu1 %v18570_v25  ;;  %v18651_v25 = vld [vmem:[#allocation50 + $0x1ec] ss:$16 sps:$4 sm:$0xff]  }
0x139e   : > { %12659 = vmatpush1.bf16.msra.mxu1 %v18568_v2  ;;  %v18649_v2 = vld [vmem:[#allocation50 + $0x1e8] ss:$16 sps:$4 sm:$0xff]  }
0x139f   : > { %12660 = vmatprep.subr.bf16.mxu1 %v18573_v42  ;;  %v18654_v42 = vld [vmem:[#allocation50 + $0x20c] ss:$16 sps:$4 sm:$0xff]  }
0x13a2   : > { %12661 = vmatpush1.bf16.msra.mxu1 %v18571_v28  ;;  %v18652_v28 = vld [vmem:[#allocation50 + $0x208] ss:$16 sps:$4 sm:$0xff]  }
0x13a3   : > { %12662 = vmatprep.subr.bf16.mxu1 %v18576_v30  ;;  %v18657_v30 = vld [vmem:[#allocation50 + $0x22c] ss:$16 sps:$4 sm:$0xff]  }
0x13a6   : > { %12663 = vmatpush1.bf16.msra.mxu1 %v18574_v16  ;;  %v18924_v16 = vld [vmem:[#allocation2] sm:$0xff] }
0x13a7   : > { %12664 = vmatprep.subr.bf16.mxu1 %v18579_v34  ;;  %v18655_v34 = vld [vmem:[#allocation50 + $0x228] ss:$16 sps:$4 sm:$0xff]  }
0x13aa   : > { %12665 = vmatpush1.bf16.msra.mxu1 %v18577_v48  ;;  %v18660_v48 = vld [vmem:[#allocation50 + $0x24c] ss:$16 sps:$4 sm:$0xff]  }
0x13ab   : > { %12666 = vmatprep.subr.bf16.mxu1 %v18582_v49  ;;  %v18658_v49 = vld [vmem:[#allocation50 + $0x248] ss:$16 sps:$4 sm:$0xff]  }
0x13ae   : > { %12667 = vmatpush1.bf16.msra.mxu1 %v18580_v32  ;;  %v18663_v32 = vld [vmem:[#allocation50 + $0x26c] ss:$16 sps:$4 sm:$0xff]  }
0x13af   : > { %12668 = vmatprep.subr.bf16.mxu1 %v18585_v47  ;;  %v18661_v47 = vld [vmem:[#allocation50 + $0x268] ss:$16 sps:$4 sm:$0xff]  }
0x13b2   : > { %12669 = vmatpush1.bf16.msra.mxu1 %v18583_v52  ;;  %v18666_v52 = vld [vmem:[#allocation50 + $0x28c] ss:$16 sps:$4 sm:$0xff]  }
0x13b3   : > { %12670 = vmatprep.subr.bf16.mxu1 %v18588_v37  ;;  %v18664_v37 = vld [vmem:[#allocation50 + $0x288] ss:$16 sps:$4 sm:$0xff]  }
0x13b6   : > { %12671 = vmatpush1.bf16.msra.mxu1 %v18586_v57  ;;  %v18667_v57 = vld [vmem:[#allocation50 + $0x2a8] ss:$16 sps:$4 sm:$0xff]  }
0x13b7   : > { %12672 = vmatprep.subr.bf16.mxu1 %v18591_v24  ;;  %v18672_v24 = vld [vmem:[#allocation50 + $0x2cc] ss:$16 sps:$4 sm:$0xff]  }
0x13ba   : > { %12673 = vmatpush1.bf16.msra.mxu1 %v18589_v58  ;;  %v18670_v58 = vld [vmem:[#allocation50 + $0x2c8] ss:$16 sps:$4 sm:$0xff]  }
0x13bb   : > { %12674 = vmatprep.subr.bf16.mxu1 %v18594_v59  ;;  %v18675_v59 = vld [vmem:[#allocation50 + $0x2ec] ss:$16 sps:$4 sm:$0xff]  }
0x13be   : > { %12675 = vmatpush1.bf16.msra.mxu1 %v18592_v27  ;;  %v18678_v27 = vld [vmem:[#allocation50 + $0x30c] ss:$16 sps:$4 sm:$0xff]  }
0x13bf   : > { %12676 = vmatprep.subr.bf16.mxu1 %v18597_v61  ;;  %v18681_v61 = vld [vmem:[#allocation50 + $0x32c] ss:$16 sps:$4 sm:$0xff]  }
0x13c2   : > { %12677 = vmatpush1.bf16.msra.mxu1 %v18595_v3  ;;  %v18679_v3 = vld [vmem:[#allocation50 + $0x328] ss:$16 sps:$4 sm:$0xff]  }
0x13c3   : > { %12678 = vmatprep.subr.bf16.mxu1 %v18600_v62  ;;  %v18684_v62 = vld [vmem:[#allocation50 + $0x34c] ss:$16 sps:$4 sm:$0xff]  }
0x13c6   : > { %12679 = vmatpush1.bf16.msra.mxu1 %v18598_v56  ;;  %v18682_v56 = vld [vmem:[#allocation50 + $0x348] ss:$16 sps:$4 sm:$0xff]  }
0x13c7   : > { %12680 = vmatprep.subr.bf16.mxu1 %v18603_v6  ;;  %v18687_v6 = vld [vmem:[#allocation50 + $0x36c] ss:$16 sps:$4 sm:$0xff]  }
0x13ca   : > { %12681 = vmatpush1.bf16.msra.mxu1 %v18601_v18  ;;  %v18685_v18 = vld [vmem:[#allocation50 + $0x368] ss:$16 sps:$4 sm:$0xff]  }
0x13cb   : > { %12701 = vmatprep.subr.bf16.mxu1 %v18606_v45  ;;  %v18690_v45 = vld [vmem:[#allocation50 + $0x38c] ss:$16 sps:$4 sm:$0xff]  }
0x13cd   : > { %12683 = vmatmul.mubr.bf16.vlgmr.msra.gmra.mrb[32].mxu1 %v21642_v54 }
0x13ce   : > { %12692 = vmatprep.mubr.bf16.mxu1 %v21692_v5  ;;  %12702 = vmatpush1.bf16.msra.mxu1 %v18604_v36  ;;  %v18688_v36 = vld [vmem:[#allocation50 + $0x388] ss:$16 sps:$4 sm:$0xff]  }
0x13cf   : > { %12703 = vmatprep.subr.bf16.mxu1 %v18609_v1  ;;  %v18693_v1 = vld [vmem:[#allocation50 + $0x3ac] ss:$16 sps:$4 sm:$0xff]  }
0x13d2   : > { %12704 = vmatpush1.bf16.msra.mxu1 %v18607_v22  ;;  %v18691_v22 = vld [vmem:[#allocation50 + $0x3a8] ss:$16 sps:$4 sm:$0xff]  }
0x13d3   : > { %12705 = vmatprep.subr.bf16.mxu1 %v18612_v51  ;;  %v18696_v51 = vld [vmem:[#allocation50 + $0x3cc] ss:$16 sps:$4 sm:$0xff]  }
0x13d5   : > { %12693 = vmatmul.mubr.bf16.gmra.mrb[36].mxu1 %v21695_v9 }
0x13d6   : > { %12706 = vmatpush1.bf16.msra.mxu1 %v18610_v21  ;;  %12733 = vmatprep.mubr.bf16.mxu1 %v21599_v33  ;;  %v18628_v33 = vld [vmem:[#allocation50 + $0x108] ss:$16 sps:$4 sm:$0xff]  }
0x13d7   : > { %12707 = vmatprep.subr.bf16.mxu1 %v18615_v46  ;;  %v18694_v21 = vld [vmem:[#allocation50 + $0x3c8] ss:$16 sps:$4 sm:$0xff]   ;;  %v18699_v46 = vld [vmem:[#allocation50 + $0x3ec] ss:$16 sps:$4 sm:$0xff]  }
0x13da   : > { %12708 = vmatpush1.bf16.msra.mxu1 %v18613_v26  ;;  %v18697_v26 = vld [vmem:[#allocation50 + $0x3e8] ss:$16 sps:$4 sm:$0xff]  }
0x13db   : > { %12709 = vmatprep.subr.bf16.mxu1 %v18618_v8  ;;  %v18702_v8 = vld [vmem:[#allocation50 + $0x804] ss:$16 sps:$4 sm:$0xff]  }
0x13de   : > { %12710 = vmatpush1.bf16.msra.mxu1 %v18616_v53  ;;  %v18700_v53 = vld [vmem:[#allocation50 + $0x800] ss:$16 sps:$4 sm:$0xff]  }
0x13df   : > { %12711 = vmatprep.subr.bf16.mxu1 %v18621_v63  ;;  %v18705_v63 = vld [vmem:[#allocation50 + $0x824] ss:$16 sps:$4 sm:$0xff]  }
0x13e2   : > { %12712 = vmatpush1.bf16.msra.mxu1 %v18619_v35  ;;  %v18703_v35 = vld [vmem:[#allocation50 + $0x820] ss:$16 sps:$4 sm:$0xff]  }
0x13e3   : > { %12713 = vmatprep.subr.bf16.mxu1 %v18624_v10  ;;  %v18708_v10 = vld [vmem:[#allocation50 + $0x844] ss:$16 sps:$4 sm:$0xff]  }
0x13e6   : > { %12714 = vmatpush1.bf16.msra.mxu1 %v18622_v4  ;;  %v12804_v4 = vld [vmem:[#allocation2 + $0x8] sm:$0xfe] }
0x13e7   : > { %12715 = vmatprep.subr.bf16.mxu1 %v18627_v38  ;;  %v18925_v38 = vld [vmem:[#allocation2 + $0x28] sm:$0xf] }
0x13ea   : > { %12716 = vmatpush1.bf16.msra.mxu1 %v18625_v7  ;;  %v21704_v7 = vrot.slane %v18925_v38, 1  ;;  %v18775_v38 = vld [vmem:[#allocation50 + $0xb20] ss:$16 sps:$4 sm:$0xff]  }
0x13eb   : > { %12717 = vmatprep.subr.bf16.mxu1 %v18630_v19  ;;  %v18706_v19 = vld [vmem:[#allocation50 + $0x840] ss:$16 sps:$4 sm:$0xff]  }
0x13ee   : > { %12718 = vmatpush1.bf16.msra.mxu1 %v18628_v33  ;;  %v12947_v33 = vrot.slane %v12804_v4, 1  ;;  %v18777_v4 = vld [vmem:[#allocation50 + $0xb24] ss:$16 sps:$4 sm:$0xff]  }
0x13ef   : > { %12719 = vmatprep.subr.bf16.mxu1 %v18633_v11  ;;  %v18711_v11 = vld [vmem:[#allocation50 + $0x864] ss:$16 sps:$4 sm:$0xff]  }
0x13f2   : > { %12720 = vmatpush1.bf16.msra.mxu1 %v18631_v12  ;;  %v18714_v12 = vld [vmem:[#allocation50 + $0x884] ss:$16 sps:$4 sm:$0xff]  }
0x13f3   : > { %12721 = vmatprep.subr.bf16.mxu1 %v18636_v20  ;;  %v18712_v20 = vld [vmem:[#allocation50 + $0x880] ss:$16 sps:$4 sm:$0xff]  }
0x13f6   : > { %12722 = vmatpush1.bf16.msra.mxu1 %v18634_v13  ;;  %v18717_v13 = vld [vmem:[#allocation50 + $0x8a4] ss:$16 sps:$4 sm:$0xff]  }
0x13f7   : > { %12723 = vmatprep.subr.bf16.mxu1 %v18639_v17  ;;  %v18715_v17 = vld [vmem:[#allocation50 + $0x8a0] ss:$16 sps:$4 sm:$0xff]  }
0x13fa   : > { %12724 = vmatpush1.bf16.msra.mxu1 %v18637_v44  ;;  %v18720_v44 = vld [vmem:[#allocation50 + $0x8c4] ss:$16 sps:$4 sm:$0xff]  }
0x13fb   : > { %12725 = vmatprep.subr.bf16.mxu1 %v18642_v43  ;;  %v18723_v43 = vld [vmem:[#allocation50 + $0x8e4] ss:$16 sps:$4 sm:$0xff]  }
0x13fe   : > { %12726 = vmatpush1.bf16.msra.mxu1 %v18640_v31  ;;  %v18721_v31 = vld [vmem:[#allocation50 + $0x8e0] ss:$16 sps:$4 sm:$0xff]  }
0x13ff   : > { %12727 = vmatprep.subr.bf16.mxu1 %v18645_v41  ;;  %v18726_v41 = vld [vmem:[#allocation50 + $0x904] ss:$16 sps:$4 sm:$0xff]  }
0x1402   : > { %12728 = vmatpush1.bf16.msra.mxu1 %v18643_v55  ;;  %v18724_v55 = vld [vmem:[#allocation50 + $0x900] ss:$16 sps:$4 sm:$0xff]  }
0x1403   : > { %12729 = vmatprep.subr.bf16.mxu1 %v18648_v29  ;;  %v18729_v29 = vld [vmem:[#allocation50 + $0x924] ss:$16 sps:$4 sm:$0xff]  }
0x1406   : > { %12730 = vmatpush1.bf16.msra.mxu1 %v18646_v14  ;;  %v18727_v14 = vld [vmem:[#allocation50 + $0x920] ss:$16 sps:$4 sm:$0xff]  }
0x1407   : > { %12731 = vmatprep.subr.bf16.mxu1 %v18651_v25  ;;  %v18732_v25 = vld [vmem:[#allocation50 + $0x944] ss:$16 sps:$4 sm:$0xff]  }
0x140a   : > { %12732 = vmatpush1.bf16.msra.mxu1 %v18649_v2  ;;  %v18730_v2 = vld [vmem:[#allocation50 + $0x940] ss:$16 sps:$4 sm:$0xff]  }
0x140b   : > { %12752 = vmatprep.subr.bf16.mxu1 %v18654_v42  ;;  %v18735_v42 = vld [vmem:[#allocation50 + $0x964] ss:$16 sps:$4 sm:$0xff]  }
0x140d   : > { %12734 = vmatmul.mubr.bf16.vlgmr.msra.gmra.mrb[40].mxu1 %v18924_v16  ;;  %v18736_v16 = vld [vmem:[#allocation50 + $0x980] ss:$16 sps:$4 sm:$0xff]  }
0x140e   : > { %12743 = vmatprep.mubr.bf16.mxu1 %v21684_v0  ;;  %12753 = vmatpush1.bf16.msra.mxu1 %v18652_v28  ;;  %v18669_v0 = vld [vmem:[#allocation50 + $0x2ac] ss:$16 sps:$4 sm:$0xff]   ;;  %v18733_v28 = vld [vmem:[#allocation50 + $0x960] ss:$16 sps:$4 sm:$0xff]  }
0x140f   : > { %12754 = vmatprep.subr.bf16.mxu1 %v18657_v30  ;;  %v18738_v30 = vld [vmem:[#allocation50 + $0x984] ss:$16 sps:$4 sm:$0xff]  }
0x1412   : > { %12755 = vmatpush1.bf16.msra.mxu1 %v18655_v34  ;;  %v18741_v34 = vld [vmem:[#allocation50 + $0x9a4] ss:$16 sps:$4 sm:$0xff]  }
0x1413   : > { %12756 = vmatprep.subr.bf16.mxu1 %v18660_v48  ;;  %v18739_v48 = vld [vmem:[#allocation50 + $0x9a0] ss:$16 sps:$4 sm:$0xff]  }
0x1415   : > { %12744 = vmatmul.mubr.bf16.gmra.mrb[44].mxu1 %v21687_v60  ;;  %v18673_v60 = vld [vmem:[#allocation50 + $0x2e8] ss:$16 sps:$4 sm:$0xff]  }
0x1416   : > { %12757 = vmatpush1.bf16.msra.mxu1 %v18658_v49  ;;  %12784 = vmatprep.mubr.bf16.mxu1 %v21647_v39  ;;  %v18676_v39 = vld [vmem:[#allocation50 + $0x308] ss:$16 sps:$4 sm:$0xff]   ;;  %v18744_v49 = vld [vmem:[#allocation50 + $0x9c4] ss:$16 sps:$4 sm:$0xff]  }
0x1417   : > { %12758 = vmatprep.subr.bf16.mxu1 %v18663_v32  ;;  %v18742_v32 = vld [vmem:[#allocation50 + $0x9c0] ss:$16 sps:$4 sm:$0xff]  }
0x141a   : > { %12759 = vmatpush1.bf16.msra.mxu1 %v18661_v47  ;;  %v18747_v47 = vld [vmem:[#allocation50 + $0x9e4] ss:$16 sps:$4 sm:$0xff]  }
0x141b   : > { %12760 = vmatprep.subr.bf16.mxu1 %v18666_v52  ;;  %v18745_v52 = vld [vmem:[#allocation50 + $0x9e0] ss:$16 sps:$4 sm:$0xff]  }
0x141e   : > { %12761 = vmatpush1.bf16.msra.mxu1 %v18664_v37  ;;  %v12803_v37 = vld [vmem:[#allocation2] sm:$0xfe] }
0x141f   : > { %12762 = vmatprep.subr.bf16.mxu1 %v18669_v0  ;;  %v18750_v0 = vld [vmem:[#allocation50 + $0xa04] ss:$16 sps:$4 sm:$0xff]  }
0x1422   : > { %12763 = vmatpush1.bf16.msra.mxu1 %v18667_v57  ;;  %v18926_v57 = vld [vmem:[#allocation2 + $0x20] sm:$0xf] }
0x1423   : > { %12764 = vmatprep.subr.bf16.mxu1 %v18672_v24  ;;  %v21712_v24 = vrot.slane %v18926_v57, 1  ;;  %v18814_v57 = vld [vmem:[#allocation50 + $0x8c8] ss:$16 sps:$4 sm:$0xff]  }
0x1426   : > { %12765 = vmatpush1.bf16.msra.mxu1 %v18670_v58  ;;  %v12944_v58 = vrot.slane %v12803_v37, 1  ;;  %v18811_v37 = vld [vmem:[#allocation50 + $0x8a8] ss:$16 sps:$4 sm:$0xff]  }
0x1427   : > { %12766 = vmatprep.subr.bf16.mxu1 %v18675_v59  ;;  %v18748_v59 = vld [vmem:[#allocation50 + $0xa00] ss:$16 sps:$4 sm:$0xff]  }
0x142a   : > { %12767 = vmatpush1.bf16.msra.mxu1 %v18673_v60  ;;  %v18753_v60 = vld [vmem:[#allocation50 + $0xa24] ss:$16 sps:$4 sm:$0xff]  }
0x142b   : > { %12768 = vmatprep.subr.bf16.mxu1 %v18678_v27  ;;  %v21716_v27 = vsel %vm2348_vm11, %v12944_v58, %v21712_v24  ;;  %v18819_v58 = vld [vmem:[#allocation50 + $0x8ec] ss:$16 sps:$4 sm:$0xff]  }
0x142e   : > { %12769 = vmatpush1.bf16.msra.mxu1 %v18676_v39  ;;  %v18751_v39 = vld [vmem:[#allocation50 + $0xa20] ss:$16 sps:$4 sm:$0xff]  }
0x142f   : > { %12770 = vmatprep.subr.bf16.mxu1 %v18681_v61  ;;  %v18756_v61 = vld [vmem:[#allocation50 + $0xa44] ss:$16 sps:$4 sm:$0xff]  }
0x1432   : > { %12771 = vmatpush1.bf16.msra.mxu1 %v18679_v3  ;;  %v12806_v3 = vld [vmem:[#allocation2 + $0x18] sm:$0xfe] }
0x1433   : > { %12772 = vmatprep.subr.bf16.mxu1 %v18684_v62  ;;  %v18927_v62 = vld [vmem:[#allocation2 + $0x38] sm:$0xf] }
0x1436   : > { %12773 = vmatpush1.bf16.msra.mxu1 %v18682_v56  ;;  %v21720_v56 = vrot.slane %v18927_v62, 1  ;;  %v18826_v62 = vld [vmem:[#allocation50 + $0x948] ss:$16 sps:$4 sm:$0xff]  }
0x1437   : > { %12774 = vmatprep.subr.bf16.mxu1 %v18687_v6  ;;  %v18754_v6 = vld [vmem:[#allocation50 + $0xa40] ss:$16 sps:$4 sm:$0xff]  }
0x143a   : > { %12775 = vmatpush1.bf16.msra.mxu1 %v18685_v18  ;;  %v12953_v18 = vrot.slane %v12806_v3, 1  ;;  %v18828_v3 = vld [vmem:[#allocation50 + $0x94c] ss:$16 sps:$4 sm:$0xff]  }
0x143b   : > { %12776 = vmatprep.subr.bf16.mxu1 %v18690_v45  ;;  %v18759_v45 = vld [vmem:[#allocation50 + $0xa64] ss:$16 sps:$4 sm:$0xff]  }
0x143e   : > { %12777 = vmatpush1.bf16.msra.mxu1 %v18688_v36  ;;  %v21725_v36 = vsel %vm2348_vm11, %v12953_v18, %v21720_v56  ;;  %v18829_v18 = vld [vmem:[#allocation50 + $0x968] ss:$16 sps:$4 sm:$0xff]  }
0x143f   : > { %12778 = vmatprep.subr.bf16.mxu1 %v18693_v1  ;;  %v18757_v1 = vld [vmem:[#allocation50 + $0xa60] ss:$16 sps:$4 sm:$0xff]  }
0x1442   : > { %12779 = vmatpush1.bf16.msra.mxu1 %v18691_v22  ;;  %v18762_v22 = vld [vmem:[#allocation50 + $0xa84] ss:$16 sps:$4 sm:$0xff]  }
0x1443   : > { %12780 = vmatprep.subr.bf16.mxu1 %v18696_v51  ;;  %v18760_v51 = vld [vmem:[#allocation50 + $0xa80] ss:$16 sps:$4 sm:$0xff]  }
0x1446   : > { %12781 = vmatpush1.bf16.msra.mxu1 %v18694_v21  ;;  %v18765_v21 = vld [vmem:[#allocation50 + $0xaa4] ss:$16 sps:$4 sm:$0xff]  }
0x1447   : > { %12782 = vmatprep.subr.bf16.mxu1 %v18699_v46  ;;  %v18763_v46 = vld [vmem:[#allocation50 + $0xaa0] ss:$16 sps:$4 sm:$0xff]  }
0x144a   : > { %12783 = vmatpush1.bf16.msra.mxu1 %v18697_v26  ;;  %v18768_v26 = vld [vmem:[#allocation50 + $0xac4] ss:$16 sps:$4 sm:$0xff]  }
0x144b   : > { %13604 = vmatprep.subr.bf16.mxu1 %v18702_v8  ;;  %v18766_v8 = vld [vmem:[#allocation50 + $0xac0] ss:$16 sps:$4 sm:$0xff]  }
0x144d   : > { %12785 = vmatmul.mubr.bf16.vlgmr.msra.gmra.mrb[40].mxu1 %v21642_v54  ;;  %v21709_v54 = vsel %vm2348_vm11, %v12947_v33, %v21704_v7  ;;  %v18778_v33 = vld [vmem:[#allocation50 + $0xb40] ss:$16 sps:$4 sm:$0xff]  }
0x144e   : > { %12794 = vmatprep.mubr.bf16.mxu1 %v21692_v5  ;;  %13605 = vmatpush1.bf16.msra.mxu1 %v18700_v53  ;;  %v18709_v5 = vld [vmem:[#allocation50 + $0x860] ss:$16 sps:$4 sm:$0xff]   ;;  %v18771_v53 = vld [vmem:[#allocation50 + $0xae4] ss:$16 sps:$4 sm:$0xff]  }
0x144f   : > { %13606 = vmatprep.subr.bf16.mxu1 %v18705_v63  ;;  %v18769_v63 = vld [vmem:[#allocation50 + $0xae0] ss:$16 sps:$4 sm:$0xff]  }
0x1452   : > { %13607 = vmatpush1.bf16.msra.mxu1 %v18703_v35  ;;  %v18774_v35 = vld [vmem:[#allocation50 + $0xb04] ss:$16 sps:$4 sm:$0xff]  }
0x1453   : > { %13608 = vmatprep.subr.bf16.mxu1 %v18708_v10  ;;  %v18772_v10 = vld [vmem:[#allocation50 + $0xb00] ss:$16 sps:$4 sm:$0xff]  }
0x1455   : > { %12795 = vmatmul.mubr.bf16.gmra.mrb[44].mxu1 %v21695_v9  ;;  %v18718_v9 = vld [vmem:[#allocation50 + $0x8c0] ss:$16 sps:$4 sm:$0xff]  }
0x1456   : > { %13609 = vmatpush1.bf16.msra.mxu1 %v18706_v19  ;;  %13636 = vmatprep.mubr.bf16.mxu1 %v21709_v54  ;;  %v18780_v19 = vld [vmem:[#allocation50 + $0xb44] ss:$16 sps:$4 sm:$0xff]  }
0x1457   : > { %13610 = vmatprep.subr.bf16.mxu1 %v18711_v11  ;;  %v18783_v11 = vld [vmem:[#allocation50 + $0xb64] ss:$16 sps:$4 sm:$0xff]  }
0x145a   : > { %13611 = vmatpush1.bf16.msra.mxu1 %v18709_v5  ;;  %v18781_v5 = vld [vmem:[#allocation50 + $0xb60] ss:$16 sps:$4 sm:$0xff]  }
0x145b   : > { %13612 = vmatprep.subr.bf16.mxu1 %v18714_v12  ;;  %v18786_v12 = vld [vmem:[#allocation50 + $0xb84] ss:$16 sps:$4 sm:$0xff]  }
0x145e   : > { %13613 = vmatpush1.bf16.msra.mxu1 %v18712_v20  ;;  %v18784_v20 = vld [vmem:[#allocation50 + $0xb80] ss:$16 sps:$4 sm:$0xff]  }
0x145f   : > { %13614 = vmatprep.subr.bf16.mxu1 %v18717_v13  ;;  %v18789_v13 = vld [vmem:[#allocation50 + $0xba4] ss:$16 sps:$4 sm:$0xff]  }
0x1462   : > { %13615 = vmatpush1.bf16.msra.mxu1 %v18715_v17  ;;  %v18787_v17 = vld [vmem:[#allocation50 + $0xba0] ss:$16 sps:$4 sm:$0xff]  }
0x1463   : > { %13616 = vmatprep.subr.bf16.mxu1 %v18720_v44  ;;  %v18792_v44 = vld [vmem:[#allocation50 + $0xbc4] ss:$16 sps:$4 sm:$0xff]  }
0x1466   : > { %13617 = vmatpush1.bf16.msra.mxu1 %v18718_v9  ;;  %v18790_v9 = vld [vmem:[#allocation50 + $0xbc0] ss:$16 sps:$4 sm:$0xff]  }
0x1467   : > { %13618 = vmatprep.subr.bf16.mxu1 %v18723_v43  ;;  %v18795_v43 = vld [vmem:[#allocation50 + $0xbe4] ss:$16 sps:$4 sm:$0xff]  }
0x146a   : > { %13619 = vmatpush1.bf16.msra.mxu1 %v18721_v31  ;;  %v18793_v31 = vld [vmem:[#allocation50 + $0xbe0] ss:$16 sps:$4 sm:$0xff]  }
0x146b   : > { %13620 = vmatprep.subr.bf16.mxu1 %v18726_v41  ;;  %v12805_v41 = vld [vmem:[#allocation2 + $0x10] sm:$0xfe] }
0x146e   : > { %13621 = vmatpush1.bf16.msra.mxu1 %v18724_v55  ;;  %v18798_v55 = vld [vmem:[#allocation50 + $0x80c] ss:$16 sps:$4 sm:$0xff]  }
0x146f   : > { %13622 = vmatprep.subr.bf16.mxu1 %v18729_v29  ;;  %v18928_v29 = vld [vmem:[#allocation2 + $0x30] sm:$0xf] }
0x1472   : > { %13623 = vmatpush1.bf16.msra.mxu1 %v18727_v14  ;;  %v21728_v14 = vrot.slane %v18928_v29, 1  ;;  %v18897_v29 = vld [vmem:[%s20208_s17 + $0x10] sm:$0xff]  }
0x1473   : > { %13624 = vmatprep.subr.bf16.mxu1 %v18732_v25  ;;  %v12950_v25 = vrot.slane %v12805_v41, 1  ;;  %v18896_v41 = vld [vmem:[%s20208_s17 + $0x50] sm:$0xff]  }
0x1476   : > { %13625 = vmatpush1.bf16.msra.mxu1 %v18730_v2  ;;  %v18796_v2 = vld [vmem:[#allocation50 + $0x808] ss:$16 sps:$4 sm:$0xff]  }
0x1477   : > { %13626 = vmatprep.subr.bf16.mxu1 %v18735_v42  ;;  %v18801_v42 = vld [vmem:[#allocation50 + $0x82c] ss:$16 sps:$4 sm:$0xff]  }
0x147a   : > { %13627 = vmatpush1.bf16.msra.mxu1 %v18733_v28  ;;  %v21732_v28 = vsel %vm2348_vm11, %v12950_v25, %v21728_v14  ;;  %v18871_v25 = vld [vmem:[#allocation50 + $0xb28] ss:$16 sps:$4 sm:$0xff]  }
0x147b   : > { %13628 = vmatprep.subr.bf16.mxu1 %v18738_v30  ;;  %v18799_v30 = vld [vmem:[#allocation50 + $0x828] ss:$16 sps:$4 sm:$0xff]  }
0x147e   : > { %13629 = vmatpush1.bf16.msra.mxu1 %v18736_v16  ;;  %v18804_v16 = vld [vmem:[#allocation50 + $0x84c] ss:$16 sps:$4 sm:$0xff]  }
0x147f   : > { %13630 = vmatprep.subr.bf16.mxu1 %v18741_v34  ;;  %v18802_v34 = vld [vmem:[#allocation50 + $0x848] ss:$16 sps:$4 sm:$0xff]  }
0x1482   : > { %13631 = vmatpush1.bf16.msra.mxu1 %v18739_v48  ;;  %v18807_v48 = vld [vmem:[#allocation50 + $0x86c] ss:$16 sps:$4 sm:$0xff]  }
0x1483   : > { %13632 = vmatprep.subr.bf16.mxu1 %v18744_v49  ;;  %v18805_v49 = vld [vmem:[#allocation50 + $0x868] ss:$16 sps:$4 sm:$0xff]  }
0x1486   : > { %13633 = vmatpush1.bf16.msra.mxu1 %v18742_v32  ;;  %v18810_v32 = vld [vmem:[#allocation50 + $0x88c] ss:$16 sps:$4 sm:$0xff]  }
0x1487   : > { %13634 = vmatprep.subr.bf16.mxu1 %v18747_v47  ;;  %v18808_v47 = vld [vmem:[#allocation50 + $0x888] ss:$16 sps:$4 sm:$0xff]  }
0x148a   : > { %13635 = vmatpush1.bf16.msra.mxu1 %v18745_v52  ;;  %v18813_v52 = vld [vmem:[#allocation50 + $0x8ac] ss:$16 sps:$4 sm:$0xff]  }
0x148b   : > { %13655 = vmatprep.subr.bf16.mxu1 %v18750_v0  ;;  %v18816_v0 = vld [vmem:[#allocation50 + $0x8cc] ss:$16 sps:$4 sm:$0xff]  }
0x148d   : > { %13637 = vmatmul.mubr.bf16.vlgmr.msra.gmra.mrb[32].mxu1 %v21716_v27 }
0x148e   : > { %13646 = vmatprep.mubr.bf16.mxu1 %v21704_v7  ;;  %13656 = vmatpush1.bf16.msra.mxu1 %v18748_v59  ;;  %v18817_v59 = vld [vmem:[#allocation50 + $0x8e8] ss:$16 sps:$4 sm:$0xff]  }
0x148f   : > { %13657 = vmatprep.subr.bf16.mxu1 %v18753_v60  ;;  %v18822_v60 = vld [vmem:[#allocation50 + $0x90c] ss:$16 sps:$4 sm:$0xff]  }
0x1492   : > { %13658 = vmatpush1.bf16.msra.mxu1 %v18751_v39  ;;  %v18825_v39 = vld [vmem:[#allocation50 + $0x92c] ss:$16 sps:$4 sm:$0xff]  }
0x1493   : > { %13659 = vmatprep.subr.bf16.mxu1 %v18756_v61  ;;  %v18823_v61 = vld [vmem:[#allocation50 + $0x928] ss:$16 sps:$4 sm:$0xff]  }
0x1495   : > { %13647 = vmatmul.mubr.bf16.gmra.mrb[36].mxu1 %v21712_v24 }
0x1496   : > { %13660 = vmatpush1.bf16.msra.mxu1 %v18754_v6  ;;  %13687 = vmatprep.mubr.bf16.mxu1 %v21725_v36  ;;  %v18831_v6 = vld [vmem:[#allocation50 + $0x96c] ss:$16 sps:$4 sm:$0xff]  }
0x1497   : > { %13661 = vmatprep.subr.bf16.mxu1 %v18759_v45  ;;  %v18834_v45 = vld [vmem:[#allocation50 + $0x98c] ss:$16 sps:$4 sm:$0xff]  }
0x149a   : > { %13662 = vmatpush1.bf16.msra.mxu1 %v18757_v1  ;;  %v18832_v1 = vld [vmem:[#allocation50 + $0x988] ss:$16 sps:$4 sm:$0xff]  }
0x149b   : > { %13663 = vmatprep.subr.bf16.mxu1 %v18762_v22  ;;  %v18837_v22 = vld [vmem:[#allocation50 + $0x9ac] ss:$16 sps:$4 sm:$0xff]  }
0x149e   : > { %13664 = vmatpush1.bf16.msra.mxu1 %v18760_v51  ;;  %v18835_v51 = vld [vmem:[#allocation50 + $0x9a8] ss:$16 sps:$4 sm:$0xff]  }
0x149f   : > { %13665 = vmatprep.subr.bf16.mxu1 %v18765_v21  ;;  %v18840_v21 = vld [vmem:[#allocation50 + $0x9cc] ss:$16 sps:$4 sm:$0xff]  }
0x14a2   : > { %13666 = vmatpush1.bf16.msra.mxu1 %v18763_v46  ;;  %v18838_v46 = vld [vmem:[#allocation50 + $0x9c8] ss:$16 sps:$4 sm:$0xff]  }
0x14a3   : > { %13667 = vmatprep.subr.bf16.mxu1 %v18768_v26  ;;  %v18843_v26 = vld [vmem:[#allocation50 + $0x9ec] ss:$16 sps:$4 sm:$0xff]  }
0x14a6   : > { %13668 = vmatpush1.bf16.msra.mxu1 %v18766_v8  ;;  %v18841_v8 = vld [vmem:[#allocation50 + $0x9e8] ss:$16 sps:$4 sm:$0xff]  }
0x14a7   : > { %13669 = vmatprep.subr.bf16.mxu1 %v18771_v53  ;;  %v18846_v53 = vld [vmem:[#allocation50 + $0xa0c] ss:$16 sps:$4 sm:$0xff]  }
0x14aa   : > { %13670 = vmatpush1.bf16.msra.mxu1 %v18769_v63  ;;  %v18844_v63 = vld [vmem:[#allocation50 + $0xa08] ss:$16 sps:$4 sm:$0xff]  }
0x14ab   : > { %13671 = vmatprep.subr.bf16.mxu1 %v18774_v35  ;;  %v18849_v35 = vld [vmem:[#allocation50 + $0xa2c] ss:$16 sps:$4 sm:$0xff]  }
0x14ae   : > { %13672 = vmatpush1.bf16.msra.mxu1 %v18772_v10  ;;  %v18847_v10 = vld [vmem:[#allocation50 + $0xa28] ss:$16 sps:$4 sm:$0xff]  }
0x14af   : > { %13673 = vmatprep.subr.bf16.mxu1 %v18777_v4  ;;  %v18852_v4 = vld [vmem:[#allocation50 + $0xa4c] ss:$16 sps:$4 sm:$0xff]  }
0x14b2   : > { %13674 = vmatpush1.bf16.msra.mxu1 %v18775_v38  ;;  %v18850_v38 = vld [vmem:[#allocation50 + $0xa48] ss:$16 sps:$4 sm:$0xff]  }
0x14b3   : > { %13675 = vmatprep.subr.bf16.mxu1 %v18780_v19  ;;  %v18855_v19 = vld [vmem:[#allocation50 + $0xa6c] ss:$16 sps:$4 sm:$0xff]  }
0x14b6   : > { %13676 = vmatpush1.bf16.msra.mxu1 %v18778_v33  ;;  %v18853_v33 = vld [vmem:[#allocation50 + $0xa68] ss:$16 sps:$4 sm:$0xff]  }
0x14b7   : > { %13677 = vmatprep.subr.bf16.mxu1 %v18783_v11  ;;  %v18861_v11 = vld [vmem:[#allocation50 + $0xaac] ss:$16 sps:$4 sm:$0xff]  }
0x14ba   : > { %13678 = vmatpush1.bf16.msra.mxu1 %v18781_v5  ;;  %v18859_v5 = vld [vmem:[#allocation50 + $0xaa8] ss:$16 sps:$4 sm:$0xff]  }
0x14bb   : > { %13679 = vmatprep.subr.bf16.mxu1 %v18786_v12  ;;  %v18864_v12 = vld [vmem:[#allocation50 + $0xacc] ss:$16 sps:$4 sm:$0xff]  }
0x14be   : > { %13680 = vmatpush1.bf16.msra.mxu1 %v18784_v20  ;;  %v18892_v20 = vld [vmem:[%s20208_s17 + $0x40] sm:$0xff]  }
0x14bf   : > { %13681 = vmatprep.subr.bf16.mxu1 %v18789_v13  ;;  %v18893_v13 = vld [vmem:[%s20208_s17] sm:$0xff]   ;;  %16244 = vmatprep.subr.bf16.mxu0 %v18892_v20 }
0x14c0   : > { %16245 = vmatpush3.bf16.msra.mxu0 %v18893_v13 }
0x14c2   : > { %13682 = vmatpush1.bf16.msra.mxu1 %v18787_v17  ;;  %v18865_v17 = vld [vmem:[#allocation50 + $0xae8] ss:$16 sps:$4 sm:$0xff]  }
0x14c3   : > { %13683 = vmatprep.subr.bf16.mxu1 %v18792_v44  ;;  %v18894_v44 = vld [vmem:[%s20208_s17 + $0x48] sm:$0xff]  }
0x14c4   : > { %16246 = vmatprep.subr.bf16.mxu0 %v18894_v44 }
0x14c6   : > { %13684 = vmatpush1.bf16.msra.mxu1 %v18790_v9  ;;  %v18870_v9 = vld [vmem:[#allocation50 + $0xb0c] ss:$16 sps:$4 sm:$0xff]  }
0x14c7   : > { %13685 = vmatprep.subr.bf16.mxu1 %v18795_v43  ;;  %v18895_v43 = vld [vmem:[%s20208_s17 + $0x8] sm:$0xff]  }
0x14c8   : > { %16247 = vmatpush3.bf16.msra.mxu0 %v18895_v43 }
0x14c9   : > { %16248 = vmatprep.subr.bf16.mxu0 %v18896_v41 }
0x14ca   : > { %13686 = vmatpush1.bf16.msra.mxu1 %v18793_v31  ;;  %v18868_v31 = vld [vmem:[#allocation50 + $0xb08] ss:$16 sps:$4 sm:$0xff]  }
0x14cb   : > { %13706 = vmatprep.subr.bf16.mxu1 %v18798_v55  ;;  %v18873_v55 = vld [vmem:[#allocation50 + $0xb2c] ss:$16 sps:$4 sm:$0xff]  }
0x14cc   : > { %16249 = vmatpush3.bf16.msra.mxu0 %v18897_v29 }
0x14cd   : > { %13688 = vmatmul.mubr.bf16.vlgmr.msra.gmra.mrb[32].mxu1 %v21732_v28 }
0x14ce   : > { %13697 = vmatprep.mubr.bf16.mxu1 %v21720_v56  ;;  %13707 = vmatpush1.bf16.msra.mxu1 %v18796_v2  ;;  %v18898_v2 = vld [vmem:[%s20208_s17 + $0x58] sm:$0xff]  }
0x14cf   : > { %13708 = vmatprep.subr.bf16.mxu1 %v18801_v42  ;;  %v18876_v42 = vld [vmem:[#allocation50 + $0xb4c] ss:$16 sps:$4 sm:$0xff]   ;;  %16250 = vmatprep.subr.bf16.mxu0 %v18898_v2 }
0x14d2   : > { %13709 = vmatpush1.bf16.msra.mxu1 %v18799_v30  ;;  %v18899_v30 = vld [vmem:[%s20208_s17 + $0x18] sm:$0xff]  }
0x14d3   : > { %13710 = vmatprep.subr.bf16.mxu1 %v18804_v16  ;;  %16251 = vmatpush3.bf16.msra.mxu0 %v18899_v30  ;;  %v18874_v16 = vld [vmem:[#allocation50 + $0xb48] ss:$16 sps:$4 sm:$0xff]  }
0x14d5   : > { %13698 = vmatmul.mubr.bf16.gmra.mrb[36].mxu1 %v21728_v14 }
0x14d6   : > { %13711 = vmatpush1.bf16.msra.mxu1 %v18802_v34  ;;  %13738 = vmatprep.mubr.bf16.mxu1 %v21709_v54  ;;  %v18820_v54 = vld [vmem:[#allocation50 + $0x908] ss:$16 sps:$4 sm:$0xff]  }
0x14d7   : > { %13712 = vmatprep.subr.bf16.mxu1 %v18807_v48  ;;  %v18900_v34 = vld [vmem:[%s20208_s17 + $0x60] sm:$0xff]   ;;  %v18879_v48 = vld [vmem:[#allocation50 + $0xb6c] ss:$16 sps:$4 sm:$0xff]  }
0x14d8   : > { %16252 = vmatprep.subr.bf16.mxu0 %v18900_v34 }
0x14da   : > { %13713 = vmatpush1.bf16.msra.mxu1 %v18805_v49  ;;  %v18901_v49 = vld [vmem:[%s20208_s17 + $0x20] sm:$0xff]  }
0x14db   : > { %13714 = vmatprep.subr.bf16.mxu1 %v18810_v32  ;;  %16253 = vmatpush3.bf16.msra.mxu0 %v18901_v49  ;;  %v18877_v32 = vld [vmem:[#allocation50 + $0xb68] ss:$16 sps:$4 sm:$0xff]  }
0x14de   : > { %13715 = vmatpush1.bf16.msra.mxu1 %v18808_v47  ;;  %v18902_v47 = vld [vmem:[%s20208_s17 + $0x68] sm:$0xff]  }
0x14df   : > { %13716 = vmatprep.subr.bf16.mxu1 %v18813_v52  ;;  %v18882_v52 = vld [vmem:[#allocation50 + $0xb8c] ss:$16 sps:$4 sm:$0xff]   ;;  %16254 = vmatprep.subr.bf16.mxu0 %v18902_v47 }
0x14e2   : > { %13717 = vmatpush1.bf16.msra.mxu1 %v18811_v37  ;;  %v18903_v37 = vld [vmem:[%s20208_s17 + $0x28] sm:$0xff]  }
0x14e3   : > { %13718 = vmatprep.subr.bf16.mxu1 %v18816_v0  ;;  %16255 = vmatpush3.bf16.msra.mxu0 %v18903_v37  ;;  %v18880_v0 = vld [vmem:[#allocation50 + $0xb88] ss:$16 sps:$4 sm:$0xff]  }
0x14e6   : > { %13719 = vmatpush1.bf16.msra.mxu1 %v18814_v57  ;;  %v18904_v57 = vld [vmem:[%s20208_s17 + $0x70] sm:$0xff]  }
0x14e7   : > { %13720 = vmatprep.subr.bf16.mxu1 %v18819_v58  ;;  %v18885_v58 = vld [vmem:[#allocation50 + $0xbac] ss:$16 sps:$4 sm:$0xff]   ;;  %16256 = vmatprep.subr.bf16.mxu0 %v18904_v57  ;;  %v18909_v57 = vld [vmem:[%s20208_s17 + $0x80] sm:$0xff]  }
0x14ea   : > { %13721 = vmatpush1.bf16.msra.mxu1 %v18817_v59  ;;  %v18905_v59 = vld [vmem:[%s20208_s17 + $0x30] sm:$0xff]  }
0x14eb   : > { %13722 = vmatprep.subr.bf16.mxu1 %v18822_v60  ;;  %v18906_v60 = vld [vmem:[%s20208_s17 + $0x78] sm:$0xff]   ;;  %16257 = vmatpush3.bf16.msra.mxu0 %v18905_v59  ;;  %v18910_v59 = vld [vmem:[%s20208_s17 + $0xc8] sm:$0xff]  }
0x14ec   : > { %16258 = vmatprep.subr.bf16.mxu0 %v18906_v60  ;;  %v18911_v60 = vld [vmem:[%s20208_s17 + $0x88] sm:$0xff]  }
0x14ee   : > { %13723 = vmatpush1.bf16.msra.mxu1 %v18820_v54  ;;  %v18907_v54 = vld [vmem:[%s20208_s17 + $0x38] sm:$0xff]  }
0x14ef   : > { %13724 = vmatprep.subr.bf16.mxu1 %v18825_v39  ;;  %v18883_v39 = vld [vmem:[#allocation50 + $0xba8] ss:$16 sps:$4 sm:$0xff]   ;;  %16259 = vmatpush3.bf16.msra.mxu0 %v18907_v54 }
0x14f0   : > { %v18912_v54 = vld [vmem:[%s20208_s17 + $0xd0] sm:$0xff]  }
0x14f2   : > { %13725 = vmatpush1.bf16.msra.mxu1 %v18823_v61  ;;  %v18888_v61 = vld [vmem:[#allocation50 + $0xbcc] ss:$16 sps:$4 sm:$0xff]  }
0x14f3   : > { %13726 = vmatprep.subr.bf16.mxu1 %v18828_v3  ;;  %v18886_v3 = vld [vmem:[#allocation50 + $0xbc8] ss:$16 sps:$4 sm:$0xff]  }
0x14f6   : > { %13727 = vmatpush1.bf16.msra.mxu1 %v18826_v62  ;;  %v18891_v62 = vld [vmem:[#allocation50 + $0xbec] ss:$16 sps:$4 sm:$0xff]  }
0x14f7   : > { %13728 = vmatprep.subr.bf16.mxu1 %v18831_v6  ;;  %v18889_v6 = vld [vmem:[#allocation50 + $0xbe8] ss:$16 sps:$4 sm:$0xff]  }
0x14fa   : > { %13729 = vmatpush1.bf16.msra.mxu1 %v18829_v18  ;;  %v21761_v18 = vld [vmem:[#allocation51] sm:$0xf] }
0x14fb   : > { %13730 = vmatprep.subr.bf16.mxu1 %v18834_v45  ;;  %v21763_v45 = vld [vmem:[#allocation53] sm:$0xf] }
0x14fe   : > { %13731 = vmatpush1.bf16.msra.mxu1 %v18832_v1  ;;  %v13824_v1 = vrot.slane %v21761_v18, %v21223_v15 }
0x14ff   : > { %13732 = vmatprep.subr.bf16.mxu1 %v18837_v22  ;;  %v13828_v22 = vrot.slane %v21761_v18, %v21226_v23 }
0x1502   : > { %13733 = vmatpush1.bf16.msra.mxu1 %v18835_v51  ;;  %v13857_v51 = vrot.slane %v21763_v45, %v21223_v15 }
0x1503   : > { %13734 = vmatprep.subr.bf16.mxu1 %v18840_v21 }
0x1506   : > { %13735 = vmatpush1.bf16.msra.mxu1 %v18838_v46 }
0x1507   : > { %13736 = vmatprep.subr.bf16.mxu1 %v18843_v26 }
0x150a   : > { %13737 = vmatpush1.bf16.msra.mxu1 %v18841_v8  ;;  %v18908_v8 = vld [vmem:[%s20208_s17 + $0xc0] sm:$0xff]  }
0x150b   : > { %13757 = vmatprep.subr.bf16.mxu1 %v18846_v53  ;;  %16266 = vmatprep.subr.bf16.mxu0 %v18908_v8 }
0x150d   : > { %13739 = vmatmul.mubr.bf16.vlgmr.msra.gmra.mrb[40].mxu1 %v21716_v27  ;;  %v18858_v27 = vld [vmem:[#allocation50 + $0xa8c] ss:$16 sps:$4 sm:$0xff]  }
0x150e   : > { %13748 = vmatprep.mubr.bf16.mxu1 %v21704_v7  ;;  %13758 = vmatpush1.bf16.msra.mxu1 %v18844_v63  ;;  %v18856_v7 = vld [vmem:[#allocation50 + $0xa88] ss:$16 sps:$4 sm:$0xff]  }
0x150f   : > { %13759 = vmatprep.subr.bf16.mxu1 %v18849_v35 }
0x1512   : > { %13760 = vmatpush1.bf16.msra.mxu1 %v18847_v10 }
0x1513   : > { %13761 = vmatprep.subr.bf16.mxu1 %v18852_v4 }
0x1515   : > { %13749 = vmatmul.mubr.bf16.gmra.mrb[44].mxu1 %v21712_v24  ;;  %v18862_v24 = vld [vmem:[#allocation50 + $0xac8] ss:$16 sps:$4 sm:$0xff]  }
0x1516   : > { %13762 = vmatpush1.bf16.msra.mxu1 %v18850_v38  ;;  %13789 = vmatprep.mubr.bf16.mxu1 %v21725_v36  ;;  %v18867_v36 = vld [vmem:[#allocation50 + $0xaec] ss:$16 sps:$4 sm:$0xff]  }
0x1517   : > { %13763 = vmatprep.subr.bf16.mxu1 %v18855_v19 }
0x151a   : > { %13764 = vmatpush1.bf16.msra.mxu1 %v18853_v33 }
0x151b   : > { %13765 = vmatprep.subr.bf16.mxu1 %v18858_v27 }
0x151e   : > { %13766 = vmatpush1.bf16.msra.mxu1 %v18856_v7 }
0x151f   : > { %13767 = vmatprep.subr.bf16.mxu1 %v18861_v11 }
0x1522   : > { %13768 = vmatpush1.bf16.msra.mxu1 %v18859_v5 }
0x1523   : > { %13769 = vmatprep.subr.bf16.mxu1 %v18864_v12 }
0x1526   : > { %13770 = vmatpush1.bf16.msra.mxu1 %v18862_v24 }
0x1527   : > { %13771 = vmatprep.subr.bf16.mxu1 %v18867_v36 }
0x152a   : > { %13772 = vmatpush1.bf16.msra.mxu1 %v18865_v17 }
0x152b   : > { %13773 = vmatprep.subr.bf16.mxu1 %v18870_v9 }
0x152e   : > { %13774 = vmatpush1.bf16.msra.mxu1 %v18868_v31 }
0x152f   : > { %13775 = vmatprep.subr.bf16.mxu1 %v18873_v55 }
0x1532   : > { %13776 = vmatpush1.bf16.msra.mxu1 %v18871_v25 }
0x1533   : > { %13777 = vmatprep.subr.bf16.mxu1 %v18876_v42 }
0x1536   : > { %13778 = vmatpush1.bf16.msra.mxu1 %v18874_v16 }
0x1537   : > { %13779 = vmatprep.subr.bf16.mxu1 %v18879_v48 }
0x153a   : > { %13780 = vmatpush1.bf16.msra.mxu1 %v18877_v32 }
0x153b   : > { %13781 = vmatprep.subr.bf16.mxu1 %v18882_v52 }
0x153e   : > { %13782 = vmatpush1.bf16.msra.mxu1 %v18880_v0 }
0x153f   : > { %13783 = vmatprep.subr.bf16.mxu1 %v18885_v58 }
0x1542   : > { %13784 = vmatpush1.bf16.msra.mxu1 %v18883_v39  ;;  %v18913_v39 = vld [vmem:[%s20208_s17 + $0x90] sm:$0xff]  }
0x1543   : > { %13785 = vmatprep.subr.bf16.mxu1 %v18888_v61  ;;  %v18914_v61 = vld [vmem:[%s20208_s17 + $0xd8] sm:$0xff]  }
0x1546   : > { %13786 = vmatpush1.bf16.msra.mxu1 %v18886_v3  ;;  %v18915_v3 = vld [vmem:[%s20208_s17 + $0x98] sm:$0xff]  }
0x1547   : > { %13787 = vmatprep.subr.bf16.mxu1 %v18891_v62  ;;  %v18916_v62 = vld [vmem:[%s20208_s17 + $0xe0] sm:$0xff]  }
0x154a   : > { %13788 = vmatpush1.bf16.msra.mxu1 %v18889_v6  ;;  %v18917_v6 = vld [vmem:[%s20208_s17 + $0xa0] sm:$0xff]  }
0x154d   : > { %13790 = vmatmul.mubr.bf16.vlgmr.msra.gmra.mrb[40].mxu1 %v21732_v28  ;;  %v13861_v28 = vrot.slane %v21763_v45, %v21226_v23 }
0x154e   : > { %13799 = vmatprep.mubr.bf16.mxu1 %v21720_v56 }
0x1555   : > { %13800 = vmatmul.mubr.bf16.gmra.mrb[44].mxu1 %v21728_v14 }
0x15a0   : > { %v13689_v21 = vpop.f32.mrb[32].mxu1 }
0x15a1   : > { %v13841_v56 = vmul.f32 %v13824_v1, %v13689_v21  ;;  %v13691_v46 = vpop.f32.mrb[33].mxu1  ;;  %v18921_v21 = vld [vmem:[%s20208_s17 + $0xb0] sm:$0xff]  }
0x15a2   : > { %v13842_v14 = vmul.f32 %v13828_v22, %v13691_v46  ;;  %v13693_v26 = vpop.f32.mrb[34].mxu1  ;;  %v13832_v46 = vrot.slane %v21761_v18, %v21627_v40 }
0x15a3   : > { %v13874_v53 = vadd.f32 %v13857_v51, %v13841_v56  ;;  %v13845_v63 = vmul.f32 %v13824_v1, %v13693_v26  ;;  %v13695_v35 = vpop.f32.mrb[35].mxu1  ;;  %v18923_v56 = vld [vmem:[%s20208_s17 + $0xb8] sm:$0xff]   ;;  %v13865_v26 = vrot.slane %v21763_v45, %v21627_v40 }
0x15a4   : > { %v13875_v10 = vadd.f32 %v13861_v28, %v13842_v14  ;;  %v13846_v4 = vmul.f32 %v13828_v22, %v13695_v35  ;;  %v13836_v14 = vrot.slane %v21761_v18, %v21630_v50 }
0x15a5   : > { %v13878_v38 = vadd.f32 %v13857_v51, %v13845_v63  ;;  %v13886_v33 = vmax.f32 %v13874_v53, 0.0  ;;  %v13869_v53 = vrot.slane %v21763_v45, %v21630_v50 }
0x15a6   : > { %v13879_v19 = vadd.f32 %v13861_v28, %v13846_v4  ;;  %v13887_v15 = vmax.f32 %v13875_v10, 0.0 }
0x15a7   : > { %v13890_v27 = vmax.f32 %v13878_v38, 0.0 }
0x15a8   : > { %v13891_v7 = vmax.f32 %v13879_v19, 0.0  ;;  %v13699_v11 = vpop.f32.mrb[36].mxu1 }
0x15a9   : > { %v13898_v5 = vmax.f32 %v13886_v33, %v13890_v27  ;;  %v13849_v23 = vmul.f32 %v13824_v1, %v13699_v11  ;;  %v13701_v12 = vpop.f32.mrb[37].mxu1  ;;  %v18918_v1 = vld [vmem:[%s20208_s17 + $0xe8] sm:$0xff]  }
0x15aa   : > { %v13908_v24 = vmax.f32 %v13887_v15, %v13891_v7  ;;  %v13850_v20 = vmul.f32 %v13828_v22, %v13701_v12  ;;  %v13703_v36 = vpop.f32.mrb[38].mxu1  ;;  %v18919_v22 = vld [vmem:[%s20208_s17 + $0xa8] sm:$0xff]  }
0x15ab   : > { %v13882_v13 = vadd.f32 %v13857_v51, %v13849_v23  ;;  %v13704_v17 = vpop.f32.mrb[39].mxu1  ;;  %v18920_v51 = vld [vmem:[%s20208_s17 + $0xf0] sm:$0xff]  }
0x15ac   : > { %v13883_v44 = vadd.f32 %v13861_v28, %v13850_v20  ;;  %v18922_v28 = vld [vmem:[%s20208_s17 + $0xf8] sm:$0xff]  }
0x15ad   : > { %v13894_v9 = vmax.f32 %v13882_v13, 0.0 }
0x15ae   : > { %v13895_v43 = vmax.f32 %v13883_v44, 0.0 }
0x15af   : > { %v13900_v31 = vsel %vm13899_vm1, %v13894_v9, -inf }
0x15b0   : > { %v13901_v41 = vmax.f32 %v13898_v5, %v13900_v31  ;;  %v13909_v55 = vsel %vm13899_vm1, %v13895_v43, -inf }
0x15b1   : > { %v13910_v29 = vmax.f32 %v13908_v24, %v13909_v55 }
0x15b2   : > { %v13902_v25 = vrot.slane %v13901_v41, 4 }
0x15b3   : > { %v13911_v2 = vrot.slane %v13910_v29, 4 }
0x15b4   : > { %v13903_v42 = vmax.f32 %v13901_v41, %v13902_v25 }
0x15b5   : > { %v13912_v30 = vmax.f32 %v13910_v29, %v13911_v2 }
0x15b6   : > { %v13904_v16 = vrot.slane %v13903_v42, 2 }
0x15b7   : > { %v13913_v34 = vrot.slane %v13912_v30, 2 }
0x15b8   : > { %v13905_v48 = vmax.f32 %v13903_v42, %v13904_v16 }
0x15b9   : > { %v13914_v49 = vmax.f32 %v13912_v30, %v13913_v34 }
0x15ba   : > { %v13906_v32 = vrot.slane %v13905_v48, 1 }
0x15bb   : > { %v13915_v47 = vrot.slane %v13914_v49, 1 }
0x15bc   : > { %v13907_v52 = vmax.f32 %v13905_v48, %v13906_v32 }
0x15bd   : > { %v13916_v37 = vmax.f32 %v13914_v49, %v13915_v47 }
0x15be   : > { %v13935_v58 = vpack.c.bf16 %v13907_v52, %v13907_v52 }
0x15bf   : > { %v13936_v0 = vpack.c.bf16 %v13916_v37, %v13916_v37 }
0x15c1   : > { %14228 = vmatprep.mubr.bf16.mxu0 %v13936_v0 }
0x15c2   : > { %14229 = vmatmul.mubr.bf16.vlgmr.msra.gmra.mrb[108].mxu0 %v13935_v58 }
0x15c3   : > { %16267 = vmatpush3.bf16.msra.mxu0 %v18909_v57 }
0x15c4   : > { %16268 = vmatprep.subr.bf16.mxu0 %v18910_v59 }
0x15c7   : > { %16269 = vmatpush3.bf16.msra.mxu0 %v18911_v60 }
0x15c8   : > { %16270 = vmatprep.subr.bf16.mxu0 %v18912_v54 }
0x15cb   : > { %16271 = vmatpush3.bf16.msra.mxu0 %v18913_v39 }
0x15cc   : > { %16272 = vmatprep.subr.bf16.mxu0 %v18914_v61 }
0x15cf   : > { %16273 = vmatpush3.bf16.msra.mxu0 %v18915_v3  ;;  %v14003_v3 = vld [vmem:[#allocation54] sm:$0x1] }
0x15d0   : > { %16274 = vmatprep.subr.bf16.mxu0 %v18916_v62 }
0x15d3   : > { %16275 = vmatpush3.bf16.msra.mxu0 %v18917_v6 }
0x15d4   : > { %16276 = vmatprep.subr.bf16.mxu0 %v18918_v1 }
0x15d7   : > { %16277 = vmatpush3.bf16.msra.mxu0 %v18919_v22 }
0x15d8   : > { %16278 = vmatprep.subr.bf16.mxu0 %v18920_v51 }
0x15db   : > { %16279 = vmatpush3.bf16.msra.mxu0 %v18921_v21 }
0x15dc   : > { %16280 = vmatprep.subr.bf16.mxu0 %v18922_v28 }
0x15df   : > { %16281 = vmatpush3.bf16.msra.mxu0 %v18923_v56 }
0x1620   : > { %v13791_v8 = vpop.f32.mrb[40].mxu1 }
0x1621   : > { %v13843_v63 = vmul.f32 %v13832_v46, %v13791_v8  ;;  %v13793_v35 = vpop.f32.mrb[41].mxu1 }
0x1622   : > { %v13844_v10 = vmul.f32 %v13836_v14, %v13793_v35  ;;  %v13795_v4 = vpop.f32.mrb[42].mxu1 }
0x1623   : > { %v13876_v38 = vadd.f32 %v13865_v26, %v13843_v63  ;;  %v13847_v19 = vmul.f32 %v13832_v46, %v13795_v4  ;;  %v13797_v33 = vpop.f32.mrb[43].mxu1 }
0x1624   : > { %v13877_v27 = vadd.f32 %v13869_v53, %v13844_v10  ;;  %v13848_v15 = vmul.f32 %v13836_v14, %v13797_v33 }
0x1625   : > { %v13880_v7 = vadd.f32 %v13865_v26, %v13847_v19  ;;  %v13888_v5 = vmax.f32 %v13876_v38, 0.0 }
0x1626   : > { %v13881_v11 = vadd.f32 %v13869_v53, %v13848_v15  ;;  %v13889_v23 = vmax.f32 %v13877_v27, 0.0 }
0x1627   : > { %v13892_v18 = vmax.f32 %v13880_v7, 0.0 }
0x1628   : > { %v13893_v12 = vmax.f32 %v13881_v11, 0.0  ;;  %v13801_v40 = vpop.f32.mrb[44].mxu1 }
0x1629   : > { %v13917_v24 = vmax.f32 %v13888_v5, %v13892_v18  ;;  %v13851_v20 = vmul.f32 %v13832_v46, %v13801_v40  ;;  %v13803_v36 = vpop.f32.mrb[45].mxu1 }
0x162a   : > { %v13926_v50 = vmax.f32 %v13889_v23, %v13893_v12  ;;  %v13852_v45 = vmul.f32 %v13836_v14, %v13803_v36  ;;  %v13805_v13 = vpop.f32.mrb[46].mxu1 }
0x162b   : > { %v13884_v17 = vadd.f32 %v13865_v26, %v13851_v20  ;;  %v13806_v44 = vpop.f32.mrb[47].mxu1 }
0x162c   : > { %v13885_v9 = vadd.f32 %v13869_v53, %v13852_v45 }
0x162d   : > { %v13896_v43 = vmax.f32 %v13884_v17, 0.0 }
0x162e   : > { %v13897_v31 = vmax.f32 %v13885_v9, 0.0 }
0x162f   : > { %v13918_v41 = vsel %vm13899_vm1, %v13896_v43, -inf }
0x1630   : > { %v13919_v55 = vmax.f32 %v13917_v24, %v13918_v41  ;;  %v13927_v29 = vsel %vm13899_vm1, %v13897_v31, -inf }
0x1631   : > { %v13928_v25 = vmax.f32 %v13926_v50, %v13927_v29 }
0x1632   : > { %v13920_v2 = vrot.slane %v13919_v55, 4 }
0x1633   : > { %v13929_v42 = vrot.slane %v13928_v25, 4 }
0x1634   : > { %v13921_v30 = vmax.f32 %v13919_v55, %v13920_v2 }
0x1635   : > { %v13930_v16 = vmax.f32 %v13928_v25, %v13929_v42 }
0x1636   : > { %v13922_v34 = vrot.slane %v13921_v30, 2 }
0x1637   : > { %v13931_v48 = vrot.slane %v13930_v16, 2 }
0x1638   : > { %v13923_v49 = vmax.f32 %v13921_v30, %v13922_v34 }
0x1639   : > { %v13932_v32 = vmax.f32 %v13930_v16, %v13931_v48 }
0x163a   : > { %v13924_v47 = vrot.slane %v13923_v49, 1 }
0x163b   : > { %v13933_v52 = vrot.slane %v13932_v32, 1 }
0x163c   : > { %v13925_v37 = vmax.f32 %v13923_v49, %v13924_v47 }
0x163d   : > { %v13934_v0 = vmax.f32 %v13932_v32, %v13933_v52 }
0x163e   : > { %v13937_v58 = vpack.c.bf16 %v13925_v37, %v13925_v37 }
0x163f   : > { %v13938_v57 = vpack.c.bf16 %v13934_v0, %v13934_v0 }
0x1641   : > { %14268 = vmatprep.mubr.bf16.mxu0 %v13938_v57 }
0x1642   : > { %14269 = vmatmul.mubr.bf16.vlgmr.msra.gmra.mrb[112].mxu0 %v13937_v58 }
0x1695   : > { %v16260_v59 = vpop.f32.mrb[108].mxu0 }
0x1696   : > { %v16261_v60 = vpop.f32.mrb[109].mxu0 }
0x1697   : > { %v16262_v54 = vadd.f32 %v16261_v60, %v16260_v59  ;;  %v16263_v39 = vpop.f32.mrb[110].mxu0 }
0x1698   : > { %v16264_v61 = vpop.f32.mrb[111].mxu0 }
0x1699   : > { %v14231_v1 = vadd.f32 %v16262_v54, %v14003_v3 }
0x1715   : > { %v16282_v62 = vpop.f32.mrb[112].mxu0 }
0x1716   : > { %v16283_v6 = vpop.f32.mrb[113].mxu0 }
0x1717   : > { %v16284_v22 = vadd.f32 %v16283_v6, %v16282_v62  ;;  %v16285_v51 = vpop.f32.mrb[114].mxu0 }
0x1718   : > { %v16286_v21 = vpop.f32.mrb[115].mxu0 }
0x1719   : > { %v14271_v28 = vadd.f32 %v16284_v22, %v14231_v1 }
0x171b   : > { %14277 = vst.msk [vmem:[%s1538_s1] sm:$0x1] %vm14276_vm3, %v14271_v28 }
0x171c   : > { %19826 = shalt.err (!%p19823_p2)
}
0x171d   : > { %s19827_s3 = scalar_lea.hbm %s21804_s10, 16  ;;  %s19831_s12 = scalar_lea.hbm %s20218_s9, 32 }
0x171e   : > { %p19828_p3 = scmp.ne.s32.totalorder %s21804_s10, %s19827_s3  ;;  %p19832_p8 = scmp.lt.u32.totalorder %s21804_s10, %s20218_s9 }
0x171f   : > { %p19833_p11 = scmp.lt.u32.totalorder %s19831_s12, %s19827_s3  ;;  %p19835_p10 = scmp.lt.u32.totalorder %s19827_s3, %s21804_s10 }
0x1720   : > { %p19829_p4 = pnand %p19828_p3, %p21976_p6 }
0x1721   : > { %p19834_p9 = por %p19833_p11, %p19832_p8 }
0x1722   : > { %p19830_p7 = pneg %p19829_p4 }
0x1723   : > { %p19836_p5 = por %p19835_p10, %p19834_p9 }
0x1725   : > { %p19837_p12 = pnand %p19836_p5, %p19830_p7 }
0x1727   : > { %19840 = shalt.err (!%p19837_p12)
}
0x1728   : > { %16929 = dma.vmem_to_hbm [thread:$0]  (%p21976_p6), %s21806_s5, 16, %s21804_s10, %s14279_s11  }
0x1729 PF: > { %s21977_s0 = sld [smem:[#allocation102_spill]]  ;;  %s21978_s1 = sld [smem:[#allocation106_spill]] }
0x172a   : > { %p17003_p13 = scmp.ge.s32.totalorder %s19947_s2, 2 }
0x172f   : > { %s14303_s26 = sand.u32 1, %s21977_s0   ;;  %p21979_p0 = scmp.ne.s32.totalorder %s21978_s1, 0 }
0x1730   : > { %s14304_s7 = scalar_lea.sflag [#allocation5], %s14303_s26 }
0x1731   : > { %p16932_p1 = pnand %p17003_p13, %p21979_p0 }
0x1733   : > { %19930 = dma.done.wait (!%p16932_p1), %s14304_s7, 16  }
0x1734   : > { %19932 = vsyncadd (!%p16932_p1), %s14304_s7, 4294967280  ;;  %s21980_s2 = sld [smem:[#allocation104_spill]]  ;;  %s21981_s6 = sld [smem:[#allocation103_spill]] }
0x1735   : > { %s21982_s1 = sld [smem:[#allocation105_spill]]  ;;  %s21983_s0 = smov %s19939_s28 }
0x173a   : > { %p101_p2 = scmp.ge.s32.totalorder %s21980_s2, 4   ;;  %s21984_s28 = smov %s21981_s6 }
0x173c   :  { %103 = sbr.rel (!%p101_p2) target bundleno = 86 (0x56), region = 394 }
0x1743   :  { %14308 = vsyncpa [#allocation4], 1 }
0x1744   :  { %14310 = vsyncpa [#allocation4 + $0x1], 1 }
0x1745   :  { %14311 = vsyncpa [#allocation7], 1 }
0x1746   :  { %14312 = vsyncpa [#allocation10], 1 }
0x1747   :  { %14313 = vsyncpa [#allocation13], 1 }
0x1748   :  { %14314 = vsyncpa [#allocation16], 1 }
0x1749   :  { %14315 = vsyncpa [#allocation19], 1 }
0x174a   :  { %14316 = vsyncpa [#allocation22], 1 }
0x174b   :  { %14317 = vsyncpa [#allocation25], 1 }
0x174c   :  { %14318 = vsyncpa [#allocation28], 1 }
0x174d   :  { %14319 = vsyncpa [#allocation31], 1 }
0x174e   :  { %14320 = vsyncpa [#allocation34], 1 }
0x174f   :  { %14321 = vsyncpa [#allocation37], 1 }
0x1750   :  { %14322 = vsyncpa [#allocation40], 1 }
0x1751   :  { %14323 = vsyncpa [#allocation43], 1 }
0x1752   :  { %14324 = vsyncpa [#allocation46], 1 }
0x1753   :  { %14325 = vsyncpa [#allocation49], 1 }
0x1754   :  { %14326 = vsyncpa [#allocation52], 1 }
0x1755   :  { %14327 = vsyncpa [#allocation55], 1 }
0x1756   :  { %14328 = vsyncpa [#allocation5], 1 }
0x1757   :  { %14330 = vsyncpa [#allocation5 + $0x1], 1 }

</bundles_post_ra>
